<compile_context>
chip_gen: v7x
topology: tpu7x:2x2x1
jax: 0.10.0
libtpu: 0.0.40
codegen_flags: <defaults>
</compile_context>

<pallas_src>
import functools
import math

import jax
import jax.numpy as jnp
from jax import lax
from jax.experimental import pallas as pl
from jax.experimental.pallas import tpu as pltpu


_COMPUTE_DTYPE = jnp.bfloat16
_V5E_SCOPED_VMEM_DEFAULT = 16 << 20   # smallest scoped-VMEM default across v5e/v6e/v7x


def _silu(y):
    # exp runs on the EUP; BN/SiLU epilogue stays in f32.
    return y * (1.0 / (1.0 + jnp.exp(-y)))


@functools.lru_cache(maxsize=None)
def _vmem_capacity_bytes():
    """Physical VMEM per core; conservative (v7x) fallback if the query fails."""
    try:
        cap = int(pltpu.get_tpu_info().vmem_capacity_bytes)
        if cap > 0:
            return cap
    except Exception:
        pass
    return 64 << 20


def _pointwise_row_budget():
    # ~21 MiB on v5e/v6e (128 MiB VMEM), ~10.7 MiB on v7x (64 MiB VMEM).
    return int(min(max(_vmem_capacity_bytes() // 6, 8 << 20), 24 << 20))


def _conv3x3_patch_budget():
    # 8 MiB on v5e/v6e, 4 MiB on v7x (image stays resident, so keep this modest).
    return int(min(max(_vmem_capacity_bytes() // 16, 4 << 20), 8 << 20))


def _compiler_params(dimension_semantics, est_vmem_bytes):
    kwargs = dict(dimension_semantics=dimension_semantics)
    if est_vmem_bytes > _V5E_SCOPED_VMEM_DEFAULT:
        cap = _vmem_capacity_bytes()
        limit = max(int(est_vmem_bytes) * 5 // 4, 32 << 20)
        # leave headroom below physical VMEM (v7x: <=56 MiB, v5e/v6e: <=112 MiB)
        kwargs["vmem_limit_bytes"] = int(min(limit, (cap * 7) // 8))
    return pltpu.CompilerParams(**kwargs)


def _spec(block_shape, index_map, *, single_buffer=False):
    """BlockSpec helper; single_buffer=True requests pipeline_mode=pl.Buffered(1)."""
    if single_buffer:
        try:
            return pl.BlockSpec(block_shape, index_map, pipeline_mode=pl.Buffered(1))
        except TypeError:
            pass
    return pl.BlockSpec(block_shape, index_map)


def _pick_rows(m, k_total, cout, in_itemsize, out_itemsize, budget_bytes):
    """Row block for the 1x1 conv: as large as the VMEM budget allows."""
    per_row = (2 * k_total * in_itemsize      # double-buffered input blocks
               + 2 * cout * out_itemsize      # double-buffered output block
               + cout * 4)                    # f32 accumulator
    tm = budget_bytes // max(per_row, 1)
    tm = max(16, min(4096, (tm // 16) * 16))
    return min(m, tm)


def _pick_row_block(h, w, c_in, itemsize, budget_bytes):
    """Rows per conv3x3 slab: largest divisor of H whose im2col patch fits the budget."""
    divisors = [r for r in range(1, h + 1)
                if h % r == 0 and (r == h or (r * w) % 8 == 0)]
    for r in sorted(divisors, reverse=True):
        if r * w * 9 * c_in * itemsize <= budget_bytes:
            return r
    return min(divisors)


def _padded_cin(cin):
    """Channel pad rule: pad to a multiple of 128 once Cin is big enough to matter."""
    if cin >= 64 and cin % 128 != 0:
        return ((cin + 127) // 128) * 128
    return cin


# ----------------------------- Pallas kernels ------------------------------

def make_pointwise_kernel(n_chunks):
    """Fused (concat +) 1x1 conv + folded BN + SiLU.

    refs: x_0..x_{k-1} (tm, K_j) row blocks, w_0..w_{k-1} (K_j, Cout) bf16,
          sb (2, Cout) f32, o (tm, Cout).
    The C2f channel concat is fused by accumulating per-chunk bf16 matmuls in f32.
    """
    def kernel(*refs):
        x_refs = refs[:n_chunks]
        w_refs = refs[n_chunks:2 * n_chunks]
        sb_ref = refs[2 * n_chunks]
        o_ref = refs[2 * n_chunks + 1]

        def chunk_dot(j):
            w = w_refs[j][...]
            x = x_refs[j][...].astype(w.dtype)    # bf16 MXU, f32 accumulate
            return jnp.dot(x, w, preferred_element_type=jnp.float32)

        acc = chunk_dot(0)
        for j in range(1, n_chunks):
            acc = acc + chunk_dot(j)
        y = acc * sb_ref[0:1, :] + sb_ref[1:2, :]
        o_ref[...] = _silu(y).astype(o_ref.dtype)

    return kernel


def make_conv3x3_kernel(R, add_residual):
    """3x3 'same' conv + folded BN + SiLU (+ optional residual), one R-row slab per step."""

    def kernel(x_ref, w_ref, sb_ref, *rest):
        # x_ref:  (1, H+2, Wp, Cin) zero-padded image (width right-padded to 8-multiple,
        #         channels possibly zero-padded), resident across the slab axis, bf16
        # w_ref:  (9, Cin, Cout)    taps flattened row-major (ky*3 + kx), bf16
        # sb_ref: (2, Cout)         folded BN scale / bias, f32
        # r_ref (optional): (1, R*W, Cout) residual slab (bottleneck input, rows flattened)
        # o_ref:  (1, R*W, Cout)    output slab (rows h*R .. h*R+R-1, flattened)
        if add_residual:
            r_ref, o_ref = rest
        else:
            (o_ref,) = rest
        Cin = x_ref.shape[3]
        Cout = o_ref.shape[2]
        W = o_ref.shape[1] // R
        h = pl.program_id(1)
        row0 = pl.multiple_of(h * R, R)
        slab = x_ref[0, pl.ds(row0, R + 2), :, :]            # (R+2, Wp, Cin)

        if Cin % 128 == 0:
            # Lane-aligned channels: fold all 9 taps into one im2col contraction (K = 9*Cin).
            patch = jnp.concatenate(
                [slab[ky:ky + R, kx:kx + W, :] for ky in range(3) for kx in range(3)],
                axis=-1).reshape(R * W, 9 * Cin)
            acc = jnp.dot(patch, w_ref[...].reshape(9 * Cin, Cout),
                          preferred_element_type=jnp.float32)
        else:
            # Tiny / unaligned Cin: 9 per-slab dots, each over M = R*W rows.
            acc = jnp.zeros((R * W, Cout), jnp.float32)
            for t in range(9):
                ky, kx = divmod(t, 3)
                piece = slab[ky:ky + R, kx:kx + W, :].reshape(R * W, Cin)
                acc = acc + jnp.dot(piece, w_ref[t],
                                    preferred_element_type=jnp.float32)

        y = acc * sb_ref[0:1, :] + sb_ref[1:2, :]
        y = _silu(y)
        if add_residual:
            y = y + r_ref[0].astype(jnp.float32)   # PyTorch: x + cv2(cv1(x)) (add after act)
        o_ref[0] = y.astype(o_ref.dtype)

    return kernel


# ----------------------------- pallas_call wrappers ------------------------

def fused_pointwise_conv(chunks, w_chunks, sb, out_dtype):
    """1x1 conv + BN + SiLU over the channel-concat of `chunks` (concat fused in-kernel).

    chunks:   list of (M, K_j) arrays (flattened N*H*W pixels x channels)
    w_chunks: list of (K_j, Cout) bf16 weight row-groups in concat order
    sb:       (2, Cout) folded BN scale / bias (f32)
    """
    n_chunks = len(chunks)
    assert n_chunks == len(w_chunks)
    m = chunks[0].shape[0]
    cout = w_chunks[0].shape[1]
    k_total = sum(x.shape[1] for x in chunks)
    in_itemsize = max(x.dtype.itemsize for x in chunks)
    out_itemsize = jnp.dtype(out_dtype).itemsize
    tm = _pick_rows(m, k_total, cout, in_itemsize, out_itemsize, _pointwise_row_budget())

    in_specs, args = [], []
    for x in chunks:
        in_specs.append(_spec((tm, x.shape[1]), lambda i: (i, 0)))
        args.append(x)
    for w in w_chunks:
        in_specs.append(_spec(w.shape, lambda i: (0, 0), single_buffer=True))
        args.append(w)
    in_specs.append(_spec((2, cout), lambda i: (0, 0), single_buffer=True))
    args.append(sb)

    est_vmem = (2 * tm * k_total * in_itemsize                        # activation blocks
                + 2 * tm * cout * out_itemsize                        # output blocks
                + sum(int(w.size) * w.dtype.itemsize for w in w_chunks)
                + 2 * cout * 4                                        # scale/bias
                + tm * cout * 4)                                      # f32 accumulator
    return pl.pallas_call(
        make_pointwise_kernel(n_chunks),
        out_shape=jax.ShapeDtypeStruct((m, cout), out_dtype),
        grid=(pl.cdiv(m, tm),),
        in_specs=in_specs,
        out_specs=pl.BlockSpec((tm, cout), lambda i: (i, 0)),
        compiler_params=_compiler_params(("parallel",), est_vmem),
    )(*args)


def conv3x3(xp, p, out_w, residual=None):
    """xp: (N, H+2, Wp, Cin_pad) zero-padded NHWC -> (N, H*W, Cout) with rows flattened."""
    N, Hp, Wp, Cin = xp.shape
    H, W = Hp - 2, out_w
    Cout = p["w"].shape[2]
    itemsize = xp.dtype.itemsize
    R = _pick_row_block(H, W, Cin, itemsize, _conv3x3_patch_budget())
    grid = (N, H // R)

    in_specs = [
        _spec((1, Hp, Wp, Cin), lambda n, h: (n, 0, 0, 0), single_buffer=True),
        _spec((9, Cin, Cout), lambda n, h: (0, 0, 0), single_buffer=True),
        _spec((2, Cout), lambda n, h: (0, 0), single_buffer=True),
    ]
    args = [xp, p["w"], p["sb"]]
    if residual is not None:
        in_specs.append(_spec((1, R * W, Cout), lambda n, h: (n, h, 0)))
        args.append(residual)

    est_vmem = (Hp * Wp * Cin * itemsize                      # resident padded image (1 buf)
                + 2 * R * W * Cout * itemsize                 # output slab (pipelined)
                + (2 * R * W * Cout * residual.dtype.itemsize if residual is not None else 0)
                + 9 * Cin * Cout * p["w"].dtype.itemsize      # weights (1 buf)
                + 2 * Cout * 4                                # scale/bias
                + R * W * 9 * Cin * itemsize                  # im2col patch / slice temps
                + R * W * Cout * 4)                           # f32 accumulator
    return pl.pallas_call(
        make_conv3x3_kernel(R, residual is not None),
        out_shape=jax.ShapeDtypeStruct((N, H * W, Cout), xp.dtype),
        grid=grid,
        in_specs=in_specs,
        out_specs=pl.BlockSpec((1, R * W, Cout), lambda n, h: (n, h, 0)),
        compiler_params=_compiler_params(("parallel", "parallel"), est_vmem),
    )(*args)


# ----------------------------- parameters ----------------------------------

def make_conv_params(key, c_in, c_out, k):
    kw, kg, kb, km, kv = jax.random.split(key, 5)
    fan_in = c_in * k * k
    w = jax.random.normal(kw, (c_out, c_in, k, k), jnp.float32) / math.sqrt(fan_in)
    gamma = jax.random.uniform(kg, (c_out,), jnp.float32, 0.5, 1.5)
    beta = jax.random.normal(kb, (c_out,), jnp.float32) * 0.1
    mean = jax.random.normal(km, (c_out,), jnp.float32) * 0.1
    var = jax.random.uniform(kv, (c_out,), jnp.float32, 0.5, 1.5)
    eps = 1e-5  # nn.BatchNorm2d default
    scale = gamma / jnp.sqrt(var + eps)
    bias = beta - mean * scale
    return dict(w=w, scale=scale, bias=bias)


def init_c2f_params(key, c1, c2, n=1, shortcut=False, g=1, e=0.5):
    assert g == 1, "grouped conv not exercised by the C2f defaults"
    c = int(c2 * e)
    keys = jax.random.split(key, 2 + 2 * n)
    return dict(
        c=c, n=n,
        cv1=make_conv_params(keys[0], c1, 2 * c, 1),
        cv2=make_conv_params(keys[1], (2 + n) * c, c2, 1),
        m=[dict(cv1=make_conv_params(keys[2 + 2 * i], c, c, 3),
                cv2=make_conv_params(keys[3 + 2 * i], c, c, 3),
                add=bool(shortcut))            # Bottleneck(c, c, ...) -> c1 == c2
           for i in range(n)],
    )


def prepare_c2f_params(params, compute_dtype=_COMPUTE_DTYPE):
    """One-time layout prep (hoisted out of the forward): bf16 kernel-ready weights,
    zero-padded channels for the im2col path, stacked f32 BN scale/bias."""
    c, n = params["c"], params["n"]

    def sb(p):
        return jnp.stack([p["scale"], p["bias"]], axis=0).astype(jnp.float32)   # (2, Cout)

    def pw_weight(p):
        return jnp.transpose(p["w"][:, :, 0, 0], (1, 0)).astype(compute_dtype)  # (Cin, Cout)

    def c3(p):
        cout, cin = p["w"].shape[0], p["w"].shape[1]
        w = jnp.transpose(p["w"], (2, 3, 1, 0)).reshape(9, cin, cout)   # (ky*3+kx, ci, co)
        cin_pad = _padded_cin(cin)
        if cin_pad != cin:
            w = jnp.pad(w, ((0, 0), (0, cin_pad - cin), (0, 0)))
        return dict(w=w.astype(compute_dtype), sb=sb(p), cin=cin, cin_pad=cin_pad)

    w2 = pw_weight(params["cv2"])                                  # ((2+n)*c, C2)
    w2_chunks = tuple([w2[:2 * c]] +
                      [w2[2 * c + i * c: 2 * c + (i + 1) * c] for i in range(n)])
    return dict(
        c=c, n=n, compute_dtype=compute_dtype,
        cv1=dict(w=pw_weight(params["cv1"]), sb=sb(params["cv1"])),
        cv2=dict(w_chunks=w2_chunks, sb=sb(params["cv2"])),
        m=[dict(cv1=c3(bp["cv1"]), cv2=c3(bp["cv2"]), add=bool(bp["add"]))
           for bp in params["m"]],
    )


# ----------------------------- C2f forward ---------------------------------

def c2f_forward(prep, x_nchw):
    x = jnp.transpose(x_nchw, (0, 2, 3, 1))          # NCHW -> NHWC
    N, H, W, C1 = x.shape
    M = N * H * W
    c = prep["c"]
    cdt = prep["compute_dtype"]

    def pad_img(z, cin_pad):
        # 'same' halo for k=3, width right-padded to an 8-multiple (sublane alignment),
        # channels zero-padded for the lane-aligned im2col path — all in one pad op.
        wpad = (-(W + 2)) % 8
        cpad = cin_pad - z.shape[-1]
        return jnp.pad(z, ((0, 0), (1, 1), (1, 1 + wpad), (0, cpad)))

    # cv1: 1x1 conv over flattened pixels -> (M, 2c) in bf16 (cast to bf16 in-kernel)
    y0 = fused_pointwise_conv([x.reshape(M, C1)], [prep["cv1"]["w"]],
                              prep["cv1"]["sb"], cdt)
    y0_img = y0.reshape(N, H, W, 2 * c)

    # bottleneck chain on the second half of y0
    z_img = y0_img[..., c:]                          # (N, H, W, c)
    z_flat = z_img.reshape(N, H * W, c)              # residual for the first bottleneck
    chunks = [y0]                                    # fused concat+cv2 consumes y0 whole
    for bp in prep["m"]:
        t1 = conv3x3(pad_img(z_img, bp["cv1"]["cin_pad"]), bp["cv1"], W)        # (N, H*W, c)
        t2 = conv3x3(pad_img(t1.reshape(N, H, W, c), bp["cv2"]["cin_pad"]), bp["cv2"], W,
                     residual=z_flat if bp["add"] else None)                    # (N, H*W, c)
        chunks.append(t2.reshape(M, c))
        z_flat = t2
        z_img = t2.reshape(N, H, W, c)

    # cv2: 1x1 conv over the channel concat [y0 | m_1 | ... | m_n]; concat fused in-kernel.
    out = fused_pointwise_conv(chunks, list(prep["cv2"]["w_chunks"]),
                               prep["cv2"]["sb"], jnp.float32)                  # (M, C2)
    C2 = out.shape[1]
    return jnp.transpose(out.reshape(N, H, W, C2), (0, 3, 1, 2))                # back to NCHW


# ----------------------------- plain-JAX reference (NCHW, mirrors PyTorch) --

def _conv_ref(p, x, k):
    pad = k // 2
    y = lax.conv_general_dilated(x, p["w"], (1, 1), [(pad, pad), (pad, pad)],
                                 dimension_numbers=("NCHW", "OIHW", "NCHW"))
    y = y * p["scale"][None, :, None, None] + p["bias"][None, :, None, None]
    return y * (1.0 / (1.0 + jnp.exp(-y)))


def c2f_forward_ref(params, x):
    c = params["c"]
    y0 = _conv_ref(params["cv1"], x, 1)
    ys = [y0[:, :c], y0[:, c:]]
    for bp in params["m"]:
        inp = ys[-1]
        t = _conv_ref(bp["cv2"], _conv_ref(bp["cv1"], inp, 3), 3)
        ys.append(inp + t if bp["add"] else t)
    return _conv_ref(params["cv2"], jnp.concatenate(ys, axis=1), 1)


# ----------------------------- main -----------------------------------------

if __name__ == "__main__":
    key = jax.random.PRNGKey(0)
    kx, kp = jax.random.split(key)
    N, C1, H, W = 2, 8, 16, 16
    C2, n_rep = 8, 2
    x = jax.random.normal(kx, (N, C1, H, W), jnp.float32)
    params = init_c2f_params(kp, C1, C2, n=n_rep, shortcut=True, e=0.5)
    prep = prepare_c2f_params(params)                # one-time layout prep (hoisted)

    fwd = jax.jit(lambda t: c2f_forward(prep, t))
    out = jax.block_until_ready(fwd(x))
    ref = jax.block_until_ready(c2f_forward_ref(params, x))

    assert out.shape == (N, C2, H, W), out.shape
    max_err = float(jnp.max(jnp.abs(out - ref)))
    # bf16 MXU path vs f32 reference -> loosened tolerance
    assert jnp.allclose(out, ref, rtol=5e-2, atol=5e-2), max_err
    print("KERNEL_OK")
</pallas_src>

<mosaic_0001>
module attributes {stable_mosaic.version = 11 : i64} {
  func.func @kernel(%arg0: i32, %arg1: memref<512x8xf32, #tpu.memory_space<vmem>>, %arg2: memref<8x8xbf16, #tpu.memory_space<vmem>>, %arg3: memref<2x8xf32, #tpu.memory_space<vmem>>, %arg4: memref<512x8xbf16, #tpu.memory_space<vmem>>) attributes {dimension_semantics = [#tpu.dimension_semantics<parallel>], iteration_bounds = array<i64: 1>, scalar_prefetch = 0 : i64, scratch_operands = 0 : i64, tpu.core_type = #tpu.core_type<tc>, window_params = [{transform_indices = @transform_0, window_bounds = array<i64: 512, 8>}, {pipeline_mode = #tpu.pipeline_mode<synchronous>, transform_indices = @transform_1, window_bounds = array<i64: 8, 8>}, {pipeline_mode = #tpu.pipeline_mode<synchronous>, transform_indices = @transform_2, window_bounds = array<i64: 2, 8>}, {transform_indices = @transform_3, window_bounds = array<i64: 512, 8>}]} {
    %c0 = arith.constant 0 : index
    %c0_0 = arith.constant 0 : index
    %0 = vector.load %arg2[%c0, %c0_0] : memref<8x8xbf16, #tpu.memory_space<vmem>>, vector<8x8xbf16>
    %c0_1 = arith.constant 0 : index
    %c0_2 = arith.constant 0 : index
    %1 = vector.load %arg1[%c0_1, %c0_2] : memref<512x8xf32, #tpu.memory_space<vmem>>, vector<512x8xf32>
    %2 = arith.truncf %1 : vector<512x8xf32> to vector<512x8xbf16>
    %cst = arith.constant dense<0.000000e+00> : vector<512x8xf32>
    %3 = tpu.matmul %2, %0, %cst {dimension_numbers = #tpu.dot_dimension_numbers<[1], [0], [0], [1], [0, 0, 1, 1], [], []>} : vector<512x8xbf16>, vector<8x8xbf16>, vector<512x8xf32> -> vector<512x8xf32>
    %c0_3 = arith.constant 0 : index
    %c0_4 = arith.constant 0 : index
    %4 = vector.load %arg3[%c0_3, %c0_4] : memref<2x8xf32, #tpu.memory_space<vmem>>, vector<1x8xf32>
    %5 = vector.broadcast %4 : vector<1x8xf32> to vector<512x8xf32>
    %6 = arith.mulf %3, %5 : vector<512x8xf32>
    %c1 = arith.constant 1 : index
    %c0_5 = arith.constant 0 : index
    %7 = vector.load %arg3[%c1, %c0_5] : memref<2x8xf32, #tpu.memory_space<vmem>>, vector<1x8xf32>
    %8 = vector.broadcast %7 : vector<1x8xf32> to vector<512x8xf32>
    %9 = arith.addf %6, %8 : vector<512x8xf32>
    %cst_6 = arith.constant 0.000000e+00 : f32
    %10 = vector.broadcast %cst_6 : f32 to vector<512x8xf32>
    %11 = arith.subf %10, %9 : vector<512x8xf32>
    %12 = math.exp %11 : vector<512x8xf32>
    %cst_7 = arith.constant 1.000000e+00 : f32
    %13 = vector.broadcast %cst_7 : f32 to vector<512x8xf32>
    %14 = arith.addf %13, %12 : vector<512x8xf32>
    %cst_8 = arith.constant 1.000000e+00 : f32
    %15 = vector.broadcast %cst_8 : f32 to vector<512x8xf32>
    %16 = arith.divf %15, %14 : vector<512x8xf32>
    %17 = arith.mulf %9, %16 : vector<512x8xf32>
    %18 = arith.truncf %17 : vector<512x8xf32> to vector<512x8xbf16>
    %c0_9 = arith.constant 0 : index
    %c0_10 = arith.constant 0 : index
    %19 = vector.load %arg4[%c0_9, %c0_10] : memref<512x8xbf16, #tpu.memory_space<vmem>>, vector<512x8xbf16>
    tpu.vector_store %arg4[%c0_9, %c0_10], %18 {strides = array<i32>} : memref<512x8xbf16, #tpu.memory_space<vmem>>, vector<512x8xbf16>,
    return
  }
  func.func @transform_0(%arg0: i32) -> (i32, i32) {
    %c0_i32 = arith.constant 0 : i32
    %c0_i32_0 = arith.constant 0 : i32
    return %arg0, %c0_i32 : i32, i32
  }
  func.func @transform_1(%arg0: i32) -> (i32, i32) {
    %c0_i32 = arith.constant 0 : i32
    %c0_i32_0 = arith.constant 0 : i32
    %c0_i32_1 = arith.constant 0 : i32
    return %c0_i32, %c0_i32_0 : i32, i32
  }
  func.func @transform_2(%arg0: i32) -> (i32, i32) {
    %c0_i32 = arith.constant 0 : i32
    %c0_i32_0 = arith.constant 0 : i32
    %c0_i32_1 = arith.constant 0 : i32
    return %c0_i32, %c0_i32_0 : i32, i32
  }
  func.func @transform_3(%arg0: i32) -> (i32, i32) {
    %c0_i32 = arith.constant 0 : i32
    %c0_i32_0 = arith.constant 0 : i32
    return %arg0, %c0_i32 : i32, i32
  }
}

module attributes {stable_mosaic.version = 11 : i64} {
  func.func @kernel(%arg0: i32, %arg1: i32, %arg2: memref<1x18x24x4xbf16, #tpu.memory_space<vmem>>, %arg3: memref<9x4x4xbf16, #tpu.memory_space<vmem>>, %arg4: memref<2x4xf32, #tpu.memory_space<vmem>>, %arg5: memref<1x256x4xbf16, #tpu.memory_space<vmem>>) attributes {dimension_semantics = [#tpu.dimension_semantics<parallel>, #tpu.dimension_semantics<parallel>], iteration_bounds = array<i64: 2, 1>, scalar_prefetch = 0 : i64, scratch_operands = 0 : i64, tpu.core_type = #tpu.core_type<tc>, window_params = [{pipeline_mode = #tpu.pipeline_mode<synchronous>, transform_indices = @transform_0, window_bounds = array<i64: 1, 18, 24, 4>}, {pipeline_mode = #tpu.pipeline_mode<synchronous>, transform_indices = @transform_1, window_bounds = array<i64: 9, 4, 4>}, {pipeline_mode = #tpu.pipeline_mode<synchronous>, transform_indices = @transform_2, window_bounds = array<i64: 2, 4>}, {transform_indices = @transform_3, window_bounds = array<i64: 1, 256, 4>}]} {
    %c16_i32 = arith.constant 16 : i32
    %0 = arith.muli %arg1, %c16_i32 : i32
    %1 = tpu.assume_multiple %0, 16 : i32
    %c0 = arith.constant 0 : index
    %2 = arith.index_cast %1 : i32 to index
    %c0_0 = arith.constant 0 : index
    %c0_1 = arith.constant 0 : index
    %3 = vector.load %arg2[%c0, %2, %c0_0, %c0_1] : memref<1x18x24x4xbf16, #tpu.memory_space<vmem>>, vector<1x18x24x4xbf16>
    %4 = vector.shape_cast %3 : vector<1x18x24x4xbf16> to vector<18x24x4xbf16>
    %cst = arith.constant 0.000000e+00 : f32
    %5 = vector.broadcast %cst : f32 to vector<256x4xf32>
    %6 = vector.extract_strided_slice %4 {offsets = [0, 0, 0], sizes = [16, 16, 4], strides = [1, 1, 1]} : vector<18x24x4xbf16> to vector<16x16x4xbf16>
    %7 = vector.shape_cast %6 : vector<16x16x4xbf16> to vector<256x4xbf16>
    %c0_2 = arith.constant 0 : index
    %c0_3 = arith.constant 0 : index
    %c0_4 = arith.constant 0 : index
    %8 = vector.load %arg3[%c0_2, %c0_3, %c0_4] : memref<9x4x4xbf16, #tpu.memory_space<vmem>>, vector<1x4x4xbf16>
    %9 = vector.shape_cast %8 : vector<1x4x4xbf16> to vector<4x4xbf16>
    %cst_5 = arith.constant dense<0.000000e+00> : vector<256x4xf32>
    %10 = tpu.matmul %7, %9, %cst_5 {dimension_numbers = #tpu.dot_dimension_numbers<[1], [0], [0], [1], [0, 0, 1, 1], [], []>} : vector<256x4xbf16>, vector<4x4xbf16>, vector<256x4xf32> -> vector<256x4xf32>
    %11 = arith.addf %5, %10 : vector<256x4xf32>
    %12 = vector.extract_strided_slice %4 {offsets = [0, 1, 0], sizes = [16, 16, 4], strides = [1, 1, 1]} : vector<18x24x4xbf16> to vector<16x16x4xbf16>
    %13 = vector.shape_cast %12 : vector<16x16x4xbf16> to vector<256x4xbf16>
    %c1 = arith.constant 1 : index
    %c0_6 = arith.constant 0 : index
    %c0_7 = arith.constant 0 : index
    %14 = vector.load %arg3[%c1, %c0_6, %c0_7] : memref<9x4x4xbf16, #tpu.memory_space<vmem>>, vector<1x4x4xbf16>
    %15 = vector.shape_cast %14 : vector<1x4x4xbf16> to vector<4x4xbf16>
    %cst_8 = arith.constant dense<0.000000e+00> : vector<256x4xf32>
    %16 = tpu.matmul %13, %15, %cst_8 {dimension_numbers = #tpu.dot_dimension_numbers<[1], [0], [0], [1], [0, 0, 1, 1], [], []>} : vector<256x4xbf16>, vector<4x4xbf16>, vector<256x4xf32> -> vector<256x4xf32>
    %17 = arith.addf %11, %16 : vector<256x4xf32>
    %18 = vector.extract_strided_slice %4 {offsets = [0, 2, 0], sizes = [16, 16, 4], strides = [1, 1, 1]} : vector<18x24x4xbf16> to vector<16x16x4xbf16>
    %19 = vector.shape_cast %18 : vector<16x16x4xbf16> to vector<256x4xbf16>
    %c2 = arith.constant 2 : index
    %c0_9 = arith.constant 0 : index
    %c0_10 = arith.constant 0 : index
    %20 = vector.load %arg3[%c2, %c0_9, %c0_10] : memref<9x4x4xbf16, #tpu.memory_space<vmem>>, vector<1x4x4xbf16>
    %21 = vector.shape_cast %20 : vector<1x4x4xbf16> to vector<4x4xbf16>
    %cst_11 = arith.constant dense<0.000000e+00> : vector<256x4xf32>
    %22 = tpu.matmul %19, %21, %cst_11 {dimension_numbers = #tpu.dot_dimension_numbers<[1], [0], [0], [1], [0, 0, 1, 1], [], []>} : vector<256x4xbf16>, vector<4x4xbf16>, vector<256x4xf32> -> vector<256x4xf32>
    %23 = arith.addf %17, %22 : vector<256x4xf32>
    %24 = vector.extract_strided_slice %4 {offsets = [1, 0, 0], sizes = [16, 16, 4], strides = [1, 1, 1]} : vector<18x24x4xbf16> to vector<16x16x4xbf16>
    %25 = vector.shape_cast %24 : vector<16x16x4xbf16> to vector<256x4xbf16>
    %c3 = arith.constant 3 : index
    %c0_12 = arith.constant 0 : index
    %c0_13 = arith.constant 0 : index
    %26 = vector.load %arg3[%c3, %c0_12, %c0_13] : memref<9x4x4xbf16, #tpu.memory_space<vmem>>, vector<1x4x4xbf16>
    %27 = vector.shape_cast %26 : vector<1x4x4xbf16> to vector<4x4xbf16>
    %cst_14 = arith.constant dense<0.000000e+00> : vector<256x4xf32>
    %28 = tpu.matmul %25, %27, %cst_14 {dimension_numbers = #tpu.dot_dimension_numbers<[1], [0], [0], [1], [0, 0, 1, 1], [], []>} : vector<256x4xbf16>, vector<4x4xbf16>, vector<256x4xf32> -> vector<256x4xf32>
    %29 = arith.addf %23, %28 : vector<256x4xf32>
    %30 = vector.extract_strided_slice %4 {offsets = [1, 1, 0], sizes = [16, 16, 4], strides = [1, 1, 1]} : vector<18x24x4xbf16> to vector<16x16x4xbf16>
    %31 = vector.shape_cast %30 : vector<16x16x4xbf16> to vector<256x4xbf16>
    %c4 = arith.constant 4 : index
    %c0_15 = arith.constant 0 : index
    %c0_16 = arith.constant 0 : index
    %32 = vector.load %arg3[%c4, %c0_15, %c0_16] : memref<9x4x4xbf16, #tpu.memory_space<vmem>>, vector<1x4x4xbf16>
    %33 = vector.shape_cast %32 : vector<1x4x4xbf16> to vector<4x4xbf16>
    %cst_17 = arith.constant dense<0.000000e+00> : vector<256x4xf32>
    %34 = tpu.matmul %31, %33, %cst_17 {dimension_numbers = #tpu.dot_dimension_numbers<[1], [0], [0], [1], [0, 0, 1, 1], [], []>} : vector<256x4xbf16>, vector<4x4xbf16>, vector<256x4xf32> -> vector<256x4xf32>
    %35 = arith.addf %29, %34 : vector<256x4xf32>
    %36 = vector.extract_strided_slice %4 {offsets = [1, 2, 0], sizes = [16, 16, 4], strides = [1, 1, 1]} : vector<18x24x4xbf16> to vector<16x16x4xbf16>
    %37 = vector.shape_cast %36 : vector<16x16x4xbf16> to vector<256x4xbf16>
    %c5 = arith.constant 5 : index
    %c0_18 = arith.constant 0 : index
    %c0_19 = arith.constant 0 : index
    %38 = vector.load %arg3[%c5, %c0_18, %c0_19] : memref<9x4x4xbf16, #tpu.memory_space<vmem>>, vector<1x4x4xbf16>
    %39 = vector.shape_cast %38 : vector<1x4x4xbf16> to vector<4x4xbf16>
    %cst_20 = arith.constant dense<0.000000e+00> : vector<256x4xf32>
    %40 = tpu.matmul %37, %39, %cst_20 {dimension_numbers = #tpu.dot_dimension_numbers<[1], [0], [0], [1], [0, 0, 1, 1], [], []>} : vector<256x4xbf16>, vector<4x4xbf16>, vector<256x4xf32> -> vector<256x4xf32>
    %41 = arith.addf %35, %40 : vector<256x4xf32>
    %42 = vector.extract_strided_slice %4 {offsets = [2, 0, 0], sizes = [16, 16, 4], strides = [1, 1, 1]} : vector<18x24x4xbf16> to vector<16x16x4xbf16>
    %43 = vector.shape_cast %42 : vector<16x16x4xbf16> to vector<256x4xbf16>
    %c6 = arith.constant 6 : index
    %c0_21 = arith.constant 0 : index
    %c0_22 = arith.constant 0 : index
    %44 = vector.load %arg3[%c6, %c0_21, %c0_22] : memref<9x4x4xbf16, #tpu.memory_space<vmem>>, vector<1x4x4xbf16>
    %45 = vector.shape_cast %44 : vector<1x4x4xbf16> to vector<4x4xbf16>
    %cst_23 = arith.constant dense<0.000000e+00> : vector<256x4xf32>
    %46 = tpu.matmul %43, %45, %cst_23 {dimension_numbers = #tpu.dot_dimension_numbers<[1], [0], [0], [1], [0, 0, 1, 1], [], []>} : vector<256x4xbf16>, vector<4x4xbf16>, vector<256x4xf32> -> vector<256x4xf32>
    %47 = arith.addf %41, %46 : vector<256x4xf32>
    %48 = vector.extract_strided_slice %4 {offsets = [2, 1, 0], sizes = [16, 16, 4], strides = [1, 1, 1]} : vector<18x24x4xbf16> to vector<16x16x4xbf16>
    %49 = vector.shape_cast %48 : vector<16x16x4xbf16> to vector<256x4xbf16>
    %c7 = arith.constant 7 : index
    %c0_24 = arith.constant 0 : index
    %c0_25 = arith.constant 0 : index
    %50 = vector.load %arg3[%c7, %c0_24, %c0_25] : memref<9x4x4xbf16, #tpu.memory_space<vmem>>, vector<1x4x4xbf16>
    %51 = vector.shape_cast %50 : vector<1x4x4xbf16> to vector<4x4xbf16>
    %cst_26 = arith.constant dense<0.000000e+00> : vector<256x4xf32>
    %52 = tpu.matmul %49, %51, %cst_26 {dimension_numbers = #tpu.dot_dimension_numbers<[1], [0], [0], [1], [0, 0, 1, 1], [], []>} : vector<256x4xbf16>, vector<4x4xbf16>, vector<256x4xf32> -> vector<256x4xf32>
    %53 = arith.addf %47, %52 : vector<256x4xf32>
    %54 = vector.extract_strided_slice %4 {offsets = [2, 2, 0], sizes = [16, 16, 4], strides = [1, 1, 1]} : vector<18x24x4xbf16> to vector<16x16x4xbf16>
    %55 = vector.shape_cast %54 : vector<16x16x4xbf16> to vector<256x4xbf16>
    %c8 = arith.constant 8 : index
    %c0_27 = arith.constant 0 : index
    %c0_28 = arith.constant 0 : index
    %56 = vector.load %arg3[%c8, %c0_27, %c0_28] : memref<9x4x4xbf16, #tpu.memory_space<vmem>>, vector<1x4x4xbf16>
    %57 = vector.shape_cast %56 : vector<1x4x4xbf16> to vector<4x4xbf16>
    %cst_29 = arith.constant dense<0.000000e+00> : vector<256x4xf32>
    %58 = tpu.matmul %55, %57, %cst_29 {dimension_numbers = #tpu.dot_dimension_numbers<[1], [0], [0], [1], [0, 0, 1, 1], [], []>} : vector<256x4xbf16>, vector<4x4xbf16>, vector<256x4xf32> -> vector<256x4xf32>
    %59 = arith.addf %53, %58 : vector<256x4xf32>
    %c0_30 = arith.constant 0 : index
    %c0_31 = arith.constant 0 : index
    %60 = vector.load %arg4[%c0_30, %c0_31] : memref<2x4xf32, #tpu.memory_space<vmem>>, vector<1x4xf32>
    %61 = vector.broadcast %60 : vector<1x4xf32> to vector<256x4xf32>
    %62 = arith.mulf %59, %61 : vector<256x4xf32>
    %c1_32 = arith.constant 1 : index
    %c0_33 = arith.constant 0 : index
    %63 = vector.load %arg4[%c1_32, %c0_33] : memref<2x4xf32, #tpu.memory_space<vmem>>, vector<1x4xf32>
    %64 = vector.broadcast %63 : vector<1x4xf32> to vector<256x4xf32>
    %65 = arith.addf %62, %64 : vector<256x4xf32>
    %cst_34 = arith.constant 0.000000e+00 : f32
    %66 = vector.broadcast %cst_34 : f32 to vector<256x4xf32>
    %67 = arith.subf %66, %65 : vector<256x4xf32>
    %68 = math.exp %67 : vector<256x4xf32>
    %cst_35 = arith.constant 1.000000e+00 : f32
    %69 = vector.broadcast %cst_35 : f32 to vector<256x4xf32>
    %70 = arith.addf %69, %68 : vector<256x4xf32>
    %cst_36 = arith.constant 1.000000e+00 : f32
    %71 = vector.broadcast %cst_36 : f32 to vector<256x4xf32>
    %72 = arith.divf %71, %70 : vector<256x4xf32>
    %73 = arith.mulf %65, %72 : vector<256x4xf32>
    %74 = arith.truncf %73 : vector<256x4xf32> to vector<256x4xbf16>
    %c0_37 = arith.constant 0 : index
    %c0_38 = arith.constant 0 : index
    %c0_39 = arith.constant 0 : index
    %75 = vector.load %arg5[%c0_37, %c0_38, %c0_39] : memref<1x256x4xbf16, #tpu.memory_space<vmem>>, vector<1x256x4xbf16>
    %76 = vector.shape_cast %75 : vector<1x256x4xbf16> to vector<256x4xbf16>
    %77 = vector.shape_cast %74 : vector<256x4xbf16> to vector<1x256x4xbf16>
    tpu.vector_store %arg5[%c0_37, %c0_38, %c0_39], %77 {strides = array<i32>} : memref<1x256x4xbf16, #tpu.memory_space<vmem>>, vector<1x256x4xbf16>,
    return
  }
  func.func @transform_0(%arg0: i32, %arg1: i32) -> (i32, i32, i32, i32) {
    %c0_i32 = arith.constant 0 : i32
    %c0_i32_0 = arith.constant 0 : i32
    %c0_i32_1 = arith.constant 0 : i32
    %c0_i32_2 = arith.constant 0 : i32
    return %arg0, %c0_i32, %c0_i32_0, %c0_i32_1 : i32, i32, i32, i32
  }
  func.func @transform_1(%arg0: i32, %arg1: i32) -> (i32, i32, i32) {
    %c0_i32 = arith.constant 0 : i32
    %c0_i32_0 = arith.constant 0 : i32
    %c0_i32_1 = arith.constant 0 : i32
    %c0_i32_2 = arith.constant 0 : i32
    return %c0_i32, %c0_i32_0, %c0_i32_1 : i32, i32, i32
  }
  func.func @transform_2(%arg0: i32, %arg1: i32) -> (i32, i32) {
    %c0_i32 = arith.constant 0 : i32
    %c0_i32_0 = arith.constant 0 : i32
    %c0_i32_1 = arith.constant 0 : i32
    return %c0_i32, %c0_i32_0 : i32, i32
  }
  func.func @transform_3(%arg0: i32, %arg1: i32) -> (i32, i32, i32) {
    %c0_i32 = arith.constant 0 : i32
    %c0_i32_0 = arith.constant 0 : i32
    return %arg0, %arg1, %c0_i32 : i32, i32, i32
  }
}

module attributes {stable_mosaic.version = 11 : i64} {
  func.func @kernel(%arg0: i32, %arg1: i32, %arg2: memref<1x18x24x4xbf16, #tpu.memory_space<vmem>>, %arg3: memref<9x4x4xbf16, #tpu.memory_space<vmem>>, %arg4: memref<2x4xf32, #tpu.memory_space<vmem>>, %arg5: memref<1x256x4xbf16, #tpu.memory_space<vmem>>, %arg6: memref<1x256x4xbf16, #tpu.memory_space<vmem>>) attributes {dimension_semantics = [#tpu.dimension_semantics<parallel>, #tpu.dimension_semantics<parallel>], iteration_bounds = array<i64: 2, 1>, scalar_prefetch = 0 : i64, scratch_operands = 0 : i64, tpu.core_type = #tpu.core_type<tc>, window_params = [{pipeline_mode = #tpu.pipeline_mode<synchronous>, transform_indices = @transform_0, window_bounds = array<i64: 1, 18, 24, 4>}, {pipeline_mode = #tpu.pipeline_mode<synchronous>, transform_indices = @transform_1, window_bounds = array<i64: 9, 4, 4>}, {pipeline_mode = #tpu.pipeline_mode<synchronous>, transform_indices = @transform_2, window_bounds = array<i64: 2, 4>}, {transform_indices = @transform_3, window_bounds = array<i64: 1, 256, 4>}, {transform_indices = @transform_4, window_bounds = array<i64: 1, 256, 4>}]} {
    %c16_i32 = arith.constant 16 : i32
    %0 = arith.muli %arg1, %c16_i32 : i32
    %1 = tpu.assume_multiple %0, 16 : i32
    %c0 = arith.constant 0 : index
    %2 = arith.index_cast %1 : i32 to index
    %c0_0 = arith.constant 0 : index
    %c0_1 = arith.constant 0 : index
    %3 = vector.load %arg2[%c0, %2, %c0_0, %c0_1] : memref<1x18x24x4xbf16, #tpu.memory_space<vmem>>, vector<1x18x24x4xbf16>
    %4 = vector.shape_cast %3 : vector<1x18x24x4xbf16> to vector<18x24x4xbf16>
    %cst = arith.constant 0.000000e+00 : f32
    %5 = vector.broadcast %cst : f32 to vector<256x4xf32>
    %6 = vector.extract_strided_slice %4 {offsets = [0, 0, 0], sizes = [16, 16, 4], strides = [1, 1, 1]} : vector<18x24x4xbf16> to vector<16x16x4xbf16>
    %7 = vector.shape_cast %6 : vector<16x16x4xbf16> to vector<256x4xbf16>
    %c0_2 = arith.constant 0 : index
    %c0_3 = arith.constant 0 : index
    %c0_4 = arith.constant 0 : index
    %8 = vector.load %arg3[%c0_2, %c0_3, %c0_4] : memref<9x4x4xbf16, #tpu.memory_space<vmem>>, vector<1x4x4xbf16>
    %9 = vector.shape_cast %8 : vector<1x4x4xbf16> to vector<4x4xbf16>
    %cst_5 = arith.constant dense<0.000000e+00> : vector<256x4xf32>
    %10 = tpu.matmul %7, %9, %cst_5 {dimension_numbers = #tpu.dot_dimension_numbers<[1], [0], [0], [1], [0, 0, 1, 1], [], []>} : vector<256x4xbf16>, vector<4x4xbf16>, vector<256x4xf32> -> vector<256x4xf32>
    %11 = arith.addf %5, %10 : vector<256x4xf32>
    %12 = vector.extract_strided_slice %4 {offsets = [0, 1, 0], sizes = [16, 16, 4], strides = [1, 1, 1]} : vector<18x24x4xbf16> to vector<16x16x4xbf16>
    %13 = vector.shape_cast %12 : vector<16x16x4xbf16> to vector<256x4xbf16>
    %c1 = arith.constant 1 : index
    %c0_6 = arith.constant 0 : index
    %c0_7 = arith.constant 0 : index
    %14 = vector.load %arg3[%c1, %c0_6, %c0_7] : memref<9x4x4xbf16, #tpu.memory_space<vmem>>, vector<1x4x4xbf16>
    %15 = vector.shape_cast %14 : vector<1x4x4xbf16> to vector<4x4xbf16>
    %cst_8 = arith.constant dense<0.000000e+00> : vector<256x4xf32>
    %16 = tpu.matmul %13, %15, %cst_8 {dimension_numbers = #tpu.dot_dimension_numbers<[1], [0], [0], [1], [0, 0, 1, 1], [], []>} : vector<256x4xbf16>, vector<4x4xbf16>, vector<256x4xf32> -> vector<256x4xf32>
    %17 = arith.addf %11, %16 : vector<256x4xf32>
    %18 = vector.extract_strided_slice %4 {offsets = [0, 2, 0], sizes = [16, 16, 4], strides = [1, 1, 1]} : vector<18x24x4xbf16> to vector<16x16x4xbf16>
    %19 = vector.shape_cast %18 : vector<16x16x4xbf16> to vector<256x4xbf16>
    %c2 = arith.constant 2 : index
    %c0_9 = arith.constant 0 : index
    %c0_10 = arith.constant 0 : index
    %20 = vector.load %arg3[%c2, %c0_9, %c0_10] : memref<9x4x4xbf16, #tpu.memory_space<vmem>>, vector<1x4x4xbf16>
    %21 = vector.shape_cast %20 : vector<1x4x4xbf16> to vector<4x4xbf16>
    %cst_11 = arith.constant dense<0.000000e+00> : vector<256x4xf32>
    %22 = tpu.matmul %19, %21, %cst_11 {dimension_numbers = #tpu.dot_dimension_numbers<[1], [0], [0], [1], [0, 0, 1, 1], [], []>} : vector<256x4xbf16>, vector<4x4xbf16>, vector<256x4xf32> -> vector<256x4xf32>
    %23 = arith.addf %17, %22 : vector<256x4xf32>
    %24 = vector.extract_strided_slice %4 {offsets = [1, 0, 0], sizes = [16, 16, 4], strides = [1, 1, 1]} : vector<18x24x4xbf16> to vector<16x16x4xbf16>
    %25 = vector.shape_cast %24 : vector<16x16x4xbf16> to vector<256x4xbf16>
    %c3 = arith.constant 3 : index
    %c0_12 = arith.constant 0 : index
    %c0_13 = arith.constant 0 : index
    %26 = vector.load %arg3[%c3, %c0_12, %c0_13] : memref<9x4x4xbf16, #tpu.memory_space<vmem>>, vector<1x4x4xbf16>
    %27 = vector.shape_cast %26 : vector<1x4x4xbf16> to vector<4x4xbf16>
    %cst_14 = arith.constant dense<0.000000e+00> : vector<256x4xf32>
    %28 = tpu.matmul %25, %27, %cst_14 {dimension_numbers = #tpu.dot_dimension_numbers<[1], [0], [0], [1], [0, 0, 1, 1], [], []>} : vector<256x4xbf16>, vector<4x4xbf16>, vector<256x4xf32> -> vector<256x4xf32>
    %29 = arith.addf %23, %28 : vector<256x4xf32>
    %30 = vector.extract_strided_slice %4 {offsets = [1, 1, 0], sizes = [16, 16, 4], strides = [1, 1, 1]} : vector<18x24x4xbf16> to vector<16x16x4xbf16>
    %31 = vector.shape_cast %30 : vector<16x16x4xbf16> to vector<256x4xbf16>
    %c4 = arith.constant 4 : index
    %c0_15 = arith.constant 0 : index
    %c0_16 = arith.constant 0 : index
    %32 = vector.load %arg3[%c4, %c0_15, %c0_16] : memref<9x4x4xbf16, #tpu.memory_space<vmem>>, vector<1x4x4xbf16>
    %33 = vector.shape_cast %32 : vector<1x4x4xbf16> to vector<4x4xbf16>
    %cst_17 = arith.constant dense<0.000000e+00> : vector<256x4xf32>
    %34 = tpu.matmul %31, %33, %cst_17 {dimension_numbers = #tpu.dot_dimension_numbers<[1], [0], [0], [1], [0, 0, 1, 1], [], []>} : vector<256x4xbf16>, vector<4x4xbf16>, vector<256x4xf32> -> vector<256x4xf32>
    %35 = arith.addf %29, %34 : vector<256x4xf32>
    %36 = vector.extract_strided_slice %4 {offsets = [1, 2, 0], sizes = [16, 16, 4], strides = [1, 1, 1]} : vector<18x24x4xbf16> to vector<16x16x4xbf16>
    %37 = vector.shape_cast %36 : vector<16x16x4xbf16> to vector<256x4xbf16>
    %c5 = arith.constant 5 : index
    %c0_18 = arith.constant 0 : index
    %c0_19 = arith.constant 0 : index
    %38 = vector.load %arg3[%c5, %c0_18, %c0_19] : memref<9x4x4xbf16, #tpu.memory_space<vmem>>, vector<1x4x4xbf16>
    %39 = vector.shape_cast %38 : vector<1x4x4xbf16> to vector<4x4xbf16>
    %cst_20 = arith.constant dense<0.000000e+00> : vector<256x4xf32>
    %40 = tpu.matmul %37, %39, %cst_20 {dimension_numbers = #tpu.dot_dimension_numbers<[1], [0], [0], [1], [0, 0, 1, 1], [], []>} : vector<256x4xbf16>, vector<4x4xbf16>, vector<256x4xf32> -> vector<256x4xf32>
    %41 = arith.addf %35, %40 : vector<256x4xf32>
    %42 = vector.extract_strided_slice %4 {offsets = [2, 0, 0], sizes = [16, 16, 4], strides = [1, 1, 1]} : vector<18x24x4xbf16> to vector<16x16x4xbf16>
    %43 = vector.shape_cast %42 : vector<16x16x4xbf16> to vector<256x4xbf16>
    %c6 = arith.constant 6 : index
    %c0_21 = arith.constant 0 : index
    %c0_22 = arith.constant 0 : index
    %44 = vector.load %arg3[%c6, %c0_21, %c0_22] : memref<9x4x4xbf16, #tpu.memory_space<vmem>>, vector<1x4x4xbf16>
    %45 = vector.shape_cast %44 : vector<1x4x4xbf16> to vector<4x4xbf16>
    %cst_23 = arith.constant dense<0.000000e+00> : vector<256x4xf32>
    %46 = tpu.matmul %43, %45, %cst_23 {dimension_numbers = #tpu.dot_dimension_numbers<[1], [0], [0], [1], [0, 0, 1, 1], [], []>} : vector<256x4xbf16>, vector<4x4xbf16>, vector<256x4xf32> -> vector<256x4xf32>
    %47 = arith.addf %41, %46 : vector<256x4xf32>
    %48 = vector.extract_strided_slice %4 {offsets = [2, 1, 0], sizes = [16, 16, 4], strides = [1, 1, 1]} : vector<18x24x4xbf16> to vector<16x16x4xbf16>
    %49 = vector.shape_cast %48 : vector<16x16x4xbf16> to vector<256x4xbf16>
    %c7 = arith.constant 7 : index
    %c0_24 = arith.constant 0 : index
    %c0_25 = arith.constant 0 : index
    %50 = vector.load %arg3[%c7, %c0_24, %c0_25] : memref<9x4x4xbf16, #tpu.memory_space<vmem>>, vector<1x4x4xbf16>
    %51 = vector.shape_cast %50 : vector<1x4x4xbf16> to vector<4x4xbf16>
    %cst_26 = arith.constant dense<0.000000e+00> : vector<256x4xf32>
    %52 = tpu.matmul %49, %51, %cst_26 {dimension_numbers = #tpu.dot_dimension_numbers<[1], [0], [0], [1], [0, 0, 1, 1], [], []>} : vector<256x4xbf16>, vector<4x4xbf16>, vector<256x4xf32> -> vector<256x4xf32>
    %53 = arith.addf %47, %52 : vector<256x4xf32>
    %54 = vector.extract_strided_slice %4 {offsets = [2, 2, 0], sizes = [16, 16, 4], strides = [1, 1, 1]} : vector<18x24x4xbf16> to vector<16x16x4xbf16>
    %55 = vector.shape_cast %54 : vector<16x16x4xbf16> to vector<256x4xbf16>
    %c8 = arith.constant 8 : index
    %c0_27 = arith.constant 0 : index
    %c0_28 = arith.constant 0 : index
    %56 = vector.load %arg3[%c8, %c0_27, %c0_28] : memref<9x4x4xbf16, #tpu.memory_space<vmem>>, vector<1x4x4xbf16>
    %57 = vector.shape_cast %56 : vector<1x4x4xbf16> to vector<4x4xbf16>
    %cst_29 = arith.constant dense<0.000000e+00> : vector<256x4xf32>
    %58 = tpu.matmul %55, %57, %cst_29 {dimension_numbers = #tpu.dot_dimension_numbers<[1], [0], [0], [1], [0, 0, 1, 1], [], []>} : vector<256x4xbf16>, vector<4x4xbf16>, vector<256x4xf32> -> vector<256x4xf32>
    %59 = arith.addf %53, %58 : vector<256x4xf32>
    %c0_30 = arith.constant 0 : index
    %c0_31 = arith.constant 0 : index
    %60 = vector.load %arg4[%c0_30, %c0_31] : memref<2x4xf32, #tpu.memory_space<vmem>>, vector<1x4xf32>
    %61 = vector.broadcast %60 : vector<1x4xf32> to vector<256x4xf32>
    %62 = arith.mulf %59, %61 : vector<256x4xf32>
    %c1_32 = arith.constant 1 : index
    %c0_33 = arith.constant 0 : index
    %63 = vector.load %arg4[%c1_32, %c0_33] : memref<2x4xf32, #tpu.memory_space<vmem>>, vector<1x4xf32>
    %64 = vector.broadcast %63 : vector<1x4xf32> to vector<256x4xf32>
    %65 = arith.addf %62, %64 : vector<256x4xf32>
    %cst_34 = arith.constant 0.000000e+00 : f32
    %66 = vector.broadcast %cst_34 : f32 to vector<256x4xf32>
    %67 = arith.subf %66, %65 : vector<256x4xf32>
    %68 = math.exp %67 : vector<256x4xf32>
    %cst_35 = arith.constant 1.000000e+00 : f32
    %69 = vector.broadcast %cst_35 : f32 to vector<256x4xf32>
    %70 = arith.addf %69, %68 : vector<256x4xf32>
    %cst_36 = arith.constant 1.000000e+00 : f32
    %71 = vector.broadcast %cst_36 : f32 to vector<256x4xf32>
    %72 = arith.divf %71, %70 : vector<256x4xf32>
    %73 = arith.mulf %65, %72 : vector<256x4xf32>
    %c0_37 = arith.constant 0 : index
    %c0_38 = arith.constant 0 : index
    %c0_39 = arith.constant 0 : index
    %74 = vector.load %arg5[%c0_37, %c0_38, %c0_39] : memref<1x256x4xbf16, #tpu.memory_space<vmem>>, vector<1x256x4xbf16>
    %75 = vector.shape_cast %74 : vector<1x256x4xbf16> to vector<256x4xbf16>
    %76 = arith.extf %75 : vector<256x4xbf16> to vector<256x4xf32>
    %77 = arith.addf %73, %76 : vector<256x4xf32>
    %78 = arith.truncf %77 : vector<256x4xf32> to vector<256x4xbf16>
    %c0_40 = arith.constant 0 : index
    %c0_41 = arith.constant 0 : index
    %c0_42 = arith.constant 0 : index
    %79 = vector.load %arg6[%c0_40, %c0_41, %c0_42] : memref<1x256x4xbf16, #tpu.memory_space<vmem>>, vector<1x256x4xbf16>
    %80 = vector.shape_cast %79 : vector<1x256x4xbf16> to vector<256x4xbf16>
    %81 = vector.shape_cast %78 : vector<256x4xbf16> to vector<1x256x4xbf16>
    tpu.vector_store %arg6[%c0_40, %c0_41, %c0_42], %81 {strides = array<i32>} : memref<1x256x4xbf16, #tpu.memory_space<vmem>>, vector<1x256x4xbf16>,
    return
  }
  func.func @transform_0(%arg0: i32, %arg1: i32) -> (i32, i32, i32, i32) {
    %c0_i32 = arith.constant 0 : i32
    %c0_i32_0 = arith.constant 0 : i32
    %c0_i32_1 = arith.constant 0 : i32
    %c0_i32_2 = arith.constant 0 : i32
    return %arg0, %c0_i32, %c0_i32_0, %c0_i32_1 : i32, i32, i32, i32
  }
  func.func @transform_1(%arg0: i32, %arg1: i32) -> (i32, i32, i32) {
    %c0_i32 = arith.constant 0 : i32
    %c0_i32_0 = arith.constant 0 : i32
    %c0_i32_1 = arith.constant 0 : i32
    %c0_i32_2 = arith.constant 0 : i32
    return %c0_i32, %c0_i32_0, %c0_i32_1 : i32, i32, i32
  }
  func.func @transform_2(%arg0: i32, %arg1: i32) -> (i32, i32) {
    %c0_i32 = arith.constant 0 : i32
    %c0_i32_0 = arith.constant 0 : i32
    %c0_i32_1 = arith.constant 0 : i32
    return %c0_i32, %c0_i32_0 : i32, i32
  }
  func.func @transform_3(%arg0: i32, %arg1: i32) -> (i32, i32, i32) {
    %c0_i32 = arith.constant 0 : i32
    %c0_i32_0 = arith.constant 0 : i32
    return %arg0, %arg1, %c0_i32 : i32, i32, i32
  }
  func.func @transform_4(%arg0: i32, %arg1: i32) -> (i32, i32, i32) {
    %c0_i32 = arith.constant 0 : i32
    %c0_i32_0 = arith.constant 0 : i32
    return %arg0, %arg1, %c0_i32 : i32, i32, i32
  }
}

module attributes {stable_mosaic.version = 11 : i64} {
  func.func @kernel(%arg0: i32, %arg1: memref<512x8xbf16, #tpu.memory_space<vmem>>, %arg2: memref<512x4xbf16, #tpu.memory_space<vmem>>, %arg3: memref<512x4xbf16, #tpu.memory_space<vmem>>, %arg4: memref<8x8xbf16, #tpu.memory_space<vmem>>, %arg5: memref<4x8xbf16, #tpu.memory_space<vmem>>, %arg6: memref<4x8xbf16, #tpu.memory_space<vmem>>, %arg7: memref<2x8xf32, #tpu.memory_space<vmem>>, %arg8: memref<512x8xf32, #tpu.memory_space<vmem>>) attributes {dimension_semantics = [#tpu.dimension_semantics<parallel>], iteration_bounds = array<i64: 1>, scalar_prefetch = 0 : i64, scratch_operands = 0 : i64, tpu.core_type = #tpu.core_type<tc>, window_params = [{transform_indices = @transform_0, window_bounds = array<i64: 512, 8>}, {transform_indices = @transform_1, window_bounds = array<i64: 512, 4>}, {transform_indices = @transform_2, window_bounds = array<i64: 512, 4>}, {pipeline_mode = #tpu.pipeline_mode<synchronous>, transform_indices = @transform_3, window_bounds = array<i64: 8, 8>}, {pipeline_mode = #tpu.pipeline_mode<synchronous>, transform_indices = @transform_4, window_bounds = array<i64: 4, 8>}, {pipeline_mode = #tpu.pipeline_mode<synchronous>, transform_indices = @transform_5, window_bounds = array<i64: 4, 8>}, {pipeline_mode = #tpu.pipeline_mode<synchronous>, transform_indices = @transform_6, window_bounds = array<i64: 2, 8>}, {transform_indices = @transform_7, window_bounds = array<i64: 512, 8>}]} {
    %c0 = arith.constant 0 : index
    %c0_0 = arith.constant 0 : index
    %0 = vector.load %arg4[%c0, %c0_0] : memref<8x8xbf16, #tpu.memory_space<vmem>>, vector<8x8xbf16>
    %c0_1 = arith.constant 0 : index
    %c0_2 = arith.constant 0 : index
    %1 = vector.load %arg1[%c0_1, %c0_2] : memref<512x8xbf16, #tpu.memory_space<vmem>>, vector<512x8xbf16>
    %cst = arith.constant dense<0.000000e+00> : vector<512x8xf32>
    %2 = tpu.matmul %1, %0, %cst {dimension_numbers = #tpu.dot_dimension_numbers<[1], [0], [0], [1], [0, 0, 1, 1], [], []>} : vector<512x8xbf16>, vector<8x8xbf16>, vector<512x8xf32> -> vector<512x8xf32>
    %c0_3 = arith.constant 0 : index
    %c0_4 = arith.constant 0 : index
    %3 = vector.load %arg5[%c0_3, %c0_4] : memref<4x8xbf16, #tpu.memory_space<vmem>>, vector<4x8xbf16>
    %c0_5 = arith.constant 0 : index
    %c0_6 = arith.constant 0 : index
    %4 = vector.load %arg2[%c0_5, %c0_6] : memref<512x4xbf16, #tpu.memory_space<vmem>>, vector<512x4xbf16>
    %cst_7 = arith.constant dense<0.000000e+00> : vector<512x8xf32>
    %5 = tpu.matmul %4, %3, %cst_7 {dimension_numbers = #tpu.dot_dimension_numbers<[1], [0], [0], [1], [0, 0, 1, 1], [], []>} : vector<512x4xbf16>, vector<4x8xbf16>, vector<512x8xf32> -> vector<512x8xf32>
    %6 = arith.addf %2, %5 : vector<512x8xf32>
    %c0_8 = arith.constant 0 : index
    %c0_9 = arith.constant 0 : index
    %7 = vector.load %arg6[%c0_8, %c0_9] : memref<4x8xbf16, #tpu.memory_space<vmem>>, vector<4x8xbf16>
    %c0_10 = arith.constant 0 : index
    %c0_11 = arith.constant 0 : index
    %8 = vector.load %arg3[%c0_10, %c0_11] : memref<512x4xbf16, #tpu.memory_space<vmem>>, vector<512x4xbf16>
    %cst_12 = arith.constant dense<0.000000e+00> : vector<512x8xf32>
    %9 = tpu.matmul %8, %7, %cst_12 {dimension_numbers = #tpu.dot_dimension_numbers<[1], [0], [0], [1], [0, 0, 1, 1], [], []>} : vector<512x4xbf16>, vector<4x8xbf16>, vector<512x8xf32> -> vector<512x8xf32>
    %10 = arith.addf %6, %9 : vector<512x8xf32>
    %c0_13 = arith.constant 0 : index
    %c0_14 = arith.constant 0 : index
    %11 = vector.load %arg7[%c0_13, %c0_14] : memref<2x8xf32, #tpu.memory_space<vmem>>, vector<1x8xf32>
    %12 = vector.broadcast %11 : vector<1x8xf32> to vector<512x8xf32>
    %13 = arith.mulf %10, %12 : vector<512x8xf32>
    %c1 = arith.constant 1 : index
    %c0_15 = arith.constant 0 : index
    %14 = vector.load %arg7[%c1, %c0_15] : memref<2x8xf32, #tpu.memory_space<vmem>>, vector<1x8xf32>
    %15 = vector.broadcast %14 : vector<1x8xf32> to vector<512x8xf32>
    %16 = arith.addf %13, %15 : vector<512x8xf32>
    %cst_16 = arith.constant 0.000000e+00 : f32
    %17 = vector.broadcast %cst_16 : f32 to vector<512x8xf32>
    %18 = arith.subf %17, %16 : vector<512x8xf32>
    %19 = math.exp %18 : vector<512x8xf32>
    %cst_17 = arith.constant 1.000000e+00 : f32
    %20 = vector.broadcast %cst_17 : f32 to vector<512x8xf32>
    %21 = arith.addf %20, %19 : vector<512x8xf32>
    %cst_18 = arith.constant 1.000000e+00 : f32
    %22 = vector.broadcast %cst_18 : f32 to vector<512x8xf32>
    %23 = arith.divf %22, %21 : vector<512x8xf32>
    %24 = arith.mulf %16, %23 : vector<512x8xf32>
    %c0_19 = arith.constant 0 : index
    %c0_20 = arith.constant 0 : index
    %25 = vector.load %arg8[%c0_19, %c0_20] : memref<512x8xf32, #tpu.memory_space<vmem>>, vector<512x8xf32>
    tpu.vector_store %arg8[%c0_19, %c0_20], %24 {strides = array<i32>} : memref<512x8xf32, #tpu.memory_space<vmem>>, vector<512x8xf32>,
    return
  }
  func.func @transform_0(%arg0: i32) -> (i32, i32) {
    %c0_i32 = arith.constant 0 : i32
    %c0_i32_0 = arith.constant 0 : i32
    return %arg0, %c0_i32 : i32, i32
  }
  func.func @transform_1(%arg0: i32) -> (i32, i32) {
    %c0_i32 = arith.constant 0 : i32
    %c0_i32_0 = arith.constant 0 : i32
    return %arg0, %c0_i32 : i32, i32
  }
  func.func @transform_2(%arg0: i32) -> (i32, i32) {
    %c0_i32 = arith.constant 0 : i32
    %c0_i32_0 = arith.constant 0 : i32
    return %arg0, %c0_i32 : i32, i32
  }
  func.func @transform_3(%arg0: i32) -> (i32, i32) {
    %c0_i32 = arith.constant 0 : i32
    %c0_i32_0 = arith.constant 0 : i32
    %c0_i32_1 = arith.constant 0 : i32
    return %c0_i32, %c0_i32_0 : i32, i32
  }
  func.func @transform_4(%arg0: i32) -> (i32, i32) {
    %c0_i32 = arith.constant 0 : i32
    %c0_i32_0 = arith.constant 0 : i32
    %c0_i32_1 = arith.constant 0 : i32
    return %c0_i32, %c0_i32_0 : i32, i32
  }
  func.func @transform_5(%arg0: i32) -> (i32, i32) {
    %c0_i32 = arith.constant 0 : i32
    %c0_i32_0 = arith.constant 0 : i32
    %c0_i32_1 = arith.constant 0 : i32
    return %c0_i32, %c0_i32_0 : i32, i32
  }
  func.func @transform_6(%arg0: i32) -> (i32, i32) {
    %c0_i32 = arith.constant 0 : i32
    %c0_i32_0 = arith.constant 0 : i32
    %c0_i32_1 = arith.constant 0 : i32
    return %c0_i32, %c0_i32_0 : i32, i32
  }
  func.func @transform_7(%arg0: i32) -> (i32, i32) {
    %c0_i32 = arith.constant 0 : i32
    %c0_i32_0 = arith.constant 0 : i32
    return %arg0, %c0_i32 : i32, i32
  }
}

</mosaic_0001>

<bundles_post_ra>
// kernel: _lambda_.6
= control target key start
LH: loop header
LB: loop body
LE: loop exit
PB: predicated region body
PF: predicated region fallthrough
CT: control target
= control target key end

     0   :  { %vm209_vm0 = vcmask 1043456   ;;  %vm112_vm1 = vcmask 64512   ;;  %vm1344_vm2 = vcmask 60416   ;;  %s2996_s1 = inlined_call_operand.vmem [shape: bf16[8,8], index: 1, kind: input, shape index: {}]   ;;  %s2997_s0 = inlined_call_operand.vmem [shape: f32[512,8], index: 0, kind: input, shape index: {}]   ;;  %s2998_s2 = inlined_call_operand.vmem [shape: f32[2,8], index: 2, kind: input, shape index: {}]   ;;  %s2999_s3 = inlined_call_operand.vmem [shape: bf16[512,8], index: 3, kind: output, shape index: {}]  }
   0x1   :  { %v15_v0 = vld [vmem:[%s2996_s1] sm:$0xf]  ;;  %v17_v2 = vld [vmem:[%s2997_s0 + $0x8] sm:$0xff]  ;;  %v18_v7 = vld [vmem:[%s2997_s0 + $0x10] sm:$0xff] }
   0x2   :  { %v16_v1 = vld [vmem:[%s2997_s0] sm:$0xff]  ;;  %1676 = vmatprep.subr.msk.bf16.mxu0 %vm209_vm0, %v15_v0  ;;  %1677 = vmatprep.subr.msk.bf16.mxu1 %vm209_vm0, %v15_v0  ;;  %v211_v3 = vsel %vm209_vm0, %v15_v0, 0  ;;  %v49_v6 = vld [vmem:[%s2997_s0 + $0x108] sm:$0xff]  ;;  %v19_v9 = vld [vmem:[%s2997_s0 + $0x18] sm:$0xff] }
   0x3   :  { %v80_v4 = vpack.c.bf16 %v17_v2, %v16_v1  ;;  %v48_v5 = vld [vmem:[%s2997_s0 + $0x100] sm:$0xff]  ;;  %1609 = vmatpush3.bf16.msra.mxu0 %v211_v3  ;;  %1675 = vmatpush3.bf16.msra.mxu1 %v211_v3  ;;  %v50_v10 = vld [vmem:[%s2997_s0 + $0x110] sm:$0xff]  ;;  %v51_v11 = vld [vmem:[%s2997_s0 + $0x118] sm:$0xff]  ;;  %v81_v12 = vpack.c.bf16 %v19_v9, %v18_v7 }
   0x4   :  { %v96_v8 = vpack.c.bf16 %v49_v6, %v48_v5  ;;  %v97_v13 = vpack.c.bf16 %v51_v11, %v50_v10  ;;  %v20_v14 = vld [vmem:[%s2997_s0 + $0x20] sm:$0xff]  ;;  %v21_v15 = vld [vmem:[%s2997_s0 + $0x28] sm:$0xff]  ;;  %v22_v20 = vld [vmem:[%s2997_s0 + $0x30] sm:$0xff] }
   0x5   :  { %1610 = vmatprep.mubr.msk.bf16.mxu0 %vm112_vm1, %v80_v4  ;;  %v52_v16 = vld [vmem:[%s2997_s0 + $0x120] sm:$0xff]  ;;  %v82_v17 = vpack.c.bf16 %v21_v15, %v20_v14  ;;  %v53_v18 = vld [vmem:[%s2997_s0 + $0x128] sm:$0xff]  ;;  %v23_v21 = vld [vmem:[%s2997_s0 + $0x38] sm:$0xff] }
   0x6   :  { %1642 = vmatprep.mubr.msk.bf16.mxu1 %vm112_vm1, %v96_v8  ;;  %1611 = vmatmul.mubr.msk.bf16.vlgmr.msra.gmra.mrb[0].mxu0 %vm112_vm1, %v81_v12  ;;  %v98_v19 = vpack.c.bf16 %v53_v18, %v52_v16  ;;  %v54_v22 = vld [vmem:[%s2997_s0 + $0x130] sm:$0xff]  ;;  %v55_v23 = vld [vmem:[%s2997_s0 + $0x138] sm:$0xff]  ;;  %v24_v24 = vld [vmem:[%s2997_s0 + $0x40] sm:$0xff]  ;;  %v83_v28 = vpack.c.bf16 %v23_v21, %v22_v20 }
   0x7   :  { %1643 = vmatmul.mubr.msk.bf16.vlgmr.msra.gmra.mrb[0].mxu1 %vm112_vm1, %v97_v13  ;;  %1614 = vmatprep.mubr.msk.bf16.mxu0 %vm112_vm1, %v82_v17  ;;  %v25_v25 = vld [vmem:[%s2997_s0 + $0x48] sm:$0xff]  ;;  %v56_v26 = vld [vmem:[%s2997_s0 + $0x140] sm:$0xff]  ;;  %v99_v29 = vpack.c.bf16 %v55_v23, %v54_v22  ;;  %v26_v32 = vld [vmem:[%s2997_s0 + $0x50] sm:$0xff] }
   0x8   :  { %1646 = vmatprep.mubr.msk.bf16.mxu1 %vm112_vm1, %v98_v19  ;;  %v57_v27 = vld [vmem:[%s2997_s0 + $0x148] sm:$0xff]  ;;  %v84_v30 = vpack.c.bf16 %v25_v25, %v24_v24  ;;  %v27_v33 = vld [vmem:[%s2997_s0 + $0x58] sm:$0xff]  ;;  %v58_v34 = vld [vmem:[%s2997_s0 + $0x150] sm:$0xff] }
   0x9   :  { %v100_v31 = vpack.c.bf16 %v57_v27, %v56_v26  ;;  %v59_v35 = vld [vmem:[%s2997_s0 + $0x158] sm:$0xff]  ;;  %v28_v36 = vld [vmem:[%s2997_s0 + $0x60] sm:$0xff]  ;;  %v29_v37 = vld [vmem:[%s2997_s0 + $0x68] sm:$0xff]  ;;  %v85_v40 = vpack.c.bf16 %v27_v33, %v26_v32 }
   0xa   :  { %v60_v38 = vld [vmem:[%s2997_s0 + $0x160] sm:$0xff]  ;;  %v61_v39 = vld [vmem:[%s2997_s0 + $0x168] sm:$0xff]  ;;  %v101_v41 = vpack.c.bf16 %v59_v35, %v58_v34  ;;  %v86_v42 = vpack.c.bf16 %v29_v37, %v28_v36  ;;  %v30_v44 = vld [vmem:[%s2997_s0 + $0x70] sm:$0xff] }
   0xb   :  { %v102_v43 = vpack.c.bf16 %v61_v39, %v60_v38  ;;  %v31_v45 = vld [vmem:[%s2997_s0 + $0x78] sm:$0xff]  ;;  %v62_v46 = vld [vmem:[%s2997_s0 + $0x170] sm:$0xff]  ;;  %v32_v48 = vld [vmem:[%s2997_s0 + $0x80] sm:$0xff] }
   0xc   :  { %v63_v47 = vld [vmem:[%s2997_s0 + $0x178] sm:$0xff]  ;;  %v33_v49 = vld [vmem:[%s2997_s0 + $0x88] sm:$0xff]  ;;  %v64_v50 = vld [vmem:[%s2997_s0 + $0x180] sm:$0xff]  ;;  %v87_v52 = vpack.c.bf16 %v31_v45, %v30_v44 }
   0xd   :  { %v65_v51 = vld [vmem:[%s2997_s0 + $0x188] sm:$0xff]  ;;  %v103_v53 = vpack.c.bf16 %v63_v47, %v62_v46  ;;  %v88_v54 = vpack.c.bf16 %v33_v49, %v32_v48  ;;  %v34_v56 = vld [vmem:[%s2997_s0 + $0x90] sm:$0xff]  ;;  %v35_v57 = vld [vmem:[%s2997_s0 + $0x98] sm:$0xff] }
   0xe   :  { %1615 = vmatmul.mubr.msk.bf16.gmra.mrb[4].mxu0 %vm112_vm1, %v83_v28  ;;  %v104_v55 = vpack.c.bf16 %v65_v51, %v64_v50  ;;  %v66_v58 = vld [vmem:[%s2997_s0 + $0x190] sm:$0xff]  ;;  %v67_v59 = vld [vmem:[%s2997_s0 + $0x198] sm:$0xff]  ;;  %v36_v60 = vld [vmem:[%s2997_s0 + $0xa0] sm:$0xff]  ;;  %v89_v0 = vpack.c.bf16 %v35_v57, %v34_v56 }
   0xf   :  { %1647 = vmatmul.mubr.msk.bf16.gmra.mrb[4].mxu1 %vm112_vm1, %v99_v29  ;;  %1618 = vmatprep.mubr.msk.bf16.mxu0 %vm112_vm1, %v84_v30  ;;  %v37_v61 = vld [vmem:[%s2997_s0 + $0xa8] sm:$0xff]  ;;  %v68_v62 = vld [vmem:[%s2997_s0 + $0x1a0] sm:$0xff]  ;;  %v105_v1 = vpack.c.bf16 %v67_v59, %v66_v58  ;;  %v38_v4 = vld [vmem:[%s2997_s0 + $0xb0] sm:$0xff] }
  0x10   :  { %1650 = vmatprep.mubr.msk.bf16.mxu1 %vm112_vm1, %v100_v31  ;;  %v69_v63 = vld [vmem:[%s2997_s0 + $0x1a8] sm:$0xff]  ;;  %v90_v2 = vpack.c.bf16 %v37_v61, %v36_v60  ;;  %v39_v5 = vld [vmem:[%s2997_s0 + $0xb8] sm:$0xff]  ;;  %v70_v6 = vld [vmem:[%s2997_s0 + $0x1b0] sm:$0xff] }
  0x11   :  { %v106_v3 = vpack.c.bf16 %v69_v63, %v68_v62  ;;  %v71_v7 = vld [vmem:[%s2997_s0 + $0x1b8] sm:$0xff]  ;;  %v40_v8 = vld [vmem:[%s2997_s0 + $0xc0] sm:$0xff]  ;;  %v41_v9 = vld [vmem:[%s2997_s0 + $0xc8] sm:$0xff]  ;;  %v91_v12 = vpack.c.bf16 %v39_v5, %v38_v4 }
  0x12   :  { %v72_v10 = vld [vmem:[%s2997_s0 + $0x1c0] sm:$0xff]  ;;  %v73_v11 = vld [vmem:[%s2997_s0 + $0x1c8] sm:$0xff]  ;;  %v107_v13 = vpack.c.bf16 %v71_v7, %v70_v6  ;;  %v92_v14 = vpack.c.bf16 %v41_v9, %v40_v8  ;;  %v42_v16 = vld [vmem:[%s2997_s0 + $0xd0] sm:$0xff] }
  0x13   :  { %v108_v15 = vpack.c.bf16 %v73_v11, %v72_v10  ;;  %v43_v17 = vld [vmem:[%s2997_s0 + $0xd8] sm:$0xff]  ;;  %v74_v18 = vld [vmem:[%s2997_s0 + $0x1d0] sm:$0xff]  ;;  %v44_v20 = vld [vmem:[%s2997_s0 + $0xe0] sm:$0xff] }
  0x14   :  { %v75_v19 = vld [vmem:[%s2997_s0 + $0x1d8] sm:$0xff]  ;;  %v45_v21 = vld [vmem:[%s2997_s0 + $0xe8] sm:$0xff]  ;;  %v76_v22 = vld [vmem:[%s2997_s0 + $0x1e0] sm:$0xff]  ;;  %v93_v24 = vpack.c.bf16 %v43_v17, %v42_v16 }
  0x15   :  { %v77_v23 = vld [vmem:[%s2997_s0 + $0x1e8] sm:$0xff]  ;;  %v109_v25 = vpack.c.bf16 %v75_v19, %v74_v18  ;;  %v94_v26 = vpack.c.bf16 %v45_v21, %v44_v20  ;;  %v46_v28 = vld [vmem:[%s2997_s0 + $0xf0] sm:$0xff]  ;;  %v47_v29 = vld [vmem:[%s2997_s0 + $0xf8] sm:$0xff] }
  0x16   :  { %1619 = vmatmul.mubr.msk.bf16.gmra.mrb[8].mxu0 %vm112_vm1, %v85_v40  ;;  %v110_v27 = vpack.c.bf16 %v77_v23, %v76_v22  ;;  %v78_v30 = vld [vmem:[%s2997_s0 + $0x1f0] sm:$0xff]  ;;  %v79_v31 = vld [vmem:[%s2997_s0 + $0x1f8] sm:$0xff]  ;;  %v95_v32 = vpack.c.bf16 %v47_v29, %v46_v28  ;;  %v2186_v34 = vld [vmem:[%s2998_s2] ss:$0 sm:$0xff] }
  0x17   :  { %1651 = vmatmul.mubr.msk.bf16.gmra.mrb[8].mxu1 %vm112_vm1, %v101_v41  ;;  %1622 = vmatprep.mubr.msk.bf16.mxu0 %vm112_vm1, %v86_v42  ;;  %v111_v33 = vpack.c.bf16 %v79_v31, %v78_v30  ;;  %v2191_v36 = vld [vmem:[%s2998_s2 + $0x1] ss:$0 sm:$0xff] }
  0x18   :  { %1654 = vmatprep.mubr.msk.bf16.mxu1 %vm112_vm1, %v102_v43 }
  0x1e   :  { %1623 = vmatmul.mubr.msk.bf16.gmra.mrb[12].mxu0 %vm112_vm1, %v87_v52 }
  0x1f   :  { %1655 = vmatmul.mubr.msk.bf16.gmra.mrb[12].mxu1 %vm112_vm1, %v103_v53  ;;  %1626 = vmatprep.mubr.msk.bf16.mxu0 %vm112_vm1, %v88_v54 }
  0x20   :  { %1658 = vmatprep.mubr.msk.bf16.mxu1 %vm112_vm1, %v104_v55 }
  0x26   :  { %1627 = vmatmul.mubr.msk.bf16.gmra.mrb[16].mxu0 %vm112_vm1, %v89_v0 }
  0x27   :  { %1659 = vmatmul.mubr.msk.bf16.gmra.mrb[16].mxu1 %vm112_vm1, %v105_v1  ;;  %1630 = vmatprep.mubr.msk.bf16.mxu0 %vm112_vm1, %v90_v2 }
  0x28   :  { %1662 = vmatprep.mubr.msk.bf16.mxu1 %vm112_vm1, %v106_v3 }
  0x2e   :  { %1631 = vmatmul.mubr.msk.bf16.gmra.mrb[20].mxu0 %vm112_vm1, %v91_v12 }
  0x2f   :  { %1663 = vmatmul.mubr.msk.bf16.gmra.mrb[20].mxu1 %vm112_vm1, %v107_v13  ;;  %1634 = vmatprep.mubr.msk.bf16.mxu0 %vm112_vm1, %v92_v14 }
  0x30   :  { %1666 = vmatprep.mubr.msk.bf16.mxu1 %vm112_vm1, %v108_v15 }
  0x36   :  { %1635 = vmatmul.mubr.msk.bf16.gmra.mrb[24].mxu0 %vm112_vm1, %v93_v24 }
  0x37   :  { %1667 = vmatmul.mubr.msk.bf16.gmra.mrb[24].mxu1 %vm112_vm1, %v109_v25  ;;  %1638 = vmatprep.mubr.msk.bf16.mxu0 %vm112_vm1, %v94_v26 }
  0x38   :  { %1670 = vmatprep.mubr.msk.bf16.mxu1 %vm112_vm1, %v110_v27 }
  0x3e   :  { %1639 = vmatmul.mubr.msk.bf16.gmra.mrb[28].mxu0 %vm112_vm1, %v95_v32 }
  0x3f   :  { %1671 = vmatmul.mubr.msk.bf16.gmra.mrb[28].mxu1 %vm112_vm1, %v111_v33 }
  0xd9   :  { %v1612_v35 = vpop.f32.mrb[0].mxu0 }
  0xda   :  { %v1644_v37 = vpop.f32.mrb[0].mxu1  ;;  %v509_v38 = vmul.f32 %v1612_v35, %v2186_v34  ;;  %v247_v40 = vpop.f32.mrb[1].mxu0 }
  0xdb   :  { %v541_v39 = vmul.f32 %v1644_v37, %v2186_v34  ;;  %v375_v41 = vpop.f32.mrb[1].mxu1  ;;  %v507_v42 = vmul.f32 %v2186_v34, %v247_v40  ;;  %v1613_v44 = vpop.f32.mrb[2].mxu0 }
  0xdc   :  { %v539_v43 = vmul.f32 %v2186_v34, %v375_v41  ;;  %v1645_v45 = vpop.f32.mrb[2].mxu1  ;;  %v2198_v46 = vadd.f32 %v2191_v36, %v509_v38  ;;  %v510_v48 = vmul.f32 %v1613_v44, %v2186_v34  ;;  %v250_v50 = vpop.f32.mrb[3].mxu0 }
  0xdd   :  { %v2201_v47 = vadd.f32 %v2191_v36, %v541_v39  ;;  %v542_v49 = vmul.f32 %v1645_v45, %v2186_v34  ;;  %v378_v51 = vpop.f32.mrb[3].mxu1  ;;  %v2206_v52 = vadd.f32 %v2191_v36, %v507_v42  ;;  %v508_v54 = vmul.f32 %v2186_v34, %v250_v50 }
  0xde   :  { %v2209_v53 = vadd.f32 %v2191_v36, %v539_v43  ;;  %v540_v55 = vmul.f32 %v2186_v34, %v378_v51  ;;  %v642_v56 = vsub.f32 0.0, %v2198_v46  ;;  %v2216_v58 = vadd.f32 %v2191_v36, %v510_v48 }
  0xdf   :  { %v674_v57 = vsub.f32 0.0, %v2201_v47  ;;  %v2219_v59 = vadd.f32 %v2191_v36, %v542_v49  ;;  %v640_v60 = vsub.f32 0.0, %v2206_v52  ;;  %v2224_v62 = vadd.f32 %v2191_v36, %v508_v54 }
  0xe0   :  { %v672_v61 = vsub.f32 0.0, %v2209_v53  ;;  %v2227_v63 = vadd.f32 %v2191_v36, %v540_v55  ;;  %v708_v0 = vmul.f32 1.442695, %v642_v56  ;;  %v643_v2 = vsub.f32 0.0, %v2216_v58 }
  0xe1   :  { %v772_v1 = vmul.f32 1.442695, %v674_v57  ;;  %v675_v3 = vsub.f32 0.0, %v2219_v59  ;;  %v704_v4 = vmul.f32 1.442695, %v640_v60  ;;  %v641_v6 = vsub.f32 0.0, %v2224_v62 }
  0xe2   :  { %v768_v5 = vmul.f32 1.442695, %v672_v61  ;;  %v673_v7 = vsub.f32 0.0, %v2227_v63  ;;  %1678 = vpow2.f32 %v708_v0  ;;  %v710_v8 = vmul.f32 1.442695, %v643_v2  ;;  %v1616_v10 = vpop.f32.mrb[4].mxu0 }
  0xe3   :  { %v774_v9 = vmul.f32 1.442695, %v675_v3  ;;  %v1648_v11 = vpop.f32.mrb[4].mxu1  ;;  %1680 = vpow2.f32 %v772_v1  ;;  %v706_v12 = vmul.f32 1.442695, %v641_v6  ;;  %v513_v14 = vmul.f32 %v1616_v10, %v2186_v34  ;;  %v263_v15 = vpop.f32.mrb[5].mxu0 }
  0xe4   :  { %v770_v13 = vmul.f32 1.442695, %v673_v7  ;;  %v391_v16 = vpop.f32.mrb[5].mxu1  ;;  %1682 = vpow2.f32 %v704_v4  ;;  %v545_v17 = vmul.f32 %v1648_v11, %v2186_v34  ;;  %v511_v18 = vmul.f32 %v2186_v34, %v263_v15  ;;  %v1617_v20 = vpop.f32.mrb[6].mxu0 }
  0xe5   :  { %v543_v19 = vmul.f32 %v2186_v34, %v391_v16  ;;  %v1649_v21 = vpop.f32.mrb[6].mxu1  ;;  %1684 = vpow2.f32 %v768_v5  ;;  %v2238_v22 = vadd.f32 %v2191_v36, %v513_v14  ;;  %v514_v23 = vmul.f32 %v1617_v20, %v2186_v34  ;;  %v266_v25 = vpop.f32.mrb[7].mxu0 }
  0xe6   :  { %v546_v24 = vmul.f32 %v1649_v21, %v2186_v34  ;;  %v394_v26 = vpop.f32.mrb[7].mxu1  ;;  %1686 = vpow2.f32 %v710_v8  ;;  %v2243_v27 = vadd.f32 %v2191_v36, %v545_v17  ;;  %v2246_v28 = vadd.f32 %v2191_v36, %v511_v18 }
  0xe7   :  { %v2249_v29 = vadd.f32 %v2191_v36, %v543_v19  ;;  %1688 = vpow2.f32 %v774_v9  ;;  %v646_v30 = vsub.f32 0.0, %v2238_v22  ;;  %v2253_v31 = vadd.f32 %v2191_v36, %v514_v23 }
  0xe8   :  { %v2256_v32 = vadd.f32 %v2191_v36, %v546_v24  ;;  %1690 = vpow2.f32 %v706_v12  ;;  %v678_v33 = vsub.f32 0.0, %v2243_v27  ;;  %v644_v35 = vsub.f32 0.0, %v2246_v28 }
  0xe9   :  { %v676_v37 = vsub.f32 0.0, %v2249_v29  ;;  %1692 = vpow2.f32 %v770_v13  ;;  %v716_v38 = vmul.f32 1.442695, %v646_v30  ;;  %v647_v39 = vsub.f32 0.0, %v2253_v31  ;;  %v1620_v41 = vpop.f32.mrb[8].mxu0 }
  0xea   :  { %v679_v40 = vsub.f32 0.0, %v2256_v32  ;;  %v1652_v42 = vpop.f32.mrb[8].mxu1  ;;  %v780_v43 = vmul.f32 1.442695, %v678_v33  ;;  %v712_v44 = vmul.f32 1.442695, %v644_v35  ;;  %v512_v48 = vmul.f32 %v2186_v34, %v266_v25 }
  0xeb   :  { %v776_v45 = vmul.f32 1.442695, %v676_v37  ;;  %1694 = vpow2.f32 %v716_v38  ;;  %v2264_v49 = vmul.f32 1.442695, %v647_v39  ;;  %v544_v51 = vmul.f32 %v2186_v34, %v394_v26  ;;  %v279_v54 = vpop.f32.mrb[9].mxu0  ;;  %v407_v55 = vpop.f32.mrb[9].mxu1 }
  0xec   :  { %v2266_v50 = vmul.f32 1.442695, %v679_v40  ;;  %v1679_v56 = vpop.eup %1678  ;;  %1696 = vpow2.f32 %v780_v43  ;;  %v2270_v57 = vadd.f32 %v2191_v36, %v512_v48  ;;  %v517_v60 = vmul.f32 %v1620_v41, %v2186_v34  ;;  %v1621_v0 = vpop.f32.mrb[10].mxu0 }
  0xed   :  { %v549_v61 = vmul.f32 %v1652_v42, %v2186_v34  ;;  %v1653_v1 = vpop.f32.mrb[10].mxu1  ;;  %v1681_v2 = vpop.eup %1680  ;;  %v834_v3 = vadd.f32 1.0, %v1679_v56  ;;  %1698 = vpow2.f32 %v712_v44  ;;  %v2275_v4 = vadd.f32 %v2191_v36, %v544_v51 }
  0xee   :  { %v515_v5 = vmul.f32 %v2186_v34, %v279_v54  ;;  %v282_v6 = vpop.f32.mrb[11].mxu0  ;;  %v2278_v7 = vpop.f32.mrb[11].mxu1  ;;  %v866_v9 = vadd.f32 1.0, %v1681_v2  ;;  %1700 = vpow2.f32 %v776_v45  ;;  %v645_v10 = vsub.f32 0.0, %v2270_v57 }
  0xef   :  { %v1683_v8 = vpop.eup %1682  ;;  %v2282_v11 = vadd.f32 %v2191_v36, %v517_v60  ;;  %1702 = vrcp.f32 %v834_v3  ;;  %v677_v14 = vsub.f32 0.0, %v2275_v4  ;;  %v2286_v15 = vadd.f32 %v2191_v36, %v549_v61 }
  0xf0   :  { %v1685_v12 = vpop.eup %1684  ;;  %v832_v13 = vadd.f32 1.0, %v1683_v8  ;;  %1704 = vrcp.f32 %v866_v9  ;;  %v2288_v18 = vmul.f32 1.442695, %v645_v10  ;;  %v2301_v37 = vadd.f32 %v2191_v36, %v515_v5 }
  0xf1   :  { %v1687_v16 = vpop.eup %1686  ;;  %v864_v17 = vadd.f32 1.0, %v1685_v12  ;;  %v650_v19 = vsub.f32 0.0, %v2282_v11  ;;  %v2291_v23 = vmul.f32 1.442695, %v677_v14  ;;  %v682_v24 = vsub.f32 0.0, %v2286_v15  ;;  %v2294_v25 = vpop.f32.mrb[12].mxu0 }
  0xf2   :  { %v1689_v20 = vpop.eup %1688  ;;  %1706 = vrcp.f32 %v832_v13  ;;  %v835_v21 = vadd.f32 1.0, %v1687_v16  ;;  %v2296_v26 = vpop.f32.mrb[12].mxu1  ;;  %v547_v43 = vmul.f32 %v2186_v34, %v407_v55  ;;  %v648_v51 = vsub.f32 0.0, %v2301_v37 }
  0xf3   :  { %v1691_v30 = vpop.eup %1690  ;;  %1708 = vrcp.f32 %v864_v17  ;;  %v867_v33 = vadd.f32 1.0, %v1689_v20  ;;  %v2298_v35 = vmul.f32 1.442695, %v650_v19  ;;  %v2303_v38 = vpop.f32.mrb[13].mxu0  ;;  %v2307_v42 = vmul.f32 1.442695, %v682_v24 }
  0xf4   :  { %v2305_v39 = vpop.f32.mrb[13].mxu1  ;;  %v1693_v40 = vpop.eup %1692  ;;  %1710 = vrcp.f32 %v835_v21  ;;  %v833_v41 = vadd.f32 1.0, %v1691_v30  ;;  %v518_v54 = vmul.f32 %v1621_v0, %v2186_v34  ;;  %v2321_v2 = vadd.f32 %v2191_v36, %v547_v43 }
  0xf5   :  { %v2310_v44 = vpop.f32.mrb[14].mxu0  ;;  %v2312_v45 = vpop.f32.mrb[14].mxu1  ;;  %1712 = vrcp.f32 %v867_v33  ;;  %v865_v48 = vadd.f32 1.0, %v1693_v40  ;;  %v550_v55 = vmul.f32 %v1653_v1, %v2186_v34  ;;  %v516_v3 = vmul.f32 %v2186_v34, %v282_v6 }
  0xf6   :  { %v2316_v56 = vpop.f32.mrb[15].mxu0  ;;  %v2318_v60 = vpop.f32.mrb[15].mxu1  ;;  %1714 = vrcp.f32 %v833_v41  ;;  %v2325_v9 = vmul.f32 1.442695, %v648_v51  ;;  %v2328_v0 = vadd.f32 %v2191_v36, %v518_v54  ;;  %v680_v13 = vsub.f32 0.0, %v2321_v2 }
  0xf7   :  { %v1695_v61 = vpop.eup %1694  ;;  %1716 = vrcp.f32 %v865_v48  ;;  %v2333_v14 = vadd.f32 %v2191_v36, %v550_v55  ;;  %v2337_v17 = vadd.f32 %v2191_v36, %v516_v3  ;;  %v548_v3 = vmul.f32 %v2186_v34, %v2278_v7 }
  0xf8   :  { %v1697_v5 = vpop.eup %1696  ;;  %v838_v8 = vadd.f32 1.0, %v1695_v61  ;;  %1718 = vpow2.f32 %v2264_v49  ;;  %v651_v16 = vsub.f32 0.0, %v2328_v0  ;;  %v784_v21 = vmul.f32 1.442695, %v680_v13 }
  0xf9   :  { %v1699_v10 = vpop.eup %1698  ;;  %v870_v12 = vadd.f32 1.0, %v1697_v5  ;;  %v683_v24 = vsub.f32 0.0, %v2333_v14  ;;  %v2340_v49 = vpop.f32.mrb[16].mxu0  ;;  %v649_v43 = vsub.f32 0.0, %v2337_v17 }
  0xfa   :  { %v1701_v1 = vpop.eup %1700  ;;  %1720 = vrcp.f32 %v838_v8  ;;  %v836_v6 = vadd.f32 1.0, %v1699_v10  ;;  %v2342_v30 = vpop.f32.mrb[16].mxu1  ;;  %v726_v41 = vmul.f32 1.442695, %v651_v16 }
  0xfb   :  { %v1703_v19 = vpop.eup %1702  ;;  %1722 = vrcp.f32 %v870_v12  ;;  %v868_v20 = vadd.f32 1.0, %v1701_v1  ;;  %v2346_v48 = vpop.f32.mrb[17].mxu0  ;;  %v2351_v55 = vmul.f32 1.442695, %v683_v24  ;;  %v2361_v13 = vmul.f32 1.442695, %v649_v43 }
  0xfc   :  { %v1705_v33 = vpop.eup %1704  ;;  %v1026_v40 = vmul.f32 %v1703_v19, %v2198_v46  ;;  %1724 = vrcp.f32 %v836_v6  ;;  %v2348_v51 = vpop.f32.mrb[17].mxu1  ;;  %v2370_v19 = vadd.f32 %v2191_v36, %v548_v3  ;;  %v521_v24 = vmul.f32 %v2294_v25, %v2186_v34 }
  0xfd   :  { %v1707_v54 = vpop.eup %1706  ;;  %v1058_v61 = vmul.f32 %v1705_v33, %v2201_v47  ;;  %1726 = vrcp.f32 %v868_v20  ;;  %v2355_v5 = vpop.f32.mrb[18].mxu0 }
  0xfe   :  { %v2357_v46 = vpop.f32.mrb[18].mxu1  ;;  %v1709_v8 = vpop.eup %1708  ;;  %v1513_v10 = vpack.c.bf16 %v1026_v40, %v1026_v40  ;;  %v1024_v12 = vmul.f32 %v1707_v54, %v2206_v52  ;;  %1728 = vpow2.f32 %v2266_v50  ;;  %v681_v40 = vsub.f32 0.0, %v2370_v19 }
  0xff   :  { %v2363_v1 = vpop.f32.mrb[19].mxu0  ;;  %v2365_v47 = vpop.f32.mrb[19].mxu1  ;;  %v1545_v16 = vpack.c.bf16 %v1058_v61, %v1058_v61  ;;  %v1056_v7 = vmul.f32 %v1709_v8, %v2209_v53  ;;  %1730 = vpow2.f32 %v2288_v18  ;;  %v2394_v25 = vadd.f32 %v2191_v36, %v521_v24 }
 0x100   :  { %v1711_v6 = vpop.eup %1710  ;;  %1347 = vst.msk [vmem:[%s2999_s3 + $0x8] sm:$0xf] %vm1344_vm2, %v1513_v10  ;;  %v1511_v52 = vpack.c.bf16 %v1024_v12, %v1024_v12  ;;  %1732 = vpow2.f32 %v2291_v23  ;;  %v786_v61 = vmul.f32 1.442695, %v681_v40 }
 0x101   :  { %v1713_v20 = vpop.eup %1712  ;;  %v1027_v50 = vmul.f32 %v1711_v6, %v2216_v58  ;;  %1379 = vst.msk [vmem:[%s2999_s3 + $0x88] sm:$0xf] %vm1344_vm2, %v1545_v16  ;;  %v1543_v18 = vpack.c.bf16 %v1056_v7, %v1056_v7  ;;  %1734 = vpow2.f32 %v2298_v35  ;;  %v2402_v3 = vpop.f32.mrb[20].mxu0  ;;  %v654_v12 = vsub.f32 0.0, %v2394_v25 }
 0x102   :  { %v1715_v53 = vpop.eup %1714  ;;  %v1059_v33 = vmul.f32 %v1713_v20, %v2219_v59  ;;  %1345 = vst.msk [vmem:[%s2999_s3] sm:$0xf] %vm1344_vm2, %v1511_v52  ;;  %1736 = vpow2.f32 %v2307_v42  ;;  %v2411_v6 = vpop.f32.mrb[21].mxu0  ;;  %v553_v20 = vmul.f32 %v2296_v26, %v2186_v34 }
 0x103   :  { %v1717_v43 = vpop.eup %1716  ;;  %v1514_v58 = vpack.c.bf16 %v1027_v50, %v1027_v50  ;;  %v1025_v23 = vmul.f32 %v1715_v53, %v2224_v62  ;;  %1377 = vst.msk [vmem:[%s2999_s3 + $0x80] sm:$0xf] %vm1344_vm2, %v1543_v18  ;;  %1738 = vpow2.f32 %v2325_v9  ;;  %v2404_v62 = vpop.f32.mrb[20].mxu1  ;;  %v732_v53 = vmul.f32 1.442695, %v654_v12 }
 0x104   :  { %v1719_v54 = vpop.eup %1718  ;;  %v1546_v59 = vpack.c.bf16 %v1059_v33, %v1059_v33  ;;  %v1057_v35 = vmul.f32 %v1717_v43, %v2227_v63  ;;  %1740 = vpow2.f32 %v784_v21  ;;  %v2413_v63 = vpop.f32.mrb[21].mxu1  ;;  %v551_v12 = vmul.f32 %v2186_v34, %v2305_v39 }
 0x105   :  { %v1721_v42 = vpop.eup %1720  ;;  %1348 = vst.msk [vmem:[%s2999_s3 + $0xc] sm:$0xf] %vm1344_vm2, %v1514_v58  ;;  %v1512_v8 = vpack.c.bf16 %v1025_v23, %v1025_v23  ;;  %v839_v10 = vadd.f32 1.0, %v1719_v54  ;;  %1742 = vpow2.f32 %v726_v41  ;;  %v2422_v21 = vpop.f32.mrb[22].mxu0 }
 0x106   :  { %v1723_v9 = vpop.eup %1722  ;;  %1380 = vst.msk [vmem:[%s2999_s3 + $0x8c] sm:$0xf] %vm1344_vm2, %v1546_v59  ;;  %v1544_v16 = vpack.c.bf16 %v1057_v35, %v1057_v35  ;;  %v1030_v7 = vmul.f32 %v1721_v42, %v2238_v22  ;;  %v2424_v52 = vpop.f32.mrb[22].mxu1  ;;  %v519_v22 = vmul.f32 %v2186_v34, %v2303_v38 }
 0x107   :  { %v1725_v50 = vpop.eup %1724  ;;  %1346 = vst.msk [vmem:[%s2999_s3 + $0x4] sm:$0xf] %vm1344_vm2, %v1512_v8  ;;  %v1062_v24 = vmul.f32 %v1723_v9, %v2243_v27  ;;  %1744 = vrcp.f32 %v839_v10  ;;  %v2433_v41 = vpop.f32.mrb[23].mxu0  ;;  %v2444_v27 = vadd.f32 %v2191_v36, %v553_v20 }
 0x108   :  { %v2435_v26 = vpop.f32.mrb[23].mxu1  ;;  %v1727_v18 = vpop.eup %1726  ;;  %1378 = vst.msk [vmem:[%s2999_s3 + $0x84] sm:$0xf] %vm1344_vm2, %v1544_v16  ;;  %v1517_v33 = vpack.c.bf16 %v1030_v7, %v1030_v7  ;;  %v1028_v40 = vmul.f32 %v1725_v50, %v2246_v28  ;;  %1746 = vpow2.f32 %v2351_v55  ;;  %v2449_v23 = vadd.f32 %v2191_v36, %v519_v22 }
 0x109   :  { %v1729_v43 = vpop.eup %1728  ;;  %v1549_v38 = vpack.c.bf16 %v1062_v24, %v1062_v24  ;;  %v1060_v58 = vmul.f32 %v1727_v18, %v2249_v29  ;;  %1748 = vpow2.f32 %v2361_v13  ;;  %v686_v59 = vsub.f32 0.0, %v2444_v27  ;;  %v2467_v9 = vpop.f32.mrb[24].mxu0 }
 0x10a   :  { %v1731_v54 = vpop.eup %1730  ;;  %1351 = vst.msk [vmem:[%s2999_s3 + $0x18] sm:$0xf] %vm1344_vm2, %v1517_v33  ;;  %v1515_v28 = vpack.c.bf16 %v1028_v40, %v1028_v40  ;;  %v871_v55 = vadd.f32 1.0, %v1729_v43  ;;  %1750 = vpow2.f32 %v786_v61  ;;  %v652_v42 = vsub.f32 0.0, %v2449_v23  ;;  %v2469_v16 = vpop.f32.mrb[24].mxu1 }
 0x10b   :  { %v1733_v35 = vpop.eup %1732  ;;  %1383 = vst.msk [vmem:[%s2999_s3 + $0x98] sm:$0xf] %vm1344_vm2, %v1549_v38  ;;  %v1547_v29 = vpack.c.bf16 %v1060_v58, %v1060_v58  ;;  %v837_v13 = vadd.f32 1.0, %v1731_v54  ;;  %1752 = vpow2.f32 %v732_v53  ;;  %v796_v10 = vmul.f32 1.442695, %v686_v59  ;;  %v2479_v53 = vpop.f32.mrb[25].mxu0 }
 0x10c   :  { %v1735_v8 = vpop.eup %1734  ;;  %1349 = vst.msk [vmem:[%s2999_s3 + $0x10] sm:$0xf] %vm1344_vm2, %v1515_v28  ;;  %1754 = vrcp.f32 %v871_v55  ;;  %v869_v61 = vadd.f32 1.0, %v1733_v35  ;;  %v2475_v50 = vmul.f32 1.442695, %v652_v42  ;;  %v522_v24 = vmul.f32 %v2310_v44, %v2186_v34  ;;  %v2481_v39 = vpop.f32.mrb[25].mxu1 }
 0x10d   :  { %v1737_v7 = vpop.eup %1736  ;;  %1381 = vst.msk [vmem:[%s2999_s3 + $0x90] sm:$0xf] %vm1344_vm2, %v1547_v29  ;;  %1756 = vrcp.f32 %v837_v13  ;;  %v842_v20 = vadd.f32 1.0, %v1735_v8  ;;  %v2484_v33 = vadd.f32 %v2191_v36, %v551_v12  ;;  %v554_v40 = vmul.f32 %v2312_v45, %v2186_v34  ;;  %v2488_v43 = vpop.f32.mrb[26].mxu0 }
 0x10e   :  { %v1739_v22 = vpop.eup %1738  ;;  %1758 = vrcp.f32 %v869_v61  ;;  %v874_v18 = vadd.f32 1.0, %v1737_v7  ;;  %v2490_v38 = vpop.f32.mrb[26].mxu1  ;;  %v2493_v54 = vadd.f32 %v2191_v36, %v522_v24  ;;  %v520_v28 = vmul.f32 %v2186_v34, %v2316_v56 }
 0x10f   :  { %3000 = vst [vmem:[#allocation2_spill] sm:$0xff] %v2490_v38  ;;  %v1741_v58 = vpop.eup %1740  ;;  %1760 = vrcp.f32 %v842_v20  ;;  %v840_v44 = vadd.f32 1.0, %v1739_v22  ;;  %v2497_v55 = vpop.f32.mrb[27].mxu0  ;;  %v684_v29 = vsub.f32 0.0, %v2484_v33  ;;  %v2503_v13 = vadd.f32 %v2191_v36, %v554_v40 }
 0x110   :  { %3001 = vst [vmem:[#allocation3_spill] sm:$0xff] %v2497_v55  ;;  %v2499_v59 = vpop.f32.mrb[27].mxu1  ;;  %v1743_v35 = vpop.eup %1742  ;;  %1762 = vrcp.f32 %v874_v18  ;;  %v872_v45 = vadd.f32 1.0, %v1741_v58  ;;  %v655_v61 = vsub.f32 0.0, %v2493_v54  ;;  %v2507_v12 = vadd.f32 %v2191_v36, %v520_v28 }
 0x111   :  { %3002 = vst [vmem:[#allocation4_spill] sm:$0xff] %v2499_v59  ;;  %v1745_v42 = vpop.eup %1744  ;;  %1764 = vrcp.f32 %v840_v44  ;;  %v843_v8 = vadd.f32 1.0, %v1743_v35  ;;  %v792_v20 = vmul.f32 1.442695, %v684_v29  ;;  %v687_v24 = vsub.f32 0.0, %v2503_v13  ;;  %v2512_v28 = vpop.f32.mrb[28].mxu0 }
 0x112   :  { %v1747_v56 = vpop.eup %1746  ;;  %v1031_v7 = vmul.f32 %v1745_v42, %v2253_v31  ;;  %1766 = vrcp.f32 %v872_v45  ;;  %v734_v40 = vmul.f32 1.442695, %v655_v61  ;;  %v653_v58 = vsub.f32 0.0, %v2507_v12  ;;  %v2514_v38 = vpop.f32.mrb[28].mxu1 }
 0x113   :  { %v1749_v22 = vpop.eup %1748  ;;  %1768 = vrcp.f32 %v843_v8  ;;  %v875_v18 = vadd.f32 1.0, %v1747_v56  ;;  %v798_v55 = vmul.f32 1.442695, %v687_v24  ;;  %v552_v42 = vmul.f32 %v2186_v34, %v2318_v60  ;;  %v2518_v8 = vpop.f32.mrb[29].mxu0 }
 0x114   :  { %v1751_v44 = vpop.eup %1750  ;;  %v1518_v35 = vpack.c.bf16 %v1031_v7, %v1031_v7  ;;  %v841_v59 = vadd.f32 1.0, %v1749_v22  ;;  %1770 = vpow2.f32 %v796_v10  ;;  %v730_v29 = vmul.f32 1.442695, %v653_v58  ;;  %v2520_v61 = vpop.f32.mrb[29].mxu1 }
 0x115   :  { %v1753_v31 = vpop.eup %1752  ;;  %1772 = vrcp.f32 %v875_v18  ;;  %v873_v45 = vadd.f32 1.0, %v1751_v44  ;;  %v525_v7 = vmul.f32 %v2340_v49, %v2186_v34  ;;  %v557_v24 = vmul.f32 %v2342_v30, %v2186_v34  ;;  %v2530_v22 = vpop.f32.mrb[30].mxu0 }
 0x116   :  { %v1755_v56 = vpop.eup %1754  ;;  %1352 = vst.msk [vmem:[%s2999_s3 + $0x1c] sm:$0xf] %vm1344_vm2, %v1518_v35  ;;  %1774 = vrcp.f32 %v841_v59  ;;  %v846_v10 = vadd.f32 1.0, %v1753_v31  ;;  %3003 = vst [vmem:[#allocation5_spill] sm:$0xff] %v2530_v22  ;;  %v2532_v60 = vpop.f32.mrb[30].mxu1  ;;  %v2536_v44 = vadd.f32 %v2191_v36, %v552_v42  ;;  %v523_v59 = vmul.f32 %v2186_v34, %v2346_v48 }
 0x117   :  { %3004 = vst [vmem:[#allocation6_spill] sm:$0xff] %v2532_v60  ;;  %v1757_v18 = vpop.eup %1756  ;;  %v1063_v58 = vmul.f32 %v1755_v56, %v2256_v32  ;;  %1776 = vrcp.f32 %v873_v45  ;;  %v2540_v35 = vpop.f32.mrb[31].mxu0  ;;  %v2546_v60 = vadd.f32 %v2191_v36, %v525_v7  ;;  %v2549_v32 = vadd.f32 %v2191_v36, %v557_v24 }
 0x118   :  { %3005 = vst [vmem:[#allocation7_spill] sm:$0xff] %v2540_v35  ;;  %v2542_v49 = vpop.f32.mrb[31].mxu1  ;;  %v1759_v31 = vpop.eup %1758  ;;  %v1029_v30 = vmul.f32 %v1757_v18, %v2270_v57  ;;  %1778 = vrcp.f32 %v846_v10  ;;  %v685_v48 = vsub.f32 0.0, %v2536_v44 }
 0x119   :  { %3006 = vst [vmem:[#allocation8_spill] sm:$0xff] %v2542_v49  ;;  %v1761_v45 = vpop.eup %1760  ;;  %v1550_v42 = vpack.c.bf16 %v1063_v58, %v1063_v58  ;;  %v1061_v56 = vmul.f32 %v1759_v31, %v2275_v4  ;;  %1780 = vpow2.f32 %v2475_v50  ;;  %v658_v57 = vsub.f32 0.0, %v2546_v60 }
 0x11a   :  { %v1763_v35 = vpop.eup %1762  ;;  %v1516_v49 = vpack.c.bf16 %v1029_v30, %v1029_v30  ;;  %v1034_v22 = vmul.f32 %v1761_v45, %v2282_v11  ;;  %1782 = vpow2.f32 %v792_v20  ;;  %v794_v50 = vmul.f32 1.442695, %v685_v48 }
 0x11b   :  { %v1765_v10 = vpop.eup %1764  ;;  %1384 = vst.msk [vmem:[%s2999_s3 + $0x9c] sm:$0xf] %vm1344_vm2, %v1550_v42  ;;  %v1548_v7 = vpack.c.bf16 %v1061_v56, %v1061_v56  ;;  %v1066_v4 = vmul.f32 %v1763_v35, %v2286_v15  ;;  %1784 = vpow2.f32 %v734_v40  ;;  %v740_v18 = vmul.f32 1.442695, %v658_v57 }
 0x11c   :  { %v1767_v24 = vpop.eup %1766  ;;  %1350 = vst.msk [vmem:[%s2999_s3 + $0x14] sm:$0xf] %vm1344_vm2, %v1516_v49  ;;  %v1521_v11 = vpack.c.bf16 %v1034_v22, %v1034_v22  ;;  %v1032_v20 = vmul.f32 %v1765_v10, %v2301_v37  ;;  %1786 = vpow2.f32 %v798_v55  ;;  %v690_v35 = vsub.f32 0.0, %v2549_v32 }
 0x11d   :  { %v1769_v58 = vpop.eup %1768  ;;  %1382 = vst.msk [vmem:[%s2999_s3 + $0x94] sm:$0xf] %vm1344_vm2, %v1548_v7  ;;  %v1553_v15 = vpack.c.bf16 %v1066_v4, %v1066_v4  ;;  %v1064_v40 = vmul.f32 %v1767_v24, %v2321_v2  ;;  %1788 = vpow2.f32 %v730_v29  ;;  %v2578_v22 = vadd.f32 %v2191_v36, %v523_v59 }
 0x11e   :  { %v1771_v31 = vpop.eup %1770  ;;  %1355 = vst.msk [vmem:[%s2999_s3 + $0x28] sm:$0xf] %vm1344_vm2, %v1521_v11  ;;  %v1519_v37 = vpack.c.bf16 %v1032_v20, %v1032_v20  ;;  %v1035_v55 = vmul.f32 %v1769_v58, %v2328_v0  ;;  %1790 = vpow2.f32 %v794_v50  ;;  %v804_v30 = vmul.f32 1.442695, %v690_v35 }
 0x11f   :  { %v1773_v49 = vpop.eup %1772  ;;  %1387 = vst.msk [vmem:[%s2999_s3 + $0xa8] sm:$0xf] %vm1344_vm2, %v1553_v15  ;;  %v1551_v2 = vpack.c.bf16 %v1064_v40, %v1064_v40  ;;  %v878_v29 = vadd.f32 1.0, %v1771_v31  ;;  %1792 = vpow2.f32 %v740_v18  ;;  %v656_v42 = vsub.f32 0.0, %v2578_v22 }
 0x120   :  { %v1775_v45 = vpop.eup %1774  ;;  %1353 = vst.msk [vmem:[%s2999_s3 + $0x20] sm:$0xf] %vm1344_vm2, %v1519_v37  ;;  %v1522_v0 = vpack.c.bf16 %v1035_v55, %v1035_v55  ;;  %v1067_v59 = vmul.f32 %v1773_v49, %v2333_v14  ;;  %v555_v56 = vmul.f32 %v2186_v34, %v2348_v51  ;;  %v526_v10 = vmul.f32 %v2355_v5, %v2186_v34 }
 0x121   :  { %v1777_v48 = vpop.eup %1776  ;;  %1385 = vst.msk [vmem:[%s2999_s3 + $0xa0] sm:$0xf] %vm1344_vm2, %v1551_v2  ;;  %v1033_v57 = vmul.f32 %v1775_v45, %v2337_v17  ;;  %1794 = vrcp.f32 %v878_v29  ;;  %v558_v14 = vmul.f32 %v2357_v46, %v2186_v34  ;;  %v736_v50 = vmul.f32 1.442695, %v656_v42 }
 0x122   :  { %v1779_v7 = vpop.eup %1778  ;;  %1356 = vst.msk [vmem:[%s2999_s3 + $0x2c] sm:$0xf] %vm1344_vm2, %v1522_v0  ;;  %v1554_v51 = vpack.c.bf16 %v1067_v59, %v1067_v59  ;;  %v1065_v4 = vmul.f32 %v1777_v48, %v2370_v19  ;;  %1796 = vpow2.f32 %v804_v30  ;;  %v2608_v5 = vadd.f32 %v2191_v36, %v555_v56 }
 0x123   :  { %v1781_v24 = vpop.eup %1780  ;;  %v1520_v17 = vpack.c.bf16 %v1033_v57, %v1033_v57  ;;  %v1038_v11 = vmul.f32 %v1779_v7, %v2394_v25  ;;  %v2611_v46 = vadd.f32 %v2191_v36, %v526_v10  ;;  %1798 = vpow2.f32 %v736_v50 }
 0x124   :  { %v1783_v20 = vpop.eup %1782  ;;  %1388 = vst.msk [vmem:[%s2999_s3 + $0xac] sm:$0xf] %vm1344_vm2, %v1554_v51  ;;  %v1552_v18 = vpack.c.bf16 %v1065_v4, %v1065_v4  ;;  %v844_v19 = vadd.f32 1.0, %v1781_v24  ;;  %v2618_v58 = vadd.f32 %v2191_v36, %v558_v14  ;;  %v688_v35 = vsub.f32 0.0, %v2608_v5 }
 0x125   :  { %v1785_v15 = vpop.eup %1784  ;;  %1354 = vst.msk [vmem:[%s2999_s3 + $0x24] sm:$0xf] %vm1344_vm2, %v1520_v17  ;;  %v1525_v25 = vpack.c.bf16 %v1038_v11, %v1038_v11  ;;  %v876_v40 = vadd.f32 1.0, %v1783_v20  ;;  %v659_v31 = vsub.f32 0.0, %v2611_v46  ;;  %v524_v2 = vmul.f32 %v2186_v34, %v2363_v1 }
 0x126   :  { %v1787_v37 = vpop.eup %1786  ;;  %1386 = vst.msk [vmem:[%s2999_s3 + $0xa4] sm:$0xf] %vm1344_vm2, %v1552_v18  ;;  %1800 = vrcp.f32 %v844_v19  ;;  %v847_v55 = vadd.f32 1.0, %v1785_v15  ;;  %v691_v49 = vsub.f32 0.0, %v2618_v58  ;;  %v800_v45 = vmul.f32 1.442695, %v688_v35 }
 0x127   :  { %v1789_v29 = vpop.eup %1788  ;;  %1359 = vst.msk [vmem:[%s2999_s3 + $0x38] sm:$0xf] %vm1344_vm2, %v1525_v25  ;;  %1802 = vrcp.f32 %v876_v40  ;;  %v879_v30 = vadd.f32 1.0, %v1787_v37  ;;  %v742_v0 = vmul.f32 1.442695, %v659_v31  ;;  %v2638_v48 = vadd.f32 %v2191_v36, %v524_v2 }
 0x128   :  { %v1791_v59 = vpop.eup %1790  ;;  %1804 = vrcp.f32 %v847_v55  ;;  %v845_v42 = vadd.f32 1.0, %v1789_v29  ;;  %v806_v56 = vmul.f32 1.442695, %v691_v49  ;;  %v556_v10 = vmul.f32 %v2186_v34, %v2365_v47 }
 0x129   :  { %v1793_v57 = vpop.eup %1792  ;;  %1806 = vrcp.f32 %v879_v30  ;;  %v877_v1 = vadd.f32 1.0, %v1791_v59  ;;  %v529_v14 = vmul.f32 %v2402_v3, %v2186_v34  ;;  %v657_v51 = vsub.f32 0.0, %v2638_v48 }
 0x12a   :  { %1808 = vrcp.f32 %v845_v42  ;;  %v850_v7 = vadd.f32 1.0, %v1793_v57  ;;  %v561_v4 = vmul.f32 %v2404_v62, %v2186_v34  ;;  %v2648_v24 = vadd.f32 %v2191_v36, %v556_v10 }
 0x12b   :  { %v1795_v50 = vpop.eup %1794  ;;  %1810 = vrcp.f32 %v877_v1  ;;  %v2651_v17 = vadd.f32 %v2191_v36, %v529_v14  ;;  %v527_v47 = vmul.f32 %v2186_v34, %v2411_v6  ;;  %v738_v20 = vmul.f32 1.442695, %v657_v51 }
 0x12c   :  { %v1797_v11 = vpop.eup %1796  ;;  %v1070_v3 = vmul.f32 %v1795_v50, %v2444_v27  ;;  %1812 = vrcp.f32 %v850_v7  ;;  %v2657_v18 = vadd.f32 %v2191_v36, %v561_v4  ;;  %v689_v19 = vsub.f32 0.0, %v2648_v24 }
 0x12d   :  { %v882_v62 = vadd.f32 1.0, %v1797_v11  ;;  %1814 = vpow2.f32 %v800_v45  ;;  %v662_v15 = vsub.f32 0.0, %v2651_v17  ;;  %v1799_v25 = vpop.eup %1798  ;;  %v2663_v6 = vadd.f32 %v2191_v36, %v527_v47 }
 0x12e   :  { %v1557_v40 = vpack.c.bf16 %v1070_v3, %v1070_v3  ;;  %1816 = vpow2.f32 %v742_v0  ;;  %v694_v35 = vsub.f32 0.0, %v2657_v18  ;;  %v848_v27 = vadd.f32 1.0, %v1799_v25 }
 0x12f   :  { %1818 = vrcp.f32 %v882_v62  ;;  %v802_v31 = vmul.f32 1.442695, %v689_v19  ;;  %v748_v37 = vmul.f32 1.442695, %v662_v15  ;;  %v660_v2 = vsub.f32 0.0, %v2663_v6 }
 0x130   :  { %v1801_v55 = vpop.eup %1800  ;;  %1391 = vst.msk [vmem:[%s2999_s3 + $0xb8] sm:$0xf] %vm1344_vm2, %v1557_v40  ;;  %1820 = vpow2.f32 %v806_v56  ;;  %v812_v49 = vmul.f32 1.442695, %v694_v35  ;;  %v559_v29 = vmul.f32 %v2186_v34, %v2413_v63  ;;  %v530_v0 = vmul.f32 %v2422_v21, %v2186_v34  ;;  %v2706_v62 = vld [vmem:[%s2998_s2 + $0x1] ss:$0 sm:$0xff] }
 0x131   :  { %v1803_v30 = vpop.eup %1802  ;;  %v1036_v45 = vmul.f32 %v1801_v55, %v2449_v23  ;;  %1822 = vrcp.f32 %v848_v27  ;;  %v562_v59 = vmul.f32 %v2424_v52, %v2186_v34  ;;  %v744_v56 = vmul.f32 1.442695, %v660_v2 }
 0x132   :  { %v1805_v42 = vpop.eup %1804  ;;  %v1068_v57 = vmul.f32 %v1803_v30, %v2484_v33  ;;  %1824 = vpow2.f32 %v738_v20  ;;  %v2679_v1 = vadd.f32 %v2191_v36, %v559_v29  ;;  %v2683_v23 = vadd.f32 %v2191_v36, %v530_v0 }
 0x133   :  { %v1807_v10 = vpop.eup %1806  ;;  %v1523_v63 = vpack.c.bf16 %v1036_v45, %v1036_v45  ;;  %v1039_v14 = vmul.f32 %v1805_v42, %v2493_v54  ;;  %1826 = vpow2.f32 %v802_v31  ;;  %v2709_v19 = vadd.f32 %v2706_v62, %v562_v59 }
 0x134   :  { %v1809_v21 = vpop.eup %1808  ;;  %v1555_v7 = vpack.c.bf16 %v1068_v57, %v1068_v57  ;;  %v1071_v34 = vmul.f32 %v1807_v10, %v2503_v13  ;;  %1828 = vpow2.f32 %v748_v37  ;;  %v692_v52 = vsub.f32 0.0, %v2679_v1 }
 0x135   :  { %v1811_v33 = vpop.eup %1810  ;;  %1357 = vst.msk [vmem:[%s2999_s3 + $0x30] sm:$0xf] %vm1344_vm2, %v1523_v63  ;;  %v1526_v51 = vpack.c.bf16 %v1039_v14, %v1039_v14  ;;  %v1037_v54 = vmul.f32 %v1809_v21, %v2507_v12  ;;  %1830 = vpow2.f32 %v812_v49  ;;  %v663_v36 = vsub.f32 0.0, %v2683_v23 }
 0x136   :  { %v1813_v4 = vpop.eup %1812  ;;  %1389 = vst.msk [vmem:[%s2999_s3 + $0xb0] sm:$0xf] %vm1344_vm2, %v1555_v7  ;;  %v1558_v13 = vpack.c.bf16 %v1071_v34, %v1071_v34  ;;  %v1069_v50 = vmul.f32 %v1811_v33, %v2536_v44  ;;  %1832 = vpow2.f32 %v744_v56  ;;  %v808_v47 = vmul.f32 1.442695, %v692_v52 }
 0x137   :  { %v1815_v11 = vpop.eup %1814  ;;  %1360 = vst.msk [vmem:[%s2999_s3 + $0x3c] sm:$0xf] %vm1344_vm2, %v1526_v51  ;;  %v1524_v12 = vpack.c.bf16 %v1037_v54, %v1037_v54  ;;  %v1042_v3 = vmul.f32 %v1813_v4, %v2546_v60  ;;  %v750_v20 = vmul.f32 1.442695, %v663_v36  ;;  %v2718_v60 = vld [vmem:[%s2998_s2] ss:$0 sm:$0xff] }
 0x138   :  { %v1817_v44 = vpop.eup %1816  ;;  %1392 = vst.msk [vmem:[%s2999_s3 + $0xbc] sm:$0xf] %vm1344_vm2, %v1558_v13  ;;  %v1556_v15 = vpack.c.bf16 %v1069_v50, %v1069_v50  ;;  %v880_v25 = vadd.f32 1.0, %v1815_v11  ;;  %1834 = vpow2.f32 %v808_v47  ;;  %v528_v40 = vmul.f32 %v2718_v60, %v2433_v41 }
 0x139   :  { %v1819_v35 = vpop.eup %1818  ;;  %1358 = vst.msk [vmem:[%s2999_s3 + $0x34] sm:$0xf] %vm1344_vm2, %v1524_v12  ;;  %v1529_v27 = vpack.c.bf16 %v1042_v3, %v1042_v3  ;;  %v851_v31 = vadd.f32 1.0, %v1817_v44  ;;  %1836 = vpow2.f32 %v750_v20  ;;  %v695_v37 = vsub.f32 0.0, %v2709_v19 }
 0x13a   :  { %v1821_v55 = vpop.eup %1820  ;;  %1390 = vst.msk [vmem:[%s2999_s3 + $0xb4] sm:$0xf] %vm1344_vm2, %v1556_v15  ;;  %v1074_v49 = vmul.f32 %v1819_v35, %v2549_v32  ;;  %1838 = vrcp.f32 %v880_v25  ;;  %v2733_v41 = vadd.f32 %v2706_v62, %v528_v40  ;;  %v560_v2 = vmul.f32 %v2718_v60, %v2435_v26  ;;  %v3007_v25 = vld [vmem:[#allocation2_spill] sm:$0xff] }
 0x13b   :  { %v1823_v29 = vpop.eup %1822  ;;  %1363 = vst.msk [vmem:[%s2999_s3 + $0x48] sm:$0xf] %vm1344_vm2, %v1529_v27  ;;  %1840 = vrcp.f32 %v851_v31  ;;  %v883_v30 = vadd.f32 1.0, %v1821_v55  ;;  %v814_v45 = vmul.f32 1.442695, %v695_v37  ;;  %v533_v0 = vmul.f32 %v2718_v60, %v2467_v9 }
 0x13c   :  { %v1825_v32 = vpop.eup %1824  ;;  %v1561_v59 = vpack.c.bf16 %v1074_v49, %v1074_v49  ;;  %v1040_v42 = vmul.f32 %v1823_v29, %v2578_v22  ;;  %v661_v57 = vsub.f32 0.0, %v2733_v41  ;;  %v2746_v26 = vadd.f32 %v2706_v62, %v560_v2 }
 0x13d   :  { %v1827_v56 = vpop.eup %1826  ;;  %1842 = vrcp.f32 %v883_v30  ;;  %v849_v10 = vadd.f32 1.0, %v1825_v32  ;;  %v2749_v63 = vadd.f32 %v2706_v62, %v533_v0  ;;  %v565_v14 = vmul.f32 %v2718_v60, %v2469_v16 }
 0x13e   :  { %v1829_v21 = vpop.eup %1828  ;;  %1395 = vst.msk [vmem:[%s2999_s3 + $0xc8] sm:$0xf] %vm1344_vm2, %v1561_v59  ;;  %v1527_v9 = vpack.c.bf16 %v1040_v42, %v1040_v42  ;;  %v881_v22 = vadd.f32 1.0, %v1827_v56  ;;  %1844 = vpow2.f32 %v814_v45  ;;  %v746_v7 = vmul.f32 1.442695, %v661_v57 }
 0x13f   :  { %v1831_v34 = vpop.eup %1830  ;;  %1846 = vrcp.f32 %v849_v10  ;;  %v854_v52 = vadd.f32 1.0, %v1829_v21  ;;  %v693_v33 = vsub.f32 0.0, %v2746_v26  ;;  %v666_v51 = vsub.f32 0.0, %v2749_v63 }
 0x140   :  { %v1833_v54 = vpop.eup %1832  ;;  %1361 = vst.msk [vmem:[%s2999_s3 + $0x40] sm:$0xf] %vm1344_vm2, %v1527_v9  ;;  %1848 = vrcp.f32 %v881_v22  ;;  %v886_v16 = vadd.f32 1.0, %v1831_v34  ;;  %v2764_v36 = vadd.f32 %v2706_v62, %v565_v14  ;;  %v531_v4 = vmul.f32 %v2718_v60, %v2479_v53 }
 0x141   :  { %1850 = vrcp.f32 %v854_v52  ;;  %v852_v13 = vadd.f32 1.0, %v1833_v54  ;;  %v810_v50 = vmul.f32 1.442695, %v693_v33  ;;  %v756_v47 = vmul.f32 1.442695, %v666_v51  ;;  %v3008_v33 = vld [vmem:[#allocation3_spill] sm:$0xff] }
 0x142   :  { %v1835_v11 = vpop.eup %1834  ;;  %1852 = vrcp.f32 %v886_v16  ;;  %v698_v12 = vsub.f32 0.0, %v2764_v36  ;;  %v2770_v3 = vadd.f32 %v2706_v62, %v531_v4  ;;  %v563_v20 = vmul.f32 %v2718_v60, %v2481_v39  ;;  %v3009_v54 = vld [vmem:[#allocation4_spill] sm:$0xff] }
 0x143   :  { %v1837_v44 = vpop.eup %1836  ;;  %1854 = vrcp.f32 %v852_v13  ;;  %v884_v15 = vadd.f32 1.0, %v1835_v11  ;;  %v534_v53 = vmul.f32 %v2718_v60, %v2488_v43  ;;  %v566_v40 = vmul.f32 %v2718_v60, %v3007_v25 }
 0x144   :  { %v1839_v35 = vpop.eup %1838  ;;  %v855_v27 = vadd.f32 1.0, %v1837_v44  ;;  %1856 = vpow2.f32 %v746_v7  ;;  %v820_v31 = vmul.f32 1.442695, %v698_v12  ;;  %v664_v37 = vsub.f32 0.0, %v2770_v3 }
 0x145   :  { %v1841_v55 = vpop.eup %1840  ;;  %v1072_v49 = vmul.f32 %v1839_v35, %v2608_v5  ;;  %1858 = vrcp.f32 %v884_v15  ;;  %v2781_v39 = vadd.f32 %v2706_v62, %v563_v20  ;;  %v2784_v2 = vadd.f32 %v2706_v62, %v534_v53 }
 0x146   :  { %v1043_v43 = vmul.f32 %v1841_v55, %v2611_v46  ;;  %1860 = vrcp.f32 %v855_v27  ;;  %v752_v29 = vmul.f32 1.442695, %v664_v37  ;;  %v2788_v30 = vadd.f32 %v2706_v62, %v566_v40 }
 0x147   :  { %v1843_v45 = vpop.eup %1842  ;;  %v1559_v0 = vpack.c.bf16 %v1072_v49, %v1072_v49  ;;  %1862 = vpow2.f32 %v810_v50  ;;  %v696_v32 = vsub.f32 0.0, %v2781_v39  ;;  %v667_v5 = vsub.f32 0.0, %v2784_v2 }
 0x148   :  { %v1845_v59 = vpop.eup %1844  ;;  %v1530_v42 = vpack.c.bf16 %v1043_v43, %v1043_v43  ;;  %v1075_v57 = vmul.f32 %v1843_v45, %v2618_v58  ;;  %1864 = vpow2.f32 %v756_v47  ;;  %v699_v56 = vsub.f32 0.0, %v2788_v30 }
 0x149   :  { %v1847_v46 = vpop.eup %1846  ;;  %1393 = vst.msk [vmem:[%s2999_s3 + $0xc0] sm:$0xf] %vm1344_vm2, %v1559_v0  ;;  %v887_v10 = vadd.f32 1.0, %v1845_v59  ;;  %1866 = vpow2.f32 %v820_v31  ;;  %v816_v14 = vmul.f32 1.442695, %v696_v32  ;;  %v532_v51 = vmul.f32 %v2718_v60, %v3008_v33 }
 0x14a   :  { %v758_v21 = vmul.f32 1.442695, %v667_v5  ;;  %v1849_v9 = vpop.eup %1848  ;;  %1364 = vst.msk [vmem:[%s2999_s3 + $0x4c] sm:$0xf] %vm1344_vm2, %v1530_v42  ;;  %v1562_v58 = vpack.c.bf16 %v1075_v57, %v1075_v57  ;;  %v1041_v22 = vmul.f32 %v1847_v46, %v2638_v48  ;;  %1868 = vpow2.f32 %v752_v29 }
 0x14b   :  { %v822_v7 = vmul.f32 1.442695, %v699_v56  ;;  %v1851_v34 = vpop.eup %1850  ;;  %v1073_v52 = vmul.f32 %v1849_v9, %v2648_v24  ;;  %1870 = vrcp.f32 %v887_v10  ;;  %v564_v16 = vmul.f32 %v2718_v60, %v3009_v54 }
 0x14c   :  { %v1853_v4 = vpop.eup %1852  ;;  %1396 = vst.msk [vmem:[%s2999_s3 + $0xcc] sm:$0xf] %vm1344_vm2, %v1562_v58  ;;  %v1528_v13 = vpack.c.bf16 %v1041_v22, %v1041_v22  ;;  %v1046_v48 = vmul.f32 %v1851_v34, %v2651_v17  ;;  %1872 = vpow2.f32 %v816_v14  ;;  %v537_v24 = vmul.f32 %v2718_v60, %v2512_v28  ;;  %v3010_v58 = vld [vmem:[#allocation5_spill] sm:$0xff] }
 0x14d   :  { %v1855_v50 = vpop.eup %1854  ;;  %v1560_v47 = vpack.c.bf16 %v1073_v52, %v1073_v52  ;;  %v1078_v11 = vmul.f32 %v1853_v4, %v2657_v18  ;;  %1874 = vpow2.f32 %v758_v21  ;;  %v2817_v12 = vadd.f32 %v2706_v62, %v532_v51 }
 0x14e   :  { %v1857_v20 = vpop.eup %1856  ;;  %1362 = vst.msk [vmem:[%s2999_s3 + $0x44] sm:$0xf] %vm1344_vm2, %v1528_v13  ;;  %v1533_v44 = vpack.c.bf16 %v1046_v48, %v1046_v48  ;;  %v1044_v17 = vmul.f32 %v1855_v50, %v2663_v6  ;;  %1876 = vpow2.f32 %v822_v7  ;;  %v2825_v28 = vadd.f32 %v2706_v62, %v564_v16 }
 0x14f   :  { %v1859_v15 = vpop.eup %1858  ;;  %1394 = vst.msk [vmem:[%s2999_s3 + $0xc4] sm:$0xf] %vm1344_vm2, %v1560_v47  ;;  %v1565_v18 = vpack.c.bf16 %v1078_v11, %v1078_v11  ;;  %v853_v53 = vadd.f32 1.0, %v1857_v20  ;;  %v665_v25 = vsub.f32 0.0, %v2817_v12  ;;  %v2833_v40 = vadd.f32 %v2706_v62, %v537_v24  ;;  %v3011_v11 = vld [vmem:[#allocation6_spill] sm:$0xff] }
 0x150   :  { %v1861_v35 = vpop.eup %1860  ;;  %1367 = vst.msk [vmem:[%s2999_s3 + $0x58] sm:$0xf] %vm1344_vm2, %v1533_v44  ;;  %v1531_v6 = vpack.c.bf16 %v1044_v17, %v1044_v17  ;;  %v1076_v27 = vmul.f32 %v1859_v15, %v2679_v1  ;;  %v697_v31 = vsub.f32 0.0, %v2825_v28  ;;  %v569_v37 = vmul.f32 %v2718_v60, %v2514_v38  ;;  %v3012_v44 = vld [vmem:[#allocation7_spill] sm:$0xff] }
 0x151   :  { %v1863_v55 = vpop.eup %1862  ;;  %1399 = vst.msk [vmem:[%s2999_s3 + $0xd8] sm:$0xf] %vm1344_vm2, %v1565_v18  ;;  %v1047_v49 = vmul.f32 %v1861_v35, %v2683_v23  ;;  %1878 = vrcp.f32 %v853_v53  ;;  %v754_v43 = vmul.f32 1.442695, %v665_v25  ;;  %v670_v29 = vsub.f32 0.0, %v2833_v40  ;;  %v3013_v53 = vld [vmem:[#allocation8_spill] sm:$0xff] }
 0x152   :  { %v1865_v45 = vpop.eup %1864  ;;  %1365 = vst.msk [vmem:[%s2999_s3 + $0x50] sm:$0xf] %vm1344_vm2, %v1531_v6  ;;  %v1563_v1 = vpack.c.bf16 %v1076_v27, %v1076_v27  ;;  %v885_v38 = vadd.f32 1.0, %v1863_v55  ;;  %v818_v0 = vmul.f32 1.442695, %v697_v31  ;;  %v2854_v32 = vadd.f32 %v2706_v62, %v569_v37 }
 0x153   :  { %v1867_v5 = vpop.eup %1866  ;;  %v1534_v59 = vpack.c.bf16 %v1047_v49, %v1047_v49  ;;  %v858_v42 = vadd.f32 1.0, %v1865_v45  ;;  %1880 = vpow2.f32 %v754_v43  ;;  %v764_v23 = vmul.f32 1.442695, %v670_v29 }
 0x154   :  { %v1869_v57 = vpop.eup %1868  ;;  %1397 = vst.msk [vmem:[%s2999_s3 + $0xd0] sm:$0xf] %vm1344_vm2, %v1563_v1  ;;  %1882 = vrcp.f32 %v885_v38  ;;  %v890_v56 = vadd.f32 1.0, %v1867_v5  ;;  %v702_v46 = vsub.f32 0.0, %v2854_v32  ;;  %v535_v10 = vmul.f32 %v2718_v60, %v2518_v8 }
 0x155   :  { %v1871_v14 = vpop.eup %1870  ;;  %1368 = vst.msk [vmem:[%s2999_s3 + $0x5c] sm:$0xf] %vm1344_vm2, %v1534_v59  ;;  %1884 = vrcp.f32 %v858_v42  ;;  %v856_v21 = vadd.f32 1.0, %v1869_v57  ;;  %v567_v9 = vmul.f32 %v2718_v60, %v2520_v61  ;;  %v538_v22 = vmul.f32 %v2718_v60, %v3010_v58 }
 0x156   :  { %v1873_v7 = vpop.eup %1872  ;;  %v1079_v34 = vmul.f32 %v1871_v14, %v2709_v19  ;;  %1886 = vrcp.f32 %v890_v56  ;;  %v828_v52 = vmul.f32 1.442695, %v702_v46  ;;  %v2873_v8 = vadd.f32 %v2706_v62, %v535_v10 }
 0x157   :  { %v1875_v33 = vpop.eup %1874  ;;  %1888 = vrcp.f32 %v856_v21  ;;  %v888_v51 = vadd.f32 1.0, %v1873_v7  ;;  %v2876_v54 = vadd.f32 %v2706_v62, %v567_v9  ;;  %v2879_v16 = vadd.f32 %v2706_v62, %v538_v22 }
 0x158   :  { %v1877_v61 = vpop.eup %1876  ;;  %v1566_v4 = vpack.c.bf16 %v1079_v34, %v1079_v34  ;;  %v859_v13 = vadd.f32 1.0, %v1875_v33  ;;  %1890 = vpow2.f32 %v818_v0  ;;  %v668_v19 = vsub.f32 0.0, %v2873_v8 }
 0x159   :  { %1892 = vrcp.f32 %v888_v51  ;;  %v891_v48 = vadd.f32 1.0, %v1877_v61  ;;  %v700_v24 = vsub.f32 0.0, %v2876_v54  ;;  %v671_v50 = vsub.f32 0.0, %v2879_v16 }
 0x15a   :  { %1400 = vst.msk [vmem:[%s2999_s3 + $0xdc] sm:$0xf] %vm1344_vm2, %v1566_v4  ;;  %1894 = vrcp.f32 %v859_v13  ;;  %v760_v47 = vmul.f32 1.442695, %v668_v19  ;;  %v570_v20 = vmul.f32 %v2718_v60, %v3011_v11  ;;  %v536_v17 = vmul.f32 %v2718_v60, %v3012_v44 }
 0x15b   :  { %v1879_v15 = vpop.eup %1878  ;;  %1896 = vrcp.f32 %v891_v48  ;;  %v824_v18 = vmul.f32 1.442695, %v700_v24  ;;  %v568_v25 = vmul.f32 %v2718_v60, %v3013_v53  ;;  %v766_v37 = vmul.f32 1.442695, %v671_v50 }
 0x15c   :  { %v1045_v35 = vmul.f32 %v1879_v15, %v2733_v41  ;;  %1898 = vpow2.f32 %v764_v23  ;;  %v2896_v6 = vadd.f32 %v2706_v62, %v570_v20  ;;  %v2899_v27 = vadd.f32 %v2706_v62, %v536_v17 }
 0x15d   :  { %v1881_v31 = vpop.eup %1880  ;;  %1900 = vpow2.f32 %v828_v52  ;;  %v2902_v55 = vadd.f32 %v2706_v62, %v568_v25 }
 0x15e   :  { %v1883_v49 = vpop.eup %1882  ;;  %v1532_v43 = vpack.c.bf16 %v1045_v35, %v1045_v35  ;;  %v857_v29 = vadd.f32 1.0, %v1881_v31  ;;  %1902 = vpow2.f32 %v760_v47  ;;  %v703_v60 = vsub.f32 0.0, %v2896_v6 }
 0x15f   :  { %v1885_v41 = vpop.eup %1884  ;;  %v1077_v45 = vmul.f32 %v1883_v49, %v2746_v26  ;;  %1904 = vpow2.f32 %v824_v18  ;;  %v669_v1 = vsub.f32 0.0, %v2899_v27  ;;  %v701_v38 = vsub.f32 0.0, %v2902_v55 }
 0x160   :  { %v1887_v0 = vpop.eup %1886  ;;  %1366 = vst.msk [vmem:[%s2999_s3 + $0x54] sm:$0xf] %vm1344_vm2, %v1532_v43  ;;  %v1050_v62 = vmul.f32 %v1885_v41, %v2749_v63  ;;  %1906 = vrcp.f32 %v857_v29  ;;  %v830_v5 = vmul.f32 1.442695, %v703_v60 }
 0x161   :  { %v1889_v59 = vpop.eup %1888  ;;  %v1564_v42 = vpack.c.bf16 %v1077_v45, %v1077_v45  ;;  %v1082_v23 = vmul.f32 %v1887_v0, %v2764_v36  ;;  %1908 = vpow2.f32 %v766_v37  ;;  %v762_v26 = vmul.f32 1.442695, %v669_v1 }
 0x162   :  { %v1891_v57 = vpop.eup %1890  ;;  %v1537_v56 = vpack.c.bf16 %v1050_v62, %v1050_v62  ;;  %v1048_v46 = vmul.f32 %v1889_v59, %v2770_v3  ;;  %1910 = vpow2.f32 %v830_v5  ;;  %v826_v10 = vmul.f32 1.442695, %v701_v38 }
 0x163   :  { %v1893_v14 = vpop.eup %1892  ;;  %1398 = vst.msk [vmem:[%s2999_s3 + $0xd4] sm:$0xf] %vm1344_vm2, %v1564_v42  ;;  %v1569_v63 = vpack.c.bf16 %v1082_v23, %v1082_v23  ;;  %v889_v21 = vadd.f32 1.0, %v1891_v57  ;;  %1912 = vpow2.f32 %v762_v26 }
 0x164   :  { %v1895_v9 = vpop.eup %1894  ;;  %1371 = vst.msk [vmem:[%s2999_s3 + $0x68] sm:$0xf] %vm1344_vm2, %v1537_v56  ;;  %v1535_v36 = vpack.c.bf16 %v1048_v46, %v1048_v46  ;;  %v1080_v3 = vmul.f32 %v1893_v14, %v2781_v39  ;;  %1914 = vpow2.f32 %v826_v10 }
 0x165   :  { %v1897_v58 = vpop.eup %1896  ;;  %1403 = vst.msk [vmem:[%s2999_s3 + $0xe8] sm:$0xf] %vm1344_vm2, %v1569_v63  ;;  %v1051_v22 = vmul.f32 %v1895_v9, %v2784_v2  ;;  %1916 = vrcp.f32 %v889_v21 }
 0x166   :  { %v1899_v7 = vpop.eup %1898  ;;  %1369 = vst.msk [vmem:[%s2999_s3 + $0x60] sm:$0xf] %vm1344_vm2, %v1535_v36  ;;  %v1567_v34 = vpack.c.bf16 %v1080_v3, %v1080_v3  ;;  %v1083_v52 = vmul.f32 %v1897_v58, %v2788_v30 }
 0x167   :  { %v1901_v39 = vpop.eup %1900  ;;  %v1538_v33 = vpack.c.bf16 %v1051_v22, %v1051_v22  ;;  %v862_v51 = vadd.f32 1.0, %v1899_v7 }
 0x168   :  { %v1903_v61 = vpop.eup %1902  ;;  %1401 = vst.msk [vmem:[%s2999_s3 + $0xe0] sm:$0xf] %vm1344_vm2, %v1567_v34  ;;  %v1570_v2 = vpack.c.bf16 %v1083_v52, %v1083_v52  ;;  %v894_v4 = vadd.f32 1.0, %v1901_v39 }
 0x169   :  { %v1905_v13 = vpop.eup %1904  ;;  %1372 = vst.msk [vmem:[%s2999_s3 + $0x6c] sm:$0xf] %vm1344_vm2, %v1538_v33  ;;  %1918 = vrcp.f32 %v862_v51  ;;  %v860_v19 = vadd.f32 1.0, %v1903_v61 }
 0x16a   :  { %v1907_v30 = vpop.eup %1906  ;;  %1404 = vst.msk [vmem:[%s2999_s3 + $0xec] sm:$0xf] %vm1344_vm2, %v1570_v2  ;;  %1920 = vrcp.f32 %v894_v4  ;;  %v892_v48 = vadd.f32 1.0, %v1905_v13 }
 0x16b   :  { %v1909_v24 = vpop.eup %1908  ;;  %v1049_v50 = vmul.f32 %v1907_v30, %v2817_v12  ;;  %1922 = vrcp.f32 %v860_v19 }
 0x16c   :  { %v1911_v47 = vpop.eup %1910  ;;  %1924 = vrcp.f32 %v892_v48  ;;  %v863_v11 = vadd.f32 1.0, %v1909_v24 }
 0x16d   :  { %v1913_v20 = vpop.eup %1912  ;;  %v1536_v44 = vpack.c.bf16 %v1049_v50, %v1049_v50  ;;  %v895_v17 = vadd.f32 1.0, %v1911_v47 }
 0x16e   :  { %v1915_v15 = vpop.eup %1914  ;;  %1926 = vrcp.f32 %v863_v11  ;;  %v861_v18 = vadd.f32 1.0, %v1913_v20 }
 0x16f   :  { %v1917_v53 = vpop.eup %1916  ;;  %1370 = vst.msk [vmem:[%s2999_s3 + $0x64] sm:$0xf] %vm1344_vm2, %v1536_v44  ;;  %1928 = vrcp.f32 %v895_v17  ;;  %v893_v25 = vadd.f32 1.0, %v1915_v15 }
 0x170   :  { %v1081_v12 = vmul.f32 %v1917_v53, %v2825_v28  ;;  %1930 = vrcp.f32 %v861_v18 }
 0x171   :  { %1932 = vrcp.f32 %v893_v25 }
 0x172   :  { %v1568_v35 = vpack.c.bf16 %v1081_v12, %v1081_v12 }
 0x173   :  { %v1919_v31 = vpop.eup %1918 }
 0x174   :  { %v1921_v37 = vpop.eup %1920  ;;  %1402 = vst.msk [vmem:[%s2999_s3 + $0xe4] sm:$0xf] %vm1344_vm2, %v1568_v35  ;;  %v1054_v49 = vmul.f32 %v1919_v31, %v2833_v40 }
 0x175   :  { %v1923_v43 = vpop.eup %1922  ;;  %v1086_v29 = vmul.f32 %v1921_v37, %v2854_v32 }
 0x176   :  { %v1925_v60 = vpop.eup %1924  ;;  %v1541_v41 = vpack.c.bf16 %v1054_v49, %v1054_v49  ;;  %v1052_v45 = vmul.f32 %v1923_v43, %v2873_v8 }
 0x177   :  { %v1573_v28 = vpack.c.bf16 %v1086_v29, %v1086_v29  ;;  %v1084_v1 = vmul.f32 %v1925_v60, %v2876_v54 }
 0x178   :  { %v1927_v38 = vpop.eup %1926  ;;  %1375 = vst.msk [vmem:[%s2999_s3 + $0x78] sm:$0xf] %vm1344_vm2, %v1541_v41  ;;  %v1539_v0 = vpack.c.bf16 %v1052_v45, %v1052_v45 }
 0x179   :  { %v1929_v62 = vpop.eup %1928  ;;  %1407 = vst.msk [vmem:[%s2999_s3 + $0xf8] sm:$0xf] %vm1344_vm2, %v1573_v28  ;;  %v1571_v40 = vpack.c.bf16 %v1084_v1, %v1084_v1  ;;  %v1055_v32 = vmul.f32 %v1927_v38, %v2879_v16 }
 0x17a   :  { %v1931_v8 = vpop.eup %1930  ;;  %1373 = vst.msk [vmem:[%s2999_s3 + $0x70] sm:$0xf] %vm1344_vm2, %v1539_v0  ;;  %v1087_v54 = vmul.f32 %v1929_v62, %v2896_v6 }
 0x17b   :  { %v1933_v5 = vpop.eup %1932  ;;  %1405 = vst.msk [vmem:[%s2999_s3 + $0xf0] sm:$0xf] %vm1344_vm2, %v1571_v40  ;;  %v1542_v59 = vpack.c.bf16 %v1055_v32, %v1055_v32  ;;  %v1053_v42 = vmul.f32 %v1931_v8, %v2899_v27 }
 0x17c   :  { %v1574_v23 = vpack.c.bf16 %v1087_v54, %v1087_v54  ;;  %v1085_v16 = vmul.f32 %v1933_v5, %v2902_v55 }
 0x17d   :  { %1376 = vst.msk [vmem:[%s2999_s3 + $0x7c] sm:$0xf] %vm1344_vm2, %v1542_v59  ;;  %v1540_v26 = vpack.c.bf16 %v1053_v42, %v1053_v42 }
 0x17e   :  { %1408 = vst.msk [vmem:[%s2999_s3 + $0xfc] sm:$0xf] %vm1344_vm2, %v1574_v23  ;;  %v1572_v6 = vpack.c.bf16 %v1085_v16, %v1085_v16 }
 0x17f   :  { %1374 = vst.msk [vmem:[%s2999_s3 + $0x74] sm:$0xf] %vm1344_vm2, %v1540_v26 }
 0x180   :  { %1406 = vst.msk [vmem:[%s2999_s3 + $0xf4] sm:$0xf] %vm1344_vm2, %v1572_v6 }

// kernel: _lambda_.11
= control target key start
LH: loop header
LB: loop body
LE: loop exit
PB: predicated region body
PF: predicated region fallthrough
CT: control target
= control target key end

     0   :  { %vm414_vm0 = vcmask 1041408   ;;  %vm964_vm1 = vcmask 1043456   ;;  %vm317_vm2 = vcmask 31744   ;;  %vm867_vm3 = vcmask 64512   ;;  %s4865_s4 = inlined_call_operand.vmem [shape: bf16[4,8], index: 4, kind: input, shape index: {}]   ;;  %s4866_s3 = inlined_call_operand.vmem [shape: bf16[8,8], index: 3, kind: input, shape index: {}]   ;;  %s4867_s1 = inlined_call_operand.vmem [shape: bf16[512,4], index: 1, kind: input, shape index: {}]   ;;  %s4868_s0 = inlined_call_operand.vmem [shape: bf16[512,8], index: 0, kind: input, shape index: {}]   ;;  %s4869_s5 = inlined_call_operand.vmem [shape: bf16[4,8], index: 5, kind: input, shape index: {}]   ;;  %s4870_s2 = inlined_call_operand.vmem [shape: bf16[512,4], index: 2, kind: input, shape index: {}]   ;;  %s4871_s6 = inlined_call_operand.vmem [shape: f32[2,8], index: 6, kind: input, shape index: {}]   ;;  %s4872_s7 = inlined_call_operand.vmem [shape: f32[512,8], index: 7, kind: output, shape index: {}]  }
   0x1   :  { %v92_v0 = vld [vmem:[%s4865_s4] sm:$0x3]  ;;  %v3215_v6 = vld [vmem:[%s4867_s1 + $0x8] sm:$0xff]   ;;  %v3217_v10 = vld [vmem:[%s4867_s1 + $0x10] sm:$0xff]  }
   0x2   :  { %v27_v1 = vld [vmem:[%s4866_s3] sm:$0xf]  ;;  %3209 = vmatprep.subr.msk.bf16.mxu1 %vm414_vm0, %v92_v0  ;;  %v416_v2 = vsel %vm414_vm0, %v92_v0, 0  ;;  %v3216_v7 = vld [vmem:[%s4868_s0 + $0x8] sm:$0xff]   ;;  %v3218_v11 = vld [vmem:[%s4868_s0 + $0x10] sm:$0xff]  }
   0x3   :  { %3210 = vmatprep.subr.msk.bf16.mxu0 %vm964_vm1, %v27_v1  ;;  %v966_v3 = vsel %vm964_vm1, %v27_v1, 0  ;;  %v3213_v4 = vld [vmem:[%s4867_s1] sm:$0xff]   ;;  %2882 = vmatpush3.bf16.msra.mxu1 %v416_v2  ;;  %v3219_v12 = vld [vmem:[%s4867_s1 + $0x18] sm:$0xff]   ;;  %v3223_v16 = vld [vmem:[%s4867_s1 + $0x28] sm:$0xff]  }
   0x4   :  { %v3214_v5 = vld [vmem:[%s4868_s0] sm:$0xff]   ;;  %2948 = vmatpush3.bf16.msra.mxu0 %v966_v3  ;;  %2883 = vmatprep.mubr.msk.bf16.mxu1 %vm317_vm2, %v3213_v4  ;;  %v3220_v13 = vld [vmem:[%s4868_s0 + $0x18] sm:$0xff]   ;;  %v3224_v17 = vld [vmem:[%s4868_s0 + $0x28] sm:$0xff]  }
   0x5   :  { %2949 = vmatprep.mubr.msk.bf16.mxu0 %vm867_vm3, %v3214_v5  ;;  %3211 = vmatprep.subr.msk.bf16.mxu1 %vm964_vm1, %v27_v1  ;;  %v1257_v8 = vld [vmem:[%s4869_s5] sm:$0x3]  ;;  %v3225_v18 = vld [vmem:[%s4867_s1 + $0x30] sm:$0xff]   ;;  %v3227_v20 = vld [vmem:[%s4867_s1 + $0x38] sm:$0xff]  }
   0x6   :  { %2884 = vmatmul.mubr.msk.bf16.vlgmr.msra.gmra.mrb[0].mxu1 %vm317_vm2, %v3215_v6  ;;  %3212 = vmatprep.subr.msk.bf16.mxu0 %vm414_vm0, %v1257_v8  ;;  %v1579_v9 = vsel %vm414_vm0, %v1257_v8, 0  ;;  %v3221_v14 = vld [vmem:[%s4867_s1 + $0x20] sm:$0xff]   ;;  %v3226_v19 = vld [vmem:[%s4868_s0 + $0x30] sm:$0xff]   ;;  %v3228_v21 = vld [vmem:[%s4868_s0 + $0x38] sm:$0xff]  }
   0x7   :  { %2950 = vmatmul.mubr.msk.bf16.vlgmr.msra.gmra.mrb[0].mxu0 %vm867_vm3, %v3216_v7  ;;  %3080 = vmatpush3.bf16.msra.mxu1 %v966_v3  ;;  %v3222_v15 = vld [vmem:[%s4868_s0 + $0x20] sm:$0xff]   ;;  %v3231_v24 = vld [vmem:[%s4867_s1 + $0x48] sm:$0xff]   ;;  %v3233_v26 = vld [vmem:[%s4867_s1 + $0x50] sm:$0xff]  }
   0x8   :  { %3014 = vmatpush3.bf16.msra.mxu0 %v1579_v9  ;;  %2887 = vmatprep.mubr.msk.bf16.mxu1 %vm317_vm2, %v3217_v10  ;;  %v3229_v22 = vld [vmem:[%s4867_s1 + $0x40] sm:$0xff]   ;;  %v3232_v25 = vld [vmem:[%s4868_s0 + $0x48] sm:$0xff]   ;;  %v3234_v27 = vld [vmem:[%s4868_s0 + $0x50] sm:$0xff]  }
   0x9   :  { %2953 = vmatprep.mubr.msk.bf16.mxu0 %vm867_vm3, %v3218_v11  ;;  %v3230_v23 = vld [vmem:[%s4868_s0 + $0x40] sm:$0xff]   ;;  %v3235_v28 = vld [vmem:[%s4867_s1 + $0x58] sm:$0xff]   ;;  %v3239_v32 = vld [vmem:[%s4867_s1 + $0x68] sm:$0xff]  }
   0xa   :  { %v3236_v29 = vld [vmem:[%s4868_s0 + $0x58] sm:$0xff]   ;;  %v3237_v30 = vld [vmem:[%s4867_s1 + $0x60] sm:$0xff]   ;;  %v3240_v33 = vld [vmem:[%s4868_s0 + $0x68] sm:$0xff]  }
   0xb   :  { %v3238_v31 = vld [vmem:[%s4868_s0 + $0x60] sm:$0xff]   ;;  %v3241_v34 = vld [vmem:[%s4867_s1 + $0x70] sm:$0xff]   ;;  %v3243_v36 = vld [vmem:[%s4867_s1 + $0x78] sm:$0xff]  }
   0xc   :  { %v3242_v35 = vld [vmem:[%s4868_s0 + $0x70] sm:$0xff]   ;;  %v3244_v37 = vld [vmem:[%s4868_s0 + $0x78] sm:$0xff]   ;;  %v3245_v38 = vld [vmem:[%s4867_s1 + $0x80] sm:$0xff]  }
   0xd   :  { %v3246_v39 = vld [vmem:[%s4870_s2] sm:$0xff]   ;;  %v3247_v40 = vld [vmem:[%s4867_s1 + $0x88] sm:$0xff]   ;;  %v3249_v42 = vld [vmem:[%s4867_s1 + $0x90] sm:$0xff]  }
   0xe   :  { %2888 = vmatmul.mubr.msk.bf16.gmra.mrb[4].mxu1 %vm317_vm2, %v3219_v12  ;;  %v3248_v41 = vld [vmem:[%s4870_s2 + $0x8] sm:$0xff]   ;;  %v3250_v43 = vld [vmem:[%s4870_s2 + $0x10] sm:$0xff]   ;;  %v3251_v44 = vld [vmem:[%s4867_s1 + $0x98] sm:$0xff]  }
   0xf   :  { %2954 = vmatmul.mubr.msk.bf16.gmra.mrb[4].mxu0 %vm867_vm3, %v3220_v13  ;;  %2891 = vmatprep.mubr.msk.bf16.mxu1 %vm317_vm2, %v3221_v14  ;;  %v3252_v45 = vld [vmem:[%s4870_s2 + $0x18] sm:$0xff]   ;;  %v3253_v46 = vld [vmem:[%s4867_s1 + $0xa0] sm:$0xff]   ;;  %v3255_v48 = vld [vmem:[%s4867_s1 + $0xa8] sm:$0xff]  }
  0x10   :  { %2957 = vmatprep.mubr.msk.bf16.mxu0 %vm867_vm3, %v3222_v15  ;;  %v3254_v47 = vld [vmem:[%s4870_s2 + $0x20] sm:$0xff]   ;;  %v3256_v49 = vld [vmem:[%s4870_s2 + $0x28] sm:$0xff]   ;;  %v3257_v50 = vld [vmem:[%s4867_s1 + $0xb0] sm:$0xff]  }
  0x11   :  { %v3258_v51 = vld [vmem:[%s4870_s2 + $0x30] sm:$0xff]   ;;  %v3259_v52 = vld [vmem:[%s4867_s1 + $0xb8] sm:$0xff]   ;;  %v3261_v54 = vld [vmem:[%s4867_s1 + $0xc0] sm:$0xff]  }
  0x12   :  { %v3260_v53 = vld [vmem:[%s4870_s2 + $0x38] sm:$0xff]   ;;  %v3262_v55 = vld [vmem:[%s4870_s2 + $0x40] sm:$0xff]   ;;  %v3263_v56 = vld [vmem:[%s4867_s1 + $0xc8] sm:$0xff]  }
  0x13   :  { %v3264_v57 = vld [vmem:[%s4870_s2 + $0x48] sm:$0xff]   ;;  %v3265_v58 = vld [vmem:[%s4867_s1 + $0xd0] sm:$0xff]   ;;  %v3267_v60 = vld [vmem:[%s4867_s1 + $0xd8] sm:$0xff]  }
  0x14   :  { %v3266_v59 = vld [vmem:[%s4870_s2 + $0x50] sm:$0xff]   ;;  %v3268_v61 = vld [vmem:[%s4870_s2 + $0x58] sm:$0xff]   ;;  %v3269_v62 = vld [vmem:[%s4867_s1 + $0xe0] sm:$0xff]  }
  0x15   :  { %v3270_v63 = vld [vmem:[%s4870_s2 + $0x60] sm:$0xff]   ;;  %v3271_v0 = vld [vmem:[%s4867_s1 + $0xe8] sm:$0xff]   ;;  %v3273_v2 = vld [vmem:[%s4867_s1 + $0xf0] sm:$0xff]  }
  0x16   :  { %2892 = vmatmul.mubr.msk.bf16.gmra.mrb[8].mxu1 %vm317_vm2, %v3223_v16  ;;  %v3272_v1 = vld [vmem:[%s4870_s2 + $0x68] sm:$0xff]   ;;  %v3274_v3 = vld [vmem:[%s4870_s2 + $0x70] sm:$0xff]   ;;  %v3275_v4 = vld [vmem:[%s4867_s1 + $0xf8] sm:$0xff]  }
  0x17   :  { %2958 = vmatmul.mubr.msk.bf16.gmra.mrb[8].mxu0 %vm867_vm3, %v3224_v17  ;;  %2895 = vmatprep.mubr.msk.bf16.mxu1 %vm317_vm2, %v3225_v18  ;;  %v3276_v5 = vld [vmem:[%s4870_s2 + $0x78] sm:$0xff]   ;;  %v3277_v6 = vld [vmem:[%s4868_s0 + $0x80] sm:$0xff]   ;;  %v3279_v8 = vld [vmem:[%s4868_s0 + $0x88] sm:$0xff]  }
  0x18   :  { %2961 = vmatprep.mubr.msk.bf16.mxu0 %vm867_vm3, %v3226_v19  ;;  %v3278_v7 = vld [vmem:[%s4870_s2 + $0x80] sm:$0xff]   ;;  %v3280_v9 = vld [vmem:[%s4870_s2 + $0x88] sm:$0xff]   ;;  %v3281_v10 = vld [vmem:[%s4868_s0 + $0x90] sm:$0xff]  }
  0x19   :  { %v3282_v11 = vld [vmem:[%s4870_s2 + $0x90] sm:$0xff]   ;;  %v3283_v12 = vld [vmem:[%s4868_s0 + $0x98] sm:$0xff]   ;;  %v3285_v14 = vld [vmem:[%s4868_s0 + $0xa0] sm:$0xff]  }
  0x1a   :  { %v3284_v13 = vld [vmem:[%s4870_s2 + $0x98] sm:$0xff]   ;;  %v3286_v15 = vld [vmem:[%s4870_s2 + $0xa0] sm:$0xff]   ;;  %v3287_v16 = vld [vmem:[%s4868_s0 + $0xa8] sm:$0xff]  }
  0x1b   :  { %v3288_v17 = vld [vmem:[%s4870_s2 + $0xa8] sm:$0xff]   ;;  %v3289_v18 = vld [vmem:[%s4868_s0 + $0xb0] sm:$0xff]  }
  0x1c   :  { %v3290_v19 = vld [vmem:[%s4870_s2 + $0xb0] sm:$0xff]  }
  0x1e   :  { %2896 = vmatmul.mubr.msk.bf16.gmra.mrb[12].mxu1 %vm317_vm2, %v3227_v20  ;;  %v3291_v20 = vld [vmem:[%s4868_s0 + $0xb8] sm:$0xff]  }
  0x1f   :  { %2962 = vmatmul.mubr.msk.bf16.gmra.mrb[12].mxu0 %vm867_vm3, %v3228_v21  ;;  %2899 = vmatprep.mubr.msk.bf16.mxu1 %vm317_vm2, %v3229_v22  ;;  %v3292_v21 = vld [vmem:[%s4870_s2 + $0xb8] sm:$0xff]   ;;  %v3293_v22 = vld [vmem:[%s4868_s0 + $0xc0] sm:$0xff]  }
  0x20   :  { %2965 = vmatprep.mubr.msk.bf16.mxu0 %vm867_vm3, %v3230_v23  ;;  %v3294_v23 = vld [vmem:[%s4870_s2 + $0xc0] sm:$0xff]  }
  0x26   :  { %2900 = vmatmul.mubr.msk.bf16.gmra.mrb[16].mxu1 %vm317_vm2, %v3231_v24  ;;  %v3295_v24 = vld [vmem:[%s4868_s0 + $0xc8] sm:$0xff]  }
  0x27   :  { %2966 = vmatmul.mubr.msk.bf16.gmra.mrb[16].mxu0 %vm867_vm3, %v3232_v25  ;;  %2903 = vmatprep.mubr.msk.bf16.mxu1 %vm317_vm2, %v3233_v26  ;;  %v3296_v25 = vld [vmem:[%s4870_s2 + $0xc8] sm:$0xff]   ;;  %v3297_v26 = vld [vmem:[%s4868_s0 + $0xd0] sm:$0xff]  }
  0x28   :  { %2969 = vmatprep.mubr.msk.bf16.mxu0 %vm867_vm3, %v3234_v27  ;;  %v3298_v27 = vld [vmem:[%s4870_s2 + $0xd0] sm:$0xff]  }
  0x2e   :  { %2904 = vmatmul.mubr.msk.bf16.gmra.mrb[20].mxu1 %vm317_vm2, %v3235_v28  ;;  %v3299_v28 = vld [vmem:[%s4868_s0 + $0xd8] sm:$0xff]  }
  0x2f   :  { %2970 = vmatmul.mubr.msk.bf16.gmra.mrb[20].mxu0 %vm867_vm3, %v3236_v29  ;;  %2907 = vmatprep.mubr.msk.bf16.mxu1 %vm317_vm2, %v3237_v30  ;;  %v3300_v29 = vld [vmem:[%s4870_s2 + $0xd8] sm:$0xff]   ;;  %v3301_v30 = vld [vmem:[%s4868_s0 + $0xe0] sm:$0xff]  }
  0x30   :  { %2973 = vmatprep.mubr.msk.bf16.mxu0 %vm867_vm3, %v3238_v31  ;;  %v3302_v31 = vld [vmem:[%s4870_s2 + $0xe0] sm:$0xff]  }
  0x36   :  { %2908 = vmatmul.mubr.msk.bf16.gmra.mrb[24].mxu1 %vm317_vm2, %v3239_v32  ;;  %v3303_v32 = vld [vmem:[%s4868_s0 + $0xe8] sm:$0xff]  }
  0x37   :  { %2974 = vmatmul.mubr.msk.bf16.gmra.mrb[24].mxu0 %vm867_vm3, %v3240_v33  ;;  %2911 = vmatprep.mubr.msk.bf16.mxu1 %vm317_vm2, %v3241_v34  ;;  %v3304_v33 = vld [vmem:[%s4870_s2 + $0xe8] sm:$0xff]   ;;  %v3305_v34 = vld [vmem:[%s4868_s0 + $0xf0] sm:$0xff]  }
  0x38   :  { %2977 = vmatprep.mubr.msk.bf16.mxu0 %vm867_vm3, %v3242_v35  ;;  %v3306_v35 = vld [vmem:[%s4870_s2 + $0xf0] sm:$0xff]  }
  0x3e   :  { %2912 = vmatmul.mubr.msk.bf16.gmra.mrb[28].mxu1 %vm317_vm2, %v3243_v36  ;;  %v3307_v36 = vld [vmem:[%s4868_s0 + $0xf8] sm:$0xff]  }
  0x3f   :  { %2978 = vmatmul.mubr.msk.bf16.gmra.mrb[28].mxu0 %vm867_vm3, %v3244_v37  ;;  %2915 = vmatprep.mubr.msk.bf16.mxu1 %vm317_vm2, %v3245_v38  ;;  %v3308_v37 = vld [vmem:[%s4870_s2 + $0xf8] sm:$0xff]  }
  0x40   :  { %3015 = vmatprep.mubr.msk.bf16.mxu0 %vm317_vm2, %v3246_v39 }
  0x46   :  { %2916 = vmatmul.mubr.msk.bf16.gmra.mrb[32].mxu1 %vm317_vm2, %v3247_v40 }
  0x47   :  { %3016 = vmatmul.mubr.msk.bf16.vlgmr.msra.gmra.mrb[0].mxu0 %vm317_vm2, %v3248_v41  ;;  %2919 = vmatprep.mubr.msk.bf16.mxu1 %vm317_vm2, %v3249_v42 }
  0x48   :  { %3019 = vmatprep.mubr.msk.bf16.mxu0 %vm317_vm2, %v3250_v43 }
  0x4e   :  { %2920 = vmatmul.mubr.msk.bf16.gmra.mrb[36].mxu1 %vm317_vm2, %v3251_v44 }
  0x4f   :  { %3020 = vmatmul.mubr.msk.bf16.gmra.mrb[4].mxu0 %vm317_vm2, %v3252_v45  ;;  %2923 = vmatprep.mubr.msk.bf16.mxu1 %vm317_vm2, %v3253_v46 }
  0x50   :  { %3023 = vmatprep.mubr.msk.bf16.mxu0 %vm317_vm2, %v3254_v47 }
  0x56   :  { %2924 = vmatmul.mubr.msk.bf16.gmra.mrb[40].mxu1 %vm317_vm2, %v3255_v48 }
  0x57   :  { %3024 = vmatmul.mubr.msk.bf16.gmra.mrb[8].mxu0 %vm317_vm2, %v3256_v49  ;;  %2927 = vmatprep.mubr.msk.bf16.mxu1 %vm317_vm2, %v3257_v50 }
  0x58   :  { %3027 = vmatprep.mubr.msk.bf16.mxu0 %vm317_vm2, %v3258_v51 }
  0x5e   :  { %2928 = vmatmul.mubr.msk.bf16.gmra.mrb[44].mxu1 %vm317_vm2, %v3259_v52 }
  0x5f   :  { %3028 = vmatmul.mubr.msk.bf16.gmra.mrb[12].mxu0 %vm317_vm2, %v3260_v53  ;;  %2931 = vmatprep.mubr.msk.bf16.mxu1 %vm317_vm2, %v3261_v54 }
  0x60   :  { %3031 = vmatprep.mubr.msk.bf16.mxu0 %vm317_vm2, %v3262_v55 }
  0x66   :  { %2932 = vmatmul.mubr.msk.bf16.gmra.mrb[48].mxu1 %vm317_vm2, %v3263_v56 }
  0x67   :  { %3032 = vmatmul.mubr.msk.bf16.gmra.mrb[16].mxu0 %vm317_vm2, %v3264_v57  ;;  %2935 = vmatprep.mubr.msk.bf16.mxu1 %vm317_vm2, %v3265_v58 }
  0x68   :  { %3035 = vmatprep.mubr.msk.bf16.mxu0 %vm317_vm2, %v3266_v59 }
  0x6e   :  { %2936 = vmatmul.mubr.msk.bf16.gmra.mrb[52].mxu1 %vm317_vm2, %v3267_v60 }
  0x6f   :  { %3036 = vmatmul.mubr.msk.bf16.gmra.mrb[20].mxu0 %vm317_vm2, %v3268_v61  ;;  %2939 = vmatprep.mubr.msk.bf16.mxu1 %vm317_vm2, %v3269_v62 }
  0x70   :  { %3039 = vmatprep.mubr.msk.bf16.mxu0 %vm317_vm2, %v3270_v63 }
  0x76   :  { %2940 = vmatmul.mubr.msk.bf16.gmra.mrb[56].mxu1 %vm317_vm2, %v3271_v0 }
  0x77   :  { %3040 = vmatmul.mubr.msk.bf16.gmra.mrb[24].mxu0 %vm317_vm2, %v3272_v1  ;;  %2943 = vmatprep.mubr.msk.bf16.mxu1 %vm317_vm2, %v3273_v2 }
  0x78   :  { %3043 = vmatprep.mubr.msk.bf16.mxu0 %vm317_vm2, %v3274_v3 }
  0x7e   :  { %2944 = vmatmul.mubr.msk.bf16.gmra.mrb[60].mxu1 %vm317_vm2, %v3275_v4 }
  0x7f   :  { %3044 = vmatmul.mubr.msk.bf16.gmra.mrb[28].mxu0 %vm317_vm2, %v3276_v5  ;;  %2981 = vmatprep.mubr.msk.bf16.mxu1 %vm867_vm3, %v3277_v6 }
  0x80   :  { %3047 = vmatprep.mubr.msk.bf16.mxu0 %vm317_vm2, %v3278_v7  ;;  %v4060_v7 = vld [vmem:[%s4871_s6] ss:$0 sm:$0xff] }
  0x86   :  { %2982 = vmatmul.mubr.msk.bf16.vlgmr.msra.gmra.mrb[32].mxu1 %vm867_vm3, %v3279_v8 }
  0x87   :  { %3048 = vmatmul.mubr.msk.bf16.gmra.mrb[32].mxu0 %vm317_vm2, %v3280_v9  ;;  %2985 = vmatprep.mubr.msk.bf16.mxu1 %vm867_vm3, %v3281_v10  ;;  %v4065_v10 = vld [vmem:[%s4871_s6 + $0x1] ss:$0 sm:$0xff] }
  0x88   :  { %3051 = vmatprep.mubr.msk.bf16.mxu0 %vm317_vm2, %v3282_v11 }
  0x8e   :  { %2986 = vmatmul.mubr.msk.bf16.gmra.mrb[36].mxu1 %vm867_vm3, %v3283_v12 }
  0x8f   :  { %3052 = vmatmul.mubr.msk.bf16.gmra.mrb[36].mxu0 %vm317_vm2, %v3284_v13  ;;  %2989 = vmatprep.mubr.msk.bf16.mxu1 %vm867_vm3, %v3285_v14 }
  0x90   :  { %3055 = vmatprep.mubr.msk.bf16.mxu0 %vm317_vm2, %v3286_v15 }
  0x96   :  { %2990 = vmatmul.mubr.msk.bf16.gmra.mrb[40].mxu1 %vm867_vm3, %v3287_v16 }
  0x97   :  { %3056 = vmatmul.mubr.msk.bf16.gmra.mrb[40].mxu0 %vm317_vm2, %v3288_v17  ;;  %2993 = vmatprep.mubr.msk.bf16.mxu1 %vm867_vm3, %v3289_v18 }
  0x98   :  { %3059 = vmatprep.mubr.msk.bf16.mxu0 %vm317_vm2, %v3290_v19 }
  0x9e   :  { %2994 = vmatmul.mubr.msk.bf16.gmra.mrb[44].mxu1 %vm867_vm3, %v3291_v20 }
  0x9f   :  { %3060 = vmatmul.mubr.msk.bf16.gmra.mrb[44].mxu0 %vm317_vm2, %v3292_v21  ;;  %2997 = vmatprep.mubr.msk.bf16.mxu1 %vm867_vm3, %v3293_v22 }
  0xa0   :  { %3063 = vmatprep.mubr.msk.bf16.mxu0 %vm317_vm2, %v3294_v23 }
  0xa6   :  { %2998 = vmatmul.mubr.msk.bf16.gmra.mrb[48].mxu1 %vm867_vm3, %v3295_v24 }
  0xa7   :  { %3064 = vmatmul.mubr.msk.bf16.gmra.mrb[48].mxu0 %vm317_vm2, %v3296_v25  ;;  %3001 = vmatprep.mubr.msk.bf16.mxu1 %vm867_vm3, %v3297_v26 }
  0xa8   :  { %3067 = vmatprep.mubr.msk.bf16.mxu0 %vm317_vm2, %v3298_v27 }
  0xae   :  { %3002 = vmatmul.mubr.msk.bf16.gmra.mrb[52].mxu1 %vm867_vm3, %v3299_v28 }
  0xaf   :  { %3068 = vmatmul.mubr.msk.bf16.gmra.mrb[52].mxu0 %vm317_vm2, %v3300_v29  ;;  %3005 = vmatprep.mubr.msk.bf16.mxu1 %vm867_vm3, %v3301_v30 }
  0xb0   :  { %3071 = vmatprep.mubr.msk.bf16.mxu0 %vm317_vm2, %v3302_v31 }
  0xb6   :  { %3006 = vmatmul.mubr.msk.bf16.gmra.mrb[56].mxu1 %vm867_vm3, %v3303_v32 }
  0xb7   :  { %3072 = vmatmul.mubr.msk.bf16.gmra.mrb[56].mxu0 %vm317_vm2, %v3304_v33  ;;  %3009 = vmatprep.mubr.msk.bf16.mxu1 %vm867_vm3, %v3305_v34 }
  0xb8   :  { %3075 = vmatprep.mubr.msk.bf16.mxu0 %vm317_vm2, %v3306_v35 }
  0xbe   :  { %3010 = vmatmul.mubr.msk.bf16.gmra.mrb[60].mxu1 %vm867_vm3, %v3307_v36 }
  0xbf   :  { %3076 = vmatmul.mubr.msk.bf16.gmra.mrb[60].mxu0 %vm317_vm2, %v3308_v37 }
  0xd9   :  { %v2885_v38 = vpop.f32.mrb[0].mxu1 }
  0xda   :  { %v452_v39 = vpop.f32.mrb[1].mxu1 }
  0xdb   :  { %v2886_v40 = vpop.f32.mrb[2].mxu1 }
  0xdc   :  { %v455_v41 = vpop.f32.mrb[3].mxu1 }
  0xe1   :  { %v2889_v42 = vpop.f32.mrb[4].mxu1 }
  0xe2   :  { %v468_v43 = vpop.f32.mrb[5].mxu1 }
  0xe3   :  { %v2890_v44 = vpop.f32.mrb[6].mxu1 }
  0xe4   :  { %v4007_v45 = vpop.f32.mrb[7].mxu1 }
  0xe9   :  { %v4009_v46 = vpop.f32.mrb[8].mxu1 }
  0xea   :  { %v4011_v47 = vpop.f32.mrb[9].mxu1 }
  0xeb   :  { %v4013_v48 = vpop.f32.mrb[10].mxu1 }
  0xec   :  { %v4015_v49 = vpop.f32.mrb[11].mxu1 }
  0xf1   :  { %v4017_v50 = vpop.f32.mrb[12].mxu1 }
  0xf2   :  { %v4019_v51 = vpop.f32.mrb[13].mxu1 }
  0xf3   :  { %v4021_v52 = vpop.f32.mrb[14].mxu1 }
  0xf4   :  { %v4023_v53 = vpop.f32.mrb[15].mxu1 }
  0xf9   :  { %v4025_v54 = vpop.f32.mrb[16].mxu1 }
  0xfa   :  { %v4027_v55 = vpop.f32.mrb[17].mxu1 }
  0xfb   :  { %v4029_v56 = vpop.f32.mrb[18].mxu1 }
  0xfc   :  { %v4031_v57 = vpop.f32.mrb[19].mxu1 }
 0x101   :  { %v4033_v58 = vpop.f32.mrb[20].mxu1 }
 0x102   :  { %v4035_v59 = vpop.f32.mrb[21].mxu1 }
 0x103   :  { %v4037_v60 = vpop.f32.mrb[22].mxu1 }
 0x104   :  { %v4039_v61 = vpop.f32.mrb[23].mxu1 }
 0x109   :  { %v4041_v62 = vpop.f32.mrb[24].mxu1 }
 0x10a   :  { %v4043_v63 = vpop.f32.mrb[25].mxu1 }
 0x10b   :  { %v4045_v0 = vpop.f32.mrb[26].mxu1 }
 0x10c   :  { %v4047_v1 = vpop.f32.mrb[27].mxu1 }
 0x111   :  { %v4049_v2 = vpop.f32.mrb[28].mxu1 }
 0x112   :  { %v4051_v3 = vpop.f32.mrb[29].mxu1 }
 0x113   :  { %v4053_v4 = vpop.f32.mrb[30].mxu1 }
 0x114   :  { %v4055_v5 = vpop.f32.mrb[31].mxu1 }
 0x11a   :  { %v3017_v6 = vpop.f32.mrb[0].mxu0 }
 0x11b   :  { %v3081_v8 = vadd.f32 %v3017_v6, %v2885_v38  ;;  %v1615_v9 = vpop.f32.mrb[1].mxu0 }
 0x11c   :  { %v3082_v11 = vadd.f32 %v1615_v9, %v452_v39  ;;  %v3018_v12 = vpop.f32.mrb[2].mxu0 }
 0x11d   :  { %v1941_v13 = vmul.f32 %v3081_v8, %v4060_v7  ;;  %v3083_v14 = vadd.f32 %v3018_v12, %v2886_v40  ;;  %v1618_v15 = vpop.f32.mrb[3].mxu0 }
 0x11e   :  { %v1939_v16 = vmul.f32 %v3082_v11, %v4060_v7  ;;  %v3084_v17 = vadd.f32 %v1618_v15, %v455_v41 }
 0x11f   :  { %v4070_v18 = vadd.f32 %v4065_v10, %v1941_v13  ;;  %v1942_v19 = vmul.f32 %v3083_v14, %v4060_v7 }
 0x120   :  { %v4074_v20 = vadd.f32 %v4065_v10, %v1939_v16  ;;  %v1940_v21 = vmul.f32 %v3084_v17, %v4060_v7 }
 0x121   :  { %v2074_v22 = vsub.f32 0.0, %v4070_v18  ;;  %v4079_v23 = vadd.f32 %v4065_v10, %v1942_v19 }
 0x122   :  { %v2072_v24 = vsub.f32 0.0, %v4074_v20  ;;  %v4083_v25 = vadd.f32 %v4065_v10, %v1940_v21  ;;  %v3021_v26 = vpop.f32.mrb[4].mxu0 }
 0x123   :  { %v2140_v27 = vmul.f32 1.442695, %v2074_v22  ;;  %v2075_v28 = vsub.f32 0.0, %v4079_v23  ;;  %v3085_v29 = vadd.f32 %v3021_v26, %v2889_v42  ;;  %v1631_v30 = vpop.f32.mrb[5].mxu0 }
 0x124   :  { %v2136_v31 = vmul.f32 1.442695, %v2072_v24  ;;  %v2073_v32 = vsub.f32 0.0, %v4083_v25  ;;  %v3086_v33 = vadd.f32 %v1631_v30, %v468_v43  ;;  %v3022_v34 = vpop.f32.mrb[6].mxu0 }
 0x125   :  { %3309 = vpow2.f32 %v2140_v27  ;;  %v2142_v35 = vmul.f32 1.442695, %v2075_v28  ;;  %v1945_v36 = vmul.f32 %v3085_v29, %v4060_v7  ;;  %v3087_v37 = vadd.f32 %v3022_v34, %v2890_v44  ;;  %v1634_v38 = vpop.f32.mrb[7].mxu0 }
 0x126   :  { %3311 = vpow2.f32 %v2136_v31  ;;  %v2138_v39 = vmul.f32 1.442695, %v2073_v32  ;;  %v1943_v40 = vmul.f32 %v3086_v33, %v4060_v7  ;;  %v3088_v41 = vadd.f32 %v1634_v38, %v4007_v45 }
 0x127   :  { %3313 = vpow2.f32 %v2142_v35  ;;  %v4091_v42 = vadd.f32 %v4065_v10, %v1945_v36  ;;  %v1946_v6 = vmul.f32 %v3087_v37, %v4060_v7 }
 0x128   :  { %3315 = vpow2.f32 %v2138_v39  ;;  %v4095_v43 = vadd.f32 %v4065_v10, %v1943_v40  ;;  %v1944_v8 = vmul.f32 %v3088_v41, %v4060_v7 }
 0x129   :  { %v2078_v44 = vsub.f32 0.0, %v4091_v42  ;;  %v4100_v9 = vadd.f32 %v4065_v10, %v1946_v6 }
 0x12a   :  { %v2076_v11 = vsub.f32 0.0, %v4095_v43  ;;  %v4104_v45 = vadd.f32 %v4065_v10, %v1944_v8  ;;  %v3025_v12 = vpop.f32.mrb[8].mxu0 }
 0x12b   :  { %v2148_v13 = vmul.f32 1.442695, %v2078_v44  ;;  %v2079_v14 = vsub.f32 0.0, %v4100_v9  ;;  %v3089_v15 = vadd.f32 %v3025_v12, %v4009_v46  ;;  %v1647_v16 = vpop.f32.mrb[9].mxu0 }
 0x12c   :  { %v2144_v17 = vmul.f32 1.442695, %v2076_v11  ;;  %v2077_v19 = vsub.f32 0.0, %v4104_v45  ;;  %v3090_v21 = vadd.f32 %v1647_v16, %v4011_v47  ;;  %v3026_v22 = vpop.f32.mrb[10].mxu0 }
 0x12d   :  { %3317 = vpow2.f32 %v2148_v13  ;;  %v2150_v24 = vmul.f32 1.442695, %v2079_v14  ;;  %v1949_v26 = vmul.f32 %v3089_v15, %v4060_v7  ;;  %v3091_v27 = vadd.f32 %v3026_v22, %v4013_v48  ;;  %v1650_v28 = vpop.f32.mrb[11].mxu0 }
 0x12e   :  { %3319 = vpow2.f32 %v2144_v17  ;;  %v2146_v29 = vmul.f32 1.442695, %v2077_v19  ;;  %v1947_v30 = vmul.f32 %v3090_v21, %v4060_v7  ;;  %v3092_v46 = vadd.f32 %v1650_v28, %v4015_v49 }
 0x12f   :  { %v3310_v31 = vpop.eup %3309  ;;  %3321 = vpow2.f32 %v2150_v24  ;;  %v4115_v32 = vadd.f32 %v4065_v10, %v1949_v26  ;;  %v1950_v47 = vmul.f32 %v3091_v27, %v4060_v7 }
 0x130   :  { %v3312_v33 = vpop.eup %3311  ;;  %v2266_v34 = vadd.f32 1.0, %v3310_v31  ;;  %3323 = vpow2.f32 %v2146_v29  ;;  %v4119_v35 = vadd.f32 %v4065_v10, %v1947_v30  ;;  %v1948_v48 = vmul.f32 %v3092_v46, %v4060_v7 }
 0x131   :  { %v3314_v36 = vpop.eup %3313  ;;  %v2264_v37 = vadd.f32 1.0, %v3312_v33  ;;  %v2082_v38 = vsub.f32 0.0, %v4115_v32  ;;  %v4124_v49 = vadd.f32 %v4065_v10, %v1950_v47 }
 0x132   :  { %v3316_v39 = vpop.eup %3315  ;;  %3325 = vrcp.f32 %v2266_v34  ;;  %v2267_v40 = vadd.f32 1.0, %v3314_v36  ;;  %v2080_v41 = vsub.f32 0.0, %v4119_v35  ;;  %v4128_v6 = vadd.f32 %v4065_v10, %v1948_v48  ;;  %v3029_v8 = vpop.f32.mrb[12].mxu0 }
 0x133   :  { %3327 = vrcp.f32 %v2264_v37  ;;  %v2265_v44 = vadd.f32 1.0, %v3316_v39  ;;  %v2156_v11 = vmul.f32 1.442695, %v2082_v38  ;;  %v2083_v12 = vsub.f32 0.0, %v4124_v49  ;;  %v1663_v13 = vpop.f32.mrb[13].mxu0 }
 0x134   :  { %3329 = vrcp.f32 %v2267_v40  ;;  %v2152_v14 = vmul.f32 1.442695, %v2080_v41  ;;  %v2081_v15 = vsub.f32 0.0, %v4128_v6  ;;  %v3093_v16 = vadd.f32 %v3029_v8, %v4017_v50  ;;  %v3030_v17 = vpop.f32.mrb[14].mxu0 }
 0x135   :  { %3331 = vrcp.f32 %v2265_v44  ;;  %v2158_v19 = vmul.f32 1.442695, %v2083_v12  ;;  %v3094_v21 = vadd.f32 %v1663_v13, %v4019_v51  ;;  %v3095_v22 = vadd.f32 %v3030_v17, %v4021_v52  ;;  %v1666_v24 = vpop.f32.mrb[15].mxu0 }
 0x136   :  { %3333 = vpow2.f32 %v2156_v11  ;;  %v2154_v26 = vmul.f32 1.442695, %v2081_v15  ;;  %v1953_v27 = vmul.f32 %v3093_v16, %v4060_v7  ;;  %v3096_v28 = vadd.f32 %v1666_v24, %v4023_v53 }
 0x137   :  { %v3318_v29 = vpop.eup %3317  ;;  %3335 = vpow2.f32 %v2152_v14  ;;  %v1951_v30 = vmul.f32 %v3094_v21, %v4060_v7  ;;  %v1954_v50 = vmul.f32 %v3095_v22, %v4060_v7 }
 0x138   :  { %v3320_v46 = vpop.eup %3319  ;;  %v2270_v31 = vadd.f32 1.0, %v3318_v29  ;;  %3337 = vpow2.f32 %v2158_v19  ;;  %v4140_v51 = vadd.f32 %v4065_v10, %v1953_v27  ;;  %v1952_v52 = vmul.f32 %v3096_v28, %v4060_v7 }
 0x139   :  { %v3322_v47 = vpop.eup %3321  ;;  %v2268_v33 = vadd.f32 1.0, %v3320_v46  ;;  %3339 = vpow2.f32 %v2154_v26  ;;  %v4144_v34 = vadd.f32 %v4065_v10, %v1951_v30  ;;  %v4147_v53 = vadd.f32 %v4065_v10, %v1954_v50 }
 0x13a   :  { %v3324_v48 = vpop.eup %3323  ;;  %3341 = vrcp.f32 %v2270_v31  ;;  %v2271_v36 = vadd.f32 1.0, %v3322_v47  ;;  %v2086_v37 = vsub.f32 0.0, %v4140_v51  ;;  %v4151_v38 = vadd.f32 %v4065_v10, %v1952_v52  ;;  %v3033_v39 = vpop.f32.mrb[16].mxu0 }
 0x13b   :  { %3343 = vrcp.f32 %v2268_v33  ;;  %v2269_v40 = vadd.f32 1.0, %v3324_v48  ;;  %v2084_v41 = vsub.f32 0.0, %v4144_v34  ;;  %v2087_v8 = vsub.f32 0.0, %v4147_v53  ;;  %v1679_v44 = vpop.f32.mrb[17].mxu0 }
 0x13c   :  { %v3326_v11 = vpop.eup %3325  ;;  %3345 = vrcp.f32 %v2271_v36  ;;  %v2164_v12 = vmul.f32 1.442695, %v2086_v37  ;;  %v2085_v13 = vsub.f32 0.0, %v4151_v38  ;;  %v3097_v14 = vadd.f32 %v3033_v39, %v4025_v54  ;;  %v3034_v15 = vpop.f32.mrb[18].mxu0 }
 0x13d   :  { %v3328_v16 = vpop.eup %3327  ;;  %v2458_v17 = vmul.f32 %v3326_v11, %v4070_v18  ;;  %3347 = vrcp.f32 %v2269_v40  ;;  %v2160_v19 = vmul.f32 1.442695, %v2084_v41  ;;  %v2166_v21 = vmul.f32 1.442695, %v2087_v8  ;;  %v1682_v22 = vpop.f32.mrb[19].mxu0 }
 0x13e   :  { %v3330_v24 = vpop.eup %3329  ;;  %v2456_v26 = vmul.f32 %v3328_v16, %v4074_v20  ;;  %3349 = vpow2.f32 %v2164_v12  ;;  %v2162_v27 = vmul.f32 1.442695, %v2085_v13  ;;  %v1957_v28 = vmul.f32 %v3097_v14, %v4060_v7 }
 0x13f   :  { %v3332_v29 = vpop.eup %3331  ;;  %2522 = vst.msk [vmem:[%s4872_s7 + $0x10] sm:$0xff] %vm867_vm3, %v2458_v17  ;;  %v2459_v54 = vmul.f32 %v3330_v24, %v4079_v23  ;;  %3351 = vpow2.f32 %v2160_v19  ;;  %v3098_v18 = vadd.f32 %v1679_v44, %v4027_v55  ;;  %v3099_v30 = vadd.f32 %v3034_v15, %v4029_v56 }
 0x140   :  { %v3334_v50 = vpop.eup %3333  ;;  %2520 = vst.msk [vmem:[%s4872_s7] sm:$0xff] %vm867_vm3, %v2456_v26  ;;  %v2457_v20 = vmul.f32 %v3332_v29, %v4083_v25  ;;  %3353 = vpow2.f32 %v2166_v21  ;;  %v4173_v46 = vadd.f32 %v4065_v10, %v1957_v28  ;;  %v3100_v31 = vadd.f32 %v1682_v22, %v4031_v57 }
 0x141   :  { %v3336_v23 = vpop.eup %3335  ;;  %2523 = vst.msk [vmem:[%s4872_s7 + $0x18] sm:$0xff] %vm867_vm3, %v2459_v54  ;;  %v2274_v55 = vadd.f32 1.0, %v3334_v50  ;;  %3355 = vpow2.f32 %v2162_v27  ;;  %v1955_v56 = vmul.f32 %v3098_v18, %v4060_v7  ;;  %v1958_v52 = vmul.f32 %v3099_v30, %v4060_v7 }
 0x142   :  { %v3338_v47 = vpop.eup %3337  ;;  %2521 = vst.msk [vmem:[%s4872_s7 + $0x8] sm:$0xff] %vm867_vm3, %v2457_v20  ;;  %v2272_v25 = vadd.f32 1.0, %v3336_v23  ;;  %v2090_v57 = vsub.f32 0.0, %v4173_v46  ;;  %v1956_v33 = vmul.f32 %v3100_v31, %v4060_v7  ;;  %v3037_v48 = vpop.f32.mrb[20].mxu0 }
 0x143   :  { %v3340_v36 = vpop.eup %3339  ;;  %3357 = vrcp.f32 %v2274_v55  ;;  %v2275_v37 = vadd.f32 1.0, %v3338_v47  ;;  %v4189_v39 = vadd.f32 %v4065_v10, %v1955_v56  ;;  %v4192_v40 = vadd.f32 %v4065_v10, %v1958_v52  ;;  %v1695_v41 = vpop.f32.mrb[21].mxu0 }
 0x144   :  { %v3342_v8 = vpop.eup %3341  ;;  %3359 = vrcp.f32 %v2272_v25  ;;  %v2273_v44 = vadd.f32 1.0, %v3340_v36  ;;  %v2172_v11 = vmul.f32 1.442695, %v2090_v57  ;;  %v4195_v12 = vadd.f32 %v4065_v10, %v1956_v33  ;;  %v3038_v13 = vpop.f32.mrb[22].mxu0 }
 0x145   :  { %v3344_v14 = vpop.eup %3343  ;;  %v2462_v15 = vmul.f32 %v3342_v8, %v4091_v42  ;;  %3361 = vrcp.f32 %v2275_v37  ;;  %v2088_v16 = vsub.f32 0.0, %v4189_v39  ;;  %v2091_v17 = vsub.f32 0.0, %v4192_v40  ;;  %v1698_v19 = vpop.f32.mrb[23].mxu0 }
 0x146   :  { %v3346_v21 = vpop.eup %3345  ;;  %v2460_v22 = vmul.f32 %v3344_v14, %v4095_v43  ;;  %3363 = vrcp.f32 %v2273_v44  ;;  %v2089_v24 = vsub.f32 0.0, %v4195_v12  ;;  %v3101_v26 = vadd.f32 %v3037_v48, %v4033_v58 }
 0x147   :  { %v3348_v27 = vpop.eup %3347  ;;  %2526 = vst.msk [vmem:[%s4872_s7 + $0x30] sm:$0xff] %vm867_vm3, %v2462_v15  ;;  %v2463_v42 = vmul.f32 %v3346_v21, %v4100_v9  ;;  %3365 = vpow2.f32 %v2172_v11  ;;  %v2168_v28 = vmul.f32 1.442695, %v2088_v16  ;;  %v2174_v29 = vmul.f32 1.442695, %v2091_v17 }
 0x148   :  { %v3350_v54 = vpop.eup %3349  ;;  %2524 = vst.msk [vmem:[%s4872_s7 + $0x20] sm:$0xff] %vm867_vm3, %v2460_v22  ;;  %v2461_v43 = vmul.f32 %v3348_v27, %v4104_v45  ;;  %v2170_v58 = vmul.f32 1.442695, %v2089_v24  ;;  %v1961_v18 = vmul.f32 %v3101_v26, %v4060_v7  ;;  %v3102_v30 = vadd.f32 %v1695_v41, %v4035_v59 }
 0x149   :  { %v3352_v50 = vpop.eup %3351  ;;  %2527 = vst.msk [vmem:[%s4872_s7 + $0x38] sm:$0xff] %vm867_vm3, %v2463_v42  ;;  %v2278_v9 = vadd.f32 1.0, %v3350_v54  ;;  %3367 = vpow2.f32 %v2168_v28  ;;  %v3103_v20 = vadd.f32 %v3038_v13, %v4037_v60  ;;  %v3104_v31 = vadd.f32 %v1698_v19, %v4039_v61 }
 0x14a   :  { %v3354_v23 = vpop.eup %3353  ;;  %2525 = vst.msk [vmem:[%s4872_s7 + $0x28] sm:$0xff] %vm867_vm3, %v2461_v43  ;;  %v2276_v45 = vadd.f32 1.0, %v3352_v50  ;;  %3369 = vpow2.f32 %v2174_v29  ;;  %v4226_v59 = vadd.f32 %v4065_v10, %v1961_v18  ;;  %v1959_v55 = vmul.f32 %v3102_v30, %v4060_v7  ;;  %v3041_v56 = vpop.f32.mrb[24].mxu0 }
 0x14b   :  { %v3356_v52 = vpop.eup %3355  ;;  %3371 = vrcp.f32 %v2278_v9  ;;  %v2279_v47 = vadd.f32 1.0, %v3354_v23  ;;  %v1962_v60 = vmul.f32 %v3103_v20, %v4060_v7  ;;  %v1960_v61 = vmul.f32 %v3104_v31, %v4060_v7  ;;  %v1711_v25 = vpop.f32.mrb[25].mxu0 }
 0x14c   :  { %3373 = vrcp.f32 %v2276_v45  ;;  %v2277_v57 = vadd.f32 1.0, %v3356_v52  ;;  %v2094_v33 = vsub.f32 0.0, %v4226_v59  ;;  %v4233_v48 = vadd.f32 %v4065_v10, %v1959_v55  ;;  %v3042_v36 = vpop.f32.mrb[26].mxu0 }
 0x14d   :  { %v3358_v37 = vpop.eup %3357  ;;  %3375 = vrcp.f32 %v2279_v47  ;;  %v4236_v41 = vadd.f32 %v4065_v10, %v1962_v60  ;;  %v4239_v8 = vadd.f32 %v4065_v10, %v1960_v61  ;;  %v3105_v44 = vadd.f32 %v3041_v56, %v4041_v62  ;;  %v1714_v11 = vpop.f32.mrb[27].mxu0 }
 0x14e   :  { %v3360_v13 = vpop.eup %3359  ;;  %v2466_v14 = vmul.f32 %v3358_v37, %v4115_v32  ;;  %3377 = vrcp.f32 %v2277_v57  ;;  %v2180_v15 = vmul.f32 1.442695, %v2094_v33  ;;  %v2092_v16 = vsub.f32 0.0, %v4233_v48 }
 0x14f   :  { %v3362_v17 = vpop.eup %3361  ;;  %v2464_v19 = vmul.f32 %v3360_v13, %v4119_v35  ;;  %3379 = vpow2.f32 %v2170_v58  ;;  %v2095_v21 = vsub.f32 0.0, %v4236_v41  ;;  %v2093_v22 = vsub.f32 0.0, %v4239_v8 }
 0x150   :  { %v3364_v24 = vpop.eup %3363  ;;  %2530 = vst.msk [vmem:[%s4872_s7 + $0x50] sm:$0xff] %vm867_vm3, %v2466_v14  ;;  %v2467_v62 = vmul.f32 %v3362_v17, %v4124_v49  ;;  %3381 = vpow2.f32 %v2180_v15  ;;  %v2176_v32 = vmul.f32 1.442695, %v2092_v16  ;;  %v1965_v26 = vmul.f32 %v3105_v44, %v4060_v7 }
 0x151   :  { %v3366_v27 = vpop.eup %3365  ;;  %2528 = vst.msk [vmem:[%s4872_s7 + $0x40] sm:$0xff] %vm867_vm3, %v2464_v19  ;;  %v2465_v35 = vmul.f32 %v3364_v24, %v4128_v6  ;;  %v2182_v42 = vmul.f32 1.442695, %v2095_v21  ;;  %v2178_v28 = vmul.f32 1.442695, %v2093_v22  ;;  %v3106_v29 = vadd.f32 %v1711_v25, %v4043_v63 }
 0x152   :  { %2531 = vst.msk [vmem:[%s4872_s7 + $0x58] sm:$0xff] %vm867_vm3, %v2467_v62  ;;  %v2282_v49 = vadd.f32 1.0, %v3366_v27  ;;  %3383 = vpow2.f32 %v2176_v32  ;;  %v4264_v54 = vadd.f32 %v4065_v10, %v1965_v26  ;;  %v3107_v43 = vadd.f32 %v3042_v36, %v4045_v0  ;;  %v3045_v58 = vpop.f32.mrb[28].mxu0 }
 0x153   :  { %v3368_v18 = vpop.eup %3367  ;;  %2529 = vst.msk [vmem:[%s4872_s7 + $0x48] sm:$0xff] %vm867_vm3, %v2465_v35  ;;  %3385 = vpow2.f32 %v2182_v42  ;;  %v1963_v63 = vmul.f32 %v3106_v29, %v4060_v7  ;;  %v3108_v6 = vadd.f32 %v1714_v11, %v4047_v1  ;;  %v3109_v30 = vadd.f32 %v3045_v58, %v4049_v2  ;;  %v1727_v50 = vpop.f32.mrb[29].mxu0 }
 0x154   :  { %v3370_v9 = vpop.eup %3369  ;;  %3387 = vrcp.f32 %v2282_v49  ;;  %v2280_v20 = vadd.f32 1.0, %v3368_v18  ;;  %v2098_v0 = vsub.f32 0.0, %v4264_v54  ;;  %v1966_v31 = vmul.f32 %v3107_v43, %v4060_v7  ;;  %v3046_v23 = vpop.f32.mrb[30].mxu0 }
 0x155   :  { %v3372_v45 = vpop.eup %3371  ;;  %v2283_v55 = vadd.f32 1.0, %v3370_v9  ;;  %3389 = vpow2.f32 %v2178_v28  ;;  %v4277_v56 = vadd.f32 %v4065_v10, %v1963_v63  ;;  %v1964_v52 = vmul.f32 %v3108_v6, %v4060_v7  ;;  %v1730_v1 = vpop.f32.mrb[31].mxu0 }
 0x156   :  { %v3374_v47 = vpop.eup %3373  ;;  %v2470_v2 = vmul.f32 %v3372_v45, %v4140_v51  ;;  %3391 = vrcp.f32 %v2280_v20  ;;  %v2188_v60 = vmul.f32 1.442695, %v2098_v0  ;;  %v4282_v61 = vadd.f32 %v4065_v10, %v1966_v31 }
 0x157   :  { %v3376_v25 = vpop.eup %3375  ;;  %v2468_v57 = vmul.f32 %v3374_v47, %v4144_v34  ;;  %3393 = vrcp.f32 %v2283_v55  ;;  %v2096_v33 = vsub.f32 0.0, %v4277_v56  ;;  %v4287_v36 = vadd.f32 %v4065_v10, %v1964_v52 }
 0x158   :  { %v3378_v37 = vpop.eup %3377  ;;  %2534 = vst.msk [vmem:[%s4872_s7 + $0x70] sm:$0xff] %vm867_vm3, %v2470_v2  ;;  %v2471_v51 = vmul.f32 %v3376_v25, %v4147_v53  ;;  %3395 = vpow2.f32 %v2188_v60  ;;  %v2099_v44 = vsub.f32 0.0, %v4282_v61  ;;  %v1969_v11 = vmul.f32 %v3109_v30, %v4060_v7 }
 0x159   :  { %v3380_v34 = vpop.eup %3379  ;;  %2532 = vst.msk [vmem:[%s4872_s7 + $0x60] sm:$0xff] %vm867_vm3, %v2468_v57  ;;  %v2469_v13 = vmul.f32 %v3378_v37, %v4151_v38  ;;  %v2184_v14 = vmul.f32 1.442695, %v2096_v33  ;;  %v2097_v15 = vsub.f32 0.0, %v4287_v36  ;;  %v3110_v16 = vadd.f32 %v1727_v50, %v4051_v3  ;;  %v2983_v17 = vpop.f32.mrb[32].mxu1 }
 0x15a   :  { %v3382_v53 = vpop.eup %3381  ;;  %2535 = vst.msk [vmem:[%s4872_s7 + $0x78] sm:$0xff] %vm867_vm3, %v2471_v51  ;;  %v2281_v19 = vadd.f32 1.0, %v3380_v34  ;;  %v2190_v21 = vmul.f32 1.442695, %v2099_v44  ;;  %v4308_v22 = vadd.f32 %v4065_v10, %v1969_v11  ;;  %v3111_v24 = vadd.f32 %v3046_v23, %v4053_v4  ;;  %v3049_v38 = vpop.f32.mrb[32].mxu0 }
 0x15b   :  { %v1130_v62 = vpop.f32.mrb[33].mxu1  ;;  %2533 = vst.msk [vmem:[%s4872_s7 + $0x68] sm:$0xff] %vm867_vm3, %v2469_v13  ;;  %v2286_v3 = vadd.f32 1.0, %v3382_v53  ;;  %3397 = vpow2.f32 %v2184_v14  ;;  %v2186_v32 = vmul.f32 1.442695, %v2097_v15  ;;  %v1967_v26 = vmul.f32 %v3110_v16, %v4060_v7  ;;  %v1743_v27 = vpop.f32.mrb[33].mxu0 }
 0x15c   :  { %v2984_v35 = vpop.f32.mrb[34].mxu1  ;;  %v3384_v42 = vpop.eup %3383  ;;  %3399 = vrcp.f32 %v2281_v19  ;;  %v2102_v28 = vsub.f32 0.0, %v4308_v22  ;;  %v1970_v4 = vmul.f32 %v3111_v24, %v4060_v7  ;;  %v3112_v29 = vadd.f32 %v1730_v1, %v4055_v5 }
 0x15d   :  { %v3050_v49 = vpop.f32.mrb[34].mxu0  ;;  %v1133_v43 = vpop.f32.mrb[35].mxu1  ;;  %3401 = vrcp.f32 %v2286_v3  ;;  %v2284_v18 = vadd.f32 1.0, %v3384_v42  ;;  %v4320_v63 = vadd.f32 %v4065_v10, %v1967_v26  ;;  %v3113_v6 = vadd.f32 %v3049_v38, %v2983_v17 }
 0x15e   :  { %v3386_v58 = vpop.eup %3385  ;;  %v1746_v30 = vpop.f32.mrb[35].mxu0  ;;  %3403 = vpow2.f32 %v2190_v21  ;;  %v2196_v20 = vmul.f32 1.442695, %v2102_v28  ;;  %v4323_v0 = vadd.f32 %v4065_v10, %v1970_v4  ;;  %v1968_v45 = vmul.f32 %v3112_v29, %v4060_v7 }
 0x15f   :  { %v3388_v50 = vpop.eup %3387  ;;  %v2287_v9 = vadd.f32 1.0, %v3386_v58  ;;  %3405 = vrcp.f32 %v2284_v18  ;;  %v2100_v23 = vsub.f32 0.0, %v4320_v63  ;;  %v1973_v47 = vmul.f32 %v3113_v6, %v4060_v7 }
 0x160   :  { %v3390_v31 = vpop.eup %3389  ;;  %v2474_v5 = vmul.f32 %v3388_v50, %v4173_v46  ;;  %v2103_v1 = vsub.f32 0.0, %v4323_v0  ;;  %v4336_v25 = vadd.f32 %v4065_v10, %v1968_v45  ;;  %v3114_v14 = vadd.f32 %v1743_v27, %v1130_v62 }
 0x161   :  { %v3392_v55 = vpop.eup %3391  ;;  %3407 = vrcp.f32 %v2287_v9  ;;  %v2285_v52 = vadd.f32 1.0, %v3390_v31  ;;  %v2192_v60 = vmul.f32 1.442695, %v2100_v23  ;;  %v2987_v57 = vpop.f32.mrb[36].mxu1  ;;  %v4340_v44 = vadd.f32 %v4065_v10, %v1973_v47 }
 0x162   :  { %v3394_v2 = vpop.eup %3393  ;;  %2538 = vst.msk [vmem:[%s4872_s7 + $0x90] sm:$0xff] %vm867_vm3, %v2474_v5  ;;  %v2472_v46 = vmul.f32 %v3392_v55, %v4189_v39  ;;  %3409 = vpow2.f32 %v2186_v32  ;;  %v2198_v51 = vmul.f32 1.442695, %v2103_v1  ;;  %v3053_v11 = vpop.f32.mrb[36].mxu0  ;;  %v2101_v13 = vsub.f32 0.0, %v4336_v25 }
 0x163   :  { %v3396_v33 = vpop.eup %3395  ;;  %v2475_v37 = vmul.f32 %v3394_v2, %v4192_v40  ;;  %3411 = vrcp.f32 %v2285_v52  ;;  %v1146_v34 = vpop.f32.mrb[37].mxu1  ;;  %v2106_v40 = vsub.f32 0.0, %v4340_v44  ;;  %v3115_v17 = vadd.f32 %v3050_v49, %v2984_v35 }
 0x164   :  { %2536 = vst.msk [vmem:[%s4872_s7 + $0x80] sm:$0xff] %vm867_vm3, %v2472_v46  ;;  %v2290_v39 = vadd.f32 1.0, %v3396_v33  ;;  %3413 = vpow2.f32 %v2196_v20  ;;  %v1759_v15 = vpop.f32.mrb[37].mxu0  ;;  %v4347_v16 = vpop.f32.mrb[38].mxu1  ;;  %v3116_v53 = vadd.f32 %v1746_v30, %v1133_v43  ;;  %v2194_v38 = vmul.f32 1.442695, %v2101_v13 }
 0x165   :  { %2539 = vst.msk [vmem:[%s4872_s7 + $0x98] sm:$0xff] %vm867_vm3, %v2475_v37  ;;  %3415 = vpow2.f32 %v2192_v60  ;;  %v3054_v19 = vpop.f32.mrb[38].mxu0  ;;  %v4354_v21 = vpop.f32.mrb[39].mxu1  ;;  %v1971_v62 = vmul.f32 %v3114_v14, %v4060_v7  ;;  %v3117_v3 = vadd.f32 %v3053_v11, %v2987_v57  ;;  %v2204_v42 = vmul.f32 1.442695, %v2106_v40 }
 0x166   :  { %v3398_v24 = vpop.eup %3397  ;;  %3417 = vrcp.f32 %v2290_v39  ;;  %v4357_v32 = vpop.f32.mrb[39].mxu0  ;;  %v1974_v28 = vmul.f32 %v3115_v17, %v4060_v7  ;;  %v1972_v49 = vmul.f32 %v3116_v53, %v4060_v7  ;;  %v3118_v45 = vadd.f32 %v1759_v15, %v1146_v34 }
 0x167   :  { %v3400_v26 = vpop.eup %3399  ;;  %v2288_v27 = vadd.f32 1.0, %v3398_v24  ;;  %3419 = vpow2.f32 %v2198_v51  ;;  %v4362_v29 = vadd.f32 %v4065_v10, %v1971_v62  ;;  %v1977_v6 = vmul.f32 %v3117_v3, %v4060_v7 }
 0x168   :  { %v3402_v4 = vpop.eup %3401  ;;  %v2473_v35 = vmul.f32 %v3400_v26, %v4195_v12  ;;  %3421 = vpow2.f32 %v2194_v38  ;;  %v4367_v18 = vadd.f32 %v4065_v10, %v1974_v28  ;;  %v4376_v9 = vadd.f32 %v4065_v10, %v1972_v49 }
 0x169   :  { %v3404_v43 = vpop.eup %3403  ;;  %v2478_v58 = vmul.f32 %v3402_v4, %v4226_v59  ;;  %3423 = vrcp.f32 %v2288_v27  ;;  %v2104_v50 = vsub.f32 0.0, %v4362_v29  ;;  %v2991_v59 = vpop.f32.mrb[40].mxu1  ;;  %v4385_v23 = vadd.f32 %v4065_v10, %v1977_v6 }
 0x16a   :  { %v3406_v30 = vpop.eup %3405  ;;  %2537 = vst.msk [vmem:[%s4872_s7 + $0x88] sm:$0xff] %vm867_vm3, %v2473_v35  ;;  %v2291_v12 = vadd.f32 1.0, %v3404_v43  ;;  %3425 = vpow2.f32 %v2204_v42  ;;  %v2107_v5 = vsub.f32 0.0, %v4367_v18  ;;  %v3057_v55 = vpop.f32.mrb[40].mxu0  ;;  %v2105_v46 = vsub.f32 0.0, %v4376_v9 }
 0x16b   :  { %v3408_v20 = vpop.eup %3407  ;;  %2542 = vst.msk [vmem:[%s4872_s7 + $0xb0] sm:$0xff] %vm867_vm3, %v2478_v58  ;;  %v2476_v31 = vmul.f32 %v3406_v30, %v4233_v48  ;;  %v4387_v52 = vpop.f32.mrb[41].mxu1  ;;  %v2200_v2 = vmul.f32 1.442695, %v2104_v50  ;;  %v2110_v51 = vsub.f32 0.0, %v4385_v23  ;;  %v1975_v11 = vmul.f32 %v3118_v45, %v4060_v7 }
 0x16c   :  { %v3410_v1 = vpop.eup %3409  ;;  %v2479_v47 = vmul.f32 %v3408_v20, %v4236_v41  ;;  %3427 = vrcp.f32 %v2291_v12  ;;  %v1775_v60 = vpop.f32.mrb[41].mxu0  ;;  %v2206_v37 = vmul.f32 1.442695, %v2107_v5  ;;  %v2202_v14 = vmul.f32 1.442695, %v2105_v46 }
 0x16d   :  { %v4391_v57 = vpop.f32.mrb[42].mxu1  ;;  %v3412_v48 = vpop.eup %3411  ;;  %2540 = vst.msk [vmem:[%s4872_s7 + $0xa0] sm:$0xff] %vm867_vm3, %v2476_v31  ;;  %v2289_v33 = vadd.f32 1.0, %v3410_v1  ;;  %3429 = vpow2.f32 %v2200_v2  ;;  %v3119_v15 = vadd.f32 %v3054_v19, %v4347_v16  ;;  %v2212_v24 = vmul.f32 1.442695, %v2110_v51 }
 0x16e   :  { %v3058_v41 = vpop.f32.mrb[42].mxu0  ;;  %v4399_v34 = vpop.f32.mrb[43].mxu1  ;;  %2543 = vst.msk [vmem:[%s4872_s7 + $0xb8] sm:$0xff] %vm867_vm3, %v2479_v47  ;;  %v2477_v13 = vmul.f32 %v3412_v48, %v4239_v8  ;;  %v4408_v38 = vadd.f32 %v4065_v10, %v1975_v11  ;;  %v3120_v16 = vadd.f32 %v4357_v32, %v4354_v21  ;;  %v3121_v42 = vadd.f32 %v3057_v55, %v2991_v59 }
 0x16f   :  { %v3414_v39 = vpop.eup %3413  ;;  %v1778_v40 = vpop.f32.mrb[43].mxu0  ;;  %3431 = vrcp.f32 %v2289_v33  ;;  %v1978_v8 = vmul.f32 %v3119_v15, %v4060_v7  ;;  %v3122_v1 = vadd.f32 %v1775_v60, %v4387_v52  ;;  %v3123_v33 = vadd.f32 %v3058_v41, %v4391_v57 }
 0x170   :  { %v3416_v17 = vpop.eup %3415  ;;  %v2294_v53 = vadd.f32 1.0, %v3414_v39  ;;  %2541 = vst.msk [vmem:[%s4872_s7 + $0xa8] sm:$0xff] %vm867_vm3, %v2477_v13  ;;  %3433 = vpow2.f32 %v2206_v37  ;;  %v2108_v27 = vsub.f32 0.0, %v4408_v38  ;;  %v1976_v49 = vmul.f32 %v3120_v16, %v4060_v7 }
 0x171   :  { %v3418_v62 = vpop.eup %3417  ;;  %v2292_v3 = vadd.f32 1.0, %v3416_v17  ;;  %v4420_v35 = vadd.f32 %v4065_v10, %v1978_v8  ;;  %v2995_v43 = vpop.f32.mrb[44].mxu1  ;;  %v1981_v32 = vmul.f32 %v3121_v42, %v4060_v7  ;;  %v1979_v51 = vmul.f32 %v3122_v1, %v4060_v7 }
 0x172   :  { %v3420_v19 = vpop.eup %3419  ;;  %v2482_v26 = vmul.f32 %v3418_v62, %v4264_v54  ;;  %3435 = vrcp.f32 %v2294_v53  ;;  %v2208_v21 = vmul.f32 1.442695, %v2108_v27  ;;  %v3061_v6 = vpop.f32.mrb[44].mxu0  ;;  %v4433_v20 = vadd.f32 %v4065_v10, %v1976_v49 }
 0x173   :  { %v3422_v28 = vpop.eup %3421  ;;  %3437 = vrcp.f32 %v2292_v3  ;;  %v2295_v4 = vadd.f32 1.0, %v3420_v19  ;;  %v4428_v30 = vpop.f32.mrb[45].mxu1  ;;  %v2111_v59 = vsub.f32 0.0, %v4420_v35  ;;  %v4440_v55 = vadd.f32 %v4065_v10, %v1981_v32 }
 0x174   :  { %v3424_v58 = vpop.eup %3423  ;;  %2546 = vst.msk [vmem:[%s4872_s7 + $0xd0] sm:$0xff] %vm867_vm3, %v2482_v26  ;;  %v2293_v54 = vadd.f32 1.0, %v3422_v28  ;;  %3439 = vpow2.f32 %v2202_v14  ;;  %v4435_v31 = vpop.f32.mrb[45].mxu0  ;;  %v2109_v48 = vsub.f32 0.0, %v4433_v20  ;;  %v1982_v13 = vmul.f32 %v3123_v33, %v4060_v7 }
 0x175   :  { %v3426_v12 = vpop.eup %3425  ;;  %v2480_v50 = vmul.f32 %v3424_v58, %v4277_v56  ;;  %3441 = vrcp.f32 %v2295_v4  ;;  %v4437_v5 = vpop.f32.mrb[46].mxu1  ;;  %v2214_v46 = vmul.f32 1.442695, %v2111_v59  ;;  %v2114_v60 = vsub.f32 0.0, %v4440_v55 }
 0x176   :  { %3443 = vrcp.f32 %v2293_v54  ;;  %v2298_v45 = vadd.f32 1.0, %v3426_v12  ;;  %v4443_v47 = vpop.f32.mrb[46].mxu0  ;;  %v4445_v56 = vpop.f32.mrb[47].mxu1  ;;  %v2210_v39 = vmul.f32 1.442695, %v2109_v48  ;;  %v3124_v14 = vadd.f32 %v1778_v40, %v4399_v34 }
 0x177   :  { %v3428_v2 = vpop.eup %3427  ;;  %2544 = vst.msk [vmem:[%s4872_s7 + $0xc0] sm:$0xff] %vm867_vm3, %v2480_v50  ;;  %3445 = vpow2.f32 %v2212_v24  ;;  %v4453_v37 = vpop.f32.mrb[47].mxu0  ;;  %v4465_v41 = vadd.f32 %v4065_v10, %v1979_v51  ;;  %v4469_v24 = vadd.f32 %v4065_v10, %v1982_v13  ;;  %v3125_v16 = vadd.f32 %v3061_v6, %v2995_v43 }
 0x178   :  { %v2483_v52 = vmul.f32 %v3428_v2, %v4282_v61  ;;  %3447 = vrcp.f32 %v2298_v45  ;;  %v3430_v11 = vpop.eup %3429  ;;  %v2220_v61 = vmul.f32 1.442695, %v2114_v60  ;;  %v1980_v34 = vmul.f32 %v3124_v14, %v4060_v7 }
 0x179   :  { %3449 = vpow2.f32 %v2208_v21  ;;  %v3432_v15 = vpop.eup %3431  ;;  %v2296_v57 = vadd.f32 1.0, %v3430_v11  ;;  %v4472_v40 = vpop.f32.mrb[48].mxu1  ;;  %v2112_v8 = vsub.f32 0.0, %v4465_v41  ;;  %v2115_v7 = vsub.f32 0.0, %v4469_v24 }
 0x17a   :  { %2547 = vst.msk [vmem:[%s4872_s7 + $0xd8] sm:$0xff] %vm867_vm3, %v2483_v52  ;;  %3451 = vpow2.f32 %v2214_v46  ;;  %v3434_v17 = vpop.eup %3433  ;;  %v2481_v53 = vmul.f32 %v3432_v15, %v4287_v36  ;;  %v3065_v19 = vpop.f32.mrb[48].mxu0  ;;  %v4486_v36 = vld [vmem:[%s4871_s6 + $0x1] ss:$0 sm:$0xff]  ;;  %v3126_v59 = vadd.f32 %v4435_v31, %v4428_v30  ;;  %v3127_v48 = vadd.f32 %v4443_v47, %v4437_v5 }
 0x17b   :  { %3453 = vpow2.f32 %v2210_v39  ;;  %v2299_v3 = vadd.f32 1.0, %v3434_v17  ;;  %v4475_v26 = vpop.f32.mrb[49].mxu1  ;;  %v4489_v42 = vadd.f32 %v4486_v36, %v1980_v34  ;;  %v1807_v28 = vpop.f32.mrb[49].mxu0  ;;  %v2216_v58 = vmul.f32 1.442695, %v2112_v8 }
 0x17c   :  { %v3436_v62 = vpop.eup %3435  ;;  %3455 = vrcp.f32 %v2296_v57  ;;  %2545 = vst.msk [vmem:[%s4872_s7 + $0xc8] sm:$0xff] %vm867_vm3, %v2481_v53  ;;  %v4491_v4 = vpop.f32.mrb[50].mxu1  ;;  %v2222_v12 = vmul.f32 1.442695, %v2115_v7  ;;  %v3128_v39 = vadd.f32 %v4453_v37, %v4445_v56  ;;  %v3130_v7 = vadd.f32 %v1807_v28, %v4475_v26 }
 0x17d   :  { %v3438_v27 = vpop.eup %3437  ;;  %v2486_v10 = vmul.f32 %v3436_v62, %v4308_v22  ;;  %3457 = vpow2.f32 %v2220_v61  ;;  %v4497_v22 = vld [vmem:[%s4871_s6] ss:$0 sm:$0xff]  ;;  %v4500_v21 = vpop.f32.mrb[50].mxu0  ;;  %v2113_v50 = vsub.f32 0.0, %v4489_v42  ;;  %v3129_v62 = vadd.f32 %v3065_v19, %v4472_v40 }
 0x17e   :  { %v3440_v49 = vpop.eup %3439  ;;  %v2484_v43 = vmul.f32 %v3438_v27, %v4320_v63  ;;  %3459 = vrcp.f32 %v2299_v3  ;;  %v1985_v54 = vmul.f32 %v4497_v22, %v3125_v16  ;;  %v4502_v32 = vpop.f32.mrb[51].mxu1  ;;  %v1983_v52 = vmul.f32 %v4497_v22, %v3126_v59 }
 0x17f   :  { %v3442_v6 = vpop.eup %3441  ;;  %2550 = vst.msk [vmem:[%s4872_s7 + $0xf0] sm:$0xff] %vm867_vm3, %v2486_v10  ;;  %v2297_v63 = vadd.f32 1.0, %v3440_v49  ;;  %v4511_v45 = vpop.f32.mrb[51].mxu0  ;;  %3461 = vpow2.f32 %v2216_v58  ;;  %v2218_v31 = vmul.f32 1.442695, %v2113_v50  ;;  %v1986_v11 = vmul.f32 %v4497_v22, %v3127_v48 }
 0x180   :  { %v3444_v1 = vpop.eup %3443  ;;  %2548 = vst.msk [vmem:[%s4872_s7 + $0xe0] sm:$0xff] %vm867_vm3, %v2484_v43  ;;  %v2487_v2 = vmul.f32 %v3442_v6, %v4323_v0  ;;  %v4519_v46 = vadd.f32 %v4486_v36, %v1985_v54  ;;  %v4537_v47 = vadd.f32 %v4486_v36, %v1983_v52  ;;  %v1984_v34 = vmul.f32 %v4497_v22, %v3128_v39 }
 0x181   :  { %v3446_v33 = vpop.eup %3445  ;;  %v2485_v30 = vmul.f32 %v3444_v1, %v4336_v25  ;;  %3463 = vrcp.f32 %v2297_v63  ;;  %v4541_v13 = vpop.f32.mrb[52].mxu1  ;;  %v4544_v61 = vadd.f32 %v4486_v36, %v1986_v11  ;;  %v1989_v26 = vmul.f32 %v4497_v22, %v3129_v62 }
 0x182   :  { %v3448_v60 = vpop.eup %3447  ;;  %2551 = vst.msk [vmem:[%s4872_s7 + $0xf8] sm:$0xff] %vm867_vm3, %v2487_v2  ;;  %v2302_v0 = vadd.f32 1.0, %v3446_v33  ;;  %3465 = vpow2.f32 %v2222_v12  ;;  %v2118_v51 = vsub.f32 0.0, %v4519_v46  ;;  %v4546_v17 = vpop.f32.mrb[52].mxu0  ;;  %v2116_v37 = vsub.f32 0.0, %v4537_v47 }
 0x183   :  { %v3450_v5 = vpop.eup %3449  ;;  %2549 = vst.msk [vmem:[%s4872_s7 + $0xe8] sm:$0xff] %vm867_vm3, %v2485_v30  ;;  %v2490_v25 = vmul.f32 %v3448_v60, %v4340_v44  ;;  %3467 = vpow2.f32 %v2218_v31  ;;  %v4548_v53 = vpop.f32.mrb[53].mxu1  ;;  %v2119_v10 = vsub.f32 0.0, %v4544_v61  ;;  %v4569_v19 = vadd.f32 %v4486_v36, %v1984_v34 }
 0x184   :  { %v3452_v14 = vpop.eup %3451  ;;  %3469 = vrcp.f32 %v2302_v0  ;;  %v2300_v15 = vadd.f32 1.0, %v3450_v5  ;;  %v2228_v57 = vmul.f32 1.442695, %v2118_v51  ;;  %v4557_v3 = vpop.f32.mrb[53].mxu0  ;;  %v2224_v40 = vmul.f32 1.442695, %v2116_v37 }
 0x185   :  { %v3454_v44 = vpop.eup %3453  ;;  %2554 = vst.msk [vmem:[%s4872_s7 + $0x110] sm:$0xff] %vm867_vm3, %v2490_v25  ;;  %v2303_v56 = vadd.f32 1.0, %v3452_v14  ;;  %v4559_v8 = vpop.f32.mrb[54].mxu1  ;;  %v2230_v50 = vmul.f32 1.442695, %v2119_v10  ;;  %v2117_v28 = vsub.f32 0.0, %v4569_v19  ;;  %v1987_v59 = vmul.f32 %v4497_v22, %v3130_v7 }
 0x186   :  { %v3456_v16 = vpop.eup %3455  ;;  %3471 = vrcp.f32 %v2300_v15  ;;  %v2301_v27 = vadd.f32 1.0, %v3454_v44  ;;  %v4563_v49 = vpop.f32.mrb[54].mxu0  ;;  %v4582_v2 = vadd.f32 %v4486_v36, %v1989_v26  ;;  %v3131_v48 = vadd.f32 %v4500_v21, %v4491_v4 }
 0x187   :  { %v4565_v43 = vpop.f32.mrb[55].mxu1  ;;  %v3458_v58 = vpop.eup %3457  ;;  %v2488_v54 = vmul.f32 %v3456_v16, %v4362_v29  ;;  %3473 = vrcp.f32 %v2303_v56  ;;  %v3132_v33 = vadd.f32 %v4511_v45, %v4502_v32  ;;  %v2226_v31 = vmul.f32 1.442695, %v2117_v28 }
 0x188   :  { %v4571_v6 = vpop.f32.mrb[55].mxu0  ;;  %v3460_v63 = vpop.eup %3459  ;;  %3475 = vrcp.f32 %v2301_v27  ;;  %v2306_v12 = vadd.f32 1.0, %v3458_v58  ;;  %v4593_v52 = vadd.f32 %v4486_v36, %v1987_v59  ;;  %v2122_v21 = vsub.f32 0.0, %v4582_v2 }
 0x189   :  { %2552 = vst.msk [vmem:[%s4872_s7 + $0x100] sm:$0xff] %vm867_vm3, %v2488_v54  ;;  %v2491_v29 = vmul.f32 %v3460_v63, %v4367_v18  ;;  %3477 = vpow2.f32 %v2228_v57  ;;  %v3462_v1 = vpop.eup %3461  ;;  %v4595_v60 = vpop.f32.mrb[56].mxu1  ;;  %v1990_v32 = vmul.f32 %v4497_v22, %v3131_v48  ;;  %v1988_v39 = vmul.f32 %v4497_v22, %v3132_v33 }
 0x18a   :  { %3479 = vrcp.f32 %v2306_v12  ;;  %v2304_v18 = vadd.f32 1.0, %v3462_v1  ;;  %v4600_v45 = vpop.f32.mrb[56].mxu0  ;;  %v4602_v51 = vpop.f32.mrb[57].mxu1  ;;  %v2120_v25 = vsub.f32 0.0, %v4593_v52  ;;  %v2236_v44 = vmul.f32 1.442695, %v2122_v21 }
 0x18b   :  { %v3464_v30 = vpop.eup %3463  ;;  %2555 = vst.msk [vmem:[%s4872_s7 + $0x118] sm:$0xff] %vm867_vm3, %v2491_v29  ;;  %3481 = vpow2.f32 %v2224_v40  ;;  %v4606_v14 = vpop.f32.mrb[57].mxu0  ;;  %v4615_v56 = vadd.f32 %v4486_v36, %v1990_v32  ;;  %v4623_v27 = vadd.f32 %v4486_v36, %v1988_v39  ;;  %v3133_v54 = vadd.f32 %v4546_v17, %v4541_v13 }
 0x18c   :  { %v3466_v0 = vpop.eup %3465  ;;  %v2489_v4 = vmul.f32 %v3464_v30, %v4376_v9  ;;  %3483 = vpow2.f32 %v2230_v50  ;;  %v4608_v15 = vpop.f32.mrb[58].mxu1  ;;  %v2232_v16 = vmul.f32 1.442695, %v2120_v25  ;;  %v3134_v40 = vadd.f32 %v4557_v3, %v4548_v53 }
 0x18d   :  { %v3468_v11 = vpop.eup %3467  ;;  %3485 = vrcp.f32 %v2304_v18  ;;  %v2307_v5 = vadd.f32 1.0, %v3466_v0  ;;  %v4617_v37 = vpop.f32.mrb[58].mxu0  ;;  %v2123_v58 = vsub.f32 0.0, %v4615_v56  ;;  %v2121_v12 = vsub.f32 0.0, %v4623_v27 }
 0x18e   :  { %v3470_v9 = vpop.eup %3469  ;;  %2553 = vst.msk [vmem:[%s4872_s7 + $0x108] sm:$0xff] %vm867_vm3, %v2489_v4  ;;  %v2305_v57 = vadd.f32 1.0, %v3468_v11  ;;  %3487 = vpow2.f32 %v2226_v31  ;;  %v4619_v34 = vpop.f32.mrb[59].mxu1  ;;  %v3135_v50 = vadd.f32 %v4563_v49, %v4559_v8  ;;  %v1993_v53 = vmul.f32 %v4497_v22, %v3133_v54 }
 0x18f   :  { %v2494_v62 = vmul.f32 %v3470_v9, %v4385_v23  ;;  %3489 = vrcp.f32 %v2307_v5  ;;  %v4625_v10 = vpop.f32.mrb[59].mxu0  ;;  %v2238_v17 = vmul.f32 1.442695, %v2123_v58  ;;  %v2234_v29 = vmul.f32 1.442695, %v2121_v12 }
 0x190   :  { %v3472_v7 = vpop.eup %3471  ;;  %3491 = vrcp.f32 %v2305_v57  ;;  %v1991_v28 = vmul.f32 %v4497_v22, %v3134_v40  ;;  %v1994_v8 = vmul.f32 %v4497_v22, %v3135_v50  ;;  %v4656_v1 = vadd.f32 %v4486_v36, %v1993_v53 }
 0x191   :  { %v3474_v63 = vpop.eup %3473  ;;  %2558 = vst.msk [vmem:[%s4872_s7 + $0x130] sm:$0xff] %vm867_vm3, %v2494_v62  ;;  %v2492_v23 = vmul.f32 %v3472_v7, %v4408_v38  ;;  %3493 = vpow2.f32 %v2236_v44  ;;  %v4649_v49 = vpop.f32.mrb[60].mxu1  ;;  %v3137_v44 = vadd.f32 %v4600_v45, %v4595_v60  ;;  %v3139_v53 = vadd.f32 %v4617_v37, %v4608_v15 }
 0x192   :  { %v3476_v26 = vpop.eup %3475  ;;  %v2495_v13 = vmul.f32 %v3474_v63, %v4420_v35  ;;  %3495 = vpow2.f32 %v2232_v16  ;;  %v3077_v48 = vpop.f32.mrb[60].mxu0  ;;  %v4668_v31 = vadd.f32 %v4486_v36, %v1991_v28  ;;  %v4671_v0 = vadd.f32 %v4486_v36, %v1994_v8 }
 0x193   :  { %v3478_v3 = vpop.eup %3477  ;;  %2556 = vst.msk [vmem:[%s4872_s7 + $0x120] sm:$0xff] %vm867_vm3, %v2492_v23  ;;  %v2493_v38 = vmul.f32 %v3476_v26, %v4433_v20  ;;  %3497 = vpow2.f32 %v2238_v17  ;;  %v3136_v20 = vadd.f32 %v4571_v6, %v4565_v43  ;;  %v4660_v33 = vpop.f32.mrb[61].mxu1  ;;  %v2126_v32 = vsub.f32 0.0, %v4656_v1 }
 0x194   :  { %v3480_v35 = vpop.eup %3479  ;;  %2559 = vst.msk [vmem:[%s4872_s7 + $0x138] sm:$0xff] %vm867_vm3, %v2495_v13  ;;  %v2310_v59 = vadd.f32 1.0, %v3478_v3  ;;  %3499 = vpow2.f32 %v2234_v29  ;;  %v4673_v4 = vpop.f32.mrb[61].mxu0  ;;  %v2124_v9 = vsub.f32 0.0, %v4668_v31  ;;  %v2127_v57 = vsub.f32 0.0, %v4671_v0 }
 0x195   :  { %v3482_v30 = vpop.eup %3481  ;;  %2557 = vst.msk [vmem:[%s4872_s7 + $0x128] sm:$0xff] %vm867_vm3, %v2493_v38  ;;  %v2498_v18 = vmul.f32 %v3480_v35, %v4440_v55  ;;  %v4675_v43 = vpop.f32.mrb[62].mxu1  ;;  %v1992_v11 = vmul.f32 %v4497_v22, %v3136_v20  ;;  %v2244_v58 = vmul.f32 1.442695, %v2126_v32  ;;  %v1997_v45 = vmul.f32 %v4497_v22, %v3137_v44 }
 0x196   :  { %v3484_v6 = vpop.eup %3483  ;;  %3501 = vrcp.f32 %v2310_v59  ;;  %v2308_v21 = vadd.f32 1.0, %v3482_v30  ;;  %v4679_v5 = vpop.f32.mrb[62].mxu0  ;;  %v2240_v23 = vmul.f32 1.442695, %v2124_v9  ;;  %v2246_v12 = vmul.f32 1.442695, %v2127_v57 }
 0x197   :  { %v4681_v55 = vpop.f32.mrb[63].mxu1  ;;  %v3486_v25 = vpop.eup %3485  ;;  %2562 = vst.msk [vmem:[%s4872_s7 + $0x150] sm:$0xff] %vm867_vm3, %v2498_v18  ;;  %v2311_v39 = vadd.f32 1.0, %v3484_v6  ;;  %v4695_v54 = vadd.f32 %v4486_v36, %v1992_v11  ;;  %v3138_v17 = vadd.f32 %v4606_v14, %v4602_v51  ;;  %v4714_v29 = vadd.f32 %v4486_v36, %v1997_v45 }
 0x198   :  { %v4691_v62 = vpop.f32.mrb[63].mxu0  ;;  %v3488_v16 = vpop.eup %3487  ;;  %v2496_v7 = vmul.f32 %v3486_v25, %v4465_v41  ;;  %3503 = vrcp.f32 %v2308_v21  ;;  %v1998_v14 = vmul.f32 %v4497_v22, %v3139_v53  ;;  %v3140_v28 = vadd.f32 %v4625_v10, %v4619_v34 }
 0x199   :  { %v3490_v40 = vpop.eup %3489  ;;  %3505 = vrcp.f32 %v2311_v39  ;;  %v2309_v63 = vadd.f32 1.0, %v3488_v16  ;;  %v2125_v41 = vsub.f32 0.0, %v4695_v54  ;;  %v1995_v51 = vmul.f32 %v4497_v22, %v3138_v17 }
 0x19a   :  { %v3492_v50 = vpop.eup %3491  ;;  %2560 = vst.msk [vmem:[%s4872_s7 + $0x140] sm:$0xff] %vm867_vm3, %v2496_v7  ;;  %v2499_v60 = vmul.f32 %v3490_v40, %v4469_v24  ;;  %3507 = vpow2.f32 %v2244_v58  ;;  %v2130_v37 = vsub.f32 0.0, %v4714_v29  ;;  %v3141_v8 = vadd.f32 %v3077_v48, %v4649_v49 }
 0x19b   :  { %v3494_v26 = vpop.eup %3493  ;;  %v2497_v13 = vmul.f32 %v3492_v50, %v4489_v42  ;;  %3509 = vrcp.f32 %v2309_v63  ;;  %v2242_v38 = vmul.f32 1.442695, %v2125_v41  ;;  %v4727_v20 = vadd.f32 %v4486_v36, %v1995_v51 }
 0x19c   :  { %v3496_v3 = vpop.eup %3495  ;;  %2563 = vst.msk [vmem:[%s4872_s7 + $0x158] sm:$0xff] %vm867_vm3, %v2499_v60  ;;  %v2314_v24 = vadd.f32 1.0, %v3494_v26  ;;  %3511 = vpow2.f32 %v2240_v23  ;;  %v4730_v30 = vadd.f32 %v4486_v36, %v1998_v14  ;;  %v2252_v21 = vmul.f32 1.442695, %v2130_v37 }
 0x19d   :  { %2561 = vst.msk [vmem:[%s4872_s7 + $0x148] sm:$0xff] %vm867_vm3, %v2497_v13  ;;  %v2312_v42 = vadd.f32 1.0, %v3496_v3  ;;  %3513 = vpow2.f32 %v2246_v12  ;;  %v3498_v15 = vpop.eup %3497  ;;  %v1996_v32 = vmul.f32 %v4497_v22, %v3140_v28  ;;  %v2128_v34 = vsub.f32 0.0, %v4727_v20 }
 0x19e   :  { %3515 = vrcp.f32 %v2314_v24  ;;  %v3500_v35 = vpop.eup %3499  ;;  %v2315_v59 = vadd.f32 1.0, %v3498_v15  ;;  %v2131_v10 = vsub.f32 0.0, %v4730_v30  ;;  %v2001_v25 = vmul.f32 %v4497_v22, %v3141_v8 }
 0x19f   :  { %3517 = vrcp.f32 %v2312_v42  ;;  %v2313_v6 = vadd.f32 1.0, %v3500_v35  ;;  %v4737_v48 = vadd.f32 %v4486_v36, %v1996_v32  ;;  %v3142_v39 = vadd.f32 %v4673_v4, %v4660_v33 }
 0x1a0   :  { %v3502_v18 = vpop.eup %3501  ;;  %3519 = vpow2.f32 %v2242_v38  ;;  %v2248_v57 = vmul.f32 1.442695, %v2128_v34  ;;  %v2254_v44 = vmul.f32 1.442695, %v2131_v10  ;;  %v4750_v40 = vadd.f32 %v4486_v36, %v2001_v25 }
 0x1a1   :  { %v2502_v11 = vmul.f32 %v3502_v18, %v4519_v46  ;;  %3521 = vrcp.f32 %v2315_v59  ;;  %v2129_v58 = vsub.f32 0.0, %v4737_v48  ;;  %v1999_v33 = vmul.f32 %v4497_v22, %v3142_v39 }
 0x1a2   :  { %v3504_v49 = vpop.eup %3503  ;;  %3523 = vrcp.f32 %v2313_v6  ;;  %v3143_v63 = vadd.f32 %v4679_v5, %v4675_v43  ;;  %v2134_v60 = vsub.f32 0.0, %v4750_v40 }
 0x1a3   :  { %v3506_v9 = vpop.eup %3505  ;;  %2566 = vst.msk [vmem:[%s4872_s7 + $0x170] sm:$0xff] %vm867_vm3, %v2502_v11  ;;  %v2500_v46 = vmul.f32 %v3504_v49, %v4537_v47  ;;  %3525 = vpow2.f32 %v2252_v21  ;;  %v2250_v50 = vmul.f32 1.442695, %v2129_v58  ;;  %v4768_v43 = vadd.f32 %v4486_v36, %v1999_v33 }
 0x1a4   :  { %v3508_v16 = vpop.eup %3507  ;;  %v2503_v7 = vmul.f32 %v3506_v9, %v4544_v61  ;;  %3527 = vpow2.f32 %v2248_v57  ;;  %v3144_v61 = vadd.f32 %v4691_v62, %v4681_v55  ;;  %v2002_v5 = vmul.f32 %v4497_v22, %v3143_v63 }
 0x1a5   :  { %v3510_v4 = vpop.eup %3509  ;;  %2564 = vst.msk [vmem:[%s4872_s7 + $0x160] sm:$0xff] %vm867_vm3, %v2500_v46  ;;  %v2318_v47 = vadd.f32 1.0, %v3508_v16  ;;  %3529 = vpow2.f32 %v2254_v44  ;;  %v2132_v53 = vsub.f32 0.0, %v4768_v43 }
 0x1a6   :  { %v3512_v23 = vpop.eup %3511  ;;  %2567 = vst.msk [vmem:[%s4872_s7 + $0x178] sm:$0xff] %vm867_vm3, %v2503_v7  ;;  %v2501_v12 = vmul.f32 %v3510_v4, %v4569_v19  ;;  %v2260_v19 = vmul.f32 1.442695, %v2134_v60  ;;  %v2000_v26 = vmul.f32 %v4497_v22, %v3144_v61  ;;  %v4779_v3 = vadd.f32 %v4486_v36, %v2002_v5 }
 0x1a7   :  { %v3514_v41 = vpop.eup %3513  ;;  %3531 = vrcp.f32 %v2318_v47  ;;  %v2316_v45 = vadd.f32 1.0, %v3512_v23 }
 0x1a8   :  { %v3516_v55 = vpop.eup %3515  ;;  %2565 = vst.msk [vmem:[%s4872_s7 + $0x168] sm:$0xff] %vm867_vm3, %v2501_v12  ;;  %v2319_v62 = vadd.f32 1.0, %v3514_v41  ;;  %3533 = vpow2.f32 %v2250_v50  ;;  %v4783_v42 = vadd.f32 %v4486_v36, %v2000_v26  ;;  %v2135_v14 = vsub.f32 0.0, %v4779_v3 }
 0x1a9   :  { %v3518_v13 = vpop.eup %3517  ;;  %v2506_v17 = vmul.f32 %v3516_v55, %v4582_v2  ;;  %3535 = vrcp.f32 %v2316_v45  ;;  %v2256_v2 = vmul.f32 1.442695, %v2132_v53 }
 0x1aa   :  { %v3520_v24 = vpop.eup %3519  ;;  %v2504_v38 = vmul.f32 %v3518_v13, %v4593_v52  ;;  %3537 = vrcp.f32 %v2319_v62  ;;  %v2133_v52 = vsub.f32 0.0, %v4783_v42  ;;  %v2262_v8 = vmul.f32 1.442695, %v2135_v14 }
 0x1ab   :  { %v3522_v51 = vpop.eup %3521  ;;  %2570 = vst.msk [vmem:[%s4872_s7 + $0x190] sm:$0xff] %vm867_vm3, %v2506_v17  ;;  %v2317_v22 = vadd.f32 1.0, %v3520_v24  ;;  %3539 = vpow2.f32 %v2260_v19 }
 0x1ac   :  { %v3524_v15 = vpop.eup %3523  ;;  %2568 = vst.msk [vmem:[%s4872_s7 + $0x180] sm:$0xff] %vm867_vm3, %v2504_v38  ;;  %v2507_v36 = vmul.f32 %v3522_v51, %v4615_v56  ;;  %v2258_v59 = vmul.f32 1.442695, %v2133_v52 }
 0x1ad   :  { %v3526_v37 = vpop.eup %3525  ;;  %v2505_v28 = vmul.f32 %v3524_v15, %v4623_v27  ;;  %3541 = vrcp.f32 %v2317_v22 }
 0x1ae   :  { %2571 = vst.msk [vmem:[%s4872_s7 + $0x198] sm:$0xff] %vm867_vm3, %v2507_v36  ;;  %v2322_v35 = vadd.f32 1.0, %v3526_v37  ;;  %3543 = vpow2.f32 %v2256_v2  ;;  %v3528_v18 = vpop.eup %3527 }
 0x1af   :  { %2569 = vst.msk [vmem:[%s4872_s7 + $0x188] sm:$0xff] %vm867_vm3, %v2505_v28  ;;  %3545 = vpow2.f32 %v2262_v8  ;;  %v3530_v56 = vpop.eup %3529  ;;  %v2320_v27 = vadd.f32 1.0, %v3528_v18 }
 0x1b0   :  { %3547 = vrcp.f32 %v2322_v35  ;;  %v2323_v21 = vadd.f32 1.0, %v3530_v56 }
 0x1b1   :  { %v3532_v6 = vpop.eup %3531  ;;  %3549 = vpow2.f32 %v2258_v59 }
 0x1b2   :  { %v3534_v32 = vpop.eup %3533  ;;  %v2510_v11 = vmul.f32 %v3532_v6, %v4656_v1  ;;  %3551 = vrcp.f32 %v2320_v27 }
 0x1b3   :  { %v3536_v34 = vpop.eup %3535  ;;  %3553 = vrcp.f32 %v2323_v21  ;;  %v2321_v10 = vadd.f32 1.0, %v3534_v32 }
 0x1b4   :  { %v3538_v49 = vpop.eup %3537  ;;  %2574 = vst.msk [vmem:[%s4872_s7 + $0x1b0] sm:$0xff] %vm867_vm3, %v2510_v11  ;;  %v2508_v25 = vmul.f32 %v3536_v34, %v4668_v31 }
 0x1b5   :  { %v3540_v39 = vpop.eup %3539  ;;  %v2511_v9 = vmul.f32 %v3538_v49, %v4671_v0  ;;  %3555 = vrcp.f32 %v2321_v10 }
 0x1b6   :  { %2572 = vst.msk [vmem:[%s4872_s7 + $0x1a0] sm:$0xff] %vm867_vm3, %v2508_v25  ;;  %v2326_v1 = vadd.f32 1.0, %v3540_v39 }
 0x1b7   :  { %v3542_v46 = vpop.eup %3541  ;;  %2575 = vst.msk [vmem:[%s4872_s7 + $0x1b8] sm:$0xff] %vm867_vm3, %v2511_v9 }
 0x1b8   :  { %v3544_v57 = vpop.eup %3543  ;;  %v2509_v44 = vmul.f32 %v3542_v46, %v4695_v54  ;;  %3557 = vrcp.f32 %v2326_v1 }
 0x1b9   :  { %v3546_v31 = vpop.eup %3545  ;;  %v2324_v16 = vadd.f32 1.0, %v3544_v57 }
 0x1ba   :  { %v3548_v0 = vpop.eup %3547  ;;  %2573 = vst.msk [vmem:[%s4872_s7 + $0x1a8] sm:$0xff] %vm867_vm3, %v2509_v44  ;;  %v2327_v7 = vadd.f32 1.0, %v3546_v31 }
 0x1bb   :  { %v3550_v58 = vpop.eup %3549  ;;  %v2514_v33 = vmul.f32 %v3548_v0, %v4714_v29  ;;  %3559 = vrcp.f32 %v2324_v16 }
 0x1bc   :  { %v3552_v4 = vpop.eup %3551  ;;  %3561 = vrcp.f32 %v2327_v7  ;;  %v2325_v47 = vadd.f32 1.0, %v3550_v58 }
 0x1bd   :  { %v3554_v63 = vpop.eup %3553  ;;  %2578 = vst.msk [vmem:[%s4872_s7 + $0x1d0] sm:$0xff] %vm867_vm3, %v2514_v33  ;;  %v2512_v54 = vmul.f32 %v3552_v4, %v4727_v20 }
 0x1be   :  { %v2515_v61 = vmul.f32 %v3554_v63, %v4730_v30  ;;  %3563 = vrcp.f32 %v2325_v47 }
 0x1bf   :  { %v3556_v23 = vpop.eup %3555  ;;  %2576 = vst.msk [vmem:[%s4872_s7 + $0x1c0] sm:$0xff] %vm867_vm3, %v2512_v54 }
 0x1c0   :  { %2579 = vst.msk [vmem:[%s4872_s7 + $0x1d8] sm:$0xff] %vm867_vm3, %v2515_v61  ;;  %v2513_v29 = vmul.f32 %v3556_v23, %v4737_v48 }
 0x1c2   :  { %v3558_v12 = vpop.eup %3557  ;;  %2577 = vst.msk [vmem:[%s4872_s7 + $0x1c8] sm:$0xff] %vm867_vm3, %v2513_v29 }
 0x1c3   :  { %v2518_v20 = vmul.f32 %v3558_v12, %v4750_v40 }
 0x1c5   :  { %v3560_v30 = vpop.eup %3559  ;;  %2582 = vst.msk [vmem:[%s4872_s7 + $0x1f0] sm:$0xff] %vm867_vm3, %v2518_v20 }
 0x1c6   :  { %v3562_v50 = vpop.eup %3561  ;;  %v2516_v60 = vmul.f32 %v3560_v30, %v4768_v43 }
 0x1c7   :  { %v2519_v41 = vmul.f32 %v3562_v50, %v4779_v3 }
 0x1c8   :  { %v3564_v48 = vpop.eup %3563  ;;  %2580 = vst.msk [vmem:[%s4872_s7 + $0x1e0] sm:$0xff] %vm867_vm3, %v2516_v60 }
 0x1c9   :  { %2583 = vst.msk [vmem:[%s4872_s7 + $0x1f8] sm:$0xff] %vm867_vm3, %v2519_v41  ;;  %v2517_v40 = vmul.f32 %v3564_v48, %v4783_v42 }
 0x1cb   :  { %2581 = vst.msk [vmem:[%s4872_s7 + $0x1e8] sm:$0xff] %vm867_vm3, %v2517_v40 }

// kernel: _lambda_.7
= control target key start
LH: loop header
LB: loop body
LE: loop exit
PB: predicated region body
PF: predicated region fallthrough
CT: control target
= control target key end

     0   :  { %s4705_s12 = smov 0   ;;  %s4707_s13 = smov 0   ;;  %s5983_s0 = inlined_call_operand.vmem [shape: bf16[2,18,24,4], index: 0, kind: input, shape index: {}]   ;;  %s5984_s1 = inlined_call_operand.vmem [shape: bf16[9,4,4], index: 1, kind: input, shape index: {}]   ;;  %s5985_s2 = inlined_call_operand.vmem [shape: f32[2,4], index: 2, kind: input, shape index: {}]   ;;  %s5986_s3 = inlined_call_operand.vmem [shape: bf16[2,256,4], index: 3, kind: output, shape index: {}]  }
   0x1   :  { %s4709_s14 = smov 0  }
   0x2 LB: > { %s25_s15 = sadd.s32 1, %s4679_s13  ;;  %p3462_p0 = scmp.ge.s32.totalorder %s4683_s14, 1  ;;  %s4683_s14 = sphi %s4709_s14, %s13_s14   ;;  %s4679_s13 = sphi %s4707_s13, %s6065_s13   ;;  %s4675_s12 = sphi %s4705_s12, %s6064_s12  }
   0x3   : > { %p27_p1 = scmp.ge.s32.totalorder %s25_s15, 2  ;;  %p151_p2 = scmp.lt.s32.totalorder %s4683_s14, 3 }
   0x5   : > { %s6067_s15 = smov (%p27_p1, %s25_s15), 0  ;;  %p152_p3 = pnand %p3462_p0, %p151_p2 }
   0x7   : > { %155 = sbr.rel (%p152_p3) target bundleno = 602 (0x25a), region = 32 }
   0xe   : > { %v3466_v0 = vld [vmem:[%s5984_s1 + $0x2] sm:$0x3]  ;;  %vm740_vm0 = vcmask 1041408   ;;  %v3598_v1 = vld [vmem:[%s5984_s1 + $0x8] sm:$0x3]  ;;  %p179_p4 = scmp.lt.s32.totalorder %s4675_s12, 1 }
   0xf   : > { %4476 = vmatprep.subr.msk.bf16.mxu1 %vm740_vm0, %v3466_v0  ;;  %4480 = vmatprep.subr.msk.bf16.mxu0 %vm740_vm0, %v3598_v1  ;;  %v742_v2 = vsel %vm740_vm0, %v3466_v0, 0  ;;  %v4733_v3 = vsel %vm740_vm0, %v3598_v1, 0  ;;  %v253_v4 = vld [vmem:[%s5984_s1] sm:$0x3]  ;;  %v3617_v5 = vld [vmem:[%s5984_s1 + $0xa] sm:$0x3] }
  0x10   : > { %6018 = vst [vmem:[#allocation2_spill] sm:$0xff] %v4733_v3  ;;  %3913 = vmatpush3.bf16.msra.mxu1 %v742_v2  ;;  %4049 = vmatpush3.bf16.msra.mxu0 %v4733_v3  ;;  %s6069_s12 = smov (!%p179_p4, %s4675_s12), 1  ;;  %vm254_vm1 = vsmask.f32 3328  ;;  %vm255_vm2 = vsmask.f32 7440 }
  0x11   : > { %4477 = vmatprep.subr.msk.bf16.mxu1 %vm740_vm0, %v253_v4  ;;  %4482 = vmatprep.subr.msk.bf16.mxu0 %vm740_vm0, %v3617_v5  ;;  %s4486_s24 = smul.u32 216, %s6069_s12  ;;  %v4753_v6 = vsel %vm740_vm0, %v253_v4, 0  ;;  %v4756_v7 = vsel %vm740_vm0, %v3617_v5, 0  ;;  %v4761_v8 = vld [vmem:[%s5984_s1 + $0xc] sm:$0x3]  ;;  %vm691_vm3 = vcmask 31744   ;;  %vm4797_vm4 = vmor %vm254_vm1, %vm255_vm2 }
  0x12   : > { %v4785_v20 = vsel %vm740_vm0, %v4761_v8, 0  ;;  %vm1213_vm5 = vcmask 1042432   ;;  %vm1214_vm6 = vcmask 1046532   ;;  %vm3340_vm8 = vcmask 27648   ;;  %s3726_s21 = sshll.u32 %s6069_s12, 7 }
  0x13   : > { %s4750_s27 = scalar_lea.vmem %s5983_s0, %s4486_s24  ;;  %vm4978_vm7 = vmor %vm1213_vm5, %vm1214_vm6  ;;  %s5791_s23 = scalar_lea.vmem %s5986_s3, %s3726_s21 }
  0x14   : > { %v4764_v9 = vld [vmem:[%s4750_s27] sm:$0xf]  ;;  %v4767_v10 = vld [vmem:[%s4750_s27 + $0x4] sm:$0xf]  ;;  %v201_v11 = vld [vmem:[%s4750_s27 + $0x8] sm:$0xf] }
  0x15   : > { %v258_v12 = vshrl.u32 %v4764_v9, 16  ;;  %v261_v13 = vshll.u32 %v4764_v9, 16  ;;  %v267_v14 = vshll.u32 %v4767_v10, 16  ;;  %v271_v15 = vshrl.u32 %v4767_v10, 16  ;;  %v4775_v16 = vld [vmem:[%s4750_s27 + $0xc] sm:$0xf] }
  0x16   : > { %v277_v17 = vshll.u32 %v201_v11, 16  ;;  %v4778_v18 = vld [vmem:[%s4750_s27 + $0x10] sm:$0xf]  ;;  %v4781_v19 = vld [vmem:[%s4750_s27 + $0x14] sm:$0xf]  ;;  %v282_v26 = vshrl.u32 %v4775_v16, 16 }
  0x17   : > { %v260_v21 = vrot.slane %v258_v12, 4  ;;  %v263_v22 = vrot.slane %v261_v13, 5  ;;  %v269_v23 = vrot.slane %v267_v14, 5  ;;  %v273_v24 = vrot.slane %v271_v15, 4  ;;  %v4793_v33 = vld [vmem:[%s4750_s27 + $0x18] sm:$0xf] }
  0x18   : > { %v279_v25 = vrot.slane %v277_v17, 5  ;;  %v285_v27 = vshll.u32 %v4775_v16, 16  ;;  %v291_v28 = vshll.u32 %v4778_v18, 16  ;;  %v295_v31 = vshrl.u32 %v4778_v18, 16  ;;  %v4806_v39 = vld [vmem:[%s4750_s27 + $0x1c] sm:$0xf] }
  0x19   : > { %v264_v29 = vor.u32 %v263_v22, %v260_v21  ;;  %v274_v30 = vor.u32 %v273_v24, %v269_v23  ;;  %v301_v32 = vshll.u32 %v4781_v19, 16  ;;  %v284_v35 = vrot.slane %v282_v26, 4  ;;  %v4810_v46 = vld [vmem:[%s4750_s27 + $0x20] sm:$0xf]  ;;  %v4820_v57 = vld [vmem:[%s4750_s27 + $0x24] sm:$0xf] }
  0x1a   : > { %v287_v36 = vrot.slane %v285_v27, 5  ;;  %v293_v37 = vrot.slane %v291_v28, 5  ;;  %v4803_v38 = vcombine.low %v4775_v16, %v4778_v18  ;;  %v297_v42 = vrot.slane %v295_v31, 4  ;;  %v4825_v62 = vld [vmem:[%s4750_s27 + $0x28] sm:$0xf] }
  0x1b   : > { %v265_v40 = vrot.slane %v264_v29, 4  ;;  %v275_v41 = vrot.slane %v274_v30, 4  ;;  %v303_v43 = vrot.slane %v301_v32, 5  ;;  %v1228_v45 = vrot.slane %v4781_v19, 5  ;;  %v4833_v4 = vld [vmem:[%s4750_s27 + $0x2c] sm:$0xf] }
  0x1c   : > { %v288_v44 = vor.u32 %v287_v36, %v284_v35  ;;  %v306_v47 = vshrl.u32 %v4793_v33, 16  ;;  %v309_v48 = vshll.u32 %v4793_v33, 16  ;;  %v298_v51 = vor.u32 %v297_v42, %v293_v37  ;;  %v4839_v14 = vld [vmem:[%s4750_s27 + $0x30] sm:$0xf]  ;;  %v4851_v28 = vld [vmem:[%s4750_s27 + $0x34] sm:$0xf] }
  0x1d   : > { %v270_v49 = vsel %vm4797_vm4, %v265_v40, %v269_v23  ;;  %v280_v50 = vsel %vm4797_vm4, %v275_v41, %v279_v25  ;;  %v315_v52 = vshll.u32 %v4806_v39, 16  ;;  %v319_v60 = vshrl.u32 %v4806_v39, 16  ;;  %v4846_v23 = vld [vmem:[%s5984_s1 + $0x4] sm:$0x3]  ;;  %v4858_v32 = vld [vmem:[%s4750_s27 + $0x38] sm:$0xf] }
  0x1e   : > { %v3467_v53 = vcombine.low %v270_v49, %v280_v50  ;;  %v289_v54 = vrot.slane %v288_v44, 4  ;;  %v308_v55 = vrot.slane %v306_v47, 4  ;;  %v311_v56 = vrot.slane %v309_v48, 5  ;;  %v4866_v48 = vld [vmem:[%s4750_s27 + $0x3c] sm:$0xf] }
  0x1f   : > { %v299_v58 = vrot.slane %v298_v51, 4  ;;  %v317_v59 = vrot.slane %v315_v52, 5  ;;  %v325_v61 = vshll.u32 %v4810_v46, 16  ;;  %v1232_v1 = vrot.slane %v4806_v39, 5  ;;  %v4874_v52 = vld [vmem:[%s4750_s27 + $0x40] sm:$0xf] }
  0x20   : > { %3914 = vmatprep.mubr.msk.bf16.mxu1 %vm691_vm3, %v3467_v53  ;;  %v294_v63 = vsel %vm4797_vm4, %v289_v54, %v293_v37  ;;  %v312_v0 = vor.u32 %v311_v56, %v308_v55  ;;  %v1235_v2 = vrot.slane %v4810_v46, 5  ;;  %v321_v11 = vrot.slane %v319_v60, 4 }
  0x21   : > { %v304_v5 = vsel %vm4797_vm4, %v299_v58, %v303_v43  ;;  %v327_v12 = vrot.slane %v325_v61, 5  ;;  %v330_v13 = vshrl.u32 %v4820_v57, 16  ;;  %v333_v21 = vshll.u32 %v4820_v57, 16 }
  0x22   : > { %v3468_v15 = vcombine.low %v294_v63, %v304_v5  ;;  %v313_v17 = vrot.slane %v312_v0, 4  ;;  %v339_v22 = vshll.u32 %v4825_v62, 16  ;;  %v322_v24 = vor.u32 %v321_v11, %v317_v59  ;;  %v4886_v5 = vld [vmem:[%s4750_s27 + $0x44] sm:$0xf] }
  0x23   : > { %v332_v25 = vrot.slane %v330_v13, 4  ;;  %v343_v26 = vshrl.u32 %v4825_v62, 16  ;;  %v349_v27 = vshll.u32 %v4833_v4, 16  ;;  %v335_v30 = vrot.slane %v333_v21, 5  ;;  %v4891_v13 = vld [vmem:[%s4750_s27 + $0x48] sm:$0xf] }
  0x24   : > { %4050 = vmatprep.mubr.msk.bf16.mxu0 %vm691_vm3, %v3468_v15  ;;  %3915 = vmatmul.mubr.msk.bf16.vlgmr.msra.gmra.mrb[0].mxu1 %vm691_vm3, %v3468_v15  ;;  %v318_v29 = vsel %vm4797_vm4, %v313_v17, %v317_v59  ;;  %v341_v31 = vrot.slane %v339_v22, 5  ;;  %v354_v35 = vshrl.u32 %v4839_v14, 16  ;;  %v323_v36 = vrot.slane %v322_v24, 4  ;;  %v4898_v24 = vld [vmem:[%s4750_s27 + $0x4c] sm:$0xf] }
  0x25   : > { %3947 = vmatpush3.bf16.msra.mxu1 %v4753_v6  ;;  %v345_v37 = vrot.slane %v343_v26, 4  ;;  %v351_v40 = vrot.slane %v349_v27, 5  ;;  %v357_v41 = vshll.u32 %v4839_v14, 16  ;;  %v336_v42 = vor.u32 %v335_v30, %v332_v25 }
  0x26   : > { %v356_v43 = vrot.slane %v354_v35, 4  ;;  %v363_v44 = vshll.u32 %v4851_v28, 16  ;;  %v367_v47 = vshrl.u32 %v4851_v28, 16  ;;  %4478 = vmatprep.subr.msk.bf16.mxu1 %vm740_vm0, %v4846_v23  ;;  %v328_v49 = vsel %vm4797_vm4, %v323_v36, %v327_v12 }
  0x27   : > { %v346_v6 = vor.u32 %v345_v37, %v341_v31  ;;  %v359_v50 = vrot.slane %v357_v41, 5  ;;  %v373_v51 = vshll.u32 %v4858_v32, 16  ;;  %v4876_v53 = vcombine.low %v318_v29, %v328_v49 }
  0x28   : > { %v337_v54 = vrot.slane %v336_v42, 4  ;;  %v365_v55 = vrot.slane %v363_v44, 5  ;;  %v369_v56 = vrot.slane %v367_v47, 4  ;;  %v378_v61 = vshrl.u32 %v4866_v48, 16  ;;  %v4920_v42 = vld [vmem:[%s4750_s27 + $0x54] sm:$0xf] }
  0x29   : > { %6021 = vst [vmem:[#allocation3_spill] sm:$0xff] %v4876_v53  ;;  %v347_v58 = vrot.slane %v346_v6, 4  ;;  %v360_v59 = vor.u32 %v359_v50, %v356_v43  ;;  %v375_v60 = vrot.slane %v373_v51, 5  ;;  %4051 = vmatmul.mubr.msk.bf16.vlgmr.msra.gmra.mrb[0].mxu0 %vm691_vm3, %v4876_v53  ;;  %3918 = vmatprep.mubr.msk.bf16.mxu1 %vm691_vm3, %v4876_v53  ;;  %v381_v11 = vshll.u32 %v4866_v48, 16  ;;  %6023 = vst [vmem:[#allocation5_spill] sm:$0xff] %v4920_v42 }
  0x2a   : > { %v342_v63 = vsel %vm4797_vm4, %v337_v54, %v341_v31  ;;  %v370_v0 = vor.u32 %v369_v56, %v365_v55  ;;  %v387_v12 = vshll.u32 %v4874_v52, 16  ;;  %4083 = vmatpush3.bf16.msra.mxu0 %v4756_v7  ;;  %v380_v21 = vrot.slane %v378_v61, 4  ;;  %v4925_v6 = vld [vmem:[%s4750_s27 + $0x58] sm:$0xf] }
  0x2b   : > { %v352_v15 = vsel %vm4797_vm4, %v347_v58, %v351_v40  ;;  %v361_v17 = vrot.slane %v360_v59, 4  ;;  %v391_v22 = vshrl.u32 %v4874_v52, 16  ;;  %v383_v27 = vrot.slane %v381_v11, 5  ;;  %4483 = vmatprep.subr.msk.bf16.mxu0 %vm740_vm0, %v4761_v8  ;;  %v4915_v8 = vld [vmem:[%s4750_s27 + $0x50] sm:$0xf] }
  0x2c   : > { %v4900_v25 = vcombine.low %v342_v63, %v352_v15  ;;  %v371_v26 = vrot.slane %v370_v0, 4  ;;  %v389_v29 = vrot.slane %v387_v12, 5  ;;  %v397_v31 = vshll.u32 %v4886_v5, 16  ;;  %v4938_v11 = vld [vmem:[%s4750_s27 + $0x5c] sm:$0xf] }
  0x2d   : > { %v366_v7 = vsel %vm4797_vm4, %v361_v17, %v365_v55  ;;  %v393_v30 = vrot.slane %v391_v22, 4  ;;  %v402_v35 = vshrl.u32 %v4891_v13, 16  ;;  %v384_v37 = vor.u32 %v383_v27, %v380_v21  ;;  %v4942_v15 = vld [vmem:[%s4750_s27 + $0x60] sm:$0xf]  ;;  %v4947_v27 = vld [vmem:[%s4750_s27 + $0x64] sm:$0xf] }
  0x2e   : > { %6022 = vst [vmem:[#allocation4_spill] sm:$0xff] %v4900_v25  ;;  %4054 = vmatprep.mubr.msk.bf16.mxu0 %vm691_vm3, %v4900_v25  ;;  %3919 = vmatmul.mubr.msk.bf16.gmra.mrb[4].mxu1 %vm691_vm3, %v4900_v25  ;;  %v376_v36 = vsel %vm4797_vm4, %v371_v26, %v375_v60  ;;  %v405_v40 = vshll.u32 %v4891_v13, 16  ;;  %v411_v41 = vshll.u32 %v4898_v24, 16  ;;  %v399_v47 = vrot.slane %v397_v31, 5  ;;  %v5159_v25 = vld [vmem:[%s4750_s27 + $0xa8] sm:$0xf] }
  0x2f   : > { %v4922_v43 = vcombine.low %v366_v7, %v376_v36  ;;  %v394_v44 = vor.u32 %v393_v30, %v389_v29  ;;  %v404_v49 = vrot.slane %v402_v35, 4  ;;  %v385_v50 = vrot.slane %v384_v37, 4 }
  0x30   : > { %v407_v51 = vrot.slane %v405_v40, 5  ;;  %v413_v54 = vrot.slane %v411_v41, 5  ;;  %v415_v55 = vshrl.u32 %v4898_v24, 16  ;;  %v421_v58 = vshll.u32 %v4915_v8, 16 }
  0x31   : > { %6024 = vst [vmem:[#allocation6_spill] sm:$0xff] %v4922_v43  ;;  %3922 = vmatprep.mubr.msk.bf16.mxu1 %vm691_vm3, %v4922_v43  ;;  %v395_v56 = vrot.slane %v394_v44, 4  ;;  %v426_v59 = vshrl.u32 %v4920_v42, 16  ;;  %v429_v60 = vshll.u32 %v4920_v42, 16  ;;  %4055 = vmatmul.mubr.msk.bf16.gmra.mrb[4].mxu0 %vm691_vm3, %v4922_v43  ;;  %v390_v61 = vsel %vm4797_vm4, %v385_v50, %v389_v29 }
  0x32   : > { %v408_v63 = vor.u32 %v407_v51, %v404_v49  ;;  %v417_v0 = vrot.slane %v415_v55, 4  ;;  %v435_v12 = vshll.u32 %v4925_v6, 16  ;;  %v423_v21 = vrot.slane %v421_v58, 5 }
  0x33   : > { %v400_v17 = vsel %vm4797_vm4, %v395_v56, %v399_v47  ;;  %v428_v22 = vrot.slane %v426_v59, 4  ;;  %v431_v26 = vrot.slane %v429_v60, 5  ;;  %v439_v36 = vshrl.u32 %v4925_v6, 16  ;;  %v4961_v47 = vld [vmem:[%s4750_s27 + $0x68] sm:$0xf] }
  0x34   : > { %v4949_v7 = vcombine.low %v390_v61, %v400_v17  ;;  %v409_v29 = vrot.slane %v408_v63, 4  ;;  %v418_v30 = vor.u32 %v417_v0, %v413_v54  ;;  %v437_v31 = vrot.slane %v435_v12, 5 }
  0x35   : > { %v432_v35 = vor.u32 %v431_v26, %v428_v22  ;;  %v445_v37 = vshll.u32 %v4938_v11, 16  ;;  %v450_v40 = vshrl.u32 %v4942_v15, 16  ;;  %v453_v49 = vshll.u32 %v4942_v15, 16 }
  0x36   : > { %6025 = vst [vmem:[#allocation7_spill] sm:$0xff] %v4949_v7  ;;  %4058 = vmatprep.mubr.msk.bf16.mxu0 %vm691_vm3, %v4949_v7  ;;  %3923 = vmatmul.mubr.msk.bf16.gmra.mrb[8].mxu1 %vm691_vm3, %v4949_v7  ;;  %v414_v41 = vsel %vm4797_vm4, %v409_v29, %v413_v54  ;;  %v419_v44 = vrot.slane %v418_v30, 4  ;;  %v459_v50 = vshll.u32 %v4947_v27, 16  ;;  %v441_v55 = vrot.slane %v439_v36, 4  ;;  %v4969_v54 = vld [vmem:[%s4750_s27 + $0x6c] sm:$0xf] }
  0x37   : > { %v433_v51 = vrot.slane %v432_v35, 4  ;;  %v447_v56 = vrot.slane %v445_v37, 5  ;;  %v452_v58 = vrot.slane %v450_v40, 4  ;;  %v455_v60 = vrot.slane %v453_v49, 5  ;;  %v4985_v36 = vld [vmem:[%s4750_s27 + $0x70] sm:$0xf] }
  0x38   : > { %v424_v59 = vsel %vm4797_vm4, %v419_v44, %v423_v21  ;;  %v461_v61 = vrot.slane %v459_v50, 5  ;;  %v463_v63 = vshrl.u32 %v4947_v27, 16  ;;  %v442_v17 = vor.u32 %v441_v55, %v437_v31  ;;  %v5136_v7 = vld [vmem:[%s4750_s27 + $0xa0] sm:$0xf] }
  0x39   : > { %v4971_v0 = vcombine.low %v414_v41, %v424_v59  ;;  %v438_v12 = vsel %vm4797_vm4, %v433_v51, %v437_v31  ;;  %v469_v22 = vshll.u32 %v4961_v47, 16  ;;  %v456_v21 = vor.u32 %v455_v60, %v452_v58  ;;  %v4998_v51 = vld [vmem:[%s4750_s27 + $0x74] sm:$0xf] }
  0x3a   : > { %v465_v29 = vrot.slane %v463_v63, 4  ;;  %v3532_v30 = vrot.slane %v4775_v16, 9  ;;  %v1225_v35 = vrot.slane %v4778_v18, 5  ;;  %v443_v31 = vrot.slane %v442_v17, 4 }
  0x3b   : > { %6026 = vst [vmem:[#allocation8_spill] sm:$0xff] %v4971_v0  ;;  %4059 = vmatmul.mubr.msk.bf16.gmra.mrb[8].mxu0 %vm691_vm3, %v4971_v0  ;;  %3926 = vmatprep.mubr.msk.bf16.mxu1 %vm691_vm3, %v4971_v0  ;;  %v471_v37 = vrot.slane %v469_v22, 5  ;;  %v474_v40 = vshrl.u32 %v4969_v54, 16  ;;  %v477_v41 = vshll.u32 %v4969_v54, 16  ;;  %v457_v44 = vrot.slane %v456_v21, 4 }
  0x3c   : > { %v466_v49 = vor.u32 %v465_v29, %v461_v61  ;;  %v1226_v16 = vsel %vm4978_vm7, %v3532_v30, %v1225_v35  ;;  %v1227_v18 = vrot.slane %v1225_v35, 4  ;;  %v448_v50 = vsel %vm4797_vm4, %v443_v31, %v447_v56  ;;  %v5010_v56 = vld [vmem:[%s4750_s27 + $0x78] sm:$0xf]  ;;  %v5026_v31 = vld [vmem:[%s4750_s27 + $0x7c] sm:$0xf] }
  0x3d   : > { %v476_v55 = vrot.slane %v474_v40, 4  ;;  %v479_v58 = vrot.slane %v477_v41, 5  ;;  %v483_v59 = vshll.u32 %v4985_v36, 16  ;;  %v5001_v60 = vcombine.low %v438_v12, %v448_v50 }
  0x3e   : > { %v462_v63 = vsel %vm4797_vm4, %v457_v44, %v461_v61  ;;  %v467_v17 = vrot.slane %v466_v49, 4  ;;  %v1229_v22 = vsel %vm4978_vm7, %v1227_v18, %v1228_v45  ;;  %v487_v35 = vshrl.u32 %v4985_v36, 16  ;;  %v5031_v49 = vld [vmem:[%s4750_s27 + $0x80] sm:$0xf] }
  0x3f   : > { %6029 = vst [vmem:[#allocation9_spill] sm:$0xff] %v5001_v60  ;;  %v5012_v21 = vcombine.low %v1226_v16, %v1229_v22  ;;  %v480_v29 = vor.u32 %v479_v58, %v476_v55  ;;  %v485_v30 = vrot.slane %v483_v59, 5  ;;  %4062 = vmatprep.mubr.msk.bf16.mxu0 %vm691_vm3, %v5001_v60  ;;  %3927 = vmatmul.mubr.msk.bf16.gmra.mrb[12].mxu1 %vm691_vm3, %v5001_v60  ;;  %v493_v45 = vshll.u32 %v4998_v51, 16  ;;  %v5129_v60 = vld [vmem:[%s4750_s27 + $0x9c] sm:$0xf] }
  0x40   : > { %v472_v19 = vsel %vm4797_vm4, %v467_v17, %v471_v37  ;;  %v3533_v61 = vrot.slane %v4793_v33, 9  ;;  %v1234_v12 = vrot.slane %v1232_v1, 4  ;;  %v489_v44 = vrot.slane %v487_v35, 4 }
  0x41   : > { %6030 = vst [vmem:[#allocation10_spill] sm:$0xff] %v5012_v21  ;;  %v5028_v40 = vcombine.low %v462_v63, %v472_v19  ;;  %v481_v41 = vrot.slane %v480_v29, 4  ;;  %v498_v16 = vshrl.u32 %v5010_v56, 16  ;;  %v495_v18 = vrot.slane %v493_v45, 5  ;;  %v5057_v29 = vld [vmem:[%s4750_s27 + $0x84] sm:$0xf] }
  0x42   : > { %v1233_v37 = vsel %vm4978_vm7, %v3533_v61, %v1232_v1  ;;  %v1236_v50 = vsel %vm4978_vm7, %v1234_v12, %v1235_v2  ;;  %v501_v55 = vshll.u32 %v5010_v56, 16  ;;  %v490_v59 = vor.u32 %v489_v44, %v485_v30 }
  0x43   : > { %6031 = vst [vmem:[#allocation11_spill] sm:$0xff] %v5028_v40  ;;  %4063 = vmatmul.mubr.msk.bf16.gmra.mrb[12].mxu0 %vm691_vm3, %v5028_v40  ;;  %3930 = vmatprep.mubr.msk.bf16.mxu1 %vm691_vm3, %v5028_v40  ;;  %v486_v58 = vsel %vm4797_vm4, %v481_v41, %v485_v30  ;;  %v5049_v63 = vcombine.low %v1233_v37, %v1236_v50  ;;  %v500_v1 = vrot.slane %v498_v16, 4  ;;  %v507_v2 = vshll.u32 %v5026_v31, 16  ;;  %v5063_v16 = vld [vmem:[%s4750_s27 + $0x88] sm:$0xf] }
  0x44   : > { %4084 = vmatprep.mubr.msk.bf16.mxu0 %vm691_vm3, %v5012_v21  ;;  %v503_v46 = vrot.slane %v501_v55, 5  ;;  %v511_v17 = vshrl.u32 %v5026_v31, 16  ;;  %v517_v22 = vshll.u32 %v5031_v49, 16  ;;  %v491_v35 = vrot.slane %v490_v59, 4 }
  0x45   : > { %6032 = vst [vmem:[#allocation12_spill] sm:$0xff] %v5049_v63  ;;  %v3534_v30 = vrot.slane %v4820_v57, 9  ;;  %v1239_v19 = vrot.slane %v4825_v62, 5  ;;  %v1242_v45 = vrot.slane %v4833_v4, 5  ;;  %v509_v12 = vrot.slane %v507_v2, 5 }
  0x46   : > { %v504_v61 = vor.u32 %v503_v46, %v500_v1  ;;  %v513_v41 = vrot.slane %v511_v17, 4  ;;  %v519_v44 = vrot.slane %v517_v22, 5  ;;  %v496_v37 = vsel %vm4797_vm4, %v491_v35, %v495_v18  ;;  %v5073_v1 = vld [vmem:[%s4750_s27 + $0x8c] sm:$0xf] }
  0x47   : > { %v1240_v50 = vsel %vm4978_vm7, %v3534_v30, %v1239_v19  ;;  %v1241_v55 = vrot.slane %v1239_v19, 4  ;;  %v522_v59 = vshrl.u32 %v5057_v29, 16  ;;  %v5070_v3 = vcombine.low %v486_v58, %v496_v37 }
  0x48   : > { %v505_v40 = vrot.slane %v504_v61, 4  ;;  %v514_v4 = vor.u32 %v513_v41, %v509_v12  ;;  %v525_v46 = vshll.u32 %v5057_v29, 16  ;;  %v531_v18 = vshll.u32 %v5063_v16, 16  ;;  %v5087_v61 = vld [vmem:[%s4750_s27 + $0x90] sm:$0xf] }
  0x49   : > { %6033 = vst [vmem:[#allocation13_spill] sm:$0xff] %v5070_v3  ;;  %v1243_v2 = vsel %vm4978_vm7, %v1241_v55, %v1242_v45  ;;  %v524_v17 = vrot.slane %v522_v59, 4  ;;  %v535_v22 = vshrl.u32 %v5063_v16, 16  ;;  %3931 = vmatmul.mubr.msk.bf16.gmra.mrb[16].mxu1 %vm691_vm3, %v5070_v3  ;;  %v5092_v45 = vld [vmem:[%s5984_s1 + $0xe] sm:$0x3]  ;;  %v1246_v59 = vrot.slane %v4851_v28, 5 }
  0x4a   : > { %v510_v58 = vsel %vm4797_vm4, %v505_v40, %v509_v12  ;;  %v515_v35 = vrot.slane %v514_v4, 4  ;;  %v5084_v30 = vcombine.low %v1240_v50, %v1243_v2  ;;  %v527_v19 = vrot.slane %v525_v46, 5  ;;  %6035 = vst [vmem:[#allocation15_spill] sm:$0xff] %v5092_v45  ;;  %v5106_v46 = vld [vmem:[%s4750_s27 + $0x94] sm:$0xf] }
  0x4b   : > { %4085 = vmatmul.mubr.msk.bf16.vlgmr.msra.gmra.mrb[0].mxu0 %vm691_vm3, %v5049_v63  ;;  %v533_v41 = vrot.slane %v531_v18, 5  ;;  %v537_v37 = vrot.slane %v535_v22, 4  ;;  %v541_v40 = vshll.u32 %v5073_v1, 16  ;;  %v3535_v12 = vrot.slane %v4839_v14, 9  ;;  %v5111_v3 = vld [vmem:[%s4750_s27 + $0x98] sm:$0xf] }
  0x4c   : > { %6034 = vst [vmem:[#allocation14_spill] sm:$0xff] %v5084_v30  ;;  %4117 = vmatpush3.bf16.msra.mxu0 %v4785_v20  ;;  %v520_v50 = vsel %vm4797_vm4, %v515_v35, %v519_v44  ;;  %4088 = vmatprep.mubr.msk.bf16.mxu0 %vm691_vm3, %v5084_v30  ;;  %v528_v55 = vor.u32 %v527_v19, %v524_v17  ;;  %v1249_v4 = vrot.slane %v4858_v32, 5  ;;  %v546_v20 = vshrl.u32 %v5087_v61, 16 }
  0x4d   : > { %v5108_v2 = vcombine.low %v510_v58, %v520_v50  ;;  %v538_v18 = vor.u32 %v537_v37, %v533_v41  ;;  %v543_v22 = vrot.slane %v541_v40, 5  ;;  %4484 = vmatprep.subr.msk.bf16.mxu0 %vm740_vm0, %v5092_v45  ;;  %v1247_v17 = vsel %vm4978_vm7, %v3535_v12, %v1246_v59 }
  0x4e   : > { %v529_v44 = vrot.slane %v528_v55, 4  ;;  %v1248_v35 = vrot.slane %v1246_v59, 4  ;;  %v549_v32 = vshll.u32 %v5087_v61, 16  ;;  %v548_v19 = vrot.slane %v546_v20, 4 }
  0x4f   : > { %6036 = vst [vmem:[#allocation16_spill] sm:$0xff] %v5108_v2  ;;  %3934 = vmatprep.mubr.msk.bf16.mxu1 %vm691_vm3, %v5108_v2  ;;  %v539_v58 = vrot.slane %v538_v18, 4  ;;  %v555_v37 = vshll.u32 %v5106_v46, 16  ;;  %v559_v40 = vshrl.u32 %v5106_v46, 16  ;;  %v565_v59 = vshll.u32 %v5111_v3, 16 }
  0x50   : > { %v534_v50 = vsel %vm4797_vm4, %v529_v44, %v533_v41  ;;  %v1250_v55 = vsel %vm4978_vm7, %v1248_v35, %v1249_v4  ;;  %v551_v12 = vrot.slane %v549_v32, 5  ;;  %v3536_v4 = vrot.slane %v4866_v48, 9 }
  0x51   : > { %v544_v2 = vsel %vm4797_vm4, %v539_v58, %v543_v22  ;;  %v5133_v18 = vcombine.low %v1247_v17, %v1250_v55  ;;  %v557_v20 = vrot.slane %v555_v37, 5  ;;  %v561_v0 = vrot.slane %v559_v40, 4  ;;  %v5149_v58 = vld [vmem:[%s4750_s27 + $0xa4] sm:$0xf] }
  0x52   : > { %v5138_v43 = vcombine.low %v534_v50, %v544_v2  ;;  %v552_v41 = vor.u32 %v551_v12, %v548_v19  ;;  %v567_v44 = vrot.slane %v565_v59, 5  ;;  %v1253_v32 = vrot.slane %v4874_v52, 5 }
  0x53   : > { %6037 = vst [vmem:[#allocation17_spill] sm:$0xff] %v5133_v18  ;;  %4089 = vmatmul.mubr.msk.bf16.gmra.mrb[4].mxu0 %vm691_vm3, %v5133_v18  ;;  %v562_v35 = vor.u32 %v561_v0, %v557_v20  ;;  %v1256_v22 = vrot.slane %v4886_v5, 5  ;;  %v570_v17 = vshrl.u32 %v5129_v60, 16  ;;  %v573_v19 = vshll.u32 %v5129_v60, 16 }
  0x54   : > { %6038 = vst [vmem:[#allocation18_spill] sm:$0xff] %v5138_v43  ;;  %3935 = vmatmul.mubr.msk.bf16.gmra.mrb[20].mxu1 %vm691_vm3, %v5138_v43  ;;  %v553_v2 = vrot.slane %v552_v41, 4  ;;  %v579_v37 = vshll.u32 %v5136_v7, 16  ;;  %v583_v0 = vshrl.u32 %v5136_v7, 16  ;;  %v1254_v5 = vsel %vm4978_vm7, %v3536_v4, %v1253_v32 }
  0x55   : > { %v563_v40 = vrot.slane %v562_v35, 4  ;;  %v1255_v50 = vrot.slane %v1253_v32, 4  ;;  %v572_v55 = vrot.slane %v570_v17, 4  ;;  %v575_v59 = vrot.slane %v573_v19, 5  ;;  %v5168_v32 = vld [vmem:[%s4750_s27 + $0xac] sm:$0xf] }
  0x56   : > { %v558_v12 = vsel %vm4797_vm4, %v553_v2, %v557_v20  ;;  %v581_v41 = vrot.slane %v579_v37, 5  ;;  %v585_v43 = vrot.slane %v583_v0, 4  ;;  %v589_v35 = vshll.u32 %v5149_v58, 16 }
  0x57   : > { %v568_v53 = vsel %vm4797_vm4, %v563_v40, %v567_v44  ;;  %v1257_v18 = vsel %vm4978_vm7, %v1255_v50, %v1256_v22  ;;  %v3537_v4 = vrot.slane %v4891_v13, 9  ;;  %v576_v2 = vor.u32 %v575_v59, %v572_v55 }
  0x58   : > { %v5170_v17 = vcombine.low %v558_v12, %v568_v53  ;;  %v5172_v20 = vcombine.low %v1254_v5, %v1257_v18  ;;  %v586_v19 = vor.u32 %v585_v43, %v581_v41  ;;  %v591_v37 = vrot.slane %v589_v35, 5  ;;  %v5182_v18 = vld [vmem:[%s4750_s27 + $0xb0] sm:$0xf] }
  0x59   : > { %v1260_v0 = vrot.slane %v4898_v24, 5  ;;  %v1263_v44 = vrot.slane %v4915_v8, 5  ;;  %v594_v22 = vshrl.u32 %v5159_v25, 16  ;;  %v577_v53 = vrot.slane %v576_v2, 4 }
  0x5a   : > { %6039 = vst [vmem:[#allocation19_spill] sm:$0xff] %v5170_v17  ;;  %6040 = vst [vmem:[#allocation20_spill] sm:$0xff] %v5172_v20  ;;  %3938 = vmatprep.mubr.msk.bf16.mxu1 %vm691_vm3, %v5170_v17  ;;  %4092 = vmatprep.mubr.msk.bf16.mxu0 %vm691_vm3, %v5172_v20  ;;  %v587_v40 = vrot.slane %v586_v19, 4  ;;  %v597_v43 = vshll.u32 %v5159_v25, 16  ;;  %v603_v5 = vshll.u32 %v5168_v32, 16  ;;  %v607_v12 = vshrl.u32 %v5168_v32, 16 }
  0x5b   : > { %v1261_v8 = vsel %vm4978_vm7, %v3537_v4, %v1260_v0  ;;  %v1262_v50 = vrot.slane %v1260_v0, 4  ;;  %v596_v55 = vrot.slane %v594_v22, 4  ;;  %v582_v59 = vsel %vm4797_vm4, %v577_v53, %v581_v41  ;;  %v5194_v17 = vld [vmem:[%s4750_s27 + $0xb4] sm:$0xf]  ;;  %v5206_v53 = vld [vmem:[%s4750_s27 + $0xb8] sm:$0xf] }
  0x5c   : > { %v592_v35 = vsel %vm4797_vm4, %v587_v40, %v591_v37  ;;  %v599_v2 = vrot.slane %v597_v43, 5  ;;  %v605_v19 = vrot.slane %v603_v5, 5  ;;  %v609_v0 = vrot.slane %v607_v12, 4 }
  0x5d   : > { %v5196_v20 = vcombine.low %v582_v59, %v592_v35  ;;  %v1264_v4 = vsel %vm4978_vm7, %v1262_v50, %v1263_v44  ;;  %v613_v22 = vshll.u32 %v5182_v18, 16  ;;  %v3538_v41 = vrot.slane %v4920_v42, 9  ;;  %v5212_v44 = vld [vmem:[%s4750_s27 + $0xbc] sm:$0xf] }
  0x5e   : > { %v5201_v30 = vcombine.low %v1261_v8, %v1264_v4  ;;  %v600_v63 = vor.u32 %v599_v2, %v596_v55  ;;  %v1267_v37 = vrot.slane %v4925_v6, 5  ;;  %v610_v40 = vor.u32 %v609_v0, %v605_v19 }
  0x5f   : > { %6041 = vst [vmem:[#allocation21_spill] sm:$0xff] %v5196_v20  ;;  %3939 = vmatmul.mubr.msk.bf16.gmra.mrb[24].mxu1 %vm691_vm3, %v5196_v20  ;;  %v615_v43 = vrot.slane %v613_v22, 5  ;;  %v1270_v5 = vrot.slane %v4938_v11, 5  ;;  %v618_v50 = vshrl.u32 %v5194_v17, 16  ;;  %v621_v59 = vshll.u32 %v5194_v17, 16 }
  0x60   : > { %6042 = vst [vmem:[#allocation22_spill] sm:$0xff] %v5201_v30  ;;  %4093 = vmatmul.mubr.msk.bf16.gmra.mrb[8].mxu0 %vm691_vm3, %v5201_v30  ;;  %v601_v8 = vrot.slane %v600_v63, 4  ;;  %v1268_v55 = vsel %vm4978_vm7, %v3538_v41, %v1267_v37  ;;  %v1269_v12 = vrot.slane %v1267_v37, 4  ;;  %v611_v35 = vrot.slane %v610_v40, 4 }
  0x61   : > { %v620_v2 = vrot.slane %v618_v50, 4  ;;  %v627_v4 = vshll.u32 %v5206_v53, 16  ;;  %v631_v11 = vshrl.u32 %v5206_v53, 16  ;;  %v623_v20 = vrot.slane %v621_v59, 5 }
  0x62   : > { %v606_v0 = vsel %vm4797_vm4, %v601_v8, %v605_v19  ;;  %v1271_v22 = vsel %vm4978_vm7, %v1269_v12, %v1270_v5  ;;  %v637_v63 = vshll.u32 %v5212_v44, 16  ;;  %v616_v41 = vsel %vm4797_vm4, %v611_v35, %v615_v43 }
  0x63   : > { %v5229_v37 = vcombine.low %v1268_v55, %v1271_v22  ;;  %v629_v40 = vrot.slane %v627_v4, 5  ;;  %v633_v50 = vrot.slane %v631_v11, 4  ;;  %v5231_v30 = vcombine.low %v606_v0, %v616_v41 }
  0x64   : > { %v624_v21 = vor.u32 %v623_v20, %v620_v2  ;;  %v639_v45 = vrot.slane %v637_v63, 5  ;;  %v3539_v42 = vrot.slane %v4942_v15, 9  ;;  %v1274_v5 = vrot.slane %v4947_v27, 5 }
  0x65   : > { %4096 = vmatprep.mubr.msk.bf16.mxu0 %vm691_vm3, %v5229_v37  ;;  %v634_v19 = vor.u32 %v633_v50, %v629_v40  ;;  %v1277_v8 = vrot.slane %v4961_v47, 5  ;;  %v3540_v43 = vrot.slane %v4969_v54, 9  ;;  %3942 = vmatprep.mubr.msk.bf16.mxu1 %vm691_vm3, %v5231_v30  ;;  %v3499_v20 = vcombine.low %v4764_v9, %v4767_v10 }
  0x66   : > { %v625_v55 = vrot.slane %v624_v21, 4  ;;  %v1281_v12 = vrot.slane %v4985_v36, 5  ;;  %v1284_v59 = vrot.slane %v4998_v51, 5  ;;  %v1275_v2 = vsel %vm4978_vm7, %v3539_v42, %v1274_v5 }
  0x67   : > { %v635_v35 = vrot.slane %v634_v19, 4  ;;  %v1276_v4 = vrot.slane %v1274_v5, 4  ;;  %v1288_v47 = vrot.slane %v5026_v31, 5  ;;  %v3541_v9 = vrot.slane %v5010_v56, 9 }
  0x68   : > { %v630_v11 = vsel %vm4797_vm4, %v625_v55, %v629_v40  ;;  %v1282_v21 = vsel %vm4978_vm7, %v3540_v43, %v1281_v12  ;;  %v1283_v0 = vrot.slane %v1281_v12, 4  ;;  %v1291_v42 = vrot.slane %v5031_v49, 5 }
  0x69   : > { %v640_v10 = vsel %vm4797_vm4, %v635_v35, %v639_v45  ;;  %v1278_v51 = vsel %vm4978_vm7, %v1276_v4, %v1277_v8  ;;  %v1290_v22 = vrot.slane %v1288_v47, 4  ;;  %v3542_v19 = vrot.slane %v5057_v29, 9 }
  0x6a   : > { %v5258_v63 = vcombine.low %v630_v11, %v640_v10  ;;  %v5260_v41 = vcombine.low %v1275_v2, %v1278_v51  ;;  %v1285_v40 = vsel %vm4978_vm7, %v1283_v0, %v1284_v59  ;;  %v1295_v5 = vrot.slane %v5063_v16, 5 }
  0x6b   : > { %v5264_v50 = vcombine.low %v1282_v21, %v1285_v40  ;;  %v1298_v49 = vrot.slane %v5073_v1, 5  ;;  %v1289_v45 = vsel %vm4978_vm7, %v3541_v9, %v1288_v47  ;;  %v1292_v8 = vsel %vm4978_vm7, %v1290_v22, %v1291_v42 }
  0x6c   : > { %3943 = vmatmul.mubr.msk.bf16.gmra.mrb[28].mxu1 %vm691_vm3, %v5258_v63  ;;  %4097 = vmatmul.mubr.msk.bf16.gmra.mrb[12].mxu0 %vm691_vm3, %v5260_v41  ;;  %v1297_v43 = vrot.slane %v1295_v5, 4  ;;  %v1302_v55 = vrot.slane %v5106_v46, 5  ;;  %v1309_v12 = vrot.slane %v5136_v7, 5  ;;  %v1296_v59 = vsel %vm4978_vm7, %v3542_v19, %v1295_v5 }
  0x6d   : > { %3948 = vmatprep.mubr.msk.bf16.mxu1 %vm691_vm3, %v3499_v20  ;;  %4100 = vmatprep.mubr.msk.bf16.mxu0 %vm691_vm3, %v5264_v50  ;;  %v5286_v20 = vcombine.low %v1289_v45, %v1292_v8  ;;  %v3543_v35 = vrot.slane %v5087_v61, 9  ;;  %v1305_v4 = vrot.slane %v5111_v3, 5  ;;  %v5292_v47 = vcombine.low %v4793_v33, %v4806_v39  ;;  %v5304_v3 = vld [vmem:[%s5984_s1 + $0x6] sm:$0x3] }
  0x6e   : > { %v1299_v1 = vsel %vm4978_vm7, %v1297_v43, %v1298_v49  ;;  %v1304_v2 = vrot.slane %v1302_v55, 4  ;;  %v3544_v11 = vrot.slane %v5129_v60, 9  ;;  %v1427_v21 = vsel %vm740_vm0, %v4846_v23, 0 }
  0x6f   : > { %v5297_v0 = vcombine.low %v1296_v59, %v1299_v1  ;;  %v1311_v9 = vrot.slane %v1309_v12, 4  ;;  %v1312_v10 = vrot.slane %v5149_v58, 5  ;;  %v1316_v51 = vrot.slane %v5168_v32, 5 }
  0x70   : > { %v1303_v33 = vsel %vm4978_vm7, %v3543_v35, %v1302_v55  ;;  %v1306_v39 = vsel %vm4978_vm7, %v1304_v2, %v1305_v4  ;;  %v5318_v23 = vcombine.low %v4820_v57, %v4825_v62  ;;  %v1310_v58 = vsel %vm4978_vm7, %v3544_v11, %v1309_v12 }
  0x71   : > { %v5324_v22 = vcombine.low %v4942_v15, %v4947_v27  ;;  %v1313_v42 = vsel %vm4978_vm7, %v1311_v9, %v1312_v10  ;;  %v3545_v40 = vrot.slane %v5159_v25, 9  ;;  %v1323_v19 = vrot.slane %v5206_v53, 5 }
  0x72   : > { %v5334_v57 = vcombine.low %v4969_v54, %v4985_v36  ;;  %v5338_v62 = vcombine.low %v1303_v33, %v1306_v39  ;;  %v1318_v15 = vrot.slane %v1316_v51, 4  ;;  %v1319_v27 = vrot.slane %v5182_v18, 5  ;;  %v249_v18 = vld [vmem:[%s4750_s27 + $0xc8] sm:$0xf] }
  0x73   : > { %v5343_v5 = vcombine.low %v5010_v56, %v5026_v31  ;;  %v5347_v49 = vcombine.low %v5057_v29, %v5063_v16  ;;  %v5351_v54 = vcombine.low %v5087_v61, %v5106_v46  ;;  %v5355_v36 = vcombine.low %v5129_v60, %v5136_v7  ;;  %v5374_v61 = vld [vmem:[%s4750_s27 + $0xc4] sm:$0xf] }
  0x74   : > { %3949 = vmatmul.mubr.msk.bf16.vlgmr.msra.gmra.mrb[0].mxu1 %vm691_vm3, %v4803_v38  ;;  %4101 = vmatmul.mubr.msk.bf16.gmra.mrb[16].mxu0 %vm691_vm3, %v5286_v20  ;;  %v5359_v45 = vcombine.low %v5159_v25, %v5168_v32  ;;  %v5363_v56 = vcombine.low %v4839_v14, %v4851_v28  ;;  %v5365_v31 = vcombine.low %v1310_v58, %v1313_v42  ;;  %v3546_v16 = vrot.slane %v5194_v17, 9  ;;  %v6043_v42 = vld [vmem:[#allocation5_spill] sm:$0xff] }
  0x75   : > { %3981 = vmatpush3.bf16.msra.mxu1 %v1427_v21  ;;  %3952 = vmatprep.mubr.msk.bf16.mxu1 %vm691_vm3, %v5292_v47  ;;  %v5369_v29 = vcombine.low %v5194_v17, %v5206_v53  ;;  %v1325_v7 = vrot.slane %v1323_v19, 4  ;;  %v1326_v60 = vrot.slane %v5212_v44, 5  ;;  %v1317_v14 = vsel %vm4978_vm7, %v3545_v40, %v1316_v51  ;;  %v5394_v17 = vld [vmem:[%s4750_s27 + $0xc0] sm:$0xf] }
  0x76   : > { %4104 = vmatprep.mubr.msk.bf16.mxu0 %vm691_vm3, %v5297_v0  ;;  %4479 = vmatprep.subr.msk.bf16.mxu1 %vm740_vm0, %v5304_v3  ;;  %v1320_v28 = vsel %vm4978_vm7, %v1318_v15, %v1319_v27  ;;  %v2059_v25 = vrot.slane %v5374_v61, 5  ;;  %v1324_v46 = vsel %vm4978_vm7, %v3546_v16, %v1323_v19  ;;  %v5399_v53 = vcombine.low %v4866_v48, %v4874_v52 }
  0x77   : > { %v1327_v32 = vsel %vm4978_vm7, %v1325_v7, %v1326_v60  ;;  %v5401_v44 = vcombine.low %v1317_v14, %v1320_v28  ;;  %v5405_v8 = vcombine.low %v4891_v13, %v4898_v24  ;;  %v1829_v43 = vshrl.u32 %v5394_v17, 16  ;;  %v3672_v60 = vld [vmem:[%s5984_s1 + $0x10] sm:$0x3]  ;;  %v4657_v14 = vld [vmem:[%s4750_s27 + $0x4] sm:$0xf] }
  0x78   : > { %v1832_v55 = vshll.u32 %v5394_v17, 16  ;;  %v1838_v12 = vshll.u32 %v5374_v61, 16  ;;  %v1842_v59 = vshrl.u32 %v5374_v61, 16  ;;  %v5411_v1 = vcombine.low %v1324_v46, %v1327_v32  ;;  %v4659_v32 = vld [vmem:[%s4750_s27] sm:$0xf] }
  0x79   : > { %v3616_v35 = vrot.slane %v5394_v17, 9  ;;  %v2061_v48 = vrot.slane %v2059_v25, 4  ;;  %v2062_v52 = vrot.slane %v249_v18, 5  ;;  %v1831_v2 = vrot.slane %v1829_v43, 4 }
  0x7a   : > { %v1834_v4 = vrot.slane %v1832_v55, 5  ;;  %v1840_v11 = vrot.slane %v1838_v12, 5  ;;  %v1844_v21 = vrot.slane %v1842_v59, 4  ;;  %v1848_v9 = vshll.u32 %v249_v18, 16 }
  0x7b   : > { %v2060_v10 = vsel %vm4978_vm7, %v3616_v35, %v2059_v25  ;;  %v2063_v51 = vsel %vm4978_vm7, %v2061_v48, %v2062_v52  ;;  %v5428_v40 = vcombine.low %v6043_v42, %v4925_v6  ;;  %v6044_v6 = vld [vmem:[#allocation15_spill] sm:$0xff]  ;;  %v1218_v28 = vrot.slane %v4657_v14, 5  ;;  %v6045_v48 = vld [vmem:[#allocation10_spill] sm:$0xff]  ;;  %v6046_v52 = vld [vmem:[#allocation12_spill] sm:$0xff] }
  0x7c   : > { %3953 = vmatmul.mubr.msk.bf16.gmra.mrb[4].mxu1 %vm691_vm3, %v5318_v23  ;;  %4105 = vmatmul.mubr.msk.bf16.gmra.mrb[20].mxu0 %vm691_vm3, %v5338_v62  ;;  %v1835_v13 = vor.u32 %v1834_v4, %v1831_v2  ;;  %v1845_v24 = vor.u32 %v1844_v21, %v1840_v11  ;;  %v1850_v58 = vrot.slane %v1848_v9, 5  ;;  %v5430_v19 = vcombine.low %v2060_v10, %v2063_v51  ;;  %v4658_v25 = vld [vmem:[%s4750_s27 + $0x8] sm:$0xf]  ;;  %v6048_v4 = vld [vmem:[#allocation17_spill] sm:$0xff]  ;;  %v6049_v21 = vld [vmem:[#allocation20_spill] sm:$0xff] }
  0x7d   : > { %3956 = vmatprep.mubr.msk.bf16.mxu1 %vm691_vm3, %v5363_v56  ;;  %4108 = vmatprep.mubr.msk.bf16.mxu0 %vm691_vm3, %v5365_v31  ;;  %v2507_v7 = vsel %vm740_vm0, %v6044_v6, 0  ;;  %v1221_v46 = vrot.slane %v4658_v25, 5  ;;  %v3531_v18 = vrot.slane %v4659_v32, 9  ;;  %v1220_v43 = vrot.slane %v1218_v28, 4  ;;  %v4660_v2 = vld [vmem:[%s5984_s1 + $0x8] sm:$0x3] }
  0x7e   : > { %v1836_v33 = vrot.slane %v1835_v13, 4  ;;  %v1846_v39 = vrot.slane %v1845_v24, 4  ;;  %v1633_v35 = vsel %vm740_vm0, %v5304_v3, 0  ;;  %v6047_v3 = vld [vmem:[#allocation14_spill] sm:$0xff]  ;;  %v5525_v24 = vld [vmem:[%s4750_s27 + $0xcc] sm:$0xf] }
  0x7f   : > { %v1219_v55 = vsel %vm4978_vm7, %v3531_v18, %v1218_v28  ;;  %v1222_v12 = vsel %vm4978_vm7, %v1220_v43, %v1221_v46  ;;  %v6050_v13 = vld [vmem:[#allocation22_spill] sm:$0xff]  ;;  %v5528_v9 = vld [vmem:[%s4750_s27 + $0xd0] sm:$0xf]  ;;  %v2719_v10 = vsel %vm740_vm0, %v3672_v60, 0  ;;  %v6056_v42 = vld [vmem:[#allocation9_spill] sm:$0xff]  ;;  %v2478_v14 = vshll.u32 %v5525_v24, 16 }
  0x80   : > { %v1841_v15 = vsel %vm4797_vm4, %v1836_v33, %v1840_v11  ;;  %v1851_v27 = vsel %vm4797_vm4, %v1846_v39, %v1850_v58  ;;  %v3548_v59 = vcombine.low %v1219_v55, %v1222_v12  ;;  %v5514_v11 = vcombine.low %v5394_v17, %v5374_v61  ;;  %v6051_v17 = vld [vmem:[#allocation3_spill] sm:$0xff]  ;;  %v6052_v51 = vld [vmem:[#allocation4_spill] sm:$0xff]  ;;  %v6053_v33 = vld [vmem:[#allocation6_spill] sm:$0xff] }
  0x81   : > { %v5436_v16 = vcombine.low %v1841_v15, %v1851_v27  ;;  %v3636_v61 = vcombine.low %v5525_v24, %v5528_v9  ;;  %v6054_v39 = vld [vmem:[#allocation7_spill] sm:$0xff]  ;;  %v6055_v58 = vld [vmem:[#allocation8_spill] sm:$0xff]  ;;  %v6058_v27 = vld [vmem:[#allocation13_spill] sm:$0xff]  ;;  %v2488_v28 = vshrl.u32 %v5528_v9, 16  ;;  %v2480_v32 = vrot.slane %v2478_v14, 5 }
  0x82   : > { %v6057_v15 = vld [vmem:[#allocation11_spill] sm:$0xff]  ;;  %v6059_v6 = vld [vmem:[#allocation16_spill] sm:$0xff]  ;;  %v6061_v25 = vld [vmem:[#allocation2_spill] sm:$0xff]  ;;  %v2705_v34 = vrot.slane %v5528_v9, 5 }
  0x83   : > { %v6062_v46 = vld [vmem:[#allocation19_spill] sm:$0xff]  ;;  %v2490_v43 = vrot.slane %v2488_v28, 4  ;;  %v252_v55 = vld [vmem:[%s4750_s27 + $0xd4] sm:$0xf]  ;;  %v6063_v12 = vld [vmem:[#allocation21_spill] sm:$0xff] }
  0x84   : > { %3957 = vmatmul.mubr.msk.bf16.gmra.mrb[8].mxu1 %vm691_vm3, %v5399_v53  ;;  %4109 = vmatmul.mubr.msk.bf16.gmra.mrb[24].mxu0 %vm691_vm3, %v5401_v44 }
  0x85   : > { %3960 = vmatprep.mubr.msk.bf16.mxu1 %vm691_vm3, %v5405_v8  ;;  %4112 = vmatprep.mubr.msk.bf16.mxu0 %vm691_vm3, %v5411_v1 }
  0x8c   : > { %3961 = vmatmul.mubr.msk.bf16.gmra.mrb[12].mxu1 %vm691_vm3, %v5428_v40  ;;  %4113 = vmatmul.mubr.msk.bf16.gmra.mrb[28].mxu0 %vm691_vm3, %v5430_v19 }
  0x8d   : > { %3964 = vmatprep.mubr.msk.bf16.mxu1 %vm691_vm3, %v5324_v22  ;;  %4118 = vmatprep.mubr.msk.bf16.mxu0 %vm691_vm3, %v5292_v47 }
  0x94   : > { %3965 = vmatmul.mubr.msk.bf16.gmra.mrb[16].mxu1 %vm691_vm3, %v5334_v57  ;;  %4119 = vmatmul.mubr.msk.bf16.vlgmr.msra.gmra.mrb[0].mxu0 %vm691_vm3, %v5318_v23 }
  0x95   : > { %4151 = vmatpush3.bf16.msra.mxu0 %v2507_v7  ;;  %3968 = vmatprep.mubr.msk.bf16.mxu1 %vm691_vm3, %v5343_v5  ;;  %v6060_v7 = vld [vmem:[#allocation18_spill] sm:$0xff] }
  0x96   : > { %4122 = vmatprep.mubr.msk.bf16.mxu0 %vm691_vm3, %v5363_v56  ;;  %4485 = vmatprep.subr.msk.bf16.mxu0 %vm740_vm0, %v3672_v60  ;;  %v2475_v60 = vshrl.u32 %v5525_v24, 16 }
  0x9c   : > { %3969 = vmatmul.mubr.msk.bf16.gmra.mrb[20].mxu1 %vm691_vm3, %v5347_v49  ;;  %4123 = vmatmul.mubr.msk.bf16.gmra.mrb[4].mxu0 %vm691_vm3, %v5399_v53 }
  0x9d   : > { %3972 = vmatprep.mubr.msk.bf16.mxu1 %vm691_vm3, %v5351_v54  ;;  %4126 = vmatprep.mubr.msk.bf16.mxu0 %vm691_vm3, %v5405_v8 }
  0xa4   : > { %3973 = vmatmul.mubr.msk.bf16.gmra.mrb[24].mxu1 %vm691_vm3, %v5355_v36  ;;  %4127 = vmatmul.mubr.msk.bf16.gmra.mrb[8].mxu0 %vm691_vm3, %v5428_v40 }
  0xa5   : > { %3976 = vmatprep.mubr.msk.bf16.mxu1 %vm691_vm3, %v5359_v45  ;;  %4130 = vmatprep.mubr.msk.bf16.mxu0 %vm691_vm3, %v5324_v22 }
  0xac   : > { %3977 = vmatmul.mubr.msk.bf16.gmra.mrb[28].mxu1 %vm691_vm3, %v5369_v29  ;;  %4131 = vmatmul.mubr.msk.bf16.gmra.mrb[12].mxu0 %vm691_vm3, %v5334_v57 }
  0xad   : > { %3982 = vmatprep.mubr.msk.bf16.mxu1 %vm691_vm3, %v3548_v59  ;;  %4134 = vmatprep.mubr.msk.bf16.mxu0 %vm691_vm3, %v5343_v5 }
  0xb4   : > { %3983 = vmatmul.mubr.msk.bf16.vlgmr.msra.gmra.mrb[0].mxu1 %vm691_vm3, %v6045_v48  ;;  %4135 = vmatmul.mubr.msk.bf16.gmra.mrb[16].mxu0 %vm691_vm3, %v5347_v49 }
  0xb5   : > { %4015 = vmatpush3.bf16.msra.mxu1 %v1633_v35  ;;  %3986 = vmatprep.mubr.msk.bf16.mxu1 %vm691_vm3, %v6046_v52  ;;  %v2494_v35 = vshll.u32 %v252_v55, 16 }
  0xb6   : > { %4138 = vmatprep.mubr.msk.bf16.mxu0 %vm691_vm3, %v5351_v54  ;;  %4481 = vmatprep.subr.msk.bf16.mxu1 %vm740_vm0, %v4660_v2 }
  0xbc   : > { %3987 = vmatmul.mubr.msk.bf16.gmra.mrb[4].mxu1 %vm691_vm3, %v6047_v3  ;;  %4139 = vmatmul.mubr.msk.bf16.gmra.mrb[20].mxu0 %vm691_vm3, %v5355_v36 }
  0xbd   : > { %3990 = vmatprep.mubr.msk.bf16.mxu1 %vm691_vm3, %v6048_v4  ;;  %4142 = vmatprep.mubr.msk.bf16.mxu0 %vm691_vm3, %v5359_v45 }
  0xc4   : > { %3991 = vmatmul.mubr.msk.bf16.gmra.mrb[8].mxu1 %vm691_vm3, %v6049_v21  ;;  %4143 = vmatmul.mubr.msk.bf16.gmra.mrb[24].mxu0 %vm691_vm3, %v5369_v29 }
  0xc5   : > { %3994 = vmatprep.mubr.msk.bf16.mxu1 %vm691_vm3, %v6050_v13  ;;  %4146 = vmatprep.mubr.msk.bf16.mxu0 %vm691_vm3, %v5514_v11 }
  0xcc   : > { %3995 = vmatmul.mubr.msk.bf16.gmra.mrb[12].mxu1 %vm691_vm3, %v5229_v37  ;;  %4147 = vmatmul.mubr.msk.bf16.gmra.mrb[28].mxu0 %vm691_vm3, %v3636_v61  ;;  %v2496_v61 = vrot.slane %v2494_v35, 5 }
  0xcd   : > { %3998 = vmatprep.mubr.msk.bf16.mxu1 %vm691_vm3, %v5260_v41  ;;  %4152 = vmatprep.mubr.msk.bf16.mxu0 %vm691_vm3, %v6051_v17 }
  0xd4   : > { %3999 = vmatmul.mubr.msk.bf16.gmra.mrb[16].mxu1 %vm691_vm3, %v5264_v50  ;;  %4153 = vmatmul.mubr.msk.bf16.vlgmr.msra.gmra.mrb[0].mxu0 %vm691_vm3, %v6052_v51 }
  0xd5   : > { %4185 = vmatpush3.bf16.msra.mxu0 %v2719_v10  ;;  %4002 = vmatprep.mubr.msk.bf16.mxu1 %vm691_vm3, %v5286_v20 }
  0xd6   : > { %4156 = vmatprep.mubr.msk.bf16.mxu0 %vm691_vm3, %v6053_v33 }
  0xdc   : > { %4003 = vmatmul.mubr.msk.bf16.gmra.mrb[20].mxu1 %vm691_vm3, %v5297_v0  ;;  %4157 = vmatmul.mubr.msk.bf16.gmra.mrb[4].mxu0 %vm691_vm3, %v6054_v39 }
  0xdd   : > { %4006 = vmatprep.mubr.msk.bf16.mxu1 %vm691_vm3, %v5338_v62  ;;  %4160 = vmatprep.mubr.msk.bf16.mxu0 %vm691_vm3, %v6055_v58 }
  0xe4   : > { %4007 = vmatmul.mubr.msk.bf16.gmra.mrb[24].mxu1 %vm691_vm3, %v5365_v31  ;;  %4161 = vmatmul.mubr.msk.bf16.gmra.mrb[8].mxu0 %vm691_vm3, %v6056_v42 }
  0xe5   : > { %4010 = vmatprep.mubr.msk.bf16.mxu1 %vm691_vm3, %v5401_v44  ;;  %4164 = vmatprep.mubr.msk.bf16.mxu0 %vm691_vm3, %v6057_v15 }
  0xec   : > { %4011 = vmatmul.mubr.msk.bf16.gmra.mrb[28].mxu1 %vm691_vm3, %v5411_v1  ;;  %4165 = vmatmul.mubr.msk.bf16.gmra.mrb[12].mxu0 %vm691_vm3, %v6058_v27 }
  0xed   : > { %4016 = vmatprep.mubr.msk.bf16.mxu1 %vm691_vm3, %v4803_v38  ;;  %4168 = vmatprep.mubr.msk.bf16.mxu0 %vm691_vm3, %v6059_v6  ;;  %v2484_v38 = vshll.u32 %v5528_v9, 16 }
  0xef   : > { %v2486_v18 = vrot.slane %v2484_v38, 5 }
  0xf1   : > { %v2491_v59 = vor.u32 %v2490_v43, %v2486_v18 }
  0xf3   : > { %v2492_v2 = vrot.slane %v2491_v59, 4 }
  0xf4   : > { %4017 = vmatmul.mubr.msk.bf16.vlgmr.msra.gmra.mrb[0].mxu1 %vm691_vm3, %v5292_v47  ;;  %4169 = vmatmul.mubr.msk.bf16.gmra.mrb[16].mxu0 %vm691_vm3, %v6060_v7  ;;  %v2477_v47 = vrot.slane %v2475_v60, 4 }
  0xf5   : > { %4219 = vmatpush3.bf16.msra.mxu1 %v6061_v25  ;;  %4020 = vmatprep.mubr.msk.bf16.mxu1 %vm691_vm3, %v5318_v23 }
  0xf6   : > { %4172 = vmatprep.mubr.msk.bf16.mxu0 %vm691_vm3, %v6062_v46  ;;  %v2481_v23 = vor.u32 %v2480_v32, %v2477_v47 }
  0xf8   : > { %v2482_v48 = vrot.slane %v2481_v23, 4 }
  0xfc   : > { %4021 = vmatmul.mubr.msk.bf16.gmra.mrb[4].mxu1 %vm691_vm3, %v5363_v56  ;;  %4173 = vmatmul.mubr.msk.bf16.gmra.mrb[20].mxu0 %vm691_vm3, %v6063_v12  ;;  %v2487_v56 = vsel %vm4797_vm4, %v2482_v48, %v2486_v18 }
  0xfd   : > { %4024 = vmatprep.mubr.msk.bf16.mxu1 %vm691_vm3, %v5399_v53  ;;  %4176 = vmatprep.mubr.msk.bf16.mxu0 %vm691_vm3, %v5231_v30  ;;  %v2497_v53 = vsel %vm4797_vm4, %v2492_v2, %v2496_v61 }
  0xfe   : > { %v3654_v17 = vcombine.low %v2487_v56, %v2497_v53 }
 0x104   : > { %4025 = vmatmul.mubr.msk.bf16.gmra.mrb[8].mxu1 %vm691_vm3, %v5405_v8  ;;  %4177 = vmatmul.mubr.msk.bf16.gmra.mrb[24].mxu0 %vm691_vm3, %v5258_v63 }
 0x105   : > { %4028 = vmatprep.mubr.msk.bf16.mxu1 %vm691_vm3, %v5428_v40  ;;  %4180 = vmatprep.mubr.msk.bf16.mxu0 %vm691_vm3, %v5436_v16 }
 0x10c   : > { %4029 = vmatmul.mubr.msk.bf16.gmra.mrb[12].mxu1 %vm691_vm3, %v5324_v22  ;;  %4181 = vmatmul.mubr.msk.bf16.gmra.mrb[28].mxu0 %vm691_vm3, %v3654_v17 }
 0x10d   : > { %4032 = vmatprep.mubr.msk.bf16.mxu1 %vm691_vm3, %v5334_v57  ;;  %4186 = vmatprep.mubr.msk.bf16.mxu0 %vm691_vm3, %v6046_v52 }
 0x114   : > { %4033 = vmatmul.mubr.msk.bf16.gmra.mrb[16].mxu1 %vm691_vm3, %v5343_v5  ;;  %4187 = vmatmul.mubr.msk.bf16.vlgmr.msra.gmra.mrb[0].mxu0 %vm691_vm3, %v6047_v3 }
 0x115   : > { %4036 = vmatprep.mubr.msk.bf16.mxu1 %vm691_vm3, %v5347_v49  ;;  %4190 = vmatprep.mubr.msk.bf16.mxu0 %vm691_vm3, %v6048_v4  ;;  %v5698_v4 = vld [vmem:[%s5985_s2 + $0x1] ss:$0 sm:$0xff] }
 0x11c   : > { %4037 = vmatmul.mubr.msk.bf16.gmra.mrb[20].mxu1 %vm691_vm3, %v5351_v54  ;;  %4191 = vmatmul.mubr.msk.bf16.gmra.mrb[4].mxu0 %vm691_vm3, %v6049_v21 }
 0x11d   : > { %4040 = vmatprep.mubr.msk.bf16.mxu1 %vm691_vm3, %v5355_v36  ;;  %4194 = vmatprep.mubr.msk.bf16.mxu0 %vm691_vm3, %v6050_v13 }
 0x124   : > { %4041 = vmatmul.mubr.msk.bf16.gmra.mrb[24].mxu1 %vm691_vm3, %v5359_v45  ;;  %4195 = vmatmul.mubr.msk.bf16.gmra.mrb[8].mxu0 %vm691_vm3, %v5229_v37  ;;  %v3671_v37 = vrot.slane %v5525_v24, 9 }
 0x125   : > { %4044 = vmatprep.mubr.msk.bf16.mxu1 %vm691_vm3, %v5369_v29  ;;  %4198 = vmatprep.mubr.msk.bf16.mxu0 %vm691_vm3, %v5260_v41  ;;  %v2707_v41 = vrot.slane %v2705_v34, 4 }
 0x12c   : > { %4045 = vmatmul.mubr.msk.bf16.gmra.mrb[28].mxu1 %vm691_vm3, %v5514_v11  ;;  %4199 = vmatmul.mubr.msk.bf16.gmra.mrb[12].mxu0 %vm691_vm3, %v5264_v50  ;;  %v2708_v50 = vrot.slane %v252_v55, 5 }
 0x12d   : > { %4066 = vmatprep.mubr.msk.bf16.mxu1 %vm691_vm3, %v6058_v27  ;;  %4202 = vmatprep.mubr.msk.bf16.mxu0 %vm691_vm3, %v5286_v20  ;;  %v2706_v20 = vsel %vm4978_vm7, %v3671_v37, %v2705_v34 }
 0x134   : > { %4067 = vmatmul.mubr.msk.bf16.vlgmr.msra.gmra.mrb[16].mxu1 %vm691_vm3, %v6059_v6  ;;  %4203 = vmatmul.mubr.msk.bf16.gmra.mrb[16].mxu0 %vm691_vm3, %v5297_v0  ;;  %v2709_v0 = vsel %vm4978_vm7, %v2707_v41, %v2708_v50 }
 0x135   : > { %4070 = vmatprep.mubr.msk.bf16.mxu1 %vm691_vm3, %v6060_v7  ;;  %4206 = vmatprep.mubr.msk.bf16.mxu0 %vm691_vm3, %v5338_v62  ;;  %v3673_v22 = vcombine.low %v2706_v20, %v2709_v0 }
 0x13c   : > { %4071 = vmatmul.mubr.msk.bf16.gmra.mrb[20].mxu1 %vm691_vm3, %v6062_v46  ;;  %4207 = vmatmul.mubr.msk.bf16.gmra.mrb[20].mxu0 %vm691_vm3, %v5365_v31 }
 0x13d   : > { %4074 = vmatprep.mubr.msk.bf16.mxu1 %vm691_vm3, %v6063_v12  ;;  %4210 = vmatprep.mubr.msk.bf16.mxu0 %vm691_vm3, %v5401_v44 }
 0x144   : > { %4075 = vmatmul.mubr.msk.bf16.gmra.mrb[24].mxu1 %vm691_vm3, %v5231_v30  ;;  %4211 = vmatmul.mubr.msk.bf16.gmra.mrb[24].mxu0 %vm691_vm3, %v5411_v1 }
 0x145   : > { %4078 = vmatprep.mubr.msk.bf16.mxu1 %vm691_vm3, %v5258_v63  ;;  %4214 = vmatprep.mubr.msk.bf16.mxu0 %vm691_vm3, %v5430_v19 }
 0x14c   : > { %4079 = vmatmul.mubr.msk.bf16.gmra.mrb[28].mxu1 %vm691_vm3, %v5436_v16  ;;  %4215 = vmatmul.mubr.msk.bf16.gmra.mrb[28].mxu0 %vm691_vm3, %v3673_v22  ;;  %v5693_v16 = vld [vmem:[%s5985_s2] ss:$0 sm:$0xff] }
 0x1c7   : > { %v4018_v30 = vpop.f32.mrb[0].mxu1 }
 0x1c8   : > { %v1669_v57 = vpop.f32.mrb[1].mxu1 }
 0x1c9   : > { %v4019_v62 = vpop.f32.mrb[2].mxu1 }
 0x1ca   : > { %v1672_v5 = vpop.f32.mrb[3].mxu1 }
 0x1cf   : > { %v4022_v63 = vpop.f32.mrb[4].mxu1 }
 0x1d0   : > { %v1685_v49 = vpop.f32.mrb[5].mxu1 }
 0x1d1   : > { %v4023_v54 = vpop.f32.mrb[6].mxu1 }
 0x1d2   : > { %v1688_v36 = vpop.f32.mrb[7].mxu1 }
 0x1d7   : > { %v4026_v45 = vpop.f32.mrb[8].mxu1 }
 0x1d8   : > { %v1701_v31 = vpop.f32.mrb[9].mxu1 }
 0x1d9   : > { %v5678_v29 = vpop.f32.mrb[10].mxu1 }
 0x1da   : > { %v5680_v26 = vpop.f32.mrb[11].mxu1 }
 0x1df   : > { %v5682_v44 = vpop.f32.mrb[12].mxu1 }
 0x1e0   : > { %v5684_v8 = vpop.f32.mrb[13].mxu1 }
 0x1e1   : > { %v5686_v1 = vpop.f32.mrb[14].mxu1 }
 0x1e2   : > { %v5688_v40 = vpop.f32.mrb[15].mxu1 }
 0x1e7   : > { %v4188_v19 = vpop.f32.mrb[0].mxu0 }
 0x1e8   : > { %v4220_v52 = vadd.f32 %v4188_v19, %v4018_v30  ;;  %v2755_v3 = vpop.f32.mrb[1].mxu0 }
 0x1e9   : > { %v4221_v11 = vadd.f32 %v2755_v3, %v1669_v57  ;;  %v4189_v21 = vpop.f32.mrb[2].mxu0 }
 0x1ea   : > { %v2921_v13 = vmul.f32 %v4220_v52, %v5693_v16  ;;  %v4222_v24 = vadd.f32 %v4189_v21, %v4019_v62  ;;  %v2758_v9 = vpop.f32.mrb[3].mxu0 }
 0x1eb   : > { %v2919_v10 = vmul.f32 %v4221_v11, %v5693_v16  ;;  %v4223_v51 = vadd.f32 %v2758_v9, %v1672_v5 }
 0x1ec   : > { %v5703_v33 = vadd.f32 %v5698_v4, %v2921_v13  ;;  %v2922_v39 = vmul.f32 %v4222_v24, %v5693_v16 }
 0x1ed   : > { %v5707_v58 = vadd.f32 %v5698_v4, %v2919_v10  ;;  %v2920_v42 = vmul.f32 %v4223_v51, %v5693_v16 }
 0x1ee   : > { %v2990_v15 = vsub.f32 0.0, %v5703_v33  ;;  %v5712_v27 = vadd.f32 %v5698_v4, %v2922_v39 }
 0x1ef   : > { %v2988_v6 = vsub.f32 0.0, %v5707_v58  ;;  %v5716_v7 = vadd.f32 %v5698_v4, %v2920_v42  ;;  %v4192_v60 = vpop.f32.mrb[4].mxu0 }
 0x1f0   : > { %v3024_v14 = vmul.f32 1.442695, %v2990_v15  ;;  %v2991_v28 = vsub.f32 0.0, %v5712_v27  ;;  %v4224_v25 = vadd.f32 %v4192_v60, %v4022_v63  ;;  %v2771_v38 = vpop.f32.mrb[5].mxu0 }
 0x1f1   : > { %v3020_v46 = vmul.f32 1.442695, %v2988_v6  ;;  %v2989_v47 = vsub.f32 0.0, %v5716_v7  ;;  %v4225_v32 = vadd.f32 %v2771_v38, %v1685_v49  ;;  %v4193_v18 = vpop.f32.mrb[6].mxu0 }
 0x1f2   : > { %4529 = vpow2.f32 %v3024_v14  ;;  %v3026_v43 = vmul.f32 1.442695, %v2991_v28  ;;  %v2925_v55 = vmul.f32 %v4224_v25, %v5693_v16  ;;  %v4226_v12 = vadd.f32 %v4193_v18, %v4023_v54  ;;  %v2774_v23 = vpop.f32.mrb[7].mxu0 }
 0x1f3   : > { %4531 = vpow2.f32 %v3020_v46  ;;  %v3022_v59 = vmul.f32 1.442695, %v2989_v47  ;;  %v2923_v35 = vmul.f32 %v4225_v32, %v5693_v16  ;;  %v4227_v48 = vadd.f32 %v2774_v23, %v1688_v36 }
 0x1f4   : > { %4533 = vpow2.f32 %v3026_v43  ;;  %v5723_v2 = vadd.f32 %v5698_v4, %v2925_v55  ;;  %v2926_v61 = vmul.f32 %v4226_v12, %v5693_v16 }
 0x1f5   : > { %4535 = vpow2.f32 %v3022_v59  ;;  %v5727_v56 = vadd.f32 %v5698_v4, %v2923_v35  ;;  %v2924_v53 = vmul.f32 %v4227_v48, %v5693_v16 }
 0x1f6   : > { %v2994_v17 = vsub.f32 0.0, %v5723_v2  ;;  %v5732_v34 = vadd.f32 %v5698_v4, %v2926_v61 }
 0x1f7   : > { %v2992_v37 = vsub.f32 0.0, %v5727_v56  ;;  %v5736_v41 = vadd.f32 %v5698_v4, %v2924_v53  ;;  %v4196_v50 = vpop.f32.mrb[8].mxu0 }
 0x1f8   : > { %v3032_v20 = vmul.f32 1.442695, %v2994_v17  ;;  %v2995_v0 = vsub.f32 0.0, %v5732_v34  ;;  %v4228_v22 = vadd.f32 %v4196_v50, %v4026_v45  ;;  %v2787_v30 = vpop.f32.mrb[9].mxu0 }
 0x1f9   : > { %v3028_v57 = vmul.f32 1.442695, %v2992_v37  ;;  %v2993_v62 = vsub.f32 0.0, %v5736_v41  ;;  %v4229_v5 = vadd.f32 %v2787_v30, %v1701_v31  ;;  %v4197_v63 = vpop.f32.mrb[10].mxu0 }
 0x1fa   : > { %4537 = vpow2.f32 %v3032_v20  ;;  %v3034_v49 = vmul.f32 1.442695, %v2995_v0  ;;  %v2929_v54 = vmul.f32 %v4228_v22, %v5693_v16  ;;  %v4230_v36 = vadd.f32 %v4197_v63, %v5678_v29  ;;  %v2790_v19 = vpop.f32.mrb[11].mxu0 }
 0x1fb   : > { %4539 = vpow2.f32 %v3028_v57  ;;  %v3030_v52 = vmul.f32 1.442695, %v2993_v62  ;;  %v2927_v3 = vmul.f32 %v4229_v5, %v5693_v16  ;;  %v4231_v11 = vadd.f32 %v2790_v19, %v5680_v26 }
 0x1fc   : > { %v4530_v45 = vpop.eup %4529  ;;  %4541 = vpow2.f32 %v3034_v49  ;;  %v5745_v21 = vadd.f32 %v5698_v4, %v2929_v54  ;;  %v2930_v31 = vmul.f32 %v4230_v36, %v5693_v16 }
 0x1fd   : > { %v4532_v13 = vpop.eup %4531  ;;  %v3086_v24 = vadd.f32 1.0, %v4530_v45  ;;  %4543 = vpow2.f32 %v3030_v52  ;;  %v5749_v9 = vadd.f32 %v5698_v4, %v2927_v3  ;;  %v2928_v29 = vmul.f32 %v4231_v11, %v5693_v16 }
 0x1fe   : > { %v4534_v10 = vpop.eup %4533  ;;  %v3084_v51 = vadd.f32 1.0, %v4532_v13  ;;  %v2998_v39 = vsub.f32 0.0, %v5745_v21  ;;  %v5754_v26 = vadd.f32 %v5698_v4, %v2930_v31 }
 0x1ff   : > { %v4536_v42 = vpop.eup %4535  ;;  %4545 = vrcp.f32 %v3086_v24  ;;  %v3087_v15 = vadd.f32 1.0, %v4534_v10  ;;  %v2996_v6 = vsub.f32 0.0, %v5749_v9  ;;  %v5758_v60 = vadd.f32 %v5698_v4, %v2928_v29  ;;  %v4200_v14 = vpop.f32.mrb[12].mxu0 }
 0x200   : > { %4547 = vrcp.f32 %v3084_v51  ;;  %v3085_v28 = vadd.f32 1.0, %v4536_v42  ;;  %v3040_v25 = vmul.f32 1.442695, %v2998_v39  ;;  %v2999_v38 = vsub.f32 0.0, %v5754_v26  ;;  %v2803_v46 = vpop.f32.mrb[13].mxu0 }
 0x201   : > { %4549 = vrcp.f32 %v3087_v15  ;;  %v3036_v47 = vmul.f32 1.442695, %v2996_v6  ;;  %v2997_v32 = vsub.f32 0.0, %v5758_v60  ;;  %v4232_v18 = vadd.f32 %v4200_v14, %v5682_v44  ;;  %v4201_v43 = vpop.f32.mrb[14].mxu0 }
 0x202   : > { %4551 = vrcp.f32 %v3085_v28  ;;  %v3042_v55 = vmul.f32 1.442695, %v2999_v38  ;;  %v4233_v12 = vadd.f32 %v2803_v46, %v5684_v8  ;;  %v4234_v23 = vadd.f32 %v4201_v43, %v5686_v1  ;;  %v2806_v59 = vpop.f32.mrb[15].mxu0 }
 0x203   : > { %4553 = vpow2.f32 %v3040_v25  ;;  %v3038_v35 = vmul.f32 1.442695, %v2997_v32  ;;  %v2933_v48 = vmul.f32 %v4232_v18, %v5693_v16  ;;  %v4235_v61 = vadd.f32 %v2806_v59, %v5688_v40 }
 0x204   : > { %v4538_v53 = vpop.eup %4537  ;;  %4555 = vpow2.f32 %v3036_v47  ;;  %v2931_v17 = vmul.f32 %v4233_v12, %v5693_v16  ;;  %v2934_v44 = vmul.f32 %v4234_v23, %v5693_v16 }
 0x205   : > { %v4540_v37 = vpop.eup %4539  ;;  %v3090_v50 = vadd.f32 1.0, %v4538_v53  ;;  %4557 = vpow2.f32 %v3042_v55  ;;  %v5770_v8 = vadd.f32 %v5698_v4, %v2933_v48  ;;  %v2932_v1 = vmul.f32 %v4235_v61, %v5693_v16 }
 0x206   : > { %v4542_v20 = vpop.eup %4541  ;;  %v3088_v0 = vadd.f32 1.0, %v4540_v37  ;;  %4559 = vpow2.f32 %v3038_v35  ;;  %v5774_v40 = vadd.f32 %v5698_v4, %v2931_v17  ;;  %v5777_v22 = vadd.f32 %v5698_v4, %v2934_v44 }
 0x207   : > { %v4544_v30 = vpop.eup %4543  ;;  %4561 = vrcp.f32 %v3090_v50  ;;  %v3091_v57 = vadd.f32 1.0, %v4542_v20  ;;  %v3002_v62 = vsub.f32 0.0, %v5770_v8  ;;  %v5781_v5 = vadd.f32 %v5698_v4, %v2932_v1  ;;  %v4068_v63 = vpop.f32.mrb[16].mxu1 }
 0x208   : > { %v4204_v49 = vpop.f32.mrb[16].mxu0  ;;  %4563 = vrcp.f32 %v3088_v0  ;;  %v3089_v54 = vadd.f32 1.0, %v4544_v30  ;;  %v3000_v36 = vsub.f32 0.0, %v5774_v40  ;;  %v3003_v19 = vsub.f32 0.0, %v5777_v22  ;;  %v1961_v52 = vpop.f32.mrb[17].mxu1 }
 0x209   : > { %v2819_v3 = vpop.f32.mrb[17].mxu0  ;;  %v4546_v11 = vpop.eup %4545  ;;  %4565 = vrcp.f32 %v3091_v57  ;;  %v3048_v45 = vmul.f32 1.442695, %v3002_v62  ;;  %v3001_v31 = vsub.f32 0.0, %v5781_v5  ;;  %v4236_v13 = vadd.f32 %v4204_v49, %v4068_v63 }
 0x20a   : > { %v4069_v24 = vpop.f32.mrb[18].mxu1  ;;  %v4205_v29 = vpop.f32.mrb[18].mxu0  ;;  %v3182_v51 = vmul.f32 %v4546_v11, %v5703_v33  ;;  %4567 = vrcp.f32 %v3089_v54  ;;  %v3044_v39 = vmul.f32 1.442695, %v3000_v36  ;;  %v3050_v42 = vmul.f32 1.442695, %v3003_v19 }
 0x20b   : > { %v4548_v10 = vpop.eup %4547  ;;  %v1964_v15 = vpop.f32.mrb[19].mxu1  ;;  %4569 = vpow2.f32 %v3048_v45  ;;  %v3046_v25 = vmul.f32 1.442695, %v3001_v31  ;;  %v2937_v38 = vmul.f32 %v4236_v13, %v5693_v16  ;;  %v4237_v32 = vadd.f32 %v2819_v3, %v1961_v52 }
 0x20c   : > { %v2822_v6 = vpop.f32.mrb[19].mxu0  ;;  %v4550_v14 = vpop.eup %4549  ;;  %v3180_v28 = vmul.f32 %v4548_v10, %v5707_v58  ;;  %v3729_v33 = vpack.c.bf16 %v3182_v51, %v3182_v51  ;;  %4571 = vpow2.f32 %v3044_v39  ;;  %v4238_v53 = vadd.f32 %v4205_v29, %v4069_v24 }
 0x20d   : > { %v4552_v46 = vpop.eup %4551  ;;  %v3183_v47 = vmul.f32 %v4550_v14, %v5712_v27  ;;  %4573 = vpow2.f32 %v3050_v42  ;;  %v5798_v12 = vadd.f32 %v5698_v4, %v2937_v38  ;;  %v2935_v35 = vmul.f32 %v4237_v32, %v5693_v16 }
 0x20e   : > { %v4554_v18 = vpop.eup %4553  ;;  %v3727_v43 = vpack.c.bf16 %v3180_v28, %v3180_v28  ;;  %v3181_v55 = vmul.f32 %v4552_v46, %v5716_v7  ;;  %3343 = vst.msk [vmem:[%s5791_s23 + $0x8] sm:$0xf] %vm3340_vm8, %v3729_v33  ;;  %4575 = vpow2.f32 %v3046_v25  ;;  %v4239_v20 = vadd.f32 %v2822_v6, %v1964_v15 }
 0x20f   : > { %v4556_v58 = vpop.eup %4555  ;;  %v3730_v23 = vpack.c.bf16 %v3183_v47, %v3183_v47  ;;  %v3094_v59 = vadd.f32 1.0, %v4554_v18  ;;  %v3006_v7 = vsub.f32 0.0, %v5798_v12  ;;  %v4072_v17 = vpop.f32.mrb[20].mxu1  ;;  %v5809_v1 = vadd.f32 %v5698_v4, %v2935_v35 }
 0x210   : > { %v4558_v27 = vpop.eup %4557  ;;  %3341 = vst.msk [vmem:[%s5791_s23] sm:$0xf] %vm3340_vm8, %v3727_v43  ;;  %v3728_v48 = vpack.c.bf16 %v3181_v55, %v3181_v55  ;;  %v3092_v61 = vadd.f32 1.0, %v4556_v58  ;;  %v4208_v44 = vpop.f32.mrb[20].mxu0  ;;  %v2938_v49 = vmul.f32 %v4238_v53, %v5693_v16  ;;  %v2936_v11 = vmul.f32 %v4239_v20, %v5693_v16 }
 0x211   : > { %v4560_v37 = vpop.eup %4559  ;;  %3344 = vst.msk [vmem:[%s5791_s23 + $0xc] sm:$0xf] %vm3340_vm8, %v3730_v23  ;;  %4577 = vrcp.f32 %v3094_v59  ;;  %v3095_v50 = vadd.f32 1.0, %v4558_v27  ;;  %v1977_v0 = vpop.f32.mrb[21].mxu1  ;;  %v3056_v63 = vmul.f32 1.442695, %v3006_v7  ;;  %v4240_v10 = vadd.f32 %v4208_v44, %v4072_v17 }
 0x212   : > { %v2835_v30 = vpop.f32.mrb[21].mxu0  ;;  %v4562_v57 = vpop.eup %4561  ;;  %3342 = vst.msk [vmem:[%s5791_s23 + $0x4] sm:$0xf] %vm3340_vm8, %v3728_v48  ;;  %4579 = vrcp.f32 %v3092_v61  ;;  %v3093_v62 = vadd.f32 1.0, %v4560_v37  ;;  %v3004_v3 = vsub.f32 0.0, %v5809_v1  ;;  %v5819_v29 = vadd.f32 %v5698_v4, %v2938_v49 }
 0x213   : > { %v4073_v54 = vpop.f32.mrb[22].mxu1  ;;  %v4209_v36 = vpop.f32.mrb[22].mxu0  ;;  %v3186_v52 = vmul.f32 %v4562_v57, %v5723_v2  ;;  %4581 = vrcp.f32 %v3095_v50  ;;  %v4241_v35 = vadd.f32 %v2835_v30, %v1977_v0 }
 0x214   : > { %v4564_v19 = vpop.eup %4563  ;;  %v1980_v45 = vpop.f32.mrb[23].mxu1  ;;  %4583 = vrcp.f32 %v3093_v62  ;;  %v3052_v42 = vmul.f32 1.442695, %v3004_v3  ;;  %v3007_v28 = vsub.f32 0.0, %v5819_v29  ;;  %v4242_v53 = vadd.f32 %v4209_v36, %v4073_v54 }
 0x215   : > { %v2838_v31 = vpop.f32.mrb[23].mxu0  ;;  %v4566_v13 = vpop.eup %4565  ;;  %v3184_v24 = vmul.f32 %v4564_v19, %v5727_v56  ;;  %v3733_v39 = vpack.c.bf16 %v3186_v52, %v3186_v52  ;;  %4585 = vpow2.f32 %v3056_v63  ;;  %v5825_v56 = vadd.f32 %v5698_v4, %v2936_v11 }
 0x216   : > { %v4568_v51 = vpop.eup %4567  ;;  %v3187_v2 = vmul.f32 %v4566_v13, %v5732_v34  ;;  %4587 = vpow2.f32 %v3052_v42  ;;  %v2941_v34 = vmul.f32 %v4240_v10, %v5693_v16  ;;  %v3058_v32 = vmul.f32 1.442695, %v3007_v28 }
 0x217   : > { %v4570_v15 = vpop.eup %4569  ;;  %v3731_v6 = vpack.c.bf16 %v3184_v24, %v3184_v24  ;;  %v3185_v14 = vmul.f32 %v4568_v51, %v5736_v41  ;;  %3347 = vst.msk [vmem:[%s5791_s23 + $0x18] sm:$0xf] %vm3340_vm8, %v3733_v39  ;;  %v3005_v18 = vsub.f32 0.0, %v5825_v56  ;;  %v4076_v43 = vpop.f32.mrb[24].mxu1  ;;  %v2939_v20 = vmul.f32 %v4241_v35, %v5693_v16 }
 0x218   : > { %v4572_v25 = vpop.eup %4571  ;;  %v3734_v38 = vpack.c.bf16 %v3187_v2, %v3187_v2  ;;  %v3098_v46 = vadd.f32 1.0, %v4570_v15  ;;  %v4212_v55 = vpop.f32.mrb[24].mxu0  ;;  %v5836_v59 = vadd.f32 %v5698_v4, %v2941_v34  ;;  %v4243_v57 = vadd.f32 %v2838_v31, %v1980_v45 }
 0x219   : > { %v4574_v33 = vpop.eup %4573  ;;  %3345 = vst.msk [vmem:[%s5791_s23 + $0x10] sm:$0xf] %vm3340_vm8, %v3731_v6  ;;  %v3732_v47 = vpack.c.bf16 %v3185_v14, %v3185_v14  ;;  %v3096_v41 = vadd.f32 1.0, %v4572_v25  ;;  %v1993_v27 = vpop.f32.mrb[25].mxu1  ;;  %v3054_v7 = vmul.f32 1.442695, %v3005_v18  ;;  %v2942_v49 = vmul.f32 %v4242_v53, %v5693_v16 }
 0x21a   : > { %v4576_v58 = vpop.eup %4575  ;;  %3348 = vst.msk [vmem:[%s5791_s23 + $0x1c] sm:$0xf] %vm3340_vm8, %v3734_v38  ;;  %4589 = vrcp.f32 %v3098_v46  ;;  %v3099_v23 = vadd.f32 1.0, %v4574_v33  ;;  %v2851_v48 = vpop.f32.mrb[25].mxu0  ;;  %v3010_v50 = vsub.f32 0.0, %v5836_v59  ;;  %v4244_v19 = vadd.f32 %v4212_v55, %v4076_v43 }
 0x21b   : > { %3346 = vst.msk [vmem:[%s5791_s23 + $0x14] sm:$0xf] %vm3340_vm8, %v3732_v47  ;;  %4591 = vrcp.f32 %v3096_v41  ;;  %v3097_v61 = vadd.f32 1.0, %v4576_v58  ;;  %v4077_v17 = vpop.f32.mrb[26].mxu1  ;;  %v4213_v44 = vpop.f32.mrb[26].mxu0  ;;  %v5846_v3 = vadd.f32 %v5698_v4, %v2939_v20  ;;  %v4245_v25 = vadd.f32 %v2851_v48, %v1993_v27 }
 0x21c   : > { %v4578_v37 = vpop.eup %4577  ;;  %4593 = vrcp.f32 %v3099_v23  ;;  %v1996_v62 = vpop.f32.mrb[27].mxu1  ;;  %v3064_v52 = vmul.f32 1.442695, %v3010_v50  ;;  %v2945_v28 = vmul.f32 %v4244_v19, %v5693_v16  ;;  %v4246_v58 = vadd.f32 %v4213_v44, %v4077_v17 }
 0x21d   : > { %v2854_v63 = vpop.f32.mrb[27].mxu0  ;;  %v4580_v0 = vpop.eup %4579  ;;  %v3190_v30 = vmul.f32 %v4578_v37, %v5745_v21  ;;  %4595 = vrcp.f32 %v3097_v61  ;;  %v5850_v21 = vadd.f32 %v5698_v4, %v2942_v49  ;;  %v2943_v55 = vmul.f32 %v4245_v25, %v5693_v16 }
 0x21e   : > { %v4582_v54 = vpop.eup %4581  ;;  %v3188_v36 = vmul.f32 %v4580_v0, %v5749_v9  ;;  %4597 = vpow2.f32 %v3058_v32  ;;  %v3008_v9 = vsub.f32 0.0, %v5846_v3  ;;  %v5873_v43 = vadd.f32 %v5698_v4, %v2945_v28 }
 0x21f   : > { %v4584_v11 = vpop.eup %4583  ;;  %v3737_v45 = vpack.c.bf16 %v3190_v30, %v3190_v30  ;;  %v3191_v31 = vmul.f32 %v4582_v54, %v5754_v26  ;;  %4599 = vpow2.f32 %v3054_v7  ;;  %v3011_v2 = vsub.f32 0.0, %v5850_v21  ;;  %v5858_v42 = vpop.f32.mrb[28].mxu1 }
 0x220   : > { %v4586_v13 = vpop.eup %4585  ;;  %v3735_v24 = vpack.c.bf16 %v3188_v36, %v3188_v36  ;;  %v3189_v10 = vmul.f32 %v4584_v11, %v5758_v60  ;;  %4601 = vpow2.f32 %v3064_v52  ;;  %v2940_v26 = vmul.f32 %v4243_v57, %v5693_v16  ;;  %v5860_v15 = vpop.f32.mrb[28].mxu0 }
 0x221   : > { %3351 = vst.msk [vmem:[%s5791_s23 + $0x28] sm:$0xf] %vm3340_vm8, %v3737_v45  ;;  %v3738_v51 = vpack.c.bf16 %v3191_v31, %v3191_v31  ;;  %v3102_v39 = vadd.f32 1.0, %v4586_v13  ;;  %v4588_v6 = vpop.eup %4587  ;;  %v3060_v14 = vmul.f32 1.442695, %v3008_v9  ;;  %v2009_v38 = vpop.f32.mrb[29].mxu1  ;;  %v4247_v7 = vadd.f32 %v2854_v63, %v1996_v62 }
 0x222   : > { %3349 = vst.msk [vmem:[%s5791_s23 + $0x20] sm:$0xf] %vm3340_vm8, %v3735_v24  ;;  %v3736_v60 = vpack.c.bf16 %v3189_v10, %v3189_v10  ;;  %v2867_v46 = vpop.f32.mrb[29].mxu0  ;;  %v3100_v34 = vadd.f32 1.0, %v4588_v6  ;;  %v3066_v33 = vmul.f32 1.442695, %v3011_v2  ;;  %v5868_v47 = vadd.f32 %v5698_v4, %v2940_v26 }
 0x223   : > { %3352 = vst.msk [vmem:[%s5791_s23 + $0x2c] sm:$0xf] %vm3340_vm8, %v3738_v51  ;;  %4603 = vrcp.f32 %v3102_v39  ;;  %v4081_v41 = vpop.f32.mrb[30].mxu1  ;;  %v4217_v32 = vpop.f32.mrb[30].mxu0  ;;  %v3014_v50 = vsub.f32 0.0, %v5873_v43  ;;  %v5881_v20 = vadd.f32 %v5698_v4, %v2943_v55  ;;  %v2946_v0 = vmul.f32 %v4246_v58, %v5693_v16 }
 0x224   : > { %v4590_v18 = vpop.eup %4589  ;;  %3350 = vst.msk [vmem:[%s5791_s23 + $0x24] sm:$0xf] %vm3340_vm8, %v3736_v60  ;;  %4605 = vpow2.f32 %v3060_v14  ;;  %v2012_v23 = vpop.f32.mrb[31].mxu1  ;;  %v3009_v61 = vsub.f32 0.0, %v5868_v47  ;;  %v2944_v24 = vmul.f32 %v4247_v7, %v5693_v16  ;;  %v4248_v10 = vadd.f32 %v5860_v15, %v5858_v42 }
 0x225   : > { %v2870_v35 = vpop.f32.mrb[31].mxu0  ;;  %v4592_v27 = vpop.eup %4591  ;;  %v3194_v48 = vmul.f32 %v4590_v18, %v5770_v8  ;;  %4607 = vrcp.f32 %v3100_v34  ;;  %v3012_v49 = vsub.f32 0.0, %v5881_v20  ;;  %v4249_v9 = vadd.f32 %v2867_v46, %v2009_v38 }
 0x226   : > { %v4594_v53 = vpop.eup %4593  ;;  %v3192_v37 = vmul.f32 %v4592_v27, %v5774_v40  ;;  %4609 = vpow2.f32 %v3066_v33  ;;  %v3062_v8 = vmul.f32 1.442695, %v3009_v61  ;;  %v3072_v40 = vmul.f32 1.442695, %v3014_v50 }
 0x227   : > { %v4596_v17 = vpop.eup %4595  ;;  %v3741_v44 = vpack.c.bf16 %v3194_v48, %v3194_v48  ;;  %v3195_v57 = vmul.f32 %v4594_v53, %v5777_v22  ;;  %v5890_v22 = vadd.f32 %v5698_v4, %v2946_v0  ;;  %v4250_v51 = vadd.f32 %v4217_v32, %v4081_v41 }
 0x228   : > { %v4598_v30 = vpop.eup %4597  ;;  %v3739_v62 = vpack.c.bf16 %v3192_v37, %v3192_v37  ;;  %v3193_v63 = vmul.f32 %v4596_v17, %v5781_v5  ;;  %4611 = vpow2.f32 %v3062_v8  ;;  %v3068_v5 = vmul.f32 1.442695, %v3012_v49 }
 0x229   : > { %v4600_v19 = vpop.eup %4599  ;;  %3355 = vst.msk [vmem:[%s5791_s23 + $0x38] sm:$0xf] %vm3340_vm8, %v3741_v44  ;;  %v3742_v54 = vpack.c.bf16 %v3195_v57, %v3195_v57  ;;  %v3103_v36 = vadd.f32 1.0, %v4598_v30  ;;  %4613 = vpow2.f32 %v3072_v40  ;;  %v3015_v13 = vsub.f32 0.0, %v5890_v22 }
 0x22a   : > { %v4602_v52 = vpop.eup %4601  ;;  %3353 = vst.msk [vmem:[%s5791_s23 + $0x30] sm:$0xf] %vm3340_vm8, %v3739_v62  ;;  %v3740_v11 = vpack.c.bf16 %v3193_v63, %v3193_v63  ;;  %v3101_v45 = vadd.f32 1.0, %v4600_v19  ;;  %v5903_v26 = vadd.f32 %v5698_v4, %v2944_v24  ;;  %v4251_v6 = vadd.f32 %v2870_v35, %v2012_v23 }
 0x22b   : > { %3356 = vst.msk [vmem:[%s5791_s23 + $0x3c] sm:$0xf] %vm3340_vm8, %v3742_v54  ;;  %4615 = vrcp.f32 %v3103_v36  ;;  %v3106_v31 = vadd.f32 1.0, %v4602_v52  ;;  %v3074_v2 = vmul.f32 1.442695, %v3015_v13  ;;  %v2949_v28 = vmul.f32 %v4248_v10, %v5693_v16 }
 0x22c   : > { %3354 = vst.msk [vmem:[%s5791_s23 + $0x34] sm:$0xf] %vm3340_vm8, %v3740_v11  ;;  %4617 = vrcp.f32 %v3101_v45  ;;  %v2947_v25 = vmul.f32 %v4249_v9, %v5693_v16  ;;  %v3013_v15 = vsub.f32 0.0, %v5903_v26  ;;  %v2950_v38 = vmul.f32 %v4250_v51, %v5693_v16 }
 0x22d   : > { %v4604_v39 = vpop.eup %4603  ;;  %4619 = vrcp.f32 %v3106_v31  ;;  %v2948_v27 = vmul.f32 %v4251_v6, %v5693_v16 }
 0x22e   : > { %v4606_v60 = vpop.eup %4605  ;;  %v3198_v14 = vmul.f32 %v4604_v39, %v5798_v12  ;;  %4621 = vpow2.f32 %v3068_v5  ;;  %v5912_v12 = vadd.f32 %v5698_v4, %v2949_v28  ;;  %v5915_v32 = vadd.f32 %v5698_v4, %v2947_v25 }
 0x22f   : > { %v4608_v34 = vpop.eup %4607  ;;  %v3104_v42 = vadd.f32 1.0, %v4606_v60  ;;  %4623 = vpow2.f32 %v3074_v2  ;;  %v3070_v55 = vmul.f32 1.442695, %v3013_v15  ;;  %v5918_v58 = vadd.f32 %v5698_v4, %v2950_v38 }
 0x230   : > { %v4610_v46 = vpop.eup %4609  ;;  %v3745_v33 = vpack.c.bf16 %v3198_v14, %v3198_v14  ;;  %v3196_v41 = vmul.f32 %v4608_v34, %v5809_v1  ;;  %v3018_v35 = vsub.f32 0.0, %v5912_v12  ;;  %v3016_v1 = vsub.f32 0.0, %v5915_v32 }
 0x231   : > { %4625 = vrcp.f32 %v3104_v42  ;;  %v3107_v18 = vadd.f32 1.0, %v4610_v46  ;;  %v3019_v61 = vsub.f32 0.0, %v5918_v58  ;;  %v5929_v57 = vadd.f32 %v5698_v4, %v2948_v27 }
 0x232   : > { %3359 = vst.msk [vmem:[%s5791_s23 + $0x48] sm:$0xf] %vm3340_vm8, %v3745_v33  ;;  %v3743_v23 = vpack.c.bf16 %v3196_v41, %v3196_v41  ;;  %v4612_v48 = vpop.eup %4611  ;;  %v3080_v37 = vmul.f32 1.442695, %v3018_v35  ;;  %v3076_v44 = vmul.f32 1.442695, %v3016_v1 }
 0x233   : > { %4627 = vrcp.f32 %v3107_v18  ;;  %v4614_v7 = vpop.eup %4613  ;;  %v3105_v53 = vadd.f32 1.0, %v4612_v48  ;;  %v3082_v16 = vmul.f32 1.442695, %v3019_v61  ;;  %v3017_v63 = vsub.f32 0.0, %v5929_v57 }
 0x234   : > { %3357 = vst.msk [vmem:[%s5791_s23 + $0x40] sm:$0xf] %vm3340_vm8, %v3743_v23  ;;  %4629 = vpow2.f32 %v3070_v55  ;;  %v3110_v17 = vadd.f32 1.0, %v4614_v7 }
 0x235   : > { %v4616_v50 = vpop.eup %4615  ;;  %4631 = vrcp.f32 %v3105_v53 }
 0x236   : > { %v4618_v8 = vpop.eup %4617  ;;  %v3199_v0 = vmul.f32 %v4616_v50, %v5819_v29  ;;  %4633 = vrcp.f32 %v3110_v17  ;;  %v3078_v29 = vmul.f32 1.442695, %v3017_v63 }
 0x237   : > { %v4620_v30 = vpop.eup %4619  ;;  %v3197_v62 = vmul.f32 %v4618_v8, %v5825_v56  ;;  %4635 = vpow2.f32 %v3080_v37 }
 0x238   : > { %v4622_v40 = vpop.eup %4621  ;;  %v3746_v49 = vpack.c.bf16 %v3199_v0, %v3199_v0  ;;  %v3202_v19 = vmul.f32 %v4620_v30, %v5836_v59  ;;  %4637 = vpow2.f32 %v3076_v44 }
 0x239   : > { %v4624_v4 = vpop.eup %4623  ;;  %v3744_v54 = vpack.c.bf16 %v3197_v62, %v3197_v62  ;;  %v3108_v36 = vadd.f32 1.0, %v4622_v40  ;;  %4639 = vpow2.f32 %v3082_v16 }
 0x23a   : > { %3360 = vst.msk [vmem:[%s5791_s23 + $0x4c] sm:$0xf] %vm3340_vm8, %v3746_v49  ;;  %v3749_v52 = vpack.c.bf16 %v3202_v19, %v3202_v19  ;;  %v3111_v56 = vadd.f32 1.0, %v4624_v4 }
 0x23b   : > { %v4626_v11 = vpop.eup %4625  ;;  %3358 = vst.msk [vmem:[%s5791_s23 + $0x44] sm:$0xf] %vm3340_vm8, %v3744_v54  ;;  %4641 = vrcp.f32 %v3108_v36 }
 0x23c   : > { %3363 = vst.msk [vmem:[%s5791_s23 + $0x58] sm:$0xf] %vm3340_vm8, %v3749_v52  ;;  %v3200_v59 = vmul.f32 %v4626_v11, %v5846_v3  ;;  %4643 = vrcp.f32 %v3111_v56 }
 0x23d   : > { %v4628_v45 = vpop.eup %4627  ;;  %4645 = vpow2.f32 %v3078_v29 }
 0x23e   : > { %v4630_v5 = vpop.eup %4629  ;;  %v3747_v31 = vpack.c.bf16 %v3200_v59, %v3200_v59  ;;  %v3203_v13 = vmul.f32 %v4628_v45, %v5850_v21 }
 0x23f   : > { %v3109_v24 = vadd.f32 1.0, %v4630_v5  ;;  %v4632_v10 = vpop.eup %4631 }
 0x240   : > { %3361 = vst.msk [vmem:[%s5791_s23 + $0x50] sm:$0xf] %vm3340_vm8, %v3747_v31  ;;  %v3750_v9 = vpack.c.bf16 %v3203_v13, %v3203_v13  ;;  %v4634_v51 = vpop.eup %4633  ;;  %v3201_v39 = vmul.f32 %v4632_v10, %v5868_v47 }
 0x241   : > { %4647 = vrcp.f32 %v3109_v24  ;;  %v4636_v2 = vpop.eup %4635  ;;  %v3206_v3 = vmul.f32 %v4634_v51, %v5873_v43 }
 0x242   : > { %3364 = vst.msk [vmem:[%s5791_s23 + $0x5c] sm:$0xf] %vm3340_vm8, %v3750_v9  ;;  %v4638_v6 = vpop.eup %4637  ;;  %v3748_v60 = vpack.c.bf16 %v3201_v39, %v3201_v39  ;;  %v3114_v14 = vadd.f32 1.0, %v4636_v2 }
 0x243   : > { %v4640_v21 = vpop.eup %4639  ;;  %v3753_v28 = vpack.c.bf16 %v3206_v3, %v3206_v3  ;;  %v3112_v25 = vadd.f32 1.0, %v4638_v6 }
 0x244   : > { %3362 = vst.msk [vmem:[%s5791_s23 + $0x54] sm:$0xf] %vm3340_vm8, %v3748_v60  ;;  %4649 = vrcp.f32 %v3114_v14  ;;  %v3115_v47 = vadd.f32 1.0, %v4640_v21 }
 0x245   : > { %v4642_v34 = vpop.eup %4641  ;;  %3367 = vst.msk [vmem:[%s5791_s23 + $0x68] sm:$0xf] %vm3340_vm8, %v3753_v28  ;;  %4651 = vrcp.f32 %v3112_v25 }
 0x246   : > { %v4644_v42 = vpop.eup %4643  ;;  %v3204_v15 = vmul.f32 %v4642_v34, %v5881_v20  ;;  %4653 = vrcp.f32 %v3115_v47 }
 0x247   : > { %v4646_v43 = vpop.eup %4645  ;;  %v3207_v38 = vmul.f32 %v4644_v42, %v5890_v22 }
 0x248   : > { %v3751_v46 = vpack.c.bf16 %v3204_v15, %v3204_v15  ;;  %v3113_v33 = vadd.f32 1.0, %v4646_v43 }
 0x249   : > { %v3754_v41 = vpack.c.bf16 %v3207_v38, %v3207_v38 }
 0x24a   : > { %3365 = vst.msk [vmem:[%s5791_s23 + $0x60] sm:$0xf] %vm3340_vm8, %v3751_v46  ;;  %4655 = vrcp.f32 %v3113_v33 }
 0x24b   : > { %v4648_v18 = vpop.eup %4647  ;;  %3368 = vst.msk [vmem:[%s5791_s23 + $0x6c] sm:$0xf] %vm3340_vm8, %v3754_v41 }
 0x24c   : > { %v3205_v55 = vmul.f32 %v4648_v18, %v5903_v26 }
 0x24e   : > { %v3752_v20 = vpack.c.bf16 %v3205_v55, %v3205_v55  ;;  %v4650_v23 = vpop.eup %4649 }
 0x24f   : > { %v4652_v35 = vpop.eup %4651  ;;  %v3210_v22 = vmul.f32 %v4650_v23, %v5912_v12 }
 0x250   : > { %3366 = vst.msk [vmem:[%s5791_s23 + $0x64] sm:$0xf] %vm3340_vm8, %v3752_v20  ;;  %v4654_v1 = vpop.eup %4653  ;;  %v3208_v27 = vmul.f32 %v4652_v35, %v5915_v32 }
 0x251   : > { %v3757_v48 = vpack.c.bf16 %v3210_v22, %v3210_v22  ;;  %v3211_v61 = vmul.f32 %v4654_v1, %v5918_v58 }
 0x252   : > { %v3755_v7 = vpack.c.bf16 %v3208_v27, %v3208_v27 }
 0x253   : > { %3371 = vst.msk [vmem:[%s5791_s23 + $0x78] sm:$0xf] %vm3340_vm8, %v3757_v48  ;;  %v3758_v26 = vpack.c.bf16 %v3211_v61, %v3211_v61 }
 0x254   : > { %v4656_v53 = vpop.eup %4655  ;;  %3369 = vst.msk [vmem:[%s5791_s23 + $0x70] sm:$0xf] %vm3340_vm8, %v3755_v7 }
 0x255   : > { %v3209_v37 = vmul.f32 %v4656_v53, %v5929_v57  ;;  %3372 = vst.msk [vmem:[%s5791_s23 + $0x7c] sm:$0xf] %vm3340_vm8, %v3758_v26 }
 0x257   : > { %v3756_v50 = vpack.c.bf16 %v3209_v37, %v3209_v37 }
 0x259   : > { %3370 = vst.msk [vmem:[%s5791_s23 + $0x74] sm:$0xf] %vm3340_vm8, %v3756_v50 }
 0x25a PF: > { %s13_s14 = sadd.s32 1, %s4683_s14   ;;  %s6064_s12 = smov %s4679_s13 }
 0x25b   : > { %p10_p5 = scmp.ge.s32.totalorder %s13_s14, 4   ;;  %s6065_s13 = smov %s6067_s15 }
 0x25d   :  { %12 = sbr.rel (!%p10_p5) target bundleno = 2 (0x2), region = 71 }

// kernel: _lambda_.8
= control target key start
LH: loop header
LB: loop body
LE: loop exit
PB: predicated region body
PF: predicated region fallthrough
CT: control target
= control target key end

     0   :  { %s4970_s15 = smov 0   ;;  %s4972_s16 = smov 0   ;;  %s6421_s0 = inlined_call_operand.vmem [shape: bf16[2,18,24,4], index: 0, kind: input, shape index: {}]   ;;  %s6422_s1 = inlined_call_operand.vmem [shape: bf16[9,4,4], index: 1, kind: input, shape index: {}]   ;;  %s6423_s2 = inlined_call_operand.vmem [shape: f32[2,4], index: 2, kind: input, shape index: {}]   ;;  %s6424_s3 = inlined_call_operand.vmem [shape: bf16[2,256,4], index: 3, kind: input, shape index: {}]   ;;  %s6425_s4 = inlined_call_operand.vmem [shape: bf16[2,256,4], index: 4, kind: output, shape index: {}]  }
   0x1   :  { %s4974_s17 = smov 0  }
   0x2 LB: > { %s26_s18 = sadd.s32 1, %s4939_s16  ;;  %p3640_p0 = scmp.ge.s32.totalorder %s4943_s17, 1  ;;  %s4943_s17 = sphi %s4974_s17, %s14_s17   ;;  %s4939_s16 = sphi %s4972_s16, %s6511_s16   ;;  %s4935_s15 = sphi %s4970_s15, %s6510_s15  }
   0x3   : > { %p28_p1 = scmp.ge.s32.totalorder %s26_s18, 2  ;;  %p193_p2 = scmp.lt.s32.totalorder %s4943_s17, 3 }
   0x5   : > { %s6513_s18 = smov (%p28_p1, %s26_s18), 0  ;;  %p194_p3 = pnand %p3640_p0, %p193_p2 }
   0x7   : > { %197 = sbr.rel (%p194_p3) target bundleno = 608 (0x260), region = 36 }
   0xe   : > { %v3646_v0 = vld [vmem:[%s6422_s1 + $0x2] sm:$0x3]  ;;  %vm803_vm0 = vcmask 1041408   ;;  %v3778_v1 = vld [vmem:[%s6422_s1 + $0x8] sm:$0x3]  ;;  %p232_p4 = scmp.lt.s32.totalorder %s4935_s15, 1 }
   0xf   : > { %4736 = vmatprep.subr.msk.bf16.mxu1 %vm803_vm0, %v3646_v0  ;;  %4740 = vmatprep.subr.msk.bf16.mxu0 %vm803_vm0, %v3778_v1  ;;  %v805_v2 = vsel %vm803_vm0, %v3646_v0, 0  ;;  %v4998_v3 = vsel %vm803_vm0, %v3778_v1, 0  ;;  %v316_v4 = vld [vmem:[%s6422_s1] sm:$0x3]  ;;  %v3797_v5 = vld [vmem:[%s6422_s1 + $0xa] sm:$0x3] }
  0x10   : > { %6457 = vst [vmem:[#allocation2_spill] sm:$0xff] %v4998_v3  ;;  %4173 = vmatpush3.bf16.msra.mxu1 %v805_v2  ;;  %4309 = vmatpush3.bf16.msra.mxu0 %v4998_v3  ;;  %s6515_s15 = smov (!%p232_p4, %s4935_s15), 1  ;;  %vm317_vm1 = vsmask.f32 3328  ;;  %vm318_vm2 = vsmask.f32 7440 }
  0x11   : > { %4737 = vmatprep.subr.msk.bf16.mxu1 %vm803_vm0, %v316_v4  ;;  %4742 = vmatprep.subr.msk.bf16.mxu0 %vm803_vm0, %v3797_v5  ;;  %s4746_s27 = smul.u32 216, %s6515_s15  ;;  %v5018_v6 = vsel %vm803_vm0, %v316_v4, 0  ;;  %v5021_v7 = vsel %vm803_vm0, %v3797_v5, 0  ;;  %v5026_v8 = vld [vmem:[%s6422_s1 + $0xc] sm:$0x3]  ;;  %vm754_vm3 = vcmask 31744   ;;  %vm5062_vm4 = vmor %vm317_vm1, %vm318_vm2 }
  0x12   : > { %v5050_v20 = vsel %vm803_vm0, %v5026_v8, 0  ;;  %vm1276_vm5 = vcmask 1042432   ;;  %vm1277_vm6 = vcmask 1046532   ;;  %s3906_s21 = sshll.u32 %s6515_s15, 7  ;;  %vm3499_vm8 = vcmask 27648  }
  0x13   : > { %s5015_s30 = scalar_lea.vmem %s6421_s0, %s4746_s27  ;;  %vm5243_vm7 = vmor %vm1276_vm5, %vm1277_vm6  ;;  %s5965_s24 = scalar_lea.vmem %s6424_s3, %s3906_s21 }
  0x14   : > { %v5029_v9 = vld [vmem:[%s5015_s30] sm:$0xf]  ;;  %v5032_v10 = vld [vmem:[%s5015_s30 + $0x4] sm:$0xf]  ;;  %v264_v11 = vld [vmem:[%s5015_s30 + $0x8] sm:$0xf]  ;;  %s6125_s5 = scalar_lea.vmem %s6425_s4, %s3906_s21 }
  0x15   : > { %v321_v12 = vshrl.u32 %v5029_v9, 16  ;;  %v324_v13 = vshll.u32 %v5029_v9, 16  ;;  %v330_v14 = vshll.u32 %v5032_v10, 16  ;;  %v334_v15 = vshrl.u32 %v5032_v10, 16  ;;  %v5040_v16 = vld [vmem:[%s5015_s30 + $0xc] sm:$0xf] }
  0x16   : > { %v340_v17 = vshll.u32 %v264_v11, 16  ;;  %v5043_v18 = vld [vmem:[%s5015_s30 + $0x10] sm:$0xf]  ;;  %v5046_v19 = vld [vmem:[%s5015_s30 + $0x14] sm:$0xf]  ;;  %v345_v26 = vshrl.u32 %v5040_v16, 16 }
  0x17   : > { %v323_v21 = vrot.slane %v321_v12, 4  ;;  %v326_v22 = vrot.slane %v324_v13, 5  ;;  %v332_v23 = vrot.slane %v330_v14, 5  ;;  %v336_v24 = vrot.slane %v334_v15, 4  ;;  %v5058_v33 = vld [vmem:[%s5015_s30 + $0x18] sm:$0xf] }
  0x18   : > { %v342_v25 = vrot.slane %v340_v17, 5  ;;  %v348_v27 = vshll.u32 %v5040_v16, 16  ;;  %v354_v28 = vshll.u32 %v5043_v18, 16  ;;  %v358_v31 = vshrl.u32 %v5043_v18, 16  ;;  %v5071_v39 = vld [vmem:[%s5015_s30 + $0x1c] sm:$0xf] }
  0x19   : > { %v327_v29 = vor.u32 %v326_v22, %v323_v21  ;;  %v337_v30 = vor.u32 %v336_v24, %v332_v23  ;;  %v364_v32 = vshll.u32 %v5046_v19, 16  ;;  %v347_v35 = vrot.slane %v345_v26, 4  ;;  %v5075_v46 = vld [vmem:[%s5015_s30 + $0x20] sm:$0xf]  ;;  %v5085_v57 = vld [vmem:[%s5015_s30 + $0x24] sm:$0xf] }
  0x1a   : > { %v350_v36 = vrot.slane %v348_v27, 5  ;;  %v356_v37 = vrot.slane %v354_v28, 5  ;;  %v5068_v38 = vcombine.low %v5040_v16, %v5043_v18  ;;  %v360_v42 = vrot.slane %v358_v31, 4  ;;  %v5090_v62 = vld [vmem:[%s5015_s30 + $0x28] sm:$0xf] }
  0x1b   : > { %v328_v40 = vrot.slane %v327_v29, 4  ;;  %v338_v41 = vrot.slane %v337_v30, 4  ;;  %v366_v43 = vrot.slane %v364_v32, 5  ;;  %v1291_v45 = vrot.slane %v5046_v19, 5  ;;  %v5098_v4 = vld [vmem:[%s5015_s30 + $0x2c] sm:$0xf] }
  0x1c   : > { %v351_v44 = vor.u32 %v350_v36, %v347_v35  ;;  %v369_v47 = vshrl.u32 %v5058_v33, 16  ;;  %v372_v48 = vshll.u32 %v5058_v33, 16  ;;  %v361_v51 = vor.u32 %v360_v42, %v356_v37  ;;  %v5104_v14 = vld [vmem:[%s5015_s30 + $0x30] sm:$0xf]  ;;  %v5116_v28 = vld [vmem:[%s5015_s30 + $0x34] sm:$0xf] }
  0x1d   : > { %v333_v49 = vsel %vm5062_vm4, %v328_v40, %v332_v23  ;;  %v343_v50 = vsel %vm5062_vm4, %v338_v41, %v342_v25  ;;  %v378_v52 = vshll.u32 %v5071_v39, 16  ;;  %v382_v60 = vshrl.u32 %v5071_v39, 16  ;;  %v5111_v23 = vld [vmem:[%s6422_s1 + $0x4] sm:$0x3]  ;;  %v5123_v32 = vld [vmem:[%s5015_s30 + $0x38] sm:$0xf] }
  0x1e   : > { %v3647_v53 = vcombine.low %v333_v49, %v343_v50  ;;  %v352_v54 = vrot.slane %v351_v44, 4  ;;  %v371_v55 = vrot.slane %v369_v47, 4  ;;  %v374_v56 = vrot.slane %v372_v48, 5  ;;  %v5131_v48 = vld [vmem:[%s5015_s30 + $0x3c] sm:$0xf] }
  0x1f   : > { %v362_v58 = vrot.slane %v361_v51, 4  ;;  %v380_v59 = vrot.slane %v378_v52, 5  ;;  %v388_v61 = vshll.u32 %v5075_v46, 16  ;;  %v1295_v1 = vrot.slane %v5071_v39, 5  ;;  %v5139_v52 = vld [vmem:[%s5015_s30 + $0x40] sm:$0xf] }
  0x20   : > { %4174 = vmatprep.mubr.msk.bf16.mxu1 %vm754_vm3, %v3647_v53  ;;  %v357_v63 = vsel %vm5062_vm4, %v352_v54, %v356_v37  ;;  %v375_v0 = vor.u32 %v374_v56, %v371_v55  ;;  %v1298_v2 = vrot.slane %v5075_v46, 5  ;;  %v384_v11 = vrot.slane %v382_v60, 4 }
  0x21   : > { %v367_v5 = vsel %vm5062_vm4, %v362_v58, %v366_v43  ;;  %v390_v12 = vrot.slane %v388_v61, 5  ;;  %v393_v13 = vshrl.u32 %v5085_v57, 16  ;;  %v396_v21 = vshll.u32 %v5085_v57, 16 }
  0x22   : > { %v3648_v15 = vcombine.low %v357_v63, %v367_v5  ;;  %v376_v17 = vrot.slane %v375_v0, 4  ;;  %v402_v22 = vshll.u32 %v5090_v62, 16  ;;  %v385_v24 = vor.u32 %v384_v11, %v380_v59  ;;  %v5151_v5 = vld [vmem:[%s5015_s30 + $0x44] sm:$0xf] }
  0x23   : > { %v395_v25 = vrot.slane %v393_v13, 4  ;;  %v406_v26 = vshrl.u32 %v5090_v62, 16  ;;  %v412_v27 = vshll.u32 %v5098_v4, 16  ;;  %v398_v30 = vrot.slane %v396_v21, 5  ;;  %v5156_v13 = vld [vmem:[%s5015_s30 + $0x48] sm:$0xf] }
  0x24   : > { %4310 = vmatprep.mubr.msk.bf16.mxu0 %vm754_vm3, %v3648_v15  ;;  %4175 = vmatmul.mubr.msk.bf16.vlgmr.msra.gmra.mrb[0].mxu1 %vm754_vm3, %v3648_v15  ;;  %v381_v29 = vsel %vm5062_vm4, %v376_v17, %v380_v59  ;;  %v404_v31 = vrot.slane %v402_v22, 5  ;;  %v417_v35 = vshrl.u32 %v5104_v14, 16  ;;  %v386_v36 = vrot.slane %v385_v24, 4  ;;  %v5163_v24 = vld [vmem:[%s5015_s30 + $0x4c] sm:$0xf] }
  0x25   : > { %4207 = vmatpush3.bf16.msra.mxu1 %v5018_v6  ;;  %v408_v37 = vrot.slane %v406_v26, 4  ;;  %v414_v40 = vrot.slane %v412_v27, 5  ;;  %v420_v41 = vshll.u32 %v5104_v14, 16  ;;  %v399_v42 = vor.u32 %v398_v30, %v395_v25 }
  0x26   : > { %v419_v43 = vrot.slane %v417_v35, 4  ;;  %v426_v44 = vshll.u32 %v5116_v28, 16  ;;  %v430_v47 = vshrl.u32 %v5116_v28, 16  ;;  %4738 = vmatprep.subr.msk.bf16.mxu1 %vm803_vm0, %v5111_v23  ;;  %v391_v49 = vsel %vm5062_vm4, %v386_v36, %v390_v12 }
  0x27   : > { %v409_v6 = vor.u32 %v408_v37, %v404_v31  ;;  %v422_v50 = vrot.slane %v420_v41, 5  ;;  %v436_v51 = vshll.u32 %v5123_v32, 16  ;;  %v5141_v53 = vcombine.low %v381_v29, %v391_v49 }
  0x28   : > { %v400_v54 = vrot.slane %v399_v42, 4  ;;  %v428_v55 = vrot.slane %v426_v44, 5  ;;  %v432_v56 = vrot.slane %v430_v47, 4  ;;  %v441_v61 = vshrl.u32 %v5131_v48, 16  ;;  %v5185_v42 = vld [vmem:[%s5015_s30 + $0x54] sm:$0xf] }
  0x29   : > { %6460 = vst [vmem:[#allocation3_spill] sm:$0xff] %v5141_v53  ;;  %v410_v58 = vrot.slane %v409_v6, 4  ;;  %v423_v59 = vor.u32 %v422_v50, %v419_v43  ;;  %v438_v60 = vrot.slane %v436_v51, 5  ;;  %4311 = vmatmul.mubr.msk.bf16.vlgmr.msra.gmra.mrb[0].mxu0 %vm754_vm3, %v5141_v53  ;;  %4178 = vmatprep.mubr.msk.bf16.mxu1 %vm754_vm3, %v5141_v53  ;;  %v444_v11 = vshll.u32 %v5131_v48, 16  ;;  %6462 = vst [vmem:[#allocation5_spill] sm:$0xff] %v5185_v42 }
  0x2a   : > { %v405_v63 = vsel %vm5062_vm4, %v400_v54, %v404_v31  ;;  %v433_v0 = vor.u32 %v432_v56, %v428_v55  ;;  %v450_v12 = vshll.u32 %v5139_v52, 16  ;;  %4343 = vmatpush3.bf16.msra.mxu0 %v5021_v7  ;;  %v443_v21 = vrot.slane %v441_v61, 4  ;;  %v5190_v6 = vld [vmem:[%s5015_s30 + $0x58] sm:$0xf] }
  0x2b   : > { %v415_v15 = vsel %vm5062_vm4, %v410_v58, %v414_v40  ;;  %v424_v17 = vrot.slane %v423_v59, 4  ;;  %v454_v22 = vshrl.u32 %v5139_v52, 16  ;;  %v446_v27 = vrot.slane %v444_v11, 5  ;;  %4743 = vmatprep.subr.msk.bf16.mxu0 %vm803_vm0, %v5026_v8  ;;  %v5180_v8 = vld [vmem:[%s5015_s30 + $0x50] sm:$0xf] }
  0x2c   : > { %v5165_v25 = vcombine.low %v405_v63, %v415_v15  ;;  %v434_v26 = vrot.slane %v433_v0, 4  ;;  %v452_v29 = vrot.slane %v450_v12, 5  ;;  %v460_v31 = vshll.u32 %v5151_v5, 16  ;;  %v5203_v11 = vld [vmem:[%s5015_s30 + $0x5c] sm:$0xf] }
  0x2d   : > { %v429_v7 = vsel %vm5062_vm4, %v424_v17, %v428_v55  ;;  %v456_v30 = vrot.slane %v454_v22, 4  ;;  %v465_v35 = vshrl.u32 %v5156_v13, 16  ;;  %v447_v37 = vor.u32 %v446_v27, %v443_v21  ;;  %v5207_v15 = vld [vmem:[%s5015_s30 + $0x60] sm:$0xf]  ;;  %v5212_v27 = vld [vmem:[%s5015_s30 + $0x64] sm:$0xf] }
  0x2e   : > { %6461 = vst [vmem:[#allocation4_spill] sm:$0xff] %v5165_v25  ;;  %4314 = vmatprep.mubr.msk.bf16.mxu0 %vm754_vm3, %v5165_v25  ;;  %4179 = vmatmul.mubr.msk.bf16.gmra.mrb[4].mxu1 %vm754_vm3, %v5165_v25  ;;  %v439_v36 = vsel %vm5062_vm4, %v434_v26, %v438_v60  ;;  %v468_v40 = vshll.u32 %v5156_v13, 16  ;;  %v474_v41 = vshll.u32 %v5163_v24, 16  ;;  %v462_v47 = vrot.slane %v460_v31, 5  ;;  %v5424_v25 = vld [vmem:[%s5015_s30 + $0xa8] sm:$0xf] }
  0x2f   : > { %v5187_v43 = vcombine.low %v429_v7, %v439_v36  ;;  %v457_v44 = vor.u32 %v456_v30, %v452_v29  ;;  %v467_v49 = vrot.slane %v465_v35, 4  ;;  %v448_v50 = vrot.slane %v447_v37, 4 }
  0x30   : > { %v470_v51 = vrot.slane %v468_v40, 5  ;;  %v476_v54 = vrot.slane %v474_v41, 5  ;;  %v478_v55 = vshrl.u32 %v5163_v24, 16  ;;  %v484_v58 = vshll.u32 %v5180_v8, 16 }
  0x31   : > { %6463 = vst [vmem:[#allocation6_spill] sm:$0xff] %v5187_v43  ;;  %4182 = vmatprep.mubr.msk.bf16.mxu1 %vm754_vm3, %v5187_v43  ;;  %v458_v56 = vrot.slane %v457_v44, 4  ;;  %v489_v59 = vshrl.u32 %v5185_v42, 16  ;;  %v492_v60 = vshll.u32 %v5185_v42, 16  ;;  %4315 = vmatmul.mubr.msk.bf16.gmra.mrb[4].mxu0 %vm754_vm3, %v5187_v43  ;;  %v453_v61 = vsel %vm5062_vm4, %v448_v50, %v452_v29 }
  0x32   : > { %v471_v63 = vor.u32 %v470_v51, %v467_v49  ;;  %v480_v0 = vrot.slane %v478_v55, 4  ;;  %v498_v12 = vshll.u32 %v5190_v6, 16  ;;  %v486_v21 = vrot.slane %v484_v58, 5 }
  0x33   : > { %v463_v17 = vsel %vm5062_vm4, %v458_v56, %v462_v47  ;;  %v491_v22 = vrot.slane %v489_v59, 4  ;;  %v494_v26 = vrot.slane %v492_v60, 5  ;;  %v502_v36 = vshrl.u32 %v5190_v6, 16  ;;  %v5226_v47 = vld [vmem:[%s5015_s30 + $0x68] sm:$0xf] }
  0x34   : > { %v5214_v7 = vcombine.low %v453_v61, %v463_v17  ;;  %v472_v29 = vrot.slane %v471_v63, 4  ;;  %v481_v30 = vor.u32 %v480_v0, %v476_v54  ;;  %v500_v31 = vrot.slane %v498_v12, 5 }
  0x35   : > { %v495_v35 = vor.u32 %v494_v26, %v491_v22  ;;  %v508_v37 = vshll.u32 %v5203_v11, 16  ;;  %v513_v40 = vshrl.u32 %v5207_v15, 16  ;;  %v516_v49 = vshll.u32 %v5207_v15, 16 }
  0x36   : > { %6464 = vst [vmem:[#allocation7_spill] sm:$0xff] %v5214_v7  ;;  %4318 = vmatprep.mubr.msk.bf16.mxu0 %vm754_vm3, %v5214_v7  ;;  %4183 = vmatmul.mubr.msk.bf16.gmra.mrb[8].mxu1 %vm754_vm3, %v5214_v7  ;;  %v477_v41 = vsel %vm5062_vm4, %v472_v29, %v476_v54  ;;  %v482_v44 = vrot.slane %v481_v30, 4  ;;  %v522_v50 = vshll.u32 %v5212_v27, 16  ;;  %v504_v55 = vrot.slane %v502_v36, 4  ;;  %v5234_v54 = vld [vmem:[%s5015_s30 + $0x6c] sm:$0xf] }
  0x37   : > { %v496_v51 = vrot.slane %v495_v35, 4  ;;  %v510_v56 = vrot.slane %v508_v37, 5  ;;  %v515_v58 = vrot.slane %v513_v40, 4  ;;  %v518_v60 = vrot.slane %v516_v49, 5  ;;  %v5250_v36 = vld [vmem:[%s5015_s30 + $0x70] sm:$0xf] }
  0x38   : > { %v487_v59 = vsel %vm5062_vm4, %v482_v44, %v486_v21  ;;  %v524_v61 = vrot.slane %v522_v50, 5  ;;  %v526_v63 = vshrl.u32 %v5212_v27, 16  ;;  %v505_v17 = vor.u32 %v504_v55, %v500_v31  ;;  %v5401_v7 = vld [vmem:[%s5015_s30 + $0xa0] sm:$0xf] }
  0x39   : > { %v5236_v0 = vcombine.low %v477_v41, %v487_v59  ;;  %v501_v12 = vsel %vm5062_vm4, %v496_v51, %v500_v31  ;;  %v532_v22 = vshll.u32 %v5226_v47, 16  ;;  %v519_v21 = vor.u32 %v518_v60, %v515_v58  ;;  %v5263_v51 = vld [vmem:[%s5015_s30 + $0x74] sm:$0xf] }
  0x3a   : > { %v528_v29 = vrot.slane %v526_v63, 4  ;;  %v3712_v30 = vrot.slane %v5040_v16, 9  ;;  %v1288_v35 = vrot.slane %v5043_v18, 5  ;;  %v506_v31 = vrot.slane %v505_v17, 4 }
  0x3b   : > { %6465 = vst [vmem:[#allocation8_spill] sm:$0xff] %v5236_v0  ;;  %4319 = vmatmul.mubr.msk.bf16.gmra.mrb[8].mxu0 %vm754_vm3, %v5236_v0  ;;  %4186 = vmatprep.mubr.msk.bf16.mxu1 %vm754_vm3, %v5236_v0  ;;  %v534_v37 = vrot.slane %v532_v22, 5  ;;  %v537_v40 = vshrl.u32 %v5234_v54, 16  ;;  %v540_v41 = vshll.u32 %v5234_v54, 16  ;;  %v520_v44 = vrot.slane %v519_v21, 4 }
  0x3c   : > { %v529_v49 = vor.u32 %v528_v29, %v524_v61  ;;  %v1289_v16 = vsel %vm5243_vm7, %v3712_v30, %v1288_v35  ;;  %v1290_v18 = vrot.slane %v1288_v35, 4  ;;  %v511_v50 = vsel %vm5062_vm4, %v506_v31, %v510_v56  ;;  %v5275_v56 = vld [vmem:[%s5015_s30 + $0x78] sm:$0xf]  ;;  %v5291_v31 = vld [vmem:[%s5015_s30 + $0x7c] sm:$0xf] }
  0x3d   : > { %v539_v55 = vrot.slane %v537_v40, 4  ;;  %v542_v58 = vrot.slane %v540_v41, 5  ;;  %v546_v59 = vshll.u32 %v5250_v36, 16  ;;  %v5266_v60 = vcombine.low %v501_v12, %v511_v50 }
  0x3e   : > { %v525_v63 = vsel %vm5062_vm4, %v520_v44, %v524_v61  ;;  %v530_v17 = vrot.slane %v529_v49, 4  ;;  %v1292_v22 = vsel %vm5243_vm7, %v1290_v18, %v1291_v45  ;;  %v550_v35 = vshrl.u32 %v5250_v36, 16  ;;  %v5296_v49 = vld [vmem:[%s5015_s30 + $0x80] sm:$0xf] }
  0x3f   : > { %6468 = vst [vmem:[#allocation9_spill] sm:$0xff] %v5266_v60  ;;  %v5277_v21 = vcombine.low %v1289_v16, %v1292_v22  ;;  %v543_v29 = vor.u32 %v542_v58, %v539_v55  ;;  %v548_v30 = vrot.slane %v546_v59, 5  ;;  %4322 = vmatprep.mubr.msk.bf16.mxu0 %vm754_vm3, %v5266_v60  ;;  %4187 = vmatmul.mubr.msk.bf16.gmra.mrb[12].mxu1 %vm754_vm3, %v5266_v60  ;;  %v556_v45 = vshll.u32 %v5263_v51, 16  ;;  %v5394_v60 = vld [vmem:[%s5015_s30 + $0x9c] sm:$0xf] }
  0x40   : > { %v535_v19 = vsel %vm5062_vm4, %v530_v17, %v534_v37  ;;  %v3713_v61 = vrot.slane %v5058_v33, 9  ;;  %v1297_v12 = vrot.slane %v1295_v1, 4  ;;  %v552_v44 = vrot.slane %v550_v35, 4 }
  0x41   : > { %6469 = vst [vmem:[#allocation10_spill] sm:$0xff] %v5277_v21  ;;  %v5293_v40 = vcombine.low %v525_v63, %v535_v19  ;;  %v544_v41 = vrot.slane %v543_v29, 4  ;;  %v561_v16 = vshrl.u32 %v5275_v56, 16  ;;  %v558_v18 = vrot.slane %v556_v45, 5  ;;  %v5322_v29 = vld [vmem:[%s5015_s30 + $0x84] sm:$0xf] }
  0x42   : > { %v1296_v37 = vsel %vm5243_vm7, %v3713_v61, %v1295_v1  ;;  %v1299_v50 = vsel %vm5243_vm7, %v1297_v12, %v1298_v2  ;;  %v564_v55 = vshll.u32 %v5275_v56, 16  ;;  %v553_v59 = vor.u32 %v552_v44, %v548_v30 }
  0x43   : > { %6470 = vst [vmem:[#allocation11_spill] sm:$0xff] %v5293_v40  ;;  %4323 = vmatmul.mubr.msk.bf16.gmra.mrb[12].mxu0 %vm754_vm3, %v5293_v40  ;;  %4190 = vmatprep.mubr.msk.bf16.mxu1 %vm754_vm3, %v5293_v40  ;;  %v549_v58 = vsel %vm5062_vm4, %v544_v41, %v548_v30  ;;  %v5314_v63 = vcombine.low %v1296_v37, %v1299_v50  ;;  %v563_v1 = vrot.slane %v561_v16, 4  ;;  %v570_v2 = vshll.u32 %v5291_v31, 16  ;;  %v5328_v16 = vld [vmem:[%s5015_s30 + $0x88] sm:$0xf] }
  0x44   : > { %4344 = vmatprep.mubr.msk.bf16.mxu0 %vm754_vm3, %v5277_v21  ;;  %v566_v46 = vrot.slane %v564_v55, 5  ;;  %v574_v17 = vshrl.u32 %v5291_v31, 16  ;;  %v580_v22 = vshll.u32 %v5296_v49, 16  ;;  %v554_v35 = vrot.slane %v553_v59, 4 }
  0x45   : > { %6471 = vst [vmem:[#allocation12_spill] sm:$0xff] %v5314_v63  ;;  %v3714_v30 = vrot.slane %v5085_v57, 9  ;;  %v1302_v19 = vrot.slane %v5090_v62, 5  ;;  %v1305_v45 = vrot.slane %v5098_v4, 5  ;;  %v572_v12 = vrot.slane %v570_v2, 5 }
  0x46   : > { %v567_v61 = vor.u32 %v566_v46, %v563_v1  ;;  %v576_v41 = vrot.slane %v574_v17, 4  ;;  %v582_v44 = vrot.slane %v580_v22, 5  ;;  %v559_v37 = vsel %vm5062_vm4, %v554_v35, %v558_v18  ;;  %v5338_v1 = vld [vmem:[%s5015_s30 + $0x8c] sm:$0xf] }
  0x47   : > { %v1303_v50 = vsel %vm5243_vm7, %v3714_v30, %v1302_v19  ;;  %v1304_v55 = vrot.slane %v1302_v19, 4  ;;  %v585_v59 = vshrl.u32 %v5322_v29, 16  ;;  %v5335_v3 = vcombine.low %v549_v58, %v559_v37 }
  0x48   : > { %v568_v40 = vrot.slane %v567_v61, 4  ;;  %v577_v4 = vor.u32 %v576_v41, %v572_v12  ;;  %v588_v46 = vshll.u32 %v5322_v29, 16  ;;  %v594_v18 = vshll.u32 %v5328_v16, 16  ;;  %v5352_v61 = vld [vmem:[%s5015_s30 + $0x90] sm:$0xf] }
  0x49   : > { %6472 = vst [vmem:[#allocation13_spill] sm:$0xff] %v5335_v3  ;;  %v1306_v2 = vsel %vm5243_vm7, %v1304_v55, %v1305_v45  ;;  %v587_v17 = vrot.slane %v585_v59, 4  ;;  %v598_v22 = vshrl.u32 %v5328_v16, 16  ;;  %4191 = vmatmul.mubr.msk.bf16.gmra.mrb[16].mxu1 %vm754_vm3, %v5335_v3  ;;  %v5357_v45 = vld [vmem:[%s6422_s1 + $0xe] sm:$0x3]  ;;  %v1309_v59 = vrot.slane %v5116_v28, 5 }
  0x4a   : > { %v573_v58 = vsel %vm5062_vm4, %v568_v40, %v572_v12  ;;  %v578_v35 = vrot.slane %v577_v4, 4  ;;  %v5349_v30 = vcombine.low %v1303_v50, %v1306_v2  ;;  %v590_v19 = vrot.slane %v588_v46, 5  ;;  %6474 = vst [vmem:[#allocation15_spill] sm:$0xff] %v5357_v45  ;;  %v5371_v46 = vld [vmem:[%s5015_s30 + $0x94] sm:$0xf] }
  0x4b   : > { %4345 = vmatmul.mubr.msk.bf16.vlgmr.msra.gmra.mrb[0].mxu0 %vm754_vm3, %v5314_v63  ;;  %v596_v41 = vrot.slane %v594_v18, 5  ;;  %v600_v37 = vrot.slane %v598_v22, 4  ;;  %v604_v40 = vshll.u32 %v5338_v1, 16  ;;  %v3715_v12 = vrot.slane %v5104_v14, 9  ;;  %v5376_v3 = vld [vmem:[%s5015_s30 + $0x98] sm:$0xf] }
  0x4c   : > { %6473 = vst [vmem:[#allocation14_spill] sm:$0xff] %v5349_v30  ;;  %4377 = vmatpush3.bf16.msra.mxu0 %v5050_v20  ;;  %v583_v50 = vsel %vm5062_vm4, %v578_v35, %v582_v44  ;;  %4348 = vmatprep.mubr.msk.bf16.mxu0 %vm754_vm3, %v5349_v30  ;;  %v591_v55 = vor.u32 %v590_v19, %v587_v17  ;;  %v1312_v4 = vrot.slane %v5123_v32, 5  ;;  %v609_v20 = vshrl.u32 %v5352_v61, 16 }
  0x4d   : > { %v5373_v2 = vcombine.low %v573_v58, %v583_v50  ;;  %v601_v18 = vor.u32 %v600_v37, %v596_v41  ;;  %v606_v22 = vrot.slane %v604_v40, 5  ;;  %4744 = vmatprep.subr.msk.bf16.mxu0 %vm803_vm0, %v5357_v45  ;;  %v1310_v17 = vsel %vm5243_vm7, %v3715_v12, %v1309_v59 }
  0x4e   : > { %v592_v44 = vrot.slane %v591_v55, 4  ;;  %v1311_v35 = vrot.slane %v1309_v59, 4  ;;  %v612_v32 = vshll.u32 %v5352_v61, 16  ;;  %v611_v19 = vrot.slane %v609_v20, 4 }
  0x4f   : > { %6475 = vst [vmem:[#allocation16_spill] sm:$0xff] %v5373_v2  ;;  %4194 = vmatprep.mubr.msk.bf16.mxu1 %vm754_vm3, %v5373_v2  ;;  %v602_v58 = vrot.slane %v601_v18, 4  ;;  %v618_v37 = vshll.u32 %v5371_v46, 16  ;;  %v622_v40 = vshrl.u32 %v5371_v46, 16  ;;  %v628_v59 = vshll.u32 %v5376_v3, 16 }
  0x50   : > { %v597_v50 = vsel %vm5062_vm4, %v592_v44, %v596_v41  ;;  %v1313_v55 = vsel %vm5243_vm7, %v1311_v35, %v1312_v4  ;;  %v614_v12 = vrot.slane %v612_v32, 5  ;;  %v3716_v4 = vrot.slane %v5131_v48, 9 }
  0x51   : > { %v607_v2 = vsel %vm5062_vm4, %v602_v58, %v606_v22  ;;  %v5398_v18 = vcombine.low %v1310_v17, %v1313_v55  ;;  %v620_v20 = vrot.slane %v618_v37, 5  ;;  %v624_v0 = vrot.slane %v622_v40, 4  ;;  %v5414_v58 = vld [vmem:[%s5015_s30 + $0xa4] sm:$0xf] }
  0x52   : > { %v5403_v43 = vcombine.low %v597_v50, %v607_v2  ;;  %v615_v41 = vor.u32 %v614_v12, %v611_v19  ;;  %v630_v44 = vrot.slane %v628_v59, 5  ;;  %v1316_v32 = vrot.slane %v5139_v52, 5 }
  0x53   : > { %6476 = vst [vmem:[#allocation17_spill] sm:$0xff] %v5398_v18  ;;  %4349 = vmatmul.mubr.msk.bf16.gmra.mrb[4].mxu0 %vm754_vm3, %v5398_v18  ;;  %v625_v35 = vor.u32 %v624_v0, %v620_v20  ;;  %v1319_v22 = vrot.slane %v5151_v5, 5  ;;  %v633_v17 = vshrl.u32 %v5394_v60, 16  ;;  %v636_v19 = vshll.u32 %v5394_v60, 16 }
  0x54   : > { %6477 = vst [vmem:[#allocation18_spill] sm:$0xff] %v5403_v43  ;;  %4195 = vmatmul.mubr.msk.bf16.gmra.mrb[20].mxu1 %vm754_vm3, %v5403_v43  ;;  %v616_v2 = vrot.slane %v615_v41, 4  ;;  %v642_v37 = vshll.u32 %v5401_v7, 16  ;;  %v646_v0 = vshrl.u32 %v5401_v7, 16  ;;  %v1317_v5 = vsel %vm5243_vm7, %v3716_v4, %v1316_v32 }
  0x55   : > { %v626_v40 = vrot.slane %v625_v35, 4  ;;  %v1318_v50 = vrot.slane %v1316_v32, 4  ;;  %v635_v55 = vrot.slane %v633_v17, 4  ;;  %v638_v59 = vrot.slane %v636_v19, 5  ;;  %v5433_v32 = vld [vmem:[%s5015_s30 + $0xac] sm:$0xf] }
  0x56   : > { %v621_v12 = vsel %vm5062_vm4, %v616_v2, %v620_v20  ;;  %v644_v41 = vrot.slane %v642_v37, 5  ;;  %v648_v43 = vrot.slane %v646_v0, 4  ;;  %v652_v35 = vshll.u32 %v5414_v58, 16 }
  0x57   : > { %v631_v53 = vsel %vm5062_vm4, %v626_v40, %v630_v44  ;;  %v1320_v18 = vsel %vm5243_vm7, %v1318_v50, %v1319_v22  ;;  %v3717_v4 = vrot.slane %v5156_v13, 9  ;;  %v639_v2 = vor.u32 %v638_v59, %v635_v55 }
  0x58   : > { %v5435_v17 = vcombine.low %v621_v12, %v631_v53  ;;  %v5437_v20 = vcombine.low %v1317_v5, %v1320_v18  ;;  %v649_v19 = vor.u32 %v648_v43, %v644_v41  ;;  %v654_v37 = vrot.slane %v652_v35, 5  ;;  %v5447_v18 = vld [vmem:[%s5015_s30 + $0xb0] sm:$0xf] }
  0x59   : > { %v1323_v0 = vrot.slane %v5163_v24, 5  ;;  %v1326_v44 = vrot.slane %v5180_v8, 5  ;;  %v657_v22 = vshrl.u32 %v5424_v25, 16  ;;  %v640_v53 = vrot.slane %v639_v2, 4 }
  0x5a   : > { %6478 = vst [vmem:[#allocation19_spill] sm:$0xff] %v5435_v17  ;;  %6479 = vst [vmem:[#allocation20_spill] sm:$0xff] %v5437_v20  ;;  %4198 = vmatprep.mubr.msk.bf16.mxu1 %vm754_vm3, %v5435_v17  ;;  %4352 = vmatprep.mubr.msk.bf16.mxu0 %vm754_vm3, %v5437_v20  ;;  %v650_v40 = vrot.slane %v649_v19, 4  ;;  %v660_v43 = vshll.u32 %v5424_v25, 16  ;;  %v666_v5 = vshll.u32 %v5433_v32, 16  ;;  %v670_v12 = vshrl.u32 %v5433_v32, 16 }
  0x5b   : > { %v1324_v8 = vsel %vm5243_vm7, %v3717_v4, %v1323_v0  ;;  %v1325_v50 = vrot.slane %v1323_v0, 4  ;;  %v659_v55 = vrot.slane %v657_v22, 4  ;;  %v645_v59 = vsel %vm5062_vm4, %v640_v53, %v644_v41  ;;  %v5459_v17 = vld [vmem:[%s5015_s30 + $0xb4] sm:$0xf]  ;;  %v5471_v53 = vld [vmem:[%s5015_s30 + $0xb8] sm:$0xf] }
  0x5c   : > { %v655_v35 = vsel %vm5062_vm4, %v650_v40, %v654_v37  ;;  %v662_v2 = vrot.slane %v660_v43, 5  ;;  %v668_v19 = vrot.slane %v666_v5, 5  ;;  %v672_v0 = vrot.slane %v670_v12, 4 }
  0x5d   : > { %v5461_v20 = vcombine.low %v645_v59, %v655_v35  ;;  %v1327_v4 = vsel %vm5243_vm7, %v1325_v50, %v1326_v44  ;;  %v676_v22 = vshll.u32 %v5447_v18, 16  ;;  %v3718_v41 = vrot.slane %v5185_v42, 9  ;;  %v5477_v44 = vld [vmem:[%s5015_s30 + $0xbc] sm:$0xf] }
  0x5e   : > { %v5466_v30 = vcombine.low %v1324_v8, %v1327_v4  ;;  %v663_v63 = vor.u32 %v662_v2, %v659_v55  ;;  %v1330_v37 = vrot.slane %v5190_v6, 5  ;;  %v673_v40 = vor.u32 %v672_v0, %v668_v19 }
  0x5f   : > { %6480 = vst [vmem:[#allocation21_spill] sm:$0xff] %v5461_v20  ;;  %4199 = vmatmul.mubr.msk.bf16.gmra.mrb[24].mxu1 %vm754_vm3, %v5461_v20  ;;  %v678_v43 = vrot.slane %v676_v22, 5  ;;  %v1333_v5 = vrot.slane %v5203_v11, 5  ;;  %v681_v50 = vshrl.u32 %v5459_v17, 16  ;;  %v684_v59 = vshll.u32 %v5459_v17, 16 }
  0x60   : > { %6481 = vst [vmem:[#allocation22_spill] sm:$0xff] %v5466_v30  ;;  %4353 = vmatmul.mubr.msk.bf16.gmra.mrb[8].mxu0 %vm754_vm3, %v5466_v30  ;;  %v664_v8 = vrot.slane %v663_v63, 4  ;;  %v1331_v55 = vsel %vm5243_vm7, %v3718_v41, %v1330_v37  ;;  %v1332_v12 = vrot.slane %v1330_v37, 4  ;;  %v674_v35 = vrot.slane %v673_v40, 4 }
  0x61   : > { %v683_v2 = vrot.slane %v681_v50, 4  ;;  %v690_v4 = vshll.u32 %v5471_v53, 16  ;;  %v694_v11 = vshrl.u32 %v5471_v53, 16  ;;  %v686_v20 = vrot.slane %v684_v59, 5 }
  0x62   : > { %v669_v0 = vsel %vm5062_vm4, %v664_v8, %v668_v19  ;;  %v1334_v22 = vsel %vm5243_vm7, %v1332_v12, %v1333_v5  ;;  %v700_v63 = vshll.u32 %v5477_v44, 16  ;;  %v679_v41 = vsel %vm5062_vm4, %v674_v35, %v678_v43 }
  0x63   : > { %v5494_v37 = vcombine.low %v1331_v55, %v1334_v22  ;;  %v692_v40 = vrot.slane %v690_v4, 5  ;;  %v696_v50 = vrot.slane %v694_v11, 4  ;;  %v5496_v30 = vcombine.low %v669_v0, %v679_v41 }
  0x64   : > { %v687_v21 = vor.u32 %v686_v20, %v683_v2  ;;  %v702_v45 = vrot.slane %v700_v63, 5  ;;  %v3719_v42 = vrot.slane %v5207_v15, 9  ;;  %v1337_v5 = vrot.slane %v5212_v27, 5 }
  0x65   : > { %4356 = vmatprep.mubr.msk.bf16.mxu0 %vm754_vm3, %v5494_v37  ;;  %v697_v19 = vor.u32 %v696_v50, %v692_v40  ;;  %v1340_v8 = vrot.slane %v5226_v47, 5  ;;  %v3720_v43 = vrot.slane %v5234_v54, 9  ;;  %4202 = vmatprep.mubr.msk.bf16.mxu1 %vm754_vm3, %v5496_v30  ;;  %v3679_v20 = vcombine.low %v5029_v9, %v5032_v10 }
  0x66   : > { %v688_v55 = vrot.slane %v687_v21, 4  ;;  %v1344_v12 = vrot.slane %v5250_v36, 5  ;;  %v1347_v59 = vrot.slane %v5263_v51, 5  ;;  %v1338_v2 = vsel %vm5243_vm7, %v3719_v42, %v1337_v5 }
  0x67   : > { %v698_v35 = vrot.slane %v697_v19, 4  ;;  %v1339_v4 = vrot.slane %v1337_v5, 4  ;;  %v1351_v47 = vrot.slane %v5291_v31, 5  ;;  %v3721_v9 = vrot.slane %v5275_v56, 9 }
  0x68   : > { %v693_v11 = vsel %vm5062_vm4, %v688_v55, %v692_v40  ;;  %v1345_v21 = vsel %vm5243_vm7, %v3720_v43, %v1344_v12  ;;  %v1346_v0 = vrot.slane %v1344_v12, 4  ;;  %v1354_v42 = vrot.slane %v5296_v49, 5 }
  0x69   : > { %v703_v10 = vsel %vm5062_vm4, %v698_v35, %v702_v45  ;;  %v1341_v51 = vsel %vm5243_vm7, %v1339_v4, %v1340_v8  ;;  %v1353_v22 = vrot.slane %v1351_v47, 4  ;;  %v3722_v19 = vrot.slane %v5322_v29, 9 }
  0x6a   : > { %v5523_v63 = vcombine.low %v693_v11, %v703_v10  ;;  %v5525_v41 = vcombine.low %v1338_v2, %v1341_v51  ;;  %v1348_v40 = vsel %vm5243_vm7, %v1346_v0, %v1347_v59  ;;  %v1358_v5 = vrot.slane %v5328_v16, 5 }
  0x6b   : > { %v5529_v50 = vcombine.low %v1345_v21, %v1348_v40  ;;  %v1361_v49 = vrot.slane %v5338_v1, 5  ;;  %v1352_v45 = vsel %vm5243_vm7, %v3721_v9, %v1351_v47  ;;  %v1355_v8 = vsel %vm5243_vm7, %v1353_v22, %v1354_v42 }
  0x6c   : > { %4203 = vmatmul.mubr.msk.bf16.gmra.mrb[28].mxu1 %vm754_vm3, %v5523_v63  ;;  %4357 = vmatmul.mubr.msk.bf16.gmra.mrb[12].mxu0 %vm754_vm3, %v5525_v41  ;;  %v1360_v43 = vrot.slane %v1358_v5, 4  ;;  %v1365_v55 = vrot.slane %v5371_v46, 5  ;;  %v1372_v12 = vrot.slane %v5401_v7, 5  ;;  %v1359_v59 = vsel %vm5243_vm7, %v3722_v19, %v1358_v5 }
  0x6d   : > { %4208 = vmatprep.mubr.msk.bf16.mxu1 %vm754_vm3, %v3679_v20  ;;  %4360 = vmatprep.mubr.msk.bf16.mxu0 %vm754_vm3, %v5529_v50  ;;  %v5551_v20 = vcombine.low %v1352_v45, %v1355_v8  ;;  %v3723_v35 = vrot.slane %v5352_v61, 9  ;;  %v1368_v4 = vrot.slane %v5376_v3, 5  ;;  %v5557_v47 = vcombine.low %v5058_v33, %v5071_v39  ;;  %v5569_v3 = vld [vmem:[%s6422_s1 + $0x6] sm:$0x3] }
  0x6e   : > { %v1362_v1 = vsel %vm5243_vm7, %v1360_v43, %v1361_v49  ;;  %v1367_v2 = vrot.slane %v1365_v55, 4  ;;  %v3724_v11 = vrot.slane %v5394_v60, 9  ;;  %v1490_v21 = vsel %vm803_vm0, %v5111_v23, 0 }
  0x6f   : > { %v5562_v0 = vcombine.low %v1359_v59, %v1362_v1  ;;  %v1374_v9 = vrot.slane %v1372_v12, 4  ;;  %v1375_v10 = vrot.slane %v5414_v58, 5  ;;  %v1379_v51 = vrot.slane %v5433_v32, 5 }
  0x70   : > { %v1366_v33 = vsel %vm5243_vm7, %v3723_v35, %v1365_v55  ;;  %v1369_v39 = vsel %vm5243_vm7, %v1367_v2, %v1368_v4  ;;  %v5583_v23 = vcombine.low %v5085_v57, %v5090_v62  ;;  %v1373_v58 = vsel %vm5243_vm7, %v3724_v11, %v1372_v12 }
  0x71   : > { %v5589_v22 = vcombine.low %v5207_v15, %v5212_v27  ;;  %v1376_v42 = vsel %vm5243_vm7, %v1374_v9, %v1375_v10  ;;  %v3725_v40 = vrot.slane %v5424_v25, 9  ;;  %v1386_v19 = vrot.slane %v5471_v53, 5 }
  0x72   : > { %v5599_v57 = vcombine.low %v5234_v54, %v5250_v36  ;;  %v5603_v62 = vcombine.low %v1366_v33, %v1369_v39  ;;  %v1381_v15 = vrot.slane %v1379_v51, 4  ;;  %v1382_v27 = vrot.slane %v5447_v18, 5  ;;  %v312_v18 = vld [vmem:[%s5015_s30 + $0xc8] sm:$0xf] }
  0x73   : > { %v5608_v5 = vcombine.low %v5275_v56, %v5291_v31  ;;  %v5612_v49 = vcombine.low %v5322_v29, %v5328_v16  ;;  %v5616_v54 = vcombine.low %v5352_v61, %v5371_v46  ;;  %v5620_v36 = vcombine.low %v5394_v60, %v5401_v7  ;;  %v5639_v61 = vld [vmem:[%s5015_s30 + $0xc4] sm:$0xf] }
  0x74   : > { %4209 = vmatmul.mubr.msk.bf16.vlgmr.msra.gmra.mrb[0].mxu1 %vm754_vm3, %v5068_v38  ;;  %4361 = vmatmul.mubr.msk.bf16.gmra.mrb[16].mxu0 %vm754_vm3, %v5551_v20  ;;  %v5624_v45 = vcombine.low %v5424_v25, %v5433_v32  ;;  %v5628_v56 = vcombine.low %v5104_v14, %v5116_v28  ;;  %v5630_v31 = vcombine.low %v1373_v58, %v1376_v42  ;;  %v3726_v16 = vrot.slane %v5459_v17, 9  ;;  %v6482_v42 = vld [vmem:[#allocation5_spill] sm:$0xff] }
  0x75   : > { %4241 = vmatpush3.bf16.msra.mxu1 %v1490_v21  ;;  %4212 = vmatprep.mubr.msk.bf16.mxu1 %vm754_vm3, %v5557_v47  ;;  %v5634_v29 = vcombine.low %v5459_v17, %v5471_v53  ;;  %v1388_v7 = vrot.slane %v1386_v19, 4  ;;  %v1389_v60 = vrot.slane %v5477_v44, 5  ;;  %v1380_v14 = vsel %vm5243_vm7, %v3725_v40, %v1379_v51  ;;  %v5659_v17 = vld [vmem:[%s5015_s30 + $0xc0] sm:$0xf] }
  0x76   : > { %4364 = vmatprep.mubr.msk.bf16.mxu0 %vm754_vm3, %v5562_v0  ;;  %4739 = vmatprep.subr.msk.bf16.mxu1 %vm803_vm0, %v5569_v3  ;;  %v1383_v28 = vsel %vm5243_vm7, %v1381_v15, %v1382_v27  ;;  %v2122_v25 = vrot.slane %v5639_v61, 5  ;;  %v1387_v46 = vsel %vm5243_vm7, %v3726_v16, %v1386_v19  ;;  %v5664_v53 = vcombine.low %v5131_v48, %v5139_v52 }
  0x77   : > { %v1390_v32 = vsel %vm5243_vm7, %v1388_v7, %v1389_v60  ;;  %v5666_v44 = vcombine.low %v1380_v14, %v1383_v28  ;;  %v5670_v8 = vcombine.low %v5156_v13, %v5163_v24  ;;  %v1892_v43 = vshrl.u32 %v5659_v17, 16  ;;  %v3852_v60 = vld [vmem:[%s6422_s1 + $0x10] sm:$0x3]  ;;  %v4917_v14 = vld [vmem:[%s5015_s30 + $0x4] sm:$0xf] }
  0x78   : > { %v1895_v55 = vshll.u32 %v5659_v17, 16  ;;  %v1901_v12 = vshll.u32 %v5639_v61, 16  ;;  %v1905_v59 = vshrl.u32 %v5639_v61, 16  ;;  %v5676_v1 = vcombine.low %v1387_v46, %v1390_v32  ;;  %v4919_v32 = vld [vmem:[%s5015_s30] sm:$0xf] }
  0x79   : > { %v3796_v35 = vrot.slane %v5659_v17, 9  ;;  %v2124_v48 = vrot.slane %v2122_v25, 4  ;;  %v2125_v52 = vrot.slane %v312_v18, 5  ;;  %v1894_v2 = vrot.slane %v1892_v43, 4 }
  0x7a   : > { %v1897_v4 = vrot.slane %v1895_v55, 5  ;;  %v1903_v11 = vrot.slane %v1901_v12, 5  ;;  %v1907_v21 = vrot.slane %v1905_v59, 4  ;;  %v1911_v9 = vshll.u32 %v312_v18, 16 }
  0x7b   : > { %v2123_v10 = vsel %vm5243_vm7, %v3796_v35, %v2122_v25  ;;  %v2126_v51 = vsel %vm5243_vm7, %v2124_v48, %v2125_v52  ;;  %v5693_v40 = vcombine.low %v6482_v42, %v5190_v6  ;;  %v6483_v6 = vld [vmem:[#allocation15_spill] sm:$0xff]  ;;  %v1281_v28 = vrot.slane %v4917_v14, 5  ;;  %v6484_v48 = vld [vmem:[#allocation10_spill] sm:$0xff]  ;;  %v6485_v52 = vld [vmem:[#allocation12_spill] sm:$0xff] }
  0x7c   : > { %4213 = vmatmul.mubr.msk.bf16.gmra.mrb[4].mxu1 %vm754_vm3, %v5583_v23  ;;  %4365 = vmatmul.mubr.msk.bf16.gmra.mrb[20].mxu0 %vm754_vm3, %v5603_v62  ;;  %v1898_v13 = vor.u32 %v1897_v4, %v1894_v2  ;;  %v1908_v24 = vor.u32 %v1907_v21, %v1903_v11  ;;  %v1913_v58 = vrot.slane %v1911_v9, 5  ;;  %v5695_v19 = vcombine.low %v2123_v10, %v2126_v51  ;;  %v4918_v25 = vld [vmem:[%s5015_s30 + $0x8] sm:$0xf]  ;;  %v6487_v4 = vld [vmem:[#allocation17_spill] sm:$0xff]  ;;  %v6488_v21 = vld [vmem:[#allocation20_spill] sm:$0xff] }
  0x7d   : > { %4216 = vmatprep.mubr.msk.bf16.mxu1 %vm754_vm3, %v5628_v56  ;;  %4368 = vmatprep.mubr.msk.bf16.mxu0 %vm754_vm3, %v5630_v31  ;;  %v2570_v7 = vsel %vm803_vm0, %v6483_v6, 0  ;;  %v1284_v46 = vrot.slane %v4918_v25, 5  ;;  %v3711_v18 = vrot.slane %v4919_v32, 9  ;;  %v1283_v43 = vrot.slane %v1281_v28, 4  ;;  %v4920_v2 = vld [vmem:[%s6422_s1 + $0x8] sm:$0x3] }
  0x7e   : > { %v1899_v33 = vrot.slane %v1898_v13, 4  ;;  %v1909_v39 = vrot.slane %v1908_v24, 4  ;;  %v1696_v35 = vsel %vm803_vm0, %v5569_v3, 0  ;;  %v6486_v3 = vld [vmem:[#allocation14_spill] sm:$0xff]  ;;  %v5790_v24 = vld [vmem:[%s5015_s30 + $0xcc] sm:$0xf] }
  0x7f   : > { %v1282_v55 = vsel %vm5243_vm7, %v3711_v18, %v1281_v28  ;;  %v1285_v12 = vsel %vm5243_vm7, %v1283_v43, %v1284_v46  ;;  %v6489_v13 = vld [vmem:[#allocation22_spill] sm:$0xff]  ;;  %v5793_v9 = vld [vmem:[%s5015_s30 + $0xd0] sm:$0xf]  ;;  %v2782_v10 = vsel %vm803_vm0, %v3852_v60, 0  ;;  %v6495_v42 = vld [vmem:[#allocation9_spill] sm:$0xff]  ;;  %v2541_v14 = vshll.u32 %v5790_v24, 16 }
  0x80   : > { %v1904_v15 = vsel %vm5062_vm4, %v1899_v33, %v1903_v11  ;;  %v1914_v27 = vsel %vm5062_vm4, %v1909_v39, %v1913_v58  ;;  %v3728_v59 = vcombine.low %v1282_v55, %v1285_v12  ;;  %v5779_v11 = vcombine.low %v5659_v17, %v5639_v61  ;;  %v6490_v17 = vld [vmem:[#allocation3_spill] sm:$0xff]  ;;  %v6491_v51 = vld [vmem:[#allocation4_spill] sm:$0xff]  ;;  %v6492_v33 = vld [vmem:[#allocation6_spill] sm:$0xff] }
  0x81   : > { %v5701_v16 = vcombine.low %v1904_v15, %v1914_v27  ;;  %v3816_v61 = vcombine.low %v5790_v24, %v5793_v9  ;;  %v6493_v39 = vld [vmem:[#allocation7_spill] sm:$0xff]  ;;  %v6494_v58 = vld [vmem:[#allocation8_spill] sm:$0xff]  ;;  %v6497_v27 = vld [vmem:[#allocation13_spill] sm:$0xff]  ;;  %v2551_v28 = vshrl.u32 %v5793_v9, 16  ;;  %v2543_v32 = vrot.slane %v2541_v14, 5 }
  0x82   : > { %v6496_v15 = vld [vmem:[#allocation11_spill] sm:$0xff]  ;;  %v6498_v6 = vld [vmem:[#allocation16_spill] sm:$0xff]  ;;  %v6500_v25 = vld [vmem:[#allocation2_spill] sm:$0xff]  ;;  %v2768_v34 = vrot.slane %v5793_v9, 5 }
  0x83   : > { %v6501_v46 = vld [vmem:[#allocation19_spill] sm:$0xff]  ;;  %v2553_v43 = vrot.slane %v2551_v28, 4  ;;  %v315_v55 = vld [vmem:[%s5015_s30 + $0xd4] sm:$0xf]  ;;  %v6502_v12 = vld [vmem:[#allocation21_spill] sm:$0xff] }
  0x84   : > { %4217 = vmatmul.mubr.msk.bf16.gmra.mrb[8].mxu1 %vm754_vm3, %v5664_v53  ;;  %4369 = vmatmul.mubr.msk.bf16.gmra.mrb[24].mxu0 %vm754_vm3, %v5666_v44 }
  0x85   : > { %4220 = vmatprep.mubr.msk.bf16.mxu1 %vm754_vm3, %v5670_v8  ;;  %4372 = vmatprep.mubr.msk.bf16.mxu0 %vm754_vm3, %v5676_v1 }
  0x8c   : > { %4221 = vmatmul.mubr.msk.bf16.gmra.mrb[12].mxu1 %vm754_vm3, %v5693_v40  ;;  %4373 = vmatmul.mubr.msk.bf16.gmra.mrb[28].mxu0 %vm754_vm3, %v5695_v19 }
  0x8d   : > { %4224 = vmatprep.mubr.msk.bf16.mxu1 %vm754_vm3, %v5589_v22  ;;  %4378 = vmatprep.mubr.msk.bf16.mxu0 %vm754_vm3, %v5557_v47 }
  0x94   : > { %4225 = vmatmul.mubr.msk.bf16.gmra.mrb[16].mxu1 %vm754_vm3, %v5599_v57  ;;  %4379 = vmatmul.mubr.msk.bf16.vlgmr.msra.gmra.mrb[0].mxu0 %vm754_vm3, %v5583_v23 }
  0x95   : > { %4411 = vmatpush3.bf16.msra.mxu0 %v2570_v7  ;;  %4228 = vmatprep.mubr.msk.bf16.mxu1 %vm754_vm3, %v5608_v5  ;;  %v6499_v7 = vld [vmem:[#allocation18_spill] sm:$0xff] }
  0x96   : > { %4382 = vmatprep.mubr.msk.bf16.mxu0 %vm754_vm3, %v5628_v56  ;;  %4745 = vmatprep.subr.msk.bf16.mxu0 %vm803_vm0, %v3852_v60  ;;  %v2538_v60 = vshrl.u32 %v5790_v24, 16 }
  0x9c   : > { %4229 = vmatmul.mubr.msk.bf16.gmra.mrb[20].mxu1 %vm754_vm3, %v5612_v49  ;;  %4383 = vmatmul.mubr.msk.bf16.gmra.mrb[4].mxu0 %vm754_vm3, %v5664_v53 }
  0x9d   : > { %4232 = vmatprep.mubr.msk.bf16.mxu1 %vm754_vm3, %v5616_v54  ;;  %4386 = vmatprep.mubr.msk.bf16.mxu0 %vm754_vm3, %v5670_v8 }
  0xa4   : > { %4233 = vmatmul.mubr.msk.bf16.gmra.mrb[24].mxu1 %vm754_vm3, %v5620_v36  ;;  %4387 = vmatmul.mubr.msk.bf16.gmra.mrb[8].mxu0 %vm754_vm3, %v5693_v40 }
  0xa5   : > { %4236 = vmatprep.mubr.msk.bf16.mxu1 %vm754_vm3, %v5624_v45  ;;  %4390 = vmatprep.mubr.msk.bf16.mxu0 %vm754_vm3, %v5589_v22 }
  0xac   : > { %4237 = vmatmul.mubr.msk.bf16.gmra.mrb[28].mxu1 %vm754_vm3, %v5634_v29  ;;  %4391 = vmatmul.mubr.msk.bf16.gmra.mrb[12].mxu0 %vm754_vm3, %v5599_v57 }
  0xad   : > { %4242 = vmatprep.mubr.msk.bf16.mxu1 %vm754_vm3, %v3728_v59  ;;  %4394 = vmatprep.mubr.msk.bf16.mxu0 %vm754_vm3, %v5608_v5 }
  0xb4   : > { %4243 = vmatmul.mubr.msk.bf16.vlgmr.msra.gmra.mrb[0].mxu1 %vm754_vm3, %v6484_v48  ;;  %4395 = vmatmul.mubr.msk.bf16.gmra.mrb[16].mxu0 %vm754_vm3, %v5612_v49 }
  0xb5   : > { %4275 = vmatpush3.bf16.msra.mxu1 %v1696_v35  ;;  %4246 = vmatprep.mubr.msk.bf16.mxu1 %vm754_vm3, %v6485_v52  ;;  %v2557_v35 = vshll.u32 %v315_v55, 16 }
  0xb6   : > { %4398 = vmatprep.mubr.msk.bf16.mxu0 %vm754_vm3, %v5616_v54  ;;  %4741 = vmatprep.subr.msk.bf16.mxu1 %vm803_vm0, %v4920_v2 }
  0xbc   : > { %4247 = vmatmul.mubr.msk.bf16.gmra.mrb[4].mxu1 %vm754_vm3, %v6486_v3  ;;  %4399 = vmatmul.mubr.msk.bf16.gmra.mrb[20].mxu0 %vm754_vm3, %v5620_v36 }
  0xbd   : > { %4250 = vmatprep.mubr.msk.bf16.mxu1 %vm754_vm3, %v6487_v4  ;;  %4402 = vmatprep.mubr.msk.bf16.mxu0 %vm754_vm3, %v5624_v45 }
  0xc4   : > { %4251 = vmatmul.mubr.msk.bf16.gmra.mrb[8].mxu1 %vm754_vm3, %v6488_v21  ;;  %4403 = vmatmul.mubr.msk.bf16.gmra.mrb[24].mxu0 %vm754_vm3, %v5634_v29 }
  0xc5   : > { %4254 = vmatprep.mubr.msk.bf16.mxu1 %vm754_vm3, %v6489_v13  ;;  %4406 = vmatprep.mubr.msk.bf16.mxu0 %vm754_vm3, %v5779_v11 }
  0xcc   : > { %4255 = vmatmul.mubr.msk.bf16.gmra.mrb[12].mxu1 %vm754_vm3, %v5494_v37  ;;  %4407 = vmatmul.mubr.msk.bf16.gmra.mrb[28].mxu0 %vm754_vm3, %v3816_v61  ;;  %v2559_v61 = vrot.slane %v2557_v35, 5 }
  0xcd   : > { %4258 = vmatprep.mubr.msk.bf16.mxu1 %vm754_vm3, %v5525_v41  ;;  %4412 = vmatprep.mubr.msk.bf16.mxu0 %vm754_vm3, %v6490_v17 }
  0xd4   : > { %4259 = vmatmul.mubr.msk.bf16.gmra.mrb[16].mxu1 %vm754_vm3, %v5529_v50  ;;  %4413 = vmatmul.mubr.msk.bf16.vlgmr.msra.gmra.mrb[0].mxu0 %vm754_vm3, %v6491_v51 }
  0xd5   : > { %4445 = vmatpush3.bf16.msra.mxu0 %v2782_v10  ;;  %4262 = vmatprep.mubr.msk.bf16.mxu1 %vm754_vm3, %v5551_v20 }
  0xd6   : > { %4416 = vmatprep.mubr.msk.bf16.mxu0 %vm754_vm3, %v6492_v33 }
  0xdc   : > { %4263 = vmatmul.mubr.msk.bf16.gmra.mrb[20].mxu1 %vm754_vm3, %v5562_v0  ;;  %4417 = vmatmul.mubr.msk.bf16.gmra.mrb[4].mxu0 %vm754_vm3, %v6493_v39 }
  0xdd   : > { %4266 = vmatprep.mubr.msk.bf16.mxu1 %vm754_vm3, %v5603_v62  ;;  %4420 = vmatprep.mubr.msk.bf16.mxu0 %vm754_vm3, %v6494_v58 }
  0xe4   : > { %4267 = vmatmul.mubr.msk.bf16.gmra.mrb[24].mxu1 %vm754_vm3, %v5630_v31  ;;  %4421 = vmatmul.mubr.msk.bf16.gmra.mrb[8].mxu0 %vm754_vm3, %v6495_v42 }
  0xe5   : > { %4270 = vmatprep.mubr.msk.bf16.mxu1 %vm754_vm3, %v5666_v44  ;;  %4424 = vmatprep.mubr.msk.bf16.mxu0 %vm754_vm3, %v6496_v15  ;;  %v5990_v15 = vld [vmem:[%s5965_s24 + $0x18] sm:$0xff]  }
  0xec   : > { %4271 = vmatmul.mubr.msk.bf16.gmra.mrb[28].mxu1 %vm754_vm3, %v5676_v1  ;;  %4425 = vmatmul.mubr.msk.bf16.gmra.mrb[12].mxu0 %vm754_vm3, %v6497_v27 }
  0xed   : > { %4276 = vmatprep.mubr.msk.bf16.mxu1 %vm754_vm3, %v5068_v38  ;;  %4428 = vmatprep.mubr.msk.bf16.mxu0 %vm754_vm3, %v6498_v6  ;;  %v2547_v38 = vshll.u32 %v5793_v9, 16  ;;  %v5982_v9 = vld [vmem:[%s5965_s24] sm:$0xff]  }
  0xef   : > { %v2549_v18 = vrot.slane %v2547_v38, 5 }
  0xf1   : > { %v2554_v59 = vor.u32 %v2553_v43, %v2549_v18  ;;  %v3954_v43 = vunpack.c.l.bf16 %v5990_v15 }
  0xf3   : > { %v2555_v2 = vrot.slane %v2554_v59, 4 }
  0xf4   : > { %4277 = vmatmul.mubr.msk.bf16.vlgmr.msra.gmra.mrb[0].mxu1 %vm754_vm3, %v5557_v47  ;;  %4429 = vmatmul.mubr.msk.bf16.gmra.mrb[16].mxu0 %vm754_vm3, %v6499_v7  ;;  %v2540_v47 = vrot.slane %v2538_v60, 4  ;;  %v3942_v60 = vunpack.c.l.bf16 %v5982_v9 }
  0xf5   : > { %4479 = vmatpush3.bf16.msra.mxu1 %v6500_v25  ;;  %4280 = vmatprep.mubr.msk.bf16.mxu1 %vm754_vm3, %v5583_v23 }
  0xf6   : > { %4432 = vmatprep.mubr.msk.bf16.mxu0 %vm754_vm3, %v6501_v46  ;;  %v2544_v23 = vor.u32 %v2543_v32, %v2540_v47 }
  0xf8   : > { %v2545_v48 = vrot.slane %v2544_v23, 4 }
  0xfc   : > { %4281 = vmatmul.mubr.msk.bf16.gmra.mrb[4].mxu1 %vm754_vm3, %v5628_v56  ;;  %4433 = vmatmul.mubr.msk.bf16.gmra.mrb[20].mxu0 %vm754_vm3, %v6502_v12  ;;  %v2550_v56 = vsel %vm5062_vm4, %v2545_v48, %v2549_v18  ;;  %v3955_v48 = vunpack.c.h.bf16 %v5990_v15 }
  0xfd   : > { %4284 = vmatprep.mubr.msk.bf16.mxu1 %vm754_vm3, %v5664_v53  ;;  %4436 = vmatprep.mubr.msk.bf16.mxu0 %vm754_vm3, %v5496_v30  ;;  %v2560_v53 = vsel %vm5062_vm4, %v2555_v2, %v2559_v61 }
  0xfe   : > { %v3834_v17 = vcombine.low %v2550_v56, %v2560_v53 }
 0x104   : > { %4285 = vmatmul.mubr.msk.bf16.gmra.mrb[8].mxu1 %vm754_vm3, %v5670_v8  ;;  %4437 = vmatmul.mubr.msk.bf16.gmra.mrb[24].mxu0 %vm754_vm3, %v5523_v63 }
 0x105   : > { %4288 = vmatprep.mubr.msk.bf16.mxu1 %vm754_vm3, %v5693_v40  ;;  %4440 = vmatprep.mubr.msk.bf16.mxu0 %vm754_vm3, %v5701_v16 }
 0x10c   : > { %4289 = vmatmul.mubr.msk.bf16.gmra.mrb[12].mxu1 %vm754_vm3, %v5589_v22  ;;  %4441 = vmatmul.mubr.msk.bf16.gmra.mrb[28].mxu0 %vm754_vm3, %v3834_v17 }
 0x10d   : > { %4292 = vmatprep.mubr.msk.bf16.mxu1 %vm754_vm3, %v5599_v57  ;;  %4446 = vmatprep.mubr.msk.bf16.mxu0 %vm754_vm3, %v6485_v52 }
 0x114   : > { %4293 = vmatmul.mubr.msk.bf16.gmra.mrb[16].mxu1 %vm754_vm3, %v5608_v5  ;;  %4447 = vmatmul.mubr.msk.bf16.vlgmr.msra.gmra.mrb[0].mxu0 %vm754_vm3, %v6486_v3 }
 0x115   : > { %4296 = vmatprep.mubr.msk.bf16.mxu1 %vm754_vm3, %v5612_v49  ;;  %4450 = vmatprep.mubr.msk.bf16.mxu0 %vm754_vm3, %v6487_v4  ;;  %v5975_v4 = vld [vmem:[%s6423_s2 + $0x1] ss:$0 sm:$0xff] }
 0x11c   : > { %4297 = vmatmul.mubr.msk.bf16.gmra.mrb[20].mxu1 %vm754_vm3, %v5616_v54  ;;  %4451 = vmatmul.mubr.msk.bf16.gmra.mrb[4].mxu0 %vm754_vm3, %v6488_v21 }
 0x11d   : > { %4300 = vmatprep.mubr.msk.bf16.mxu1 %vm754_vm3, %v5620_v36  ;;  %4454 = vmatprep.mubr.msk.bf16.mxu0 %vm754_vm3, %v6489_v13 }
 0x124   : > { %4301 = vmatmul.mubr.msk.bf16.gmra.mrb[24].mxu1 %vm754_vm3, %v5624_v45  ;;  %4455 = vmatmul.mubr.msk.bf16.gmra.mrb[8].mxu0 %vm754_vm3, %v5494_v37  ;;  %v3851_v37 = vrot.slane %v5790_v24, 9  ;;  %v5979_v24 = vld [vmem:[%s5965_s24 + $0x8] sm:$0xff]  }
 0x125   : > { %4304 = vmatprep.mubr.msk.bf16.mxu1 %vm754_vm3, %v5634_v29  ;;  %4458 = vmatprep.mubr.msk.bf16.mxu0 %vm754_vm3, %v5525_v41  ;;  %v2770_v41 = vrot.slane %v2768_v34, 4  ;;  %v3947_v38 = vunpack.c.h.bf16 %v5979_v24 }
 0x12c   : > { %4305 = vmatmul.mubr.msk.bf16.gmra.mrb[28].mxu1 %vm754_vm3, %v5779_v11  ;;  %4459 = vmatmul.mubr.msk.bf16.gmra.mrb[12].mxu0 %vm754_vm3, %v5529_v50  ;;  %v2771_v50 = vrot.slane %v315_v55, 5 }
 0x12d   : > { %4326 = vmatprep.mubr.msk.bf16.mxu1 %vm754_vm3, %v6497_v27  ;;  %4462 = vmatprep.mubr.msk.bf16.mxu0 %vm754_vm3, %v5551_v20  ;;  %v2769_v20 = vsel %vm5243_vm7, %v3851_v37, %v2768_v34  ;;  %v5993_v27 = vld [vmem:[%s5965_s24 + $0x10] sm:$0xff]   ;;  %v6018_v34 = vld [vmem:[%s5965_s24 + $0x28] sm:$0xff]  }
 0x12e   : > { %v3950_v55 = vunpack.c.l.bf16 %v5993_v27  ;;  %v3951_v17 = vunpack.c.h.bf16 %v5993_v27 }
 0x134   : > { %4327 = vmatmul.mubr.msk.bf16.vlgmr.msra.gmra.mrb[16].mxu1 %vm754_vm3, %v6498_v6  ;;  %4463 = vmatmul.mubr.msk.bf16.gmra.mrb[16].mxu0 %vm754_vm3, %v5562_v0  ;;  %v2772_v0 = vsel %vm5243_vm7, %v2770_v41, %v2771_v50  ;;  %v3946_v6 = vunpack.c.l.bf16 %v5979_v24 }
 0x135   : > { %4330 = vmatprep.mubr.msk.bf16.mxu1 %vm754_vm3, %v6499_v7  ;;  %4466 = vmatprep.mubr.msk.bf16.mxu0 %vm754_vm3, %v5603_v62  ;;  %v3853_v22 = vcombine.low %v2769_v20, %v2772_v0  ;;  %v6022_v0 = vld [vmem:[%s5965_s24 + $0x20] sm:$0xff]  }
 0x13c   : > { %4331 = vmatmul.mubr.msk.bf16.gmra.mrb[20].mxu1 %vm754_vm3, %v6501_v46  ;;  %4467 = vmatmul.mubr.msk.bf16.gmra.mrb[20].mxu0 %vm754_vm3, %v5630_v31  ;;  %v3943_v46 = vunpack.c.h.bf16 %v5982_v9 }
 0x13d   : > { %4334 = vmatprep.mubr.msk.bf16.mxu1 %vm754_vm3, %v6502_v12  ;;  %4470 = vmatprep.mubr.msk.bf16.mxu0 %vm754_vm3, %v5666_v44 }
 0x144   : > { %4335 = vmatmul.mubr.msk.bf16.gmra.mrb[24].mxu1 %vm754_vm3, %v5496_v30  ;;  %4471 = vmatmul.mubr.msk.bf16.gmra.mrb[24].mxu0 %vm754_vm3, %v5676_v1 }
 0x145   : > { %4338 = vmatprep.mubr.msk.bf16.mxu1 %vm754_vm3, %v5523_v63  ;;  %4474 = vmatprep.mubr.msk.bf16.mxu0 %vm754_vm3, %v5695_v19 }
 0x14c   : > { %4339 = vmatmul.mubr.msk.bf16.gmra.mrb[28].mxu1 %vm754_vm3, %v5701_v16  ;;  %4475 = vmatmul.mubr.msk.bf16.gmra.mrb[28].mxu0 %vm754_vm3, %v3853_v22  ;;  %v5970_v16 = vld [vmem:[%s6423_s2] ss:$0 sm:$0xff] }
 0x1c7   : > { %v4278_v30 = vpop.f32.mrb[0].mxu1 }
 0x1c8   : > { %v1732_v57 = vpop.f32.mrb[1].mxu1 }
 0x1c9   : > { %v4279_v63 = vpop.f32.mrb[2].mxu1 }
 0x1ca   : > { %v1735_v62 = vpop.f32.mrb[3].mxu1 }
 0x1cf   : > { %v4282_v5 = vpop.f32.mrb[4].mxu1 }
 0x1d0   : > { %v1748_v49 = vpop.f32.mrb[5].mxu1 }
 0x1d1   : > { %v4283_v54 = vpop.f32.mrb[6].mxu1 }
 0x1d2   : > { %v1751_v36 = vpop.f32.mrb[7].mxu1 }
 0x1d7   : > { %v5943_v45 = vpop.f32.mrb[8].mxu1 }
 0x1d8   : > { %v5945_v26 = vpop.f32.mrb[9].mxu1 }
 0x1d9   : > { %v5947_v31 = vpop.f32.mrb[10].mxu1 }
 0x1da   : > { %v5949_v29 = vpop.f32.mrb[11].mxu1 }
 0x1df   : > { %v5951_v44 = vpop.f32.mrb[12].mxu1 }
 0x1e0   : > { %v5953_v8 = vpop.f32.mrb[13].mxu1 }
 0x1e1   : > { %v5955_v1 = vpop.f32.mrb[14].mxu1 }
 0x1e2   : > { %v5957_v40 = vpop.f32.mrb[15].mxu1 }
 0x1e7   : > { %v4448_v19 = vpop.f32.mrb[0].mxu0 }
 0x1e8   : > { %v4480_v52 = vadd.f32 %v4448_v19, %v4278_v30  ;;  %v2818_v3 = vpop.f32.mrb[1].mxu0  ;;  %v6034_v19 = vld [vmem:[%s5965_s24 + $0x30] sm:$0xff]  }
 0x1e9   : > { %v4481_v11 = vadd.f32 %v2818_v3, %v1732_v57  ;;  %v4449_v21 = vpop.f32.mrb[2].mxu0 }
 0x1ea   : > { %v2984_v13 = vmul.f32 %v4480_v52, %v5970_v16  ;;  %v4482_v10 = vadd.f32 %v4449_v21, %v4279_v63  ;;  %v2821_v51 = vpop.f32.mrb[3].mxu0  ;;  %v3963_v21 = vunpack.c.h.bf16 %v6018_v34 }
 0x1eb   : > { %v2982_v33 = vmul.f32 %v4481_v11, %v5970_v16  ;;  %v4483_v39 = vadd.f32 %v2821_v51, %v1735_v62 }
 0x1ec   : > { %v5986_v58 = vadd.f32 %v5975_v4, %v2984_v13  ;;  %v2985_v42 = vmul.f32 %v4482_v10, %v5970_v16  ;;  %v3959_v13 = vunpack.c.h.bf16 %v6022_v0 }
 0x1ed   : > { %v5997_v7 = vadd.f32 %v5975_v4, %v2982_v33  ;;  %v2983_v14 = vmul.f32 %v4483_v39, %v5970_v16 }
 0x1ee   : > { %v3053_v28 = vsub.f32 0.0, %v5986_v58  ;;  %v6003_v25 = vadd.f32 %v5975_v4, %v2985_v42 }
 0x1ef   : > { %v3051_v47 = vsub.f32 0.0, %v5997_v7  ;;  %v6009_v32 = vadd.f32 %v5975_v4, %v2983_v14  ;;  %v4452_v18 = vpop.f32.mrb[4].mxu0 }
 0x1f0   : > { %v3087_v12 = vmul.f32 1.442695, %v3053_v28  ;;  %v3054_v23 = vsub.f32 0.0, %v6003_v25  ;;  %v4484_v59 = vadd.f32 %v4452_v18, %v4282_v5  ;;  %v2834_v35 = vpop.f32.mrb[5].mxu0  ;;  %v3962_v5 = vunpack.c.l.bf16 %v6018_v34 }
 0x1f1   : > { %v3083_v2 = vmul.f32 1.442695, %v3051_v47  ;;  %v3052_v61 = vsub.f32 0.0, %v6009_v32  ;;  %v4485_v56 = vadd.f32 %v2834_v35, %v1748_v49  ;;  %v4453_v53 = vpop.f32.mrb[6].mxu0  ;;  %v6031_v49 = vld [vmem:[%s5965_s24 + $0x38] sm:$0xff]  }
 0x1f2   : > { %4789 = vpow2.f32 %v3087_v12  ;;  %v3089_v37 = vmul.f32 1.442695, %v3054_v23  ;;  %v2988_v41 = vmul.f32 %v4484_v59, %v5970_v16  ;;  %v4486_v50 = vadd.f32 %v4453_v53, %v4283_v54  ;;  %v2837_v20 = vpop.f32.mrb[7].mxu0 }
 0x1f3   : > { %4791 = vpow2.f32 %v3083_v2  ;;  %v3085_v22 = vmul.f32 1.442695, %v3052_v61  ;;  %v2986_v30 = vmul.f32 %v4485_v56, %v5970_v16  ;;  %v4487_v57 = vadd.f32 %v2837_v20, %v1751_v36  ;;  %v6060_v56 = vld [vmem:[%s5965_s24 + $0x48] sm:$0xff]  }
 0x1f4   : > { %4793 = vpow2.f32 %v3089_v37  ;;  %v6026_v63 = vadd.f32 %v5975_v4, %v2988_v41  ;;  %v2989_v62 = vmul.f32 %v4486_v50, %v5970_v16  ;;  %v3958_v36 = vunpack.c.l.bf16 %v6022_v0 }
 0x1f5   : > { %4795 = vpow2.f32 %v3085_v22  ;;  %v6037_v54 = vadd.f32 %v5975_v4, %v2986_v30  ;;  %v2987_v52 = vmul.f32 %v4487_v57, %v5970_v16  ;;  %v6067_v30 = vld [vmem:[%s5965_s24 + $0x40] sm:$0xff]  }
 0x1f6   : > { %v3057_v3 = vsub.f32 0.0, %v6026_v63  ;;  %v6043_v11 = vadd.f32 %v5975_v4, %v2989_v62 }
 0x1f7   : > { %v3055_v10 = vsub.f32 0.0, %v6037_v54  ;;  %v6049_v51 = vadd.f32 %v5975_v4, %v2987_v52  ;;  %v4456_v33 = vpop.f32.mrb[8].mxu0 }
 0x1f8   : > { %v3095_v14 = vmul.f32 1.442695, %v3057_v3  ;;  %v3058_v28 = vsub.f32 0.0, %v6043_v11  ;;  %v4488_v47 = vadd.f32 %v4456_v33, %v5943_v45  ;;  %v2850_v18 = vpop.f32.mrb[9].mxu0 }
 0x1f9   : > { %v3091_v23 = vmul.f32 1.442695, %v3055_v10  ;;  %v3056_v59 = vsub.f32 0.0, %v6049_v51  ;;  %v4489_v35 = vadd.f32 %v2850_v18, %v5945_v26  ;;  %v4457_v2 = vpop.f32.mrb[10].mxu0 }
 0x1fa   : > { %4797 = vpow2.f32 %v3095_v14  ;;  %v3097_v53 = vmul.f32 1.442695, %v3058_v28  ;;  %v2992_v37 = vmul.f32 %v4488_v47, %v5970_v16  ;;  %v4490_v45 = vadd.f32 %v4457_v2, %v5947_v31  ;;  %v2853_v41 = vpop.f32.mrb[11].mxu0 }
 0x1fb   : > { %4799 = vpow2.f32 %v3091_v23  ;;  %v3093_v50 = vmul.f32 1.442695, %v3056_v59  ;;  %v2990_v20 = vmul.f32 %v4489_v35, %v5970_v16  ;;  %v4491_v22 = vadd.f32 %v2853_v41, %v5949_v29 }
 0x1fc   : > { %v4790_v26 = vpop.eup %4789  ;;  %4801 = vpow2.f32 %v3097_v53  ;;  %v6070_v57 = vadd.f32 %v5975_v4, %v2992_v37  ;;  %v2993_v62 = vmul.f32 %v4490_v45, %v5970_v16 }
 0x1fd   : > { %v4792_v3 = vpop.eup %4791  ;;  %v3149_v31 = vadd.f32 1.0, %v4790_v26  ;;  %4803 = vpow2.f32 %v3093_v50  ;;  %v6075_v10 = vadd.f32 %v5975_v4, %v2990_v20  ;;  %v2991_v33 = vmul.f32 %v4491_v22, %v5970_v16 }
 0x1fe   : > { %v4794_v29 = vpop.eup %4793  ;;  %v3147_v14 = vadd.f32 1.0, %v4792_v3  ;;  %v3061_v28 = vsub.f32 0.0, %v6070_v57  ;;  %v6080_v47 = vadd.f32 %v5975_v4, %v2993_v62 }
 0x1ff   : > { %v4796_v23 = vpop.eup %4795  ;;  %4805 = vrcp.f32 %v3149_v31  ;;  %v3150_v59 = vadd.f32 1.0, %v4794_v29  ;;  %v3059_v35 = vsub.f32 0.0, %v6075_v10  ;;  %v6085_v2 = vadd.f32 %v5975_v4, %v2991_v33  ;;  %v4460_v53 = vpop.f32.mrb[12].mxu0 }
 0x200   : > { %4807 = vrcp.f32 %v3147_v14  ;;  %v3148_v37 = vadd.f32 1.0, %v4796_v23  ;;  %v3103_v45 = vmul.f32 1.442695, %v3061_v28  ;;  %v3062_v41 = vsub.f32 0.0, %v6080_v47  ;;  %v2866_v50 = vpop.f32.mrb[13].mxu0 }
 0x201   : > { %4809 = vrcp.f32 %v3150_v59  ;;  %v3099_v20 = vmul.f32 1.442695, %v3059_v35  ;;  %v3060_v22 = vsub.f32 0.0, %v6085_v2  ;;  %v4492_v26 = vadd.f32 %v4460_v53, %v5951_v44  ;;  %v4461_v62 = vpop.f32.mrb[14].mxu0 }
 0x202   : > { %4811 = vrcp.f32 %v3148_v37  ;;  %v3105_v3 = vmul.f32 1.442695, %v3062_v41  ;;  %v4493_v31 = vadd.f32 %v2866_v50, %v5953_v8  ;;  %v4494_v33 = vadd.f32 %v4461_v62, %v5955_v1  ;;  %v2869_v29 = vpop.f32.mrb[15].mxu0 }
 0x203   : > { %4813 = vpow2.f32 %v3103_v45  ;;  %v3101_v14 = vmul.f32 1.442695, %v3060_v22  ;;  %v2996_v28 = vmul.f32 %v4492_v26, %v5970_v16  ;;  %v4495_v23 = vadd.f32 %v2869_v29, %v5957_v40 }
 0x204   : > { %v4798_v59 = vpop.eup %4797  ;;  %4815 = vpow2.f32 %v3099_v20  ;;  %v2994_v35 = vmul.f32 %v4493_v31, %v5970_v16  ;;  %v2997_v44 = vmul.f32 %v4494_v33, %v5970_v16 }
 0x205   : > { %v4800_v37 = vpop.eup %4799  ;;  %v3153_v8 = vadd.f32 1.0, %v4798_v59  ;;  %4817 = vpow2.f32 %v3105_v3  ;;  %v6098_v1 = vadd.f32 %v5975_v4, %v2996_v28  ;;  %v2995_v45 = vmul.f32 %v4495_v23, %v5970_v16 }
 0x206   : > { %v4802_v41 = vpop.eup %4801  ;;  %v3151_v50 = vadd.f32 1.0, %v4800_v37  ;;  %4819 = vpow2.f32 %v3101_v14  ;;  %v6102_v40 = vadd.f32 %v5975_v4, %v2994_v35  ;;  %v6105_v20 = vadd.f32 %v5975_v4, %v2997_v44 }
 0x207   : > { %v4804_v22 = vpop.eup %4803  ;;  %4821 = vrcp.f32 %v3153_v8  ;;  %v3154_v26 = vadd.f32 1.0, %v4802_v41  ;;  %v3065_v62 = vsub.f32 0.0, %v6098_v1  ;;  %v6109_v3 = vadd.f32 %v5975_v4, %v2995_v45  ;;  %v4328_v31 = vpop.f32.mrb[16].mxu1 }
 0x208   : > { %v4464_v33 = vpop.f32.mrb[16].mxu0  ;;  %4823 = vrcp.f32 %v3151_v50  ;;  %v3152_v29 = vadd.f32 1.0, %v4804_v22  ;;  %v3063_v14 = vsub.f32 0.0, %v6102_v40  ;;  %v3066_v28 = vsub.f32 0.0, %v6105_v20  ;;  %v2024_v23 = vpop.f32.mrb[17].mxu1 }
 0x209   : > { %v2882_v59 = vpop.f32.mrb[17].mxu0  ;;  %v4806_v35 = vpop.eup %4805  ;;  %4825 = vrcp.f32 %v3154_v26  ;;  %v3111_v44 = vmul.f32 1.442695, %v3065_v62  ;;  %v3064_v37 = vsub.f32 0.0, %v6109_v3  ;;  %v4496_v8 = vadd.f32 %v4464_v33, %v4328_v31 }
 0x20a   : > { %v4329_v41 = vpop.f32.mrb[18].mxu1  ;;  %v4465_v53 = vpop.f32.mrb[18].mxu0  ;;  %v3245_v18 = vmul.f32 %v4806_v35, %v5986_v58  ;;  %4827 = vrcp.f32 %v3152_v29  ;;  %v3107_v50 = vmul.f32 1.442695, %v3063_v14  ;;  %v3113_v22 = vmul.f32 1.442695, %v3066_v28 }
 0x20b   : > { %v4808_v45 = vpop.eup %4807  ;;  %v2027_v52 = vpop.f32.mrb[19].mxu1  ;;  %4829 = vpow2.f32 %v3111_v44  ;;  %v3109_v26 = vmul.f32 1.442695, %v3064_v37  ;;  %v3000_v62 = vmul.f32 %v4496_v8, %v5970_v16  ;;  %v4497_v58 = vadd.f32 %v2882_v59, %v2024_v23 }
 0x20c   : > { %v2885_v61 = vpop.f32.mrb[19].mxu0  ;;  %v4810_v12 = vpop.eup %4809  ;;  %v3243_v42 = vmul.f32 %v4808_v45, %v5997_v7  ;;  %v3341_v31 = vadd.f32 %v3946_v6, %v3245_v18  ;;  %4831 = vpow2.f32 %v3107_v50 }
 0x20d   : > { %v4812_v39 = vpop.eup %4811  ;;  %v3246_v33 = vmul.f32 %v4810_v12, %v6003_v25  ;;  %4833 = vpow2.f32 %v3113_v22  ;;  %v6131_v6 = vadd.f32 %v5975_v4, %v3000_v62 }
 0x20e   : > { %v4814_v29 = vpop.eup %4813  ;;  %v3339_v7 = vadd.f32 %v3942_v60, %v3243_v42  ;;  %v3244_v14 = vmul.f32 %v4812_v39, %v6009_v32  ;;  %v3910_v12 = vpack.c.bf16 %v3341_v31, %v3341_v31  ;;  %4835 = vpow2.f32 %v3109_v26 }
 0x20f   : > { %v4816_v25 = vpop.eup %4815  ;;  %v3342_v18 = vadd.f32 %v3947_v38, %v3246_v33  ;;  %v3157_v28 = vadd.f32 1.0, %v4814_v29  ;;  %v3069_v32 = vsub.f32 0.0, %v6131_v6  ;;  %v4332_v39 = vpop.f32.mrb[20].mxu1  ;;  %v2998_v38 = vmul.f32 %v4497_v58, %v5970_v16 }
 0x210   : > { %v4818_v23 = vpop.eup %4817  ;;  %v3908_v59 = vpack.c.bf16 %v3339_v7, %v3339_v7  ;;  %v3340_v60 = vadd.f32 %v3943_v46, %v3244_v14  ;;  %v3155_v42 = vadd.f32 1.0, %v4816_v25  ;;  %v4468_v35 = vpop.f32.mrb[20].mxu0  ;;  %3502 = vst.msk [vmem:[%s6125_s5 + $0x8] sm:$0xf] %vm3499_vm8, %v3910_v12  ;;  %v4498_v29 = vadd.f32 %v4465_v53, %v4329_v41 }
 0x211   : > { %v4820_v44 = vpop.eup %4819  ;;  %v3911_v37 = vpack.c.bf16 %v3342_v18, %v3342_v18  ;;  %4837 = vrcp.f32 %v3157_v28  ;;  %v3158_v24 = vadd.f32 1.0, %v4818_v23  ;;  %v6141_v8 = vpop.f32.mrb[21].mxu1  ;;  %v3119_v22 = vmul.f32 1.442695, %v3069_v32 }
 0x212   : > { %v6143_v45 = vpop.f32.mrb[21].mxu0  ;;  %v4822_v9 = vpop.eup %4821  ;;  %3500 = vst.msk [vmem:[%s6125_s5] sm:$0xf] %vm3499_vm8, %v3908_v59  ;;  %v3909_v46 = vpack.c.bf16 %v3340_v60, %v3340_v60  ;;  %4839 = vrcp.f32 %v3155_v42  ;;  %v3156_v50 = vadd.f32 1.0, %v4820_v44  ;;  %v6155_v58 = vadd.f32 %v5975_v4, %v2998_v38 }
 0x213   : > { %v6147_v26 = vpop.f32.mrb[22].mxu1  ;;  %v6149_v62 = vpop.f32.mrb[22].mxu0  ;;  %3503 = vst.msk [vmem:[%s6125_s5 + $0xc] sm:$0xf] %vm3499_vm8, %v3911_v37  ;;  %v3249_v33 = vmul.f32 %v4822_v9, %v6026_v63  ;;  %4841 = vrcp.f32 %v3158_v24  ;;  %v4499_v18 = vadd.f32 %v2885_v61, %v2027_v52  ;;  %v4500_v28 = vadd.f32 %v4468_v35, %v4332_v39 }
 0x214   : > { %v4824_v31 = vpop.eup %4823  ;;  %v6157_v7 = vpop.f32.mrb[23].mxu1  ;;  %3501 = vst.msk [vmem:[%s6125_s5 + $0x4] sm:$0xf] %vm3499_vm8, %v3909_v46  ;;  %4843 = vrcp.f32 %v3156_v50  ;;  %v3067_v53 = vsub.f32 0.0, %v6155_v58 }
 0x215   : > { %v6159_v14 = vpop.f32.mrb[23].mxu0  ;;  %v4826_v25 = vpop.eup %4825  ;;  %v3247_v12 = vmul.f32 %v4824_v31, %v6037_v54  ;;  %v3345_v63 = vadd.f32 %v3954_v43, %v3249_v33  ;;  %4845 = vpow2.f32 %v3119_v22  ;;  %v3001_v54 = vmul.f32 %v4498_v29, %v5970_v16 }
 0x216   : > { %v4828_v23 = vpop.eup %4827  ;;  %v3250_v59 = vmul.f32 %v4826_v25, %v6043_v11  ;;  %v2999_v61 = vmul.f32 %v4499_v18, %v5970_v16  ;;  %v3115_v39 = vmul.f32 1.442695, %v3067_v53  ;;  %v3004_v18 = vmul.f32 %v4500_v28, %v5970_v16 }
 0x217   : > { %v4830_v41 = vpop.eup %4829  ;;  %v3343_v60 = vadd.f32 %v3950_v55, %v3247_v12  ;;  %v3248_v42 = vmul.f32 %v4828_v23, %v6049_v51  ;;  %v3914_v32 = vpack.c.bf16 %v3345_v63, %v3345_v63  ;;  %v6178_v51 = vadd.f32 %v5975_v4, %v3001_v54  ;;  %v6180_v24 = vpop.f32.mrb[24].mxu1 }
 0x218   : > { %v4832_v52 = vpop.eup %4831  ;;  %v3346_v43 = vadd.f32 %v3955_v48, %v3250_v59  ;;  %v3161_v11 = vadd.f32 1.0, %v4830_v41  ;;  %v6182_v38 = vpop.f32.mrb[24].mxu0  ;;  %v6187_v46 = vadd.f32 %v5975_v4, %v2999_v61  ;;  %v4501_v23 = vadd.f32 %v6143_v45, %v6141_v8 }
 0x219   : > { %v4834_v35 = vpop.eup %4833  ;;  %v3912_v44 = vpack.c.bf16 %v3343_v60, %v3343_v60  ;;  %v3344_v55 = vadd.f32 %v3951_v17, %v3248_v42  ;;  %v3159_v37 = vadd.f32 1.0, %v4832_v52  ;;  %3506 = vst.msk [vmem:[%s6125_s5 + $0x18] sm:$0xf] %vm3499_vm8, %v3914_v32  ;;  %v6189_v27 = vpop.f32.mrb[25].mxu1  ;;  %v3070_v31 = vsub.f32 0.0, %v6178_v51 }
 0x21a   : > { %v4836_v9 = vpop.eup %4835  ;;  %v3915_v15 = vpack.c.bf16 %v3346_v43, %v3346_v43  ;;  %4847 = vrcp.f32 %v3161_v11  ;;  %v3162_v48 = vadd.f32 1.0, %v4834_v35  ;;  %v6191_v17 = vpop.f32.mrb[25].mxu0  ;;  %v3068_v12 = vsub.f32 0.0, %v6187_v46 }
 0x21b   : > { %3504 = vst.msk [vmem:[%s6125_s5 + $0x10] sm:$0xf] %vm3499_vm8, %v3912_v44  ;;  %v3913_v50 = vpack.c.bf16 %v3344_v55, %v3344_v55  ;;  %4849 = vrcp.f32 %v3159_v37  ;;  %v3160_v22 = vadd.f32 1.0, %v4836_v9  ;;  %v6196_v33 = vpop.f32.mrb[26].mxu1  ;;  %v6198_v29 = vpop.f32.mrb[26].mxu0  ;;  %v4502_v42 = vadd.f32 %v6149_v62, %v6147_v26 }
 0x21c   : > { %v4838_v25 = vpop.eup %4837  ;;  %3507 = vst.msk [vmem:[%s6125_s5 + $0x1c] sm:$0xf] %vm3499_vm8, %v3915_v15  ;;  %4851 = vrcp.f32 %v3162_v48  ;;  %v6206_v63 = vpop.f32.mrb[27].mxu1  ;;  %v3121_v60 = vmul.f32 1.442695, %v3070_v31  ;;  %v6217_v8 = vadd.f32 %v5975_v4, %v3004_v18  ;;  %v4503_v48 = vadd.f32 %v6159_v14, %v6157_v7 }
 0x21d   : > { %v6208_v59 = vpop.f32.mrb[27].mxu0  ;;  %v4840_v53 = vpop.eup %4839  ;;  %3505 = vst.msk [vmem:[%s6125_s5 + $0x14] sm:$0xf] %vm3499_vm8, %v3913_v50  ;;  %v3253_v41 = vmul.f32 %v4838_v25, %v6070_v57  ;;  %4853 = vrcp.f32 %v3160_v22  ;;  %v3117_v61 = vmul.f32 1.442695, %v3068_v12  ;;  %v3002_v57 = vmul.f32 %v4501_v23, %v5970_v16 }
 0x21e   : > { %v4842_v54 = vpop.eup %4841  ;;  %v3251_v28 = vmul.f32 %v4840_v53, %v6075_v10  ;;  %4855 = vpow2.f32 %v3115_v39  ;;  %v3073_v62 = vsub.f32 0.0, %v6217_v8  ;;  %v3005_v37 = vmul.f32 %v4502_v42, %v5970_v16 }
 0x21f   : > { %v4844_v45 = vpop.eup %4843  ;;  %v3349_v52 = vadd.f32 %v3962_v5, %v3253_v41  ;;  %v3254_v32 = vmul.f32 %v4842_v54, %v6080_v47  ;;  %4857 = vpow2.f32 %v3121_v60  ;;  %v6230_v47 = vadd.f32 %v5975_v4, %v3002_v57  ;;  %v6232_v35 = vpop.f32.mrb[28].mxu1 }
 0x220   : > { %v4846_v43 = vpop.eup %4845  ;;  %v3347_v26 = vadd.f32 %v3958_v36, %v3251_v28  ;;  %v3252_v10 = vmul.f32 %v4844_v45, %v6085_v2  ;;  %4859 = vpow2.f32 %v3117_v61  ;;  %v6234_v44 = vpop.f32.mrb[28].mxu0  ;;  %v3127_v55 = vmul.f32 1.442695, %v3073_v62 }
 0x221   : > { %v3918_v11 = vpack.c.bf16 %v3349_v52, %v3349_v52  ;;  %v3350_v39 = vadd.f32 %v3963_v21, %v3254_v32  ;;  %v3165_v5 = vadd.f32 1.0, %v4846_v43  ;;  %v6239_v9 = vpop.f32.mrb[29].mxu1  ;;  %v6241_v34 = vpop.f32.mrb[29].mxu0  ;;  %v3071_v15 = vsub.f32 0.0, %v6230_v47 }
 0x222   : > { %v3916_v36 = vpack.c.bf16 %v3347_v26, %v3347_v26  ;;  %v3348_v2 = vadd.f32 %v3959_v13, %v3252_v10  ;;  %v6248_v50 = vpop.f32.mrb[30].mxu1  ;;  %v6250_v0 = vpop.f32.mrb[30].mxu0  ;;  %v6255_v31 = vadd.f32 %v5975_v4, %v3005_v37  ;;  %v4504_v25 = vadd.f32 %v6182_v38, %v6180_v24 }
 0x223   : > { %3510 = vst.msk [vmem:[%s6125_s5 + $0x28] sm:$0xf] %vm3499_vm8, %v3918_v11  ;;  %v3919_v21 = vpack.c.bf16 %v3350_v39, %v3350_v39  ;;  %4861 = vrcp.f32 %v3165_v5  ;;  %v6259_v12 = vpop.f32.mrb[31].mxu1  ;;  %v6261_v18 = vpop.f32.mrb[31].mxu0  ;;  %v3123_v23 = vmul.f32 1.442695, %v3071_v15  ;;  %v3003_v53 = vmul.f32 %v4503_v48, %v5970_v16 }
 0x224   : > { %v4848_v13 = vpop.eup %4847  ;;  %3508 = vst.msk [vmem:[%s6125_s5 + $0x20] sm:$0xf] %vm3499_vm8, %v3916_v36  ;;  %v3917_v22 = vpack.c.bf16 %v3348_v2, %v3348_v2  ;;  %4863 = vpow2.f32 %v3127_v55  ;;  %v4505_v41 = vadd.f32 %v6191_v17, %v6189_v27  ;;  %v3074_v38 = vsub.f32 0.0, %v6255_v31 }
 0x225   : > { %v4850_v7 = vpop.eup %4849  ;;  %3511 = vst.msk [vmem:[%s6125_s5 + $0x2c] sm:$0xf] %vm3499_vm8, %v3919_v21  ;;  %v3257_v14 = vmul.f32 %v4848_v13, %v6098_v1  ;;  %v3008_v42 = vmul.f32 %v4504_v25, %v5970_v16  ;;  %v4506_v54 = vadd.f32 %v6198_v29, %v6196_v33  ;;  %v6503_v1 = vunpack.c.l.bf16 %v6031_v49 }
 0x226   : > { %v4852_v60 = vpop.eup %4851  ;;  %3509 = vst.msk [vmem:[%s6125_s5 + $0x24] sm:$0xf] %vm3499_vm8, %v3917_v22  ;;  %v3255_v24 = vmul.f32 %v4850_v7, %v6102_v40  ;;  %4865 = vpow2.f32 %v3123_v23  ;;  %v6280_v27 = vadd.f32 %v5975_v4, %v3003_v53  ;;  %v6504_v40 = vunpack.c.l.bf16 %v6034_v19 }
 0x227   : > { %v4854_v28 = vpop.eup %4853  ;;  %v3353_v61 = vadd.f32 %v6503_v1, %v3257_v14  ;;  %v3258_v45 = vmul.f32 %v4852_v60, %v6105_v20  ;;  %v3129_v57 = vmul.f32 1.442695, %v3074_v38  ;;  %v6286_v33 = vadd.f32 %v5975_v4, %v3008_v42 }
 0x228   : > { %v4856_v17 = vpop.eup %4855  ;;  %v3351_v52 = vadd.f32 %v6504_v40, %v3255_v24  ;;  %v3256_v32 = vmul.f32 %v4854_v28, %v6109_v3  ;;  %v6505_v20 = vunpack.c.h.bf16 %v6031_v49  ;;  %v3072_v62 = vsub.f32 0.0, %v6280_v27 }
 0x229   : > { %v4858_v29 = vpop.eup %4857  ;;  %v3922_v43 = vpack.c.bf16 %v3353_v61, %v3353_v61  ;;  %v3163_v10 = vadd.f32 1.0, %v4856_v17  ;;  %v6506_v5 = vunpack.c.h.bf16 %v6034_v19  ;;  %4867 = vpow2.f32 %v3129_v57  ;;  %v6338_v57 = vld [vmem:[%s5965_s24 + $0x58] sm:$0xff]  }
 0x22a   : > { %v3354_v26 = vadd.f32 %v6505_v20, %v3258_v45  ;;  %v4860_v11 = vpop.eup %4859  ;;  %v3920_v39 = vpack.c.bf16 %v3351_v52, %v3351_v52  ;;  %v3166_v3 = vadd.f32 1.0, %v4858_v29  ;;  %v3125_v37 = vmul.f32 1.442695, %v3072_v62 }
 0x22b   : > { %v3352_v36 = vadd.f32 %v6506_v5, %v3256_v32  ;;  %3514 = vst.msk [vmem:[%s6125_s5 + $0x38] sm:$0xf] %vm3499_vm8, %v3922_v43  ;;  %4869 = vrcp.f32 %v3163_v10  ;;  %v3164_v55 = vadd.f32 1.0, %v4860_v11  ;;  %v3077_v21 = vsub.f32 0.0, %v6286_v33 }
 0x22c   : > { %v3923_v2 = vpack.c.bf16 %v3354_v26, %v3354_v26  ;;  %3512 = vst.msk [vmem:[%s6125_s5 + $0x30] sm:$0xf] %vm3499_vm8, %v3920_v39  ;;  %4871 = vrcp.f32 %v3166_v3  ;;  %v3006_v15 = vmul.f32 %v4505_v41, %v5970_v16  ;;  %v3009_v19 = vmul.f32 %v4506_v54, %v5970_v16 }
 0x22d   : > { %v3921_v49 = vpack.c.bf16 %v3352_v36, %v3352_v36  ;;  %v4862_v48 = vpop.eup %4861  ;;  %4873 = vrcp.f32 %v3164_v55  ;;  %v4507_v13 = vadd.f32 %v6208_v59, %v6206_v63  ;;  %v4508_v22 = vadd.f32 %v6234_v44, %v6232_v35 }
 0x22e   : > { %3515 = vst.msk [vmem:[%s6125_s5 + $0x3c] sm:$0xf] %vm3499_vm8, %v3923_v2  ;;  %v4864_v25 = vpop.eup %4863  ;;  %v3261_v7 = vmul.f32 %v4862_v48, %v6131_v6  ;;  %4875 = vpow2.f32 %v3125_v37  ;;  %v3135_v14 = vmul.f32 1.442695, %v3077_v21  ;;  %v6310_v23 = vadd.f32 %v5975_v4, %v3006_v15 }
 0x22f   : > { %3513 = vst.msk [vmem:[%s6125_s5 + $0x34] sm:$0xf] %vm3499_vm8, %v3921_v49  ;;  %v3169_v53 = vadd.f32 1.0, %v4864_v25  ;;  %v6313_v41 = vadd.f32 %v5975_v4, %v3009_v19  ;;  %v3007_v60 = vmul.f32 %v4507_v13, %v5970_v16  ;;  %v3012_v63 = vmul.f32 %v4508_v22, %v5970_v16  ;;  %v4013_v13 = vld [vmem:[%s5965_s24 + $0x50] sm:$0xff]  }
 0x230   : > { %v6507_v59 = vunpack.c.l.bf16 %v6060_v56  ;;  %4877 = vpow2.f32 %v3135_v14  ;;  %v3075_v44 = vsub.f32 0.0, %v6310_v23  ;;  %v4509_v6 = vadd.f32 %v6241_v34, %v6239_v9  ;;  %v4866_v24 = vpop.eup %4865 }
 0x231   : > { %4879 = vrcp.f32 %v3169_v53  ;;  %v3078_v38 = vsub.f32 0.0, %v6313_v41  ;;  %v6324_v42 = vadd.f32 %v5975_v4, %v3007_v60  ;;  %v6327_v54 = vadd.f32 %v5975_v4, %v3012_v63 }
 0x232   : > { %v3357_v35 = vadd.f32 %v6507_v59, %v3261_v7  ;;  %v3167_v1 = vadd.f32 1.0, %v4866_v24  ;;  %v3131_v61 = vmul.f32 1.442695, %v3075_v44  ;;  %v3010_v45 = vmul.f32 %v4509_v6, %v5970_v16 }
 0x233   : > { %v3137_v17 = vmul.f32 1.442695, %v3078_v38  ;;  %v3076_v40 = vsub.f32 0.0, %v6324_v42  ;;  %v3081_v9 = vsub.f32 0.0, %v6327_v54  ;;  %v4510_v34 = vadd.f32 %v6250_v0, %v6248_v50  ;;  %v4868_v52 = vpop.eup %4867 }
 0x234   : > { %v3926_v28 = vpack.c.bf16 %v3357_v35, %v3357_v35  ;;  %v3975_v32 = vunpack.c.h.bf16 %v6067_v30  ;;  %4881 = vrcp.f32 %v3167_v1  ;;  %v6341_v29 = vadd.f32 %v5975_v4, %v3010_v45 }
 0x235   : > { %v4511_v43 = vadd.f32 %v6261_v18, %v6259_v12  ;;  %v4870_v20 = vpop.eup %4869  ;;  %v3170_v26 = vadd.f32 1.0, %v4868_v52  ;;  %4883 = vpow2.f32 %v3131_v61  ;;  %v3133_v10 = vmul.f32 1.442695, %v3076_v40 }
 0x236   : > { %3518 = vst.msk [vmem:[%s6125_s5 + $0x48] sm:$0xf] %vm3499_vm8, %v3926_v28  ;;  %v3143_v62 = vmul.f32 1.442695, %v3081_v9  ;;  %v4872_v50 = vpop.eup %4871  ;;  %v3259_v0 = vmul.f32 %v4870_v20, %v6155_v58  ;;  %4885 = vpow2.f32 %v3137_v17  ;;  %v3079_v11 = vsub.f32 0.0, %v6341_v29 }
 0x237   : > { %v3013_v39 = vmul.f32 %v4510_v34, %v5970_v16  ;;  %v4874_v5 = vpop.eup %4873  ;;  %v3262_v36 = vmul.f32 %v4872_v50, %v6178_v51  ;;  %v3986_v3 = vunpack.c.l.bf16 %v6338_v57  ;;  %4887 = vrcp.f32 %v3170_v26  ;;  %v4016_v34 = vld [vmem:[%s5965_s24 + $0x68] sm:$0xff]  }
 0x238   : > { %v3011_v12 = vmul.f32 %v4511_v43, %v5970_v16  ;;  %v4876_v18 = vpop.eup %4875  ;;  %v6508_v2 = vunpack.c.l.bf16 %v6067_v30  ;;  %v3260_v58 = vmul.f32 %v4874_v5, %v6187_v46  ;;  %4889 = vpow2.f32 %v3133_v10  ;;  %v4015_v5 = vld [vmem:[%s5965_s24 + $0x60] sm:$0xff]  }
 0x239   : > { %v3139_v37 = vmul.f32 1.442695, %v3079_v11  ;;  %v6509_v49 = vunpack.c.h.bf16 %v6060_v56  ;;  %v3168_v15 = vadd.f32 1.0, %v4876_v18  ;;  %4891 = vpow2.f32 %v3143_v62 }
 0x23a   : > { %v3355_v55 = vadd.f32 %v6508_v2, %v3259_v0  ;;  %v6357_v51 = vadd.f32 %v5975_v4, %v3013_v39  ;;  %v4878_v48 = vpop.eup %4877  ;;  %v3356_v19 = vadd.f32 %v3975_v32, %v3260_v58  ;;  %v6361_v30 = vadd.f32 %v5975_v4, %v3011_v12 }
 0x23b   : > { %v3358_v21 = vadd.f32 %v6509_v49, %v3262_v36  ;;  %4893 = vpow2.f32 %v3139_v37  ;;  %v4880_v46 = vpop.eup %4879  ;;  %v3173_v56 = vadd.f32 1.0, %v4878_v48  ;;  %v3982_v60 = vunpack.c.l.bf16 %v4013_v13  ;;  %v4017_v48 = vld [vmem:[%s5965_s24 + $0x70] sm:$0xff]  }
 0x23c   : > { %v3924_v16 = vpack.c.bf16 %v3355_v55, %v3355_v55  ;;  %4895 = vrcp.f32 %v3168_v15  ;;  %v3082_v25 = vsub.f32 0.0, %v6357_v51  ;;  %v3925_v7 = vpack.c.bf16 %v3356_v19, %v3356_v19 }
 0x23d   : > { %v3927_v22 = vpack.c.bf16 %v3358_v21, %v3358_v21  ;;  %v3265_v14 = vmul.f32 %v4880_v46, %v6217_v8  ;;  %v3080_v53 = vsub.f32 0.0, %v6361_v30  ;;  %4897 = vrcp.f32 %v3173_v56  ;;  %v4018_v21 = vld [vmem:[%s5965_s24 + $0x78] sm:$0xff]  }
 0x23e   : > { %3516 = vst.msk [vmem:[%s6125_s5 + $0x40] sm:$0xf] %vm3499_vm8, %v3924_v16  ;;  %v3145_v63 = vmul.f32 1.442695, %v3082_v25  ;;  %v4882_v4 = vpop.eup %4881  ;;  %3517 = vst.msk [vmem:[%s6125_s5 + $0x44] sm:$0xf] %vm3499_vm8, %v3925_v7  ;;  %v3987_v38 = vunpack.c.h.bf16 %v6338_v57  ;;  %v3983_v43 = vunpack.c.h.bf16 %v4013_v13  ;;  %v3994_v50 = vunpack.c.l.bf16 %v4016_v34 }
 0x23f   : > { %3519 = vst.msk [vmem:[%s6125_s5 + $0x4c] sm:$0xf] %vm3499_vm8, %v3927_v22  ;;  %v3361_v59 = vadd.f32 %v3986_v3, %v3265_v14  ;;  %v3141_v35 = vmul.f32 1.442695, %v3080_v53  ;;  %v4884_v44 = vpop.eup %4883  ;;  %v3263_v6 = vmul.f32 %v4882_v4, %v6230_v47  ;;  %v3995_v49 = vunpack.c.h.bf16 %v4016_v34 }
 0x240   : > { %4899 = vpow2.f32 %v3145_v63  ;;  %v4886_v24 = vpop.eup %4885  ;;  %v3171_v28 = vadd.f32 1.0, %v4884_v44  ;;  %v3991_v19 = vunpack.c.h.bf16 %v4015_v5  ;;  %v4002_v22 = vunpack.c.l.bf16 %v4018_v21 }
 0x241   : > { %v3930_v8 = vpack.c.bf16 %v3361_v59, %v3361_v59  ;;  %4901 = vpow2.f32 %v3141_v35  ;;  %v4888_v1 = vpop.eup %4887  ;;  %v3359_v61 = vadd.f32 %v3982_v60, %v3263_v6  ;;  %v3174_v45 = vadd.f32 1.0, %v4886_v24 }
 0x242   : > { %v4890_v17 = vpop.eup %4889  ;;  %v3266_v40 = vmul.f32 %v4888_v1, %v6255_v31  ;;  %4903 = vrcp.f32 %v3171_v28  ;;  %v3998_v14 = vunpack.c.l.bf16 %v4017_v48  ;;  %v4003_v6 = vunpack.c.h.bf16 %v4018_v21 }
 0x243   : > { %3522 = vst.msk [vmem:[%s6125_s5 + $0x58] sm:$0xf] %vm3499_vm8, %v3930_v8  ;;  %v4892_v9 = vpop.eup %4891  ;;  %v3928_v47 = vpack.c.bf16 %v3359_v61, %v3359_v61  ;;  %4905 = vrcp.f32 %v3174_v45  ;;  %v3172_v52 = vadd.f32 1.0, %v4890_v17  ;;  %v3999_v8 = vunpack.c.h.bf16 %v4017_v48 }
 0x244   : > { %v3362_v57 = vadd.f32 %v3987_v38, %v3266_v40  ;;  %v3177_v20 = vadd.f32 1.0, %v4892_v9 }
 0x245   : > { %v4894_v32 = vpop.eup %4893  ;;  %3520 = vst.msk [vmem:[%s6125_s5 + $0x50] sm:$0xf] %vm3499_vm8, %v3928_v47  ;;  %4907 = vrcp.f32 %v3172_v52 }
 0x246   : > { %v4896_v26 = vpop.eup %4895  ;;  %v3175_v10 = vadd.f32 1.0, %v4894_v32  ;;  %v3931_v62 = vpack.c.bf16 %v3362_v57, %v3362_v57  ;;  %4909 = vrcp.f32 %v3177_v20 }
 0x247   : > { %v3264_v31 = vmul.f32 %v4896_v26, %v6280_v27  ;;  %v4898_v0 = vpop.eup %4897  ;;  %v3990_v27 = vunpack.c.l.bf16 %v4015_v5 }
 0x248   : > { %4911 = vrcp.f32 %v3175_v10  ;;  %3523 = vst.msk [vmem:[%s6125_s5 + $0x5c] sm:$0xf] %vm3499_vm8, %v3931_v62  ;;  %v3269_v39 = vmul.f32 %v4898_v0, %v6286_v33 }
 0x249   : > { %v3360_v11 = vadd.f32 %v3983_v43, %v3264_v31 }
 0x24a   : > { %v4900_v36 = vpop.eup %4899  ;;  %v3365_v18 = vadd.f32 %v3994_v50, %v3269_v39 }
 0x24b   : > { %v4902_v3 = vpop.eup %4901  ;;  %v3929_v12 = vpack.c.bf16 %v3360_v11, %v3360_v11  ;;  %v3178_v2 = vadd.f32 1.0, %v4900_v36 }
 0x24c   : > { %v3176_v55 = vadd.f32 1.0, %v4902_v3  ;;  %v4904_v58 = vpop.eup %4903  ;;  %v3934_v37 = vpack.c.bf16 %v3365_v18, %v3365_v18 }
 0x24d   : > { %3521 = vst.msk [vmem:[%s6125_s5 + $0x54] sm:$0xf] %vm3499_vm8, %v3929_v12  ;;  %4913 = vrcp.f32 %v3178_v2  ;;  %v4906_v15 = vpop.eup %4905  ;;  %v3267_v33 = vmul.f32 %v4904_v58, %v6310_v23 }
 0x24e   : > { %4915 = vrcp.f32 %v3176_v55  ;;  %3526 = vst.msk [vmem:[%s6125_s5 + $0x68] sm:$0xf] %vm3499_vm8, %v3934_v37  ;;  %v3270_v16 = vmul.f32 %v4906_v15, %v6313_v41 }
 0x24f   : > { %v4908_v13 = vpop.eup %4907  ;;  %v3363_v46 = vadd.f32 %v3990_v27, %v3267_v33 }
 0x250   : > { %v4910_v56 = vpop.eup %4909  ;;  %v3366_v25 = vadd.f32 %v3995_v49, %v3270_v16  ;;  %v3268_v7 = vmul.f32 %v4908_v13, %v6324_v42 }
 0x251   : > { %v3932_v23 = vpack.c.bf16 %v3363_v46, %v3363_v46  ;;  %v3273_v60 = vmul.f32 %v4910_v56, %v6327_v54 }
 0x252   : > { %v4912_v53 = vpop.eup %4911  ;;  %v3935_v63 = vpack.c.bf16 %v3366_v25, %v3366_v25  ;;  %v3364_v4 = vadd.f32 %v3991_v19, %v3268_v7 }
 0x253   : > { %v3271_v41 = vmul.f32 %v4912_v53, %v6341_v29  ;;  %3524 = vst.msk [vmem:[%s6125_s5 + $0x60] sm:$0xf] %vm3499_vm8, %v3932_v23  ;;  %v3369_v59 = vadd.f32 %v4002_v22, %v3273_v60 }
 0x254   : > { %3527 = vst.msk [vmem:[%s6125_s5 + $0x6c] sm:$0xf] %vm3499_vm8, %v3935_v63  ;;  %v3933_v35 = vpack.c.bf16 %v3364_v4, %v3364_v4 }
 0x255   : > { %v3367_v44 = vadd.f32 %v3998_v14, %v3271_v41  ;;  %v3938_v42 = vpack.c.bf16 %v3369_v59, %v3369_v59 }
 0x256   : > { %3525 = vst.msk [vmem:[%s6125_s5 + $0x64] sm:$0xf] %vm3499_vm8, %v3933_v35 }
 0x257   : > { %v4914_v24 = vpop.eup %4913  ;;  %v3936_v54 = vpack.c.bf16 %v3367_v44, %v3367_v44  ;;  %3530 = vst.msk [vmem:[%s6125_s5 + $0x78] sm:$0xf] %vm3499_vm8, %v3938_v42 }
 0x258   : > { %v4916_v38 = vpop.eup %4915  ;;  %v3274_v29 = vmul.f32 %v4914_v24, %v6357_v51 }
 0x259   : > { %3528 = vst.msk [vmem:[%s6125_s5 + $0x70] sm:$0xf] %vm3499_vm8, %v3936_v54  ;;  %v3272_v28 = vmul.f32 %v4916_v38, %v6361_v30 }
 0x25a   : > { %v3370_v1 = vadd.f32 %v4003_v6, %v3274_v29 }
 0x25b   : > { %v3368_v61 = vadd.f32 %v3999_v8, %v3272_v28 }
 0x25c   : > { %v3939_v45 = vpack.c.bf16 %v3370_v1, %v3370_v1 }
 0x25d   : > { %v3937_v17 = vpack.c.bf16 %v3368_v61, %v3368_v61 }
 0x25e   : > { %3531 = vst.msk [vmem:[%s6125_s5 + $0x7c] sm:$0xf] %vm3499_vm8, %v3939_v45 }
 0x25f   : > { %3529 = vst.msk [vmem:[%s6125_s5 + $0x74] sm:$0xf] %vm3499_vm8, %v3937_v17 }
 0x260 PF: > { %s14_s17 = sadd.s32 1, %s4943_s17   ;;  %s6510_s15 = smov %s4939_s16 }
 0x261   : > { %p11_p5 = scmp.ge.s32.totalorder %s14_s17, 4   ;;  %s6511_s16 = smov %s6513_s18 }
 0x263   :  { %13 = sbr.rel (!%p11_p5) target bundleno = 2 (0x2), region = 78 }

</bundles_post_ra>
